<compile_context>
chip_gen: v7x
topology: tpu7x:2x2x1
jax: 0.10.0
libtpu: 0.0.40
codegen_flags: <defaults>
</compile_context>

<pallas_src>
import jax
import jax.numpy as jnp
from jax.experimental import pallas as pl
from jax.experimental.pallas import tpu as pltpu

IN_DIM = 32 * 32 * 3   # 3072
H1, H2, H3, OUT = 1024, 512, 128, 64
OUT_PAD = 128          # lane-dense output width (sliced back to 64)

# MAC count per batch row (fc1..fc4, with fc4 padded to 128 output lanes).
_MACS_PER_ROW = IN_DIM * H1 + H1 * H2 + H2 * H3 + H3 * OUT_PAD
_WEIGHT_BYTES = 2 * _MACS_PER_ROW + 4 * (H1 + H2 + H3 + OUT_PAD)   # bf16 W + f32 b


def mlp_kernel(x_ref, w1_ref, b1_ref, w2_ref, b2_ref, w3_ref, b3_ref,
               w4_ref, b4_ref, o_ref):
    """Fused fc1..fc4 + relu + softmax for one batch tile.

    x streams as f32 and is cast to bf16 in-kernel; weights are pre-cast bf16;
    every dot accumulates in f32 on the MXU; activations are cast back to bf16
    between layers. Padded logit columns (64..127) carry a -1e30 bias ->
    exp() == 0 -> softmax over 128 lanes equals softmax over the real 64.
    """
    x = x_ref[...].astype(jnp.bfloat16)                                       # in-kernel cast

    h1 = jnp.dot(x, w1_ref[...], preferred_element_type=jnp.float32)
    h1 = jnp.maximum(h1 + b1_ref[...], 0.0).astype(jnp.bfloat16)              # relu(fc1)

    h2 = jnp.dot(h1, w2_ref[...], preferred_element_type=jnp.float32)
    h2 = jnp.maximum(h2 + b2_ref[...], 0.0).astype(jnp.bfloat16)              # relu(fc2)

    h3 = jnp.dot(h2, w3_ref[...], preferred_element_type=jnp.float32)
    h3 = jnp.maximum(h3 + b3_ref[...], 0.0).astype(jnp.bfloat16)              # relu(fc3)

    logits = jnp.dot(h3, w4_ref[...], preferred_element_type=jnp.float32)
    logits = logits + b4_ref[...]                                             # fc4 (+ -1e30 pad)

    # numerically stable softmax over the last axis (f32 end-to-end)
    m = jnp.max(logits, axis=-1, keepdims=True)
    e = jnp.exp(logits - m)
    inv = pl.reciprocal(jnp.sum(e, axis=-1, keepdims=True), approx=True)      # EUP slot
    o_ref[...] = (e * inv).astype(o_ref.dtype)


def prepare_params(params):
    """Once-off (outside the jitted forward): bf16 weights, f32 biases,
    fc4 padded to 128 output lanes (zero weights, -1e30 bias on pad cols)."""
    w1, b1, w2, b2, w3, b3, w4, b4 = params
    w4p = jnp.pad(w4.astype(jnp.bfloat16), ((0, 0), (0, OUT_PAD - OUT)))
    b4p = jnp.pad(b4.astype(jnp.float32), ((0, 0), (0, OUT_PAD - OUT)),
                  constant_values=-1e30)
    return (w1.astype(jnp.bfloat16), b1.astype(jnp.float32),
            w2.astype(jnp.bfloat16), b2.astype(jnp.float32),
            w3.astype(jnp.bfloat16), b3.astype(jnp.float32),
            w4p, b4p)


def _choose_tile(b8: int) -> int:
    """Pick the batch tile TB (multiple of 8).

    - >= 2 grid steps once b8 >= 16 so 'parallel' can shard across both v7x
      TensorCores (a single-step grid leaves one core idle).
    - minimize padded rows for ragged batches, traded against per-grid-step
      overhead (~0.35us, modeled as ~32 row-equivalents).
    - allows 256/512-row tiles for large batches (fewer steps on v5e/v6e).
    """
    if b8 <= 8:
        return 8
    best_tb, best_cost = 8, None
    for tb in (512, 256, 128, 64, 32, 16, 8):
        if tb >= b8:                       # would give a 1-step grid -> skip
            continue
        n = -(-b8 // tb)
        cost = n * tb + 32 * n             # padded rows + step-overhead proxy
        if best_cost is None or cost < best_cost:
            best_tb, best_cost = tb, cost
    return best_tb


@jax.jit
def mlp_forward(x, prepared):
    """x: [B, C, H, W] float32 (NCHW, like PyTorch). `prepared` from
    prepare_params(). Returns [B, 64] softmax probabilities (float32)."""
    w1, b1, w2, b2, w3, b3, w4, b4 = prepared
    B = x.shape[0]
    x2 = x.reshape(B, -1)                              # x.view(-1, 32*32*3), stays f32
    assert x2.shape[1] == IN_DIM

    # Adaptive batch tiling (trace-time Python on static shapes).
    B8 = max(8, ((B + 7) // 8) * 8)
    TB = _choose_tile(B8)
    B_pad = ((B8 + TB - 1) // TB) * TB
    if B_pad != B:
        x2 = jnp.pad(x2, ((0, B_pad - B), (0, 0)))

    resident = dict(pipeline_mode=pl.Buffered(1))      # constant blocks: single buffer

    cost = pl.CostEstimate(
        flops=2 * B_pad * _MACS_PER_ROW,
        transcendentals=B_pad * OUT_PAD,
        bytes_accessed=_WEIGHT_BYTES + B_pad * IN_DIM * 4 + B_pad * OUT_PAD * 4,
    )

    out_padded = pl.pallas_call(
        mlp_kernel,
        out_shape=jax.ShapeDtypeStruct((B_pad, OUT_PAD), jnp.float32),
        grid_spec=pltpu.PrefetchScalarGridSpec(
            num_scalar_prefetch=0,
            grid=(B_pad // TB,),
            in_specs=[
                pl.BlockSpec((TB, IN_DIM), lambda b: (b, 0)),                   # x tile (f32)
                pl.BlockSpec((IN_DIM, H1), lambda b: (0, 0), **resident),       # fc1 W
                pl.BlockSpec((1, H1),      lambda b: (0, 0), **resident),       # fc1 b
                pl.BlockSpec((H1, H2),     lambda b: (0, 0), **resident),       # fc2 W
                pl.BlockSpec((1, H2),      lambda b: (0, 0), **resident),       # fc2 b
                pl.BlockSpec((H2, H3),     lambda b: (0, 0), **resident),       # fc3 W
                pl.BlockSpec((1, H3),      lambda b: (0, 0), **resident),       # fc3 b
                pl.BlockSpec((H3, OUT_PAD), lambda b: (0, 0), **resident),      # fc4 W (padded)
                pl.BlockSpec((1, OUT_PAD),  lambda b: (0, 0), **resident),      # fc4 b (padded)
            ],
            out_specs=pl.BlockSpec((TB, OUT_PAD), lambda b: (b, 0)),
        ),
        compiler_params=pltpu.CompilerParams(
            dimension_semantics=("parallel",),          # independent batch tiles
            vmem_limit_bytes=32 << 20,                  # <=~22 MiB actual footprint @ TB=512
        ),
        cost_estimate=cost,
    )(x2, w1, b1, w2, b2, w3, b3, w4, b4)

    return out_padded[:B, :OUT]


def init_params(key):
    """Deterministic init mimicking torch.nn.Linear default (U[-1/sqrt(fan_in), +])."""
    dims = [(IN_DIM, H1), (H1, H2), (H2, H3), (H3, OUT)]
    params = []
    for fan_in, fan_out in dims:
        kw, kb, key = jax.random.split(key, 3)
        bound = 1.0 / (fan_in ** 0.5)
        w = jax.random.uniform(kw, (fan_in, fan_out), jnp.float32, -bound, bound)
        b = jax.random.uniform(kb, (1, fan_out), jnp.float32, -bound, bound)
        params.extend([w, b])
    return tuple(params)


def mlp_reference(x, params):
    """Pure-JAX f32 reference of the PyTorch forward pass."""
    w1, b1, w2, b2, w3, b3, w4, b4 = params
    h = x.reshape(x.shape[0], -1)
    h = jax.nn.relu(h @ w1 + b1)
    h = jax.nn.relu(h @ w2 + b2)
    h = jax.nn.relu(h @ w3 + b3)
    return jax.nn.softmax(h @ w4 + b4, axis=-1)


# TODO(synk): fc5 (64->10) exists in __init__ but is unused in forward(); omitted.

if __name__ == "__main__":
    key = jax.random.PRNGKey(0)
    kx, kp = jax.random.split(key)
    # small batch, CIFAR-like input implied by 32*32*3
    x = jax.random.normal(kx, (2, 3, 32, 32), dtype=jnp.float32)
    params = init_params(kp)
    prepared = jax.block_until_ready(prepare_params(params))   # once-off, outside jit

    out = mlp_forward(x, prepared)
    out = jax.block_until_ready(out)

    assert out.shape == (2, OUT)
    # sanity: softmax rows sum to ~1 (approx reciprocal -> slightly looser tol)
    assert bool(jnp.allclose(jnp.sum(out, axis=-1), 1.0, atol=2e-3))
    # sanity: matches f32 reference within bf16 weight/activation-stream tolerance
    ref = mlp_reference(x, params)
    assert bool(jnp.allclose(out, ref, atol=5e-3))
    print("KERNEL_OK")
</pallas_src>

<mosaic_0001>
module attributes {stable_mosaic.version = 11 : i64} {
  func.func @mlp_kernel(%arg0: i32, %arg1: memref<8x3072xf32, #tpu.memory_space<vmem>>, %arg2: memref<3072x1024xbf16, #tpu.memory_space<vmem>>, %arg3: memref<1x1024xf32, #tpu.memory_space<vmem>>, %arg4: memref<1024x512xbf16, #tpu.memory_space<vmem>>, %arg5: memref<1x512xf32, #tpu.memory_space<vmem>>, %arg6: memref<512x128xbf16, #tpu.memory_space<vmem>>, %arg7: memref<1x128xf32, #tpu.memory_space<vmem>>, %arg8: memref<128x128xbf16, #tpu.memory_space<vmem>>, %arg9: memref<1x128xf32, #tpu.memory_space<vmem>>, %arg10: memref<8x128xf32, #tpu.memory_space<vmem>>) attributes {dimension_semantics = [#tpu.dimension_semantics<parallel>], iteration_bounds = array<i64: 1>, scalar_prefetch = 0 : i64, scratch_operands = 0 : i64, tpu.core_type = #tpu.core_type<tc>, window_params = [{transform_indices = @transform_0, window_bounds = array<i64: 8, 3072>}, {pipeline_mode = #tpu.pipeline_mode<synchronous>, transform_indices = @transform_1, window_bounds = array<i64: 3072, 1024>}, {pipeline_mode = #tpu.pipeline_mode<synchronous>, transform_indices = @transform_2, window_bounds = array<i64: 1, 1024>}, {pipeline_mode = #tpu.pipeline_mode<synchronous>, transform_indices = @transform_3, window_bounds = array<i64: 1024, 512>}, {pipeline_mode = #tpu.pipeline_mode<synchronous>, transform_indices = @transform_4, window_bounds = array<i64: 1, 512>}, {pipeline_mode = #tpu.pipeline_mode<synchronous>, transform_indices = @transform_5, window_bounds = array<i64: 512, 128>}, {pipeline_mode = #tpu.pipeline_mode<synchronous>, transform_indices = @transform_6, window_bounds = array<i64: 1, 128>}, {pipeline_mode = #tpu.pipeline_mode<synchronous>, transform_indices = @transform_7, window_bounds = array<i64: 128, 128>}, {pipeline_mode = #tpu.pipeline_mode<synchronous>, transform_indices = @transform_8, window_bounds = array<i64: 1, 128>}, {transform_indices = @transform_9, window_bounds = array<i64: 8, 128>}]} {
    %c0 = arith.constant 0 : index
    %c0_0 = arith.constant 0 : index
    %0 = vector.load %arg1[%c0, %c0_0] : memref<8x3072xf32, #tpu.memory_space<vmem>>, vector<8x3072xf32>
    %1 = arith.truncf %0 : vector<8x3072xf32> to vector<8x3072xbf16>
    %c0_1 = arith.constant 0 : index
    %c0_2 = arith.constant 0 : index
    %2 = vector.load %arg2[%c0_1, %c0_2] : memref<3072x1024xbf16, #tpu.memory_space<vmem>>, vector<3072x1024xbf16>
    %cst = arith.constant dense<0.000000e+00> : vector<8x1024xf32>
    %3 = tpu.matmul %1, %2, %cst {dimension_numbers = #tpu.dot_dimension_numbers<[1], [0], [0], [1], [0, 0, 1, 1], [], []>} : vector<8x3072xbf16>, vector<3072x1024xbf16>, vector<8x1024xf32> -> vector<8x1024xf32>
    %c0_3 = arith.constant 0 : index
    %c0_4 = arith.constant 0 : index
    %4 = vector.load %arg3[%c0_3, %c0_4] : memref<1x1024xf32, #tpu.memory_space<vmem>>, vector<1x1024xf32>
    %5 = vector.broadcast %4 : vector<1x1024xf32> to vector<8x1024xf32>
    %6 = arith.addf %3, %5 : vector<8x1024xf32>
    %cst_5 = arith.constant 0.000000e+00 : f32
    %7 = vector.broadcast %cst_5 : f32 to vector<8x1024xf32>
    %8 = arith.maximumf %6, %7 : vector<8x1024xf32>
    %9 = arith.truncf %8 : vector<8x1024xf32> to vector<8x1024xbf16>
    %c0_6 = arith.constant 0 : index
    %c0_7 = arith.constant 0 : index
    %10 = vector.load %arg4[%c0_6, %c0_7] : memref<1024x512xbf16, #tpu.memory_space<vmem>>, vector<1024x512xbf16>
    %cst_8 = arith.constant dense<0.000000e+00> : vector<8x512xf32>
    %11 = tpu.matmul %9, %10, %cst_8 {dimension_numbers = #tpu.dot_dimension_numbers<[1], [0], [0], [1], [0, 0, 1, 1], [], []>} : vector<8x1024xbf16>, vector<1024x512xbf16>, vector<8x512xf32> -> vector<8x512xf32>
    %c0_9 = arith.constant 0 : index
    %c0_10 = arith.constant 0 : index
    %12 = vector.load %arg5[%c0_9, %c0_10] : memref<1x512xf32, #tpu.memory_space<vmem>>, vector<1x512xf32>
    %13 = vector.broadcast %12 : vector<1x512xf32> to vector<8x512xf32>
    %14 = arith.addf %11, %13 : vector<8x512xf32>
    %cst_11 = arith.constant 0.000000e+00 : f32
    %15 = vector.broadcast %cst_11 : f32 to vector<8x512xf32>
    %16 = arith.maximumf %14, %15 : vector<8x512xf32>
    %17 = arith.truncf %16 : vector<8x512xf32> to vector<8x512xbf16>
    %c0_12 = arith.constant 0 : index
    %c0_13 = arith.constant 0 : index
    %18 = vector.load %arg6[%c0_12, %c0_13] : memref<512x128xbf16, #tpu.memory_space<vmem>>, vector<512x128xbf16>
    %cst_14 = arith.constant dense<0.000000e+00> : vector<8x128xf32>
    %19 = tpu.matmul %17, %18, %cst_14 {dimension_numbers = #tpu.dot_dimension_numbers<[1], [0], [0], [1], [0, 0, 1, 1], [], []>} : vector<8x512xbf16>, vector<512x128xbf16>, vector<8x128xf32> -> vector<8x128xf32>
    %c0_15 = arith.constant 0 : index
    %c0_16 = arith.constant 0 : index
    %20 = vector.load %arg7[%c0_15, %c0_16] : memref<1x128xf32, #tpu.memory_space<vmem>>, vector<1x128xf32>
    %21 = vector.broadcast %20 : vector<1x128xf32> to vector<8x128xf32>
    %22 = arith.addf %19, %21 : vector<8x128xf32>
    %cst_17 = arith.constant 0.000000e+00 : f32
    %23 = vector.broadcast %cst_17 : f32 to vector<8x128xf32>
    %24 = arith.maximumf %22, %23 : vector<8x128xf32>
    %25 = arith.truncf %24 : vector<8x128xf32> to vector<8x128xbf16>
    %c0_18 = arith.constant 0 : index
    %c0_19 = arith.constant 0 : index
    %26 = vector.load %arg8[%c0_18, %c0_19] : memref<128x128xbf16, #tpu.memory_space<vmem>>, vector<128x128xbf16>
    %cst_20 = arith.constant dense<0.000000e+00> : vector<8x128xf32>
    %27 = tpu.matmul %25, %26, %cst_20 {dimension_numbers = #tpu.dot_dimension_numbers<[1], [0], [0], [1], [0, 0, 1, 1], [], []>} : vector<8x128xbf16>, vector<128x128xbf16>, vector<8x128xf32> -> vector<8x128xf32>
    %c0_21 = arith.constant 0 : index
    %c0_22 = arith.constant 0 : index
    %28 = vector.load %arg9[%c0_21, %c0_22] : memref<1x128xf32, #tpu.memory_space<vmem>>, vector<1x128xf32>
    %29 = vector.broadcast %28 : vector<1x128xf32> to vector<8x128xf32>
    %30 = arith.addf %27, %29 : vector<8x128xf32>
    %cst_23 = arith.constant dense<0xFF800000> : vector<8xf32>
    %31 = vector.multi_reduction <maximumf>, %30, %cst_23 [1] : vector<8x128xf32> to vector<8xf32>
    %32 = vector.shape_cast %31 : vector<8xf32> to vector<8x1xf32>
    %33 = vector.broadcast %32 : vector<8x1xf32> to vector<8x128xf32>
    %34 = arith.subf %30, %33 : vector<8x128xf32>
    %35 = math.exp %34 : vector<8x128xf32>
    %cst_24 = arith.constant dense<0.000000e+00> : vector<8xf32>
    %36 = vector.multi_reduction <add>, %35, %cst_24 [1] : vector<8x128xf32> to vector<8xf32>
    %37 = vector.shape_cast %36 : vector<8xf32> to vector<8x1xf32>
    %38 = tpu.reciprocal %37 {approx = true} : vector<8x1xf32> -> vector<8x1xf32>
    %39 = vector.broadcast %38 : vector<8x1xf32> to vector<8x128xf32>
    %40 = arith.mulf %35, %39 : vector<8x128xf32>
    %c0_25 = arith.constant 0 : index
    %c0_26 = arith.constant 0 : index
    %41 = vector.load %arg10[%c0_25, %c0_26] : memref<8x128xf32, #tpu.memory_space<vmem>>, vector<8x128xf32>
    tpu.vector_store %arg10[%c0_25, %c0_26], %40 {strides = array<i32>} : memref<8x128xf32, #tpu.memory_space<vmem>>, vector<8x128xf32>,
    return
  }
  func.func @transform_0(%arg0: i32) -> (i32, i32) {
    %c0_i32 = arith.constant 0 : i32
    %c0_i32_0 = arith.constant 0 : i32
    return %arg0, %c0_i32 : i32, i32
  }
  func.func @transform_1(%arg0: i32) -> (i32, i32) {
    %c0_i32 = arith.constant 0 : i32
    %c0_i32_0 = arith.constant 0 : i32
    %c0_i32_1 = arith.constant 0 : i32
    return %c0_i32, %c0_i32_0 : i32, i32
  }
  func.func @transform_2(%arg0: i32) -> (i32, i32) {
    %c0_i32 = arith.constant 0 : i32
    %c0_i32_0 = arith.constant 0 : i32
    %c0_i32_1 = arith.constant 0 : i32
    return %c0_i32, %c0_i32_0 : i32, i32
  }
  func.func @transform_3(%arg0: i32) -> (i32, i32) {
    %c0_i32 = arith.constant 0 : i32
    %c0_i32_0 = arith.constant 0 : i32
    %c0_i32_1 = arith.constant 0 : i32
    return %c0_i32, %c0_i32_0 : i32, i32
  }
  func.func @transform_4(%arg0: i32) -> (i32, i32) {
    %c0_i32 = arith.constant 0 : i32
    %c0_i32_0 = arith.constant 0 : i32
    %c0_i32_1 = arith.constant 0 : i32
    return %c0_i32, %c0_i32_0 : i32, i32
  }
  func.func @transform_5(%arg0: i32) -> (i32, i32) {
    %c0_i32 = arith.constant 0 : i32
    %c0_i32_0 = arith.constant 0 : i32
    %c0_i32_1 = arith.constant 0 : i32
    return %c0_i32, %c0_i32_0 : i32, i32
  }
  func.func @transform_6(%arg0: i32) -> (i32, i32) {
    %c0_i32 = arith.constant 0 : i32
    %c0_i32_0 = arith.constant 0 : i32
    %c0_i32_1 = arith.constant 0 : i32
    return %c0_i32, %c0_i32_0 : i32, i32
  }
  func.func @transform_7(%arg0: i32) -> (i32, i32) {
    %c0_i32 = arith.constant 0 : i32
    %c0_i32_0 = arith.constant 0 : i32
    %c0_i32_1 = arith.constant 0 : i32
    return %c0_i32, %c0_i32_0 : i32, i32
  }
  func.func @transform_8(%arg0: i32) -> (i32, i32) {
    %c0_i32 = arith.constant 0 : i32
    %c0_i32_0 = arith.constant 0 : i32
    %c0_i32_1 = arith.constant 0 : i32
    return %c0_i32, %c0_i32_0 : i32, i32
  }
  func.func @transform_9(%arg0: i32) -> (i32, i32) {
    %c0_i32 = arith.constant 0 : i32
    %c0_i32_0 = arith.constant 0 : i32
    return %arg0, %c0_i32 : i32, i32
  }
}

</mosaic_0001>

<bundles_post_ra>
// kernel: mlp_forward.1
= control target key start
LH: loop header
LB: loop body
LE: loop exit
PB: predicated region body
PF: predicated region fallthrough
CT: control target
= control target key end

     0   :  { %14 = vsyncpa [#allocation3], 0  ;;  %s16981_s0 = inlined_call_operand.vmem [shape: f32[8,3072], index: 0, kind: input, shape index: {}]   ;;  %s16982_s1 = inlined_call_operand.hbm [shape: bf16[3072,1024], index: 1, kind: input, shape index: {}]   ;;  %s16983_s2 = inlined_call_operand.hbm [shape: f32[1,1024], index: 2, kind: input, shape index: {}]   ;;  %s16984_s3 = inlined_call_operand.hbm [shape: bf16[1024,512], index: 3, kind: input, shape index: {}]   ;;  %s16985_s4 = inlined_call_operand.hbm [shape: f32[1,512], index: 4, kind: input, shape index: {}]   ;;  %s16986_s5 = inlined_call_operand.hbm [shape: bf16[512,128], index: 5, kind: input, shape index: {}]   ;;  %s16987_s6 = inlined_call_operand.hbm [shape: f32[1,128], index: 6, kind: input, shape index: {}]   ;;  %s16988_s7 = inlined_call_operand.hbm [shape: bf16[128,128], index: 7, kind: input, shape index: {}]   ;;  %s16989_s8 = inlined_call_operand.hbm [shape: f32[1,128], index: 8, kind: input, shape index: {}]   ;;  %s16990_s9 = inlined_call_operand.vmem [shape: f32[8,128], index: 9, kind: output, shape index: {}]  }
   0x1   :  { %15 = vsyncpa [#allocation5], 0 }
   0x2   :  { %16 = vsyncpa [#allocation8], 0 }
   0x3   :  { %17 = vsyncpa [#allocation11], 0 }
   0x4   :  { %18 = vsyncpa [#allocation14], 0  ;;  %s16543_s30 = smov [#allocation4]   ;;  %s16544_s11 = smov [#allocation7]  }
   0x5   :  { %s39_s10 = sshll.u32 %s16543_s30, 4  ;;  %s61_s12 = sshll.u32 %s16544_s11, 4  ;;  %s40_s10 = int_to_ptr.vmem [resolvable:$true] %s39_s10  ;;  %s62_s12 = int_to_ptr.vmem [resolvable:$true] %s61_s12 }
   0x6   :  { %s16357_s15 = scalar_lea.hbm %s16983_s2, 128 }
   0x7   :  { %p16358_p0 = scmp.ne.s32.totalorder %s16983_s2, %s16357_s15  ;;  %p16361_p1 = scmp.lt.u32.totalorder %s16357_s15, %s16983_s2 }
   0x9   :  { %p16363_p2 = pnand %p16361_p1, %p16358_p0 }
   0xb   :  { %16366 = shalt.err (!%p16363_p2)
}
   0xc   :  { %s16367_s20 = scalar_lea.vmem %s40_s10, 128  ;;  %p16372_p4 = scmp.lt.s32.totalorder %s40_s10, %s40_s10 }
   0xd   :  { %p16368_p3 = scmp.ne.s32.totalorder %s40_s10, %s16367_s20  ;;  %p16373_p5 = scmp.lt.s32.totalorder %s16367_s20, %s16367_s20 }
   0xf   :  { %p16374_p6 = por %p16373_p5, %p16372_p4 }
  0x11   :  { %p16375_p7 = pnand %p16374_p6, %p16368_p3 }
  0x13   :  { %16378 = shalt.err (!%p16375_p7)
}
  0x14   :  { %42 = dma.hbm_to_vmem [thread:$0]  %s16983_s2, 128, %s40_s10, [#allocation5]  }
  0x15   :  { %s16379_s25 = scalar_lea.hbm %s16985_s4, 64 }
  0x16   :  { %p16380_p8 = scmp.ne.s32.totalorder %s16985_s4, %s16379_s25  ;;  %p16383_p9 = scmp.lt.u32.totalorder %s16379_s25, %s16985_s4 }
  0x18   :  { %p16385_p10 = pnand %p16383_p9, %p16380_p8 }
  0x1a   :  { %16388 = shalt.err (!%p16385_p10)
}
  0x1b   :  { %s16389_s30 = scalar_lea.vmem %s62_s12, 64  ;;  %p16394_p12 = scmp.lt.s32.totalorder %s62_s12, %s62_s12 }
  0x1c   :  { %p16390_p11 = scmp.ne.s32.totalorder %s62_s12, %s16389_s30  ;;  %p16395_p13 = scmp.lt.s32.totalorder %s16389_s30, %s16389_s30 }
  0x1e   :  { %p16396_p0 = por %p16395_p13, %p16394_p12 }
  0x20   :  { %p16397_p1 = pnand %p16396_p0, %p16390_p11 }
  0x22   :  { %16400 = shalt.err (!%p16397_p1)
}
  0x23   :  { %64 = dma.hbm_to_vmem [thread:$0]  %s16985_s4, 64, %s62_s12, [#allocation8]  }
  0x24   :  { %s16545_s11 = smov [#allocation10]   ;;  %s16546_s14 = smov [#allocation2]  }
  0x25   :  { %s83_s13 = sshll.u32 %s16545_s11, 4  ;;  %s26_s15 = sshll.u32 %s16546_s14, 4  ;;  %s84_s13 = int_to_ptr.vmem [resolvable:$true] %s83_s13  ;;  %s16633_s15 = int_to_ptr.vmem [resolvable:$true] %s26_s15 }
  0x26   :  { %s16401_s18 = scalar_lea.hbm %s16987_s6, 16 }
  0x27   :  { %p16402_p2 = scmp.ne.s32.totalorder %s16987_s6, %s16401_s18  ;;  %p16405_p3 = scmp.lt.u32.totalorder %s16401_s18, %s16987_s6 }
  0x29   :  { %p16407_p4 = pnand %p16405_p3, %p16402_p2 }
  0x2b   :  { %16410 = shalt.err (!%p16407_p4)
}
  0x2c   :  { %s16411_s4 = scalar_lea.vmem %s84_s13, 16  ;;  %s16415_s12 = scalar_lea.vmem %s84_s13, 32 }
  0x2d   :  { %p16412_p5 = scmp.ne.s32.totalorder %s84_s13, %s16411_s4  ;;  %p16416_p6 = scmp.lt.s32.totalorder %s84_s13, %s84_s13 }
  0x2e   :  { %p16417_p7 = scmp.lt.s32.totalorder %s16415_s12, %s16411_s4 }
  0x30   :  { %p16418_p8 = por %p16417_p7, %p16416_p6 }
  0x32   :  { %p16419_p9 = pnand %p16418_p8, %p16412_p5 }
  0x34   :  { %16422 = shalt.err (!%p16419_p9)
}
  0x35   :  { %86 = dma.hbm_to_vmem [thread:$0]  %s16987_s6, 16, %s84_s13, [#allocation11]  }
  0x36   :  { %s16423_s27 = scalar_lea.hbm %s16982_s1, 196608 }
  0x37   :  { %p16424_p10 = scmp.ne.s32.totalorder %s16982_s1, %s16423_s27  ;;  %p16427_p11 = scmp.lt.u32.totalorder %s16423_s27, %s16982_s1 }
  0x39   :  { %p16429_p12 = pnand %p16427_p11, %p16424_p10 }
  0x3b   :  { %16432 = shalt.err (!%p16429_p12)
}
  0x3c   :  { %s16433_s10 = scalar_lea.vmem %s16633_s15, 196608  ;;  %p16438_p0 = scmp.lt.s32.totalorder %s16633_s15, %s16633_s15 }
  0x3d   :  { %p16434_p13 = scmp.ne.s32.totalorder %s16633_s15, %s16433_s10  ;;  %p16439_p1 = scmp.lt.s32.totalorder %s16433_s10, %s16433_s10 }
  0x3f   :  { %p16440_p2 = por %p16439_p1, %p16438_p0 }
  0x41   :  { %p16441_p3 = pnand %p16440_p2, %p16434_p13 }
  0x43   :  { %16444 = shalt.err (!%p16441_p3)
}
  0x44   :  { %s16547_s6 = smov 512   ;;  %s16548_s11 = smov 32  }
  0x45   :  { %32 = dma.hbm_to_vmem [thread:$0]  %s16982_s1, 196608, %s16633_s15, [#allocation3], %s16547_s6, %s16547_s6, %s16548_s11  }
  0x46   :  { %s16549_s16 = smov [#allocation6]   ;;  %s16445_s20 = scalar_lea.hbm %s16984_s3, 32768 }
  0x47   :  { %s48_s17 = sshll.u32 %s16549_s16, 4  ;;  %p16446_p4 = scmp.ne.s32.totalorder %s16984_s3, %s16445_s20  ;;  %s49_s17 = int_to_ptr.vmem [resolvable:$true] %s48_s17 }
  0x48   :  { %p16449_p5 = scmp.lt.u32.totalorder %s16445_s20, %s16984_s3 }
  0x4a   :  { %p16451_p6 = pnand %p16449_p5, %p16446_p4 }
  0x4c   :  { %16454 = shalt.err (!%p16451_p6)
}
  0x4d   :  { %s16455_s23 = scalar_lea.vmem %s49_s17, 32768  ;;  %p16460_p8 = scmp.lt.s32.totalorder %s49_s17, %s49_s17 }
  0x4e   :  { %p16456_p7 = scmp.ne.s32.totalorder %s49_s17, %s16455_s23  ;;  %p16461_p9 = scmp.lt.s32.totalorder %s16455_s23, %s16455_s23 }
  0x50   :  { %p16462_p10 = por %p16461_p9, %p16460_p8 }
  0x52   :  { %p16463_p11 = pnand %p16462_p10, %p16456_p7 }
  0x54   :  { %16466 = shalt.err (!%p16463_p11)
}
  0x55   :  { %s16550_s1 = smov 256   ;;  %s16551_s15 = smov 16  }
  0x56   :  { %54 = dma.hbm_to_vmem [thread:$0]  %s16984_s3, 32768, %s49_s17, [#allocation5], %s16550_s1, %s16550_s1, %s16551_s15  }
  0x57   :  { %s16552_s26 = smov [#allocation9]   ;;  %s16467_s30 = scalar_lea.hbm %s16986_s5, 4096 }
  0x58   :  { %s70_s27 = sshll.u32 %s16552_s26, 4  ;;  %p16468_p12 = scmp.ne.s32.totalorder %s16986_s5, %s16467_s30  ;;  %s71_s27 = int_to_ptr.vmem [resolvable:$true] %s70_s27 }
  0x59   :  { %p16471_p13 = scmp.lt.u32.totalorder %s16467_s30, %s16986_s5 }
  0x5b   :  { %p16473_p0 = pnand %p16471_p13, %p16468_p12 }
  0x5d   :  { %16476 = shalt.err (!%p16473_p0)
}
  0x5e   :  { %s16477_s13 = scalar_lea.vmem %s71_s27, 4096  ;;  %p16482_p2 = scmp.lt.s32.totalorder %s71_s27, %s71_s27 }
  0x5f   :  { %p16478_p1 = scmp.ne.s32.totalorder %s71_s27, %s16477_s13  ;;  %p16483_p3 = scmp.lt.s32.totalorder %s16477_s13, %s16477_s13 }
  0x61   :  { %p16484_p4 = por %p16483_p3, %p16482_p2 }
  0x63   :  { %p16485_p5 = pnand %p16484_p4, %p16478_p1 }
  0x65   :  { %16488 = shalt.err (!%p16485_p5)
}
  0x66   :  { %s16553_s3 = smov 64   ;;  %s16554_s14 = smov 4  }
  0x67   :  { %76 = dma.hbm_to_vmem [thread:$0]  %s16986_s5, 4096, %s71_s27, [#allocation8], %s16553_s3, %s16553_s3, %s16554_s14  }
  0x68   :  { %s16555_s18 = smov [#allocation12]   ;;  %s16556_s20 = smov [#allocation13]  }
  0x69   :  { %s92_s19 = sshll.u32 %s16555_s18, 4  ;;  %s105_s21 = sshll.u32 %s16556_s20, 4  ;;  %s93_s19 = int_to_ptr.vmem [resolvable:$true] %s92_s19  ;;  %s106_s21 = int_to_ptr.vmem [resolvable:$true] %s105_s21 }
  0x6a   :  { %s16489_s12 = scalar_lea.hbm %s16988_s7, 1024 }
  0x6b   :  { %p16490_p6 = scmp.ne.s32.totalorder %s16988_s7, %s16489_s12  ;;  %p16493_p7 = scmp.lt.u32.totalorder %s16489_s12, %s16988_s7 }
  0x6d   :  { %p16495_p8 = pnand %p16493_p7, %p16490_p6 }
  0x6f   :  { %16498 = shalt.err (!%p16495_p8)
}
  0x70   :  { %s16499_s5 = scalar_lea.vmem %s93_s19, 1024  ;;  %p16504_p10 = scmp.lt.s32.totalorder %s93_s19, %s93_s19 }
  0x71   :  { %p16500_p9 = scmp.ne.s32.totalorder %s93_s19, %s16499_s5  ;;  %p16505_p11 = scmp.lt.s32.totalorder %s16499_s5, %s16499_s5 }
  0x73   :  { %p16506_p12 = por %p16505_p11, %p16504_p10 }
  0x75   :  { %p16507_p13 = pnand %p16506_p12, %p16500_p9 }
  0x77   :  { %16510 = shalt.err (!%p16507_p13)
}
  0x78   :  { %98 = dma.hbm_to_vmem [thread:$0]  %s16988_s7, 1024, %s93_s19, [#allocation11], %s16553_s3, %s16553_s3, %s16554_s14  }
  0x79   :  { %s16511_s29 = scalar_lea.hbm %s16989_s8, 16 }
  0x7a   :  { %p16512_p0 = scmp.ne.s32.totalorder %s16989_s8, %s16511_s29  ;;  %p16515_p1 = scmp.lt.u32.totalorder %s16511_s29, %s16989_s8 }
  0x7c   :  { %p16517_p2 = pnand %p16515_p1, %p16512_p0 }
  0x7e   :  { %16520 = shalt.err (!%p16517_p2)
}
  0x7f   :  { %s16521_s11 = scalar_lea.vmem %s106_s21, 16  ;;  %s16525_s13 = scalar_lea.vmem %s106_s21, 32 }
  0x80   :  { %p16522_p3 = scmp.ne.s32.totalorder %s106_s21, %s16521_s11  ;;  %p16526_p4 = scmp.lt.s32.totalorder %s106_s21, %s106_s21 }
  0x81   :  { %p16527_p5 = scmp.lt.s32.totalorder %s16525_s13, %s16521_s11 }
  0x83   :  { %p16528_p6 = por %p16527_p5, %p16526_p4 }
  0x85   :  { %p16529_p7 = pnand %p16528_p6, %p16522_p3 }
  0x87   :  { %16532 = shalt.err (!%p16529_p7)
}
  0x88   :  { %108 = dma.hbm_to_vmem [thread:$0]  %s16989_s8, 16, %s106_s21, [#allocation14]  }
  0x89   :  { %16533 = dma.done.wait [#allocation3], 196608  }
  0x8a   :  { %16534 = vsyncadd [#allocation3], 4294770688 }
  0x8b   :  { %16535 = dma.done.wait [#allocation5], 32896  }
  0x8c   :  { %16536 = vsyncadd [#allocation5], 4294934400 }
  0x8d   :  { %16537 = dma.done.wait [#allocation8], 4160  }
  0x8e   :  { %16538 = vsyncadd [#allocation8], 4294963136 }
  0x8f   :  { %16539 = dma.done.wait [#allocation11], 1040  }
  0x90   :  { %16540 = vsyncadd [#allocation11], 4294966256 }
  0x91   :  { %16541 = dma.done.wait [#allocation14], 16  }
  0x92   :  { %16542 = vsyncadd [#allocation14], 4294967280  ;;  %v182_v0 = vld [vmem:[#allocation2] sm:$0xff]  ;;  %v183_v2 = vld [vmem:[#allocation2 + $0x8] sm:$0xff]  ;;  %vm16558_vm0 = vmmov 0  }
  0x93   :  { %v186_v1 = vld [vmem:[#allocation2 + $0x20] sm:$0xff]  ;;  %v187_v4 = vld [vmem:[#allocation2 + $0x28] sm:$0xff] }
  0x94   :  { %v13794_v3 = vcombine.high %v182_v0, %v186_v1  ;;  %v13793_v5 = vcombine.low %v182_v0, %v186_v1  ;;  %v190_v6 = vld [vmem:[#allocation2 + $0x40] sm:$0xff]  ;;  %v13796_v8 = vcombine.high %v183_v2, %v187_v4  ;;  %v13795_v9 = vcombine.low %v183_v2, %v187_v4  ;;  %v191_v11 = vld [vmem:[#allocation2 + $0x48] sm:$0xff] }
  0x95   :  { %v194_v7 = vld [vmem:[#allocation2 + $0x60] sm:$0xff]  ;;  %v195_v12 = vld [vmem:[#allocation2 + $0x68] sm:$0xff] }
  0x96   :  { %v13802_v10 = vcombine.high %v190_v6, %v194_v7  ;;  %v198_v13 = vld [vmem:[#allocation2 + $0x80] sm:$0xff]  ;;  %9440 = vmatprep.subr.bf16.mxu0 %v13794_v3  ;;  %v13804_v14 = vcombine.high %v191_v11, %v195_v12  ;;  %v199_v16 = vld [vmem:[#allocation2 + $0x88] sm:$0xff]  ;;  %9932 = vmatprep.subr.bf16.mxu1 %v13796_v8  ;;  %v13801_v18 = vcombine.low %v190_v6, %v194_v7 }
  0x97   :  { %v202_v15 = vld [vmem:[#allocation2 + $0xa0] sm:$0xff]  ;;  %v203_v17 = vld [vmem:[#allocation2 + $0xa8] sm:$0xff]  ;;  %9441 = vmatpush1.bf16.msra.mxu0 %v13793_v5  ;;  %9933 = vmatpush1.bf16.msra.mxu1 %v13795_v9  ;;  %v13803_v19 = vcombine.low %v191_v11, %v195_v12 }
  0x98   :  { %9442 = vmatprep.subr.bf16.mxu0 %v13802_v10  ;;  %v13810_v20 = vcombine.high %v198_v13, %v202_v15  ;;  %9934 = vmatprep.subr.bf16.mxu1 %v13804_v14  ;;  %v13812_v21 = vcombine.high %v199_v16, %v203_v17  ;;  %v206_v22 = vld [vmem:[#allocation2 + $0xc0] sm:$0xff]  ;;  %v207_v24 = vld [vmem:[#allocation2 + $0xc8] sm:$0xff]  ;;  %v13809_v26 = vcombine.low %v198_v13, %v202_v15 }
  0x99   :  { %v210_v23 = vld [vmem:[#allocation2 + $0xe0] sm:$0xff]  ;;  %v211_v25 = vld [vmem:[#allocation2 + $0xe8] sm:$0xff]  ;;  %v13811_v27 = vcombine.low %v199_v16, %v203_v17 }
  0x9a   :  { %v13818_v28 = vcombine.high %v206_v22, %v210_v23  ;;  %v13820_v29 = vcombine.high %v207_v24, %v211_v25  ;;  %v214_v30 = vld [vmem:[#allocation2 + $0x100] sm:$0xff]  ;;  %v215_v32 = vld [vmem:[#allocation2 + $0x108] sm:$0xff]  ;;  %v13817_v34 = vcombine.low %v206_v22, %v210_v23  ;;  %v13819_v35 = vcombine.low %v207_v24, %v211_v25 }
  0x9b   :  { %9443 = vmatpush1.bf16.msra.mxu0 %v13801_v18  ;;  %9935 = vmatpush1.bf16.msra.mxu1 %v13803_v19  ;;  %v218_v31 = vld [vmem:[#allocation2 + $0x120] sm:$0xff]  ;;  %v219_v33 = vld [vmem:[#allocation2 + $0x128] sm:$0xff] }
  0x9c   :  { %9444 = vmatprep.subr.bf16.mxu0 %v13810_v20  ;;  %9936 = vmatprep.subr.bf16.mxu1 %v13812_v21  ;;  %v13826_v36 = vcombine.high %v214_v30, %v218_v31  ;;  %v13828_v37 = vcombine.high %v215_v32, %v219_v33  ;;  %v222_v38 = vld [vmem:[#allocation2 + $0x140] sm:$0xff]  ;;  %v223_v40 = vld [vmem:[#allocation2 + $0x148] sm:$0xff]  ;;  %v13825_v42 = vcombine.low %v214_v30, %v218_v31 }
  0x9d   :  { %v226_v39 = vld [vmem:[#allocation2 + $0x160] sm:$0xff]  ;;  %v227_v41 = vld [vmem:[#allocation2 + $0x168] sm:$0xff]  ;;  %v13827_v43 = vcombine.low %v215_v32, %v219_v33 }
  0x9e   :  { %v13834_v44 = vcombine.high %v222_v38, %v226_v39  ;;  %v13836_v45 = vcombine.high %v223_v40, %v227_v41  ;;  %v230_v46 = vld [vmem:[#allocation2 + $0x180] sm:$0xff]  ;;  %v231_v48 = vld [vmem:[#allocation2 + $0x188] sm:$0xff]  ;;  %v13833_v50 = vcombine.low %v222_v38, %v226_v39  ;;  %v13835_v51 = vcombine.low %v223_v40, %v227_v41 }
  0x9f   :  { %9445 = vmatpush1.bf16.msra.mxu0 %v13809_v26  ;;  %9937 = vmatpush1.bf16.msra.mxu1 %v13811_v27  ;;  %v234_v47 = vld [vmem:[#allocation2 + $0x1a0] sm:$0xff]  ;;  %v235_v49 = vld [vmem:[#allocation2 + $0x1a8] sm:$0xff] }
  0xa0   :  { %9446 = vmatprep.subr.bf16.mxu0 %v13818_v28  ;;  %9938 = vmatprep.subr.bf16.mxu1 %v13820_v29  ;;  %v13842_v52 = vcombine.high %v230_v46, %v234_v47  ;;  %v135_v53 = vld [vmem:[%s16981_s0 + $0x8] sm:$0xff]  ;;  %v13844_v54 = vcombine.high %v231_v48, %v235_v49  ;;  %v238_v55 = vld [vmem:[#allocation2 + $0x1c0] sm:$0xff]  ;;  %v13841_v60 = vcombine.low %v230_v46, %v234_v47 }
  0xa1   :  { %v242_v56 = vld [vmem:[#allocation2 + $0x1e0] sm:$0xff]  ;;  %v16715_v57 = vpack.c.bf16 %v135_v53, %v135_v53  ;;  %v239_v58 = vld [vmem:[#allocation2 + $0x1c8] sm:$0xff]  ;;  %v13843_v61 = vcombine.low %v231_v48, %v235_v49 }
  0xa2   :  { %v243_v59 = vld [vmem:[#allocation2 + $0x1e8] sm:$0xff]  ;;  %v13850_v62 = vcombine.high %v238_v55, %v242_v56  ;;  %v246_v0 = vld [vmem:[#allocation2 + $0x200] sm:$0xff]  ;;  %v13849_v4 = vcombine.low %v238_v55, %v242_v56 }
  0xa3   :  { %9447 = vmatpush1.bf16.msra.mxu0 %v13817_v34  ;;  %9939 = vmatpush1.bf16.msra.mxu1 %v13819_v35  ;;  %v13852_v63 = vcombine.high %v239_v58, %v243_v59  ;;  %v250_v1 = vld [vmem:[#allocation2 + $0x220] sm:$0xff]  ;;  %v247_v2 = vld [vmem:[#allocation2 + $0x208] sm:$0xff]  ;;  %v13851_v5 = vcombine.low %v239_v58, %v243_v59 }
  0xa4   :  { %9448 = vmatprep.subr.bf16.mxu0 %v13826_v36  ;;  %9940 = vmatprep.subr.bf16.mxu1 %v13828_v37  ;;  %v251_v3 = vld [vmem:[#allocation2 + $0x228] sm:$0xff]  ;;  %v13858_v6 = vcombine.high %v246_v0, %v250_v1  ;;  %v254_v8 = vld [vmem:[#allocation2 + $0x240] sm:$0xff]  ;;  %v13857_v12 = vcombine.low %v246_v0, %v250_v1 }
  0xa5   :  { %9472 = vmatprep.mubr.bf16.mxu0 %v16715_v57  ;;  %9964 = vmatprep.mubr.bf16.mxu1 %v16715_v57  ;;  %v13860_v7 = vcombine.high %v247_v2, %v251_v3  ;;  %v258_v9 = vld [vmem:[#allocation2 + $0x260] sm:$0xff]  ;;  %v255_v10 = vld [vmem:[#allocation2 + $0x248] sm:$0xff]  ;;  %v13859_v13 = vcombine.low %v247_v2, %v251_v3 }
  0xa6   :  { %v259_v11 = vld [vmem:[#allocation2 + $0x268] sm:$0xff]  ;;  %v13866_v14 = vcombine.high %v254_v8, %v258_v9  ;;  %v262_v16 = vld [vmem:[#allocation2 + $0x280] sm:$0xff]  ;;  %v13865_v20 = vcombine.low %v254_v8, %v258_v9 }
  0xa7   :  { %9449 = vmatpush1.bf16.msra.mxu0 %v13825_v42  ;;  %9941 = vmatpush1.bf16.msra.mxu1 %v13827_v43  ;;  %v13868_v15 = vcombine.high %v255_v10, %v259_v11  ;;  %v266_v17 = vld [vmem:[#allocation2 + $0x2a0] sm:$0xff]  ;;  %v263_v18 = vld [vmem:[#allocation2 + $0x288] sm:$0xff]  ;;  %v13867_v21 = vcombine.low %v255_v10, %v259_v11 }
  0xa8   :  { %9450 = vmatprep.subr.bf16.mxu0 %v13834_v44  ;;  %9942 = vmatprep.subr.bf16.mxu1 %v13836_v45  ;;  %v267_v19 = vld [vmem:[#allocation2 + $0x2a8] sm:$0xff]  ;;  %v13874_v22 = vcombine.high %v262_v16, %v266_v17  ;;  %v270_v24 = vld [vmem:[#allocation2 + $0x2c0] sm:$0xff]  ;;  %v13873_v28 = vcombine.low %v262_v16, %v266_v17 }
  0xa9   :  { %v13876_v23 = vcombine.high %v263_v18, %v267_v19  ;;  %v274_v25 = vld [vmem:[#allocation2 + $0x2e0] sm:$0xff]  ;;  %v271_v26 = vld [vmem:[#allocation2 + $0x2c8] sm:$0xff]  ;;  %v13875_v29 = vcombine.low %v263_v18, %v267_v19 }
  0xaa   :  { %v275_v27 = vld [vmem:[#allocation2 + $0x2e8] sm:$0xff]  ;;  %v13882_v30 = vcombine.high %v270_v24, %v274_v25  ;;  %v278_v32 = vld [vmem:[#allocation2 + $0x300] sm:$0xff]  ;;  %v13881_v36 = vcombine.low %v270_v24, %v274_v25 }
  0xab   :  { %9451 = vmatpush1.bf16.msra.mxu0 %v13833_v50  ;;  %9943 = vmatpush1.bf16.msra.mxu1 %v13835_v51  ;;  %v13884_v31 = vcombine.high %v271_v26, %v275_v27  ;;  %v282_v33 = vld [vmem:[#allocation2 + $0x320] sm:$0xff]  ;;  %v279_v34 = vld [vmem:[#allocation2 + $0x308] sm:$0xff]  ;;  %v13883_v37 = vcombine.low %v271_v26, %v275_v27 }
  0xac   :  { %9452 = vmatprep.subr.bf16.mxu0 %v13842_v52  ;;  %9944 = vmatprep.subr.bf16.mxu1 %v13844_v54  ;;  %v283_v35 = vld [vmem:[#allocation2 + $0x328] sm:$0xff]  ;;  %v13890_v38 = vcombine.high %v278_v32, %v282_v33  ;;  %v286_v40 = vld [vmem:[#allocation2 + $0x340] sm:$0xff]  ;;  %v13889_v44 = vcombine.low %v278_v32, %v282_v33 }
  0xad   :  { %v13892_v39 = vcombine.high %v279_v34, %v283_v35  ;;  %v290_v41 = vld [vmem:[#allocation2 + $0x360] sm:$0xff]  ;;  %v287_v42 = vld [vmem:[#allocation2 + $0x348] sm:$0xff]  ;;  %v13891_v45 = vcombine.low %v279_v34, %v283_v35 }
  0xae   :  { %v291_v43 = vld [vmem:[#allocation2 + $0x368] sm:$0xff]  ;;  %v13898_v46 = vcombine.high %v286_v40, %v290_v41  ;;  %v294_v48 = vld [vmem:[#allocation2 + $0x380] sm:$0xff]  ;;  %v13897_v52 = vcombine.low %v286_v40, %v290_v41 }
  0xaf   :  { %9453 = vmatpush1.bf16.msra.mxu0 %v13841_v60  ;;  %9945 = vmatpush1.bf16.msra.mxu1 %v13843_v61  ;;  %v13900_v47 = vcombine.high %v287_v42, %v291_v43  ;;  %v298_v49 = vld [vmem:[#allocation2 + $0x3a0] sm:$0xff]  ;;  %v295_v50 = vld [vmem:[#allocation2 + $0x388] sm:$0xff]  ;;  %v13899_v53 = vcombine.low %v287_v42, %v291_v43 }
  0xb0   :  { %9454 = vmatprep.subr.bf16.mxu0 %v13850_v62  ;;  %9946 = vmatprep.subr.bf16.mxu1 %v13852_v63  ;;  %v299_v51 = vld [vmem:[#allocation2 + $0x3a8] sm:$0xff]  ;;  %v13906_v54 = vcombine.high %v294_v48, %v298_v49  ;;  %v302_v56 = vld [vmem:[#allocation2 + $0x3c0] sm:$0xff]  ;;  %v13905_v61 = vcombine.low %v294_v48, %v298_v49 }
  0xb1   :  { %v13908_v55 = vcombine.high %v295_v50, %v299_v51  ;;  %v306_v58 = vld [vmem:[#allocation2 + $0x3e0] sm:$0xff]  ;;  %v303_v59 = vld [vmem:[#allocation2 + $0x3c8] sm:$0xff]  ;;  %v13907_v62 = vcombine.low %v295_v50, %v299_v51 }
  0xb2   :  { %v307_v60 = vld [vmem:[#allocation2 + $0x3e8] sm:$0xff]  ;;  %v13914_v63 = vcombine.high %v302_v56, %v306_v58  ;;  %v310_v1 = vld [vmem:[#allocation2 + $0x400] sm:$0xff] }
  0xb3   :  { %9455 = vmatpush1.bf16.msra.mxu0 %v13849_v4  ;;  %9947 = vmatpush1.bf16.msra.mxu1 %v13851_v5  ;;  %v13916_v0 = vcombine.high %v303_v59, %v307_v60  ;;  %v314_v2 = vld [vmem:[#allocation2 + $0x420] sm:$0xff]  ;;  %v311_v3 = vld [vmem:[#allocation2 + $0x408] sm:$0xff]  ;;  %v13913_v5 = vcombine.low %v302_v56, %v306_v58 }
  0xb4   :  { %9456 = vmatprep.subr.bf16.mxu0 %v13858_v6  ;;  %9948 = vmatprep.subr.bf16.mxu1 %v13860_v7  ;;  %v315_v4 = vld [vmem:[#allocation2 + $0x428] sm:$0xff]  ;;  %v134_v6 = vld [vmem:[%s16981_s0] sm:$0xff]  ;;  %v13915_v7 = vcombine.low %v303_v59, %v307_v60  ;;  %v13922_v8 = vcombine.high %v310_v1, %v314_v2  ;;  %v13921_v16 = vcombine.low %v310_v1, %v314_v2 }
  0xb5   :  { %v13924_v9 = vcombine.high %v311_v3, %v315_v4  ;;  %v318_v10 = vld [vmem:[#allocation2 + $0x440] sm:$0xff]  ;;  %v13923_v17 = vcombine.low %v311_v3, %v315_v4  ;;  %v331_v24 = vld [vmem:[#allocation2 + $0x4a8] sm:$0xff] }
  0xb6   :  { %v322_v11 = vld [vmem:[#allocation2 + $0x460] sm:$0xff]  ;;  %v339_v32 = vld [vmem:[#allocation2 + $0x4e8] sm:$0xff] }
  0xb7   :  { %9457 = vmatpush1.bf16.msra.mxu0 %v13857_v12  ;;  %9949 = vmatpush1.bf16.msra.mxu1 %v13859_v13  ;;  %v16722_v12 = vpack.c.bf16 %v134_v6, %v134_v6  ;;  %v319_v13 = vld [vmem:[#allocation2 + $0x448] sm:$0xff]  ;;  %v13930_v18 = vcombine.high %v318_v10, %v322_v11  ;;  %v13929_v25 = vcombine.low %v318_v10, %v322_v11  ;;  %v378_v6 = vld [vmem:[#allocation2 + $0x620] sm:$0xff] }
  0xb8   :  { %9458 = vmatprep.subr.bf16.mxu0 %v13866_v14  ;;  %9950 = vmatprep.subr.bf16.mxu1 %v13868_v15  ;;  %v323_v14 = vld [vmem:[#allocation2 + $0x468] sm:$0xff]  ;;  %v137_v15 = vld [vmem:[%s16981_s0 + $0x18] sm:$0xff] }
  0xb9   :  { %v13932_v19 = vcombine.high %v319_v13, %v323_v14  ;;  %v13931_v26 = vcombine.low %v319_v13, %v323_v14  ;;  %v347_v40 = vld [vmem:[#allocation2 + $0x528] sm:$0xff]  ;;  %v382_v14 = vld [vmem:[#allocation2 + $0x640] sm:$0xff] }
  0xba   :  { %v355_v48 = vld [vmem:[#allocation2 + $0x568] sm:$0xff] }
  0xbb   :  { %9459 = vmatpush1.bf16.msra.mxu0 %v13865_v20  ;;  %9951 = vmatpush1.bf16.msra.mxu1 %v13867_v21  ;;  %v326_v20 = vld [vmem:[#allocation2 + $0x480] sm:$0xff]  ;;  %v363_v56 = vld [vmem:[#allocation2 + $0x5a8] sm:$0xff] }
  0xbc   :  { %9460 = vmatprep.subr.bf16.mxu0 %v13874_v22  ;;  %9952 = vmatprep.subr.bf16.mxu1 %v13876_v23  ;;  %v330_v21 = vld [vmem:[#allocation2 + $0x4a0] sm:$0xff]  ;;  %v327_v22 = vld [vmem:[#allocation2 + $0x488] sm:$0xff]  ;;  %v16727_v23 = vpack.c.bf16 %v137_v15, %v137_v15 }
  0xbd   :  { %v13938_v27 = vcombine.high %v326_v20, %v330_v21  ;;  %v13937_v33 = vcombine.low %v326_v20, %v330_v21  ;;  %v13939_v34 = vcombine.low %v327_v22, %v331_v24  ;;  %v371_v1 = vld [vmem:[#allocation2 + $0x5e8] sm:$0xff]  ;;  %v386_v15 = vld [vmem:[#allocation2 + $0x660] sm:$0xff] }
  0xbe   :  { %v13994_v21 = vcombine.high %v382_v14, %v386_v15 }
  0xbf   :  { %9461 = vmatpush1.bf16.msra.mxu0 %v13873_v28  ;;  %9953 = vmatpush1.bf16.msra.mxu1 %v13875_v29  ;;  %v334_v28 = vld [vmem:[#allocation2 + $0x4c0] sm:$0xff] }
  0xc0   :  { %9462 = vmatprep.subr.bf16.mxu0 %v13882_v30  ;;  %9954 = vmatprep.subr.bf16.mxu1 %v13884_v31  ;;  %v338_v29 = vld [vmem:[#allocation2 + $0x4e0] sm:$0xff]  ;;  %v335_v30 = vld [vmem:[#allocation2 + $0x4c8] sm:$0xff]  ;;  %v13940_v31 = vcombine.high %v327_v22, %v331_v24 }
  0xc1   :  { %v13946_v35 = vcombine.high %v334_v28, %v338_v29  ;;  %v13945_v41 = vcombine.low %v334_v28, %v338_v29  ;;  %v13947_v42 = vcombine.low %v335_v30, %v339_v32  ;;  %v390_v22 = vld [vmem:[#allocation2 + $0x680] sm:$0xff]  ;;  %v13993_v28 = vcombine.low %v382_v14, %v386_v15  ;;  %v136_v14 = vld [vmem:[%s16981_s0 + $0x10] sm:$0xff] }
  0xc2   :  { %v394_v24 = vld [vmem:[#allocation2 + $0x6a0] sm:$0xff] }
  0xc3   :  { %9463 = vmatpush1.bf16.msra.mxu0 %v13881_v36  ;;  %9955 = vmatpush1.bf16.msra.mxu1 %v13883_v37  ;;  %v342_v36 = vld [vmem:[#allocation2 + $0x500] sm:$0xff] }
  0xc4   :  { %9464 = vmatprep.subr.bf16.mxu0 %v13890_v38  ;;  %9956 = vmatprep.subr.bf16.mxu1 %v13892_v39  ;;  %v346_v37 = vld [vmem:[#allocation2 + $0x520] sm:$0xff]  ;;  %v343_v38 = vld [vmem:[#allocation2 + $0x508] sm:$0xff]  ;;  %v13948_v39 = vcombine.high %v335_v30, %v339_v32  ;;  %v14002_v30 = vcombine.high %v390_v22, %v394_v24 }
  0xc5   :  { %v13954_v43 = vcombine.high %v342_v36, %v346_v37  ;;  %v13953_v49 = vcombine.low %v342_v36, %v346_v37  ;;  %v13955_v50 = vcombine.low %v343_v38, %v347_v40  ;;  %v402_v32 = vld [vmem:[#allocation2 + $0x6e0] sm:$0xff]  ;;  %v14001_v36 = vcombine.low %v390_v22, %v394_v24  ;;  %v139_v24 = vld [vmem:[%s16981_s0 + $0x28] sm:$0xff] }
  0xc7   :  { %9465 = vmatpush1.bf16.msra.mxu0 %v13889_v44  ;;  %9957 = vmatpush1.bf16.msra.mxu1 %v13891_v45  ;;  %v350_v44 = vld [vmem:[#allocation2 + $0x540] sm:$0xff] }
  0xc8   :  { %9466 = vmatprep.subr.bf16.mxu0 %v13898_v46  ;;  %9958 = vmatprep.subr.bf16.mxu1 %v13900_v47  ;;  %v354_v45 = vld [vmem:[#allocation2 + $0x560] sm:$0xff]  ;;  %v351_v46 = vld [vmem:[#allocation2 + $0x548] sm:$0xff]  ;;  %v13956_v47 = vcombine.high %v343_v38, %v347_v40 }
  0xc9   :  { %v13962_v51 = vcombine.high %v350_v44, %v354_v45  ;;  %v13961_v58 = vcombine.low %v350_v44, %v354_v45  ;;  %v13963_v59 = vcombine.low %v351_v46, %v355_v48  ;;  %v410_v40 = vld [vmem:[#allocation2 + $0x720] sm:$0xff] }
  0xcb   :  { %9467 = vmatpush1.bf16.msra.mxu0 %v13897_v52  ;;  %9959 = vmatpush1.bf16.msra.mxu1 %v13899_v53  ;;  %v358_v52 = vld [vmem:[#allocation2 + $0x580] sm:$0xff] }
  0xcc   :  { %9468 = vmatprep.subr.bf16.mxu0 %v13906_v54  ;;  %9960 = vmatprep.subr.bf16.mxu1 %v13908_v55  ;;  %v362_v53 = vld [vmem:[#allocation2 + $0x5a0] sm:$0xff]  ;;  %v359_v54 = vld [vmem:[#allocation2 + $0x588] sm:$0xff]  ;;  %v13964_v55 = vcombine.high %v351_v46, %v355_v48 }
  0xcd   :  { %v13970_v60 = vcombine.high %v358_v52, %v362_v53  ;;  %v13969_v2 = vcombine.low %v358_v52, %v362_v53  ;;  %v13971_v3 = vcombine.low %v359_v54, %v363_v56  ;;  %v418_v48 = vld [vmem:[#allocation2 + $0x760] sm:$0xff] }
  0xcf   :  { %9469 = vmatpush1.bf16.msra.mxu0 %v13905_v61  ;;  %9961 = vmatpush1.bf16.msra.mxu1 %v13907_v62  ;;  %v366_v61 = vld [vmem:[#allocation2 + $0x5c0] sm:$0xff] }
  0xd0   :  { %9470 = vmatprep.subr.bf16.mxu0 %v13914_v63  ;;  %9962 = vmatprep.subr.bf16.mxu1 %v13916_v0  ;;  %v370_v62 = vld [vmem:[#allocation2 + $0x5e0] sm:$0xff]  ;;  %v367_v63 = vld [vmem:[#allocation2 + $0x5c8] sm:$0xff]  ;;  %v13972_v0 = vcombine.high %v359_v54, %v363_v56 }
  0xd1   :  { %v13978_v4 = vcombine.high %v366_v61, %v370_v62  ;;  %v13977_v10 = vcombine.low %v366_v61, %v370_v62  ;;  %v13979_v11 = vcombine.low %v367_v63, %v371_v1  ;;  %v426_v56 = vld [vmem:[#allocation2 + $0x7a0] sm:$0xff] }
  0xd3   :  { %9471 = vmatpush1.bf16.msra.mxu0 %v13913_v5  ;;  %9963 = vmatpush1.bf16.msra.mxu1 %v13915_v7  ;;  %v374_v5 = vld [vmem:[#allocation2 + $0x600] sm:$0xff]  ;;  %v375_v7 = vld [vmem:[#allocation2 + $0x608] sm:$0xff] }
  0xd4   :  { %9481 = vmatprep.subr.bf16.mxu0 %v13922_v8  ;;  %9973 = vmatprep.subr.bf16.mxu1 %v13924_v9  ;;  %v13980_v8 = vcombine.high %v367_v63, %v371_v1  ;;  %v379_v9 = vld [vmem:[#allocation2 + $0x628] sm:$0xff]  ;;  %v13986_v13 = vcombine.high %v374_v5, %v378_v6  ;;  %v434_v1 = vld [vmem:[#allocation2 + $0x7e0] sm:$0xff] }
  0xd5   :  { %v13987_v20 = vcombine.low %v375_v7, %v379_v9 }
  0xd6   :  { %9473 = vmatmul.mubr.bf16.vlgmr.msra.gmra.mrb[0].mxu0 %v16722_v12  ;;  %9965 = vmatmul.mubr.bf16.vlgmr.msra.gmra.mrb[0].mxu1 %v16722_v12 }
  0xd7   :  { %9482 = vmatpush1.bf16.msra.mxu0 %v13921_v16  ;;  %9974 = vmatpush1.bf16.msra.mxu1 %v13923_v17  ;;  %v383_v16 = vld [vmem:[#allocation2 + $0x648] sm:$0xff]  ;;  %v13988_v17 = vcombine.high %v375_v7, %v379_v9  ;;  %v442_v9 = vld [vmem:[#allocation2 + $0x820] sm:$0xff] }
  0xd8   :  { %9483 = vmatprep.subr.bf16.mxu0 %v13930_v18  ;;  %9975 = vmatprep.subr.bf16.mxu1 %v13932_v19  ;;  %v387_v18 = vld [vmem:[#allocation2 + $0x668] sm:$0xff]  ;;  %v13985_v19 = vcombine.low %v374_v5, %v378_v6  ;;  %v438_v6 = vld [vmem:[#allocation2 + $0x800] sm:$0xff] }
  0xd9   :  { %9513 = vmatprep.mubr.bf16.mxu0 %v16727_v23  ;;  %10005 = vmatprep.mubr.bf16.mxu1 %v16727_v23  ;;  %v13995_v29 = vcombine.low %v383_v16, %v387_v18 }
  0xdb   :  { %9484 = vmatpush1.bf16.msra.mxu0 %v13929_v25  ;;  %9976 = vmatpush1.bf16.msra.mxu1 %v13931_v26  ;;  %v391_v25 = vld [vmem:[#allocation2 + $0x688] sm:$0xff]  ;;  %v13996_v26 = vcombine.high %v383_v16, %v387_v18  ;;  %v446_v16 = vld [vmem:[#allocation2 + $0x840] sm:$0xff]  ;;  %v14050_v18 = vcombine.high %v438_v6, %v442_v9 }
  0xdc   :  { %9485 = vmatprep.subr.bf16.mxu0 %v13938_v27  ;;  %9977 = vmatprep.subr.bf16.mxu1 %v13940_v31  ;;  %v395_v27 = vld [vmem:[#allocation2 + $0x6a8] sm:$0xff]  ;;  %v398_v31 = vld [vmem:[#allocation2 + $0x6c0] sm:$0xff] }
  0xdd   :  { %v14003_v37 = vcombine.low %v391_v25, %v395_v27  ;;  %v14010_v38 = vcombine.high %v398_v31, %v402_v32  ;;  %v14009_v44 = vcombine.low %v398_v31, %v402_v32  ;;  %v458_v31 = vld [vmem:[#allocation2 + $0x8a0] sm:$0xff]  ;;  %v455_v32 = vld [vmem:[#allocation2 + $0x888] sm:$0xff] }
  0xdf   :  { %9486 = vmatpush1.bf16.msra.mxu0 %v13937_v33  ;;  %9978 = vmatpush1.bf16.msra.mxu1 %v13939_v34  ;;  %v399_v33 = vld [vmem:[#allocation2 + $0x6c8] sm:$0xff]  ;;  %v14004_v34 = vcombine.high %v391_v25, %v395_v27  ;;  %v16739_v25 = vpack.c.bf16 %v136_v14, %v136_v14 }
  0xe0   :  { %9487 = vmatprep.subr.bf16.mxu0 %v13946_v35  ;;  %9979 = vmatprep.subr.bf16.mxu1 %v13948_v39  ;;  %v403_v35 = vld [vmem:[#allocation2 + $0x6e8] sm:$0xff]  ;;  %v406_v39 = vld [vmem:[#allocation2 + $0x700] sm:$0xff] }
  0xe1   :  { %v14011_v45 = vcombine.low %v399_v33, %v403_v35  ;;  %v14018_v46 = vcombine.high %v406_v39, %v410_v40  ;;  %v14017_v52 = vcombine.low %v406_v39, %v410_v40  ;;  %v466_v39 = vld [vmem:[#allocation2 + $0x8e0] sm:$0xff]  ;;  %v463_v40 = vld [vmem:[#allocation2 + $0x8c8] sm:$0xff] }
  0xe3   :  { %9488 = vmatpush1.bf16.msra.mxu0 %v13945_v41  ;;  %9980 = vmatpush1.bf16.msra.mxu1 %v13947_v42  ;;  %v407_v41 = vld [vmem:[#allocation2 + $0x708] sm:$0xff]  ;;  %v14012_v42 = vcombine.high %v399_v33, %v403_v35 }
  0xe4   :  { %9489 = vmatprep.subr.bf16.mxu0 %v13954_v43  ;;  %9981 = vmatprep.subr.bf16.mxu1 %v13956_v47  ;;  %v411_v43 = vld [vmem:[#allocation2 + $0x728] sm:$0xff]  ;;  %v414_v47 = vld [vmem:[#allocation2 + $0x740] sm:$0xff] }
  0xe5   :  { %v14019_v53 = vcombine.low %v407_v41, %v411_v43  ;;  %v14026_v54 = vcombine.high %v414_v47, %v418_v48  ;;  %v14025_v61 = vcombine.low %v414_v47, %v418_v48  ;;  %v459_v33 = vld [vmem:[#allocation2 + $0x8a8] sm:$0xff]  ;;  %v474_v47 = vld [vmem:[#allocation2 + $0x920] sm:$0xff] }
  0xe6   :  { %v471_v48 = vld [vmem:[#allocation2 + $0x908] sm:$0xff] }
  0xe7   :  { %9490 = vmatpush1.bf16.msra.mxu0 %v13953_v49  ;;  %9982 = vmatpush1.bf16.msra.mxu1 %v13955_v50  ;;  %v415_v49 = vld [vmem:[#allocation2 + $0x748] sm:$0xff]  ;;  %v14020_v50 = vcombine.high %v407_v41, %v411_v43  ;;  %v14068_v41 = vcombine.high %v455_v32, %v459_v33 }
  0xe8   :  { %9491 = vmatprep.subr.bf16.mxu0 %v13962_v51  ;;  %9983 = vmatprep.subr.bf16.mxu1 %v13964_v55  ;;  %v419_v51 = vld [vmem:[#allocation2 + $0x768] sm:$0xff]  ;;  %v422_v55 = vld [vmem:[#allocation2 + $0x780] sm:$0xff] }
  0xe9   :  { %v14027_v62 = vcombine.low %v415_v49, %v419_v51  ;;  %v14034_v63 = vcombine.high %v422_v55, %v426_v56  ;;  %v14033_v5 = vcombine.low %v422_v55, %v426_v56  ;;  %v482_v55 = vld [vmem:[#allocation2 + $0x960] sm:$0xff]  ;;  %v479_v56 = vld [vmem:[#allocation2 + $0x948] sm:$0xff] }
  0xeb   :  { %9492 = vmatpush1.bf16.msra.mxu0 %v13961_v58  ;;  %9984 = vmatpush1.bf16.msra.mxu1 %v13963_v59  ;;  %v423_v58 = vld [vmem:[#allocation2 + $0x788] sm:$0xff]  ;;  %v14028_v59 = vcombine.high %v415_v49, %v419_v51 }
  0xec   :  { %9493 = vmatprep.subr.bf16.mxu0 %v13970_v60  ;;  %9985 = vmatprep.subr.bf16.mxu1 %v13972_v0  ;;  %v427_v60 = vld [vmem:[#allocation2 + $0x7a8] sm:$0xff]  ;;  %v430_v0 = vld [vmem:[#allocation2 + $0x7c0] sm:$0xff] }
  0xed   :  { %v14035_v7 = vcombine.low %v423_v58, %v427_v60  ;;  %v14041_v15 = vcombine.low %v430_v0, %v434_v1 }
  0xef   :  { %9494 = vmatpush1.bf16.msra.mxu0 %v13969_v2  ;;  %9986 = vmatpush1.bf16.msra.mxu1 %v13971_v3  ;;  %v431_v2 = vld [vmem:[#allocation2 + $0x7c8] sm:$0xff]  ;;  %v14036_v3 = vcombine.high %v423_v58, %v427_v60 }
  0xf0   :  { %9495 = vmatprep.subr.bf16.mxu0 %v13978_v4  ;;  %9987 = vmatprep.subr.bf16.mxu1 %v13980_v8  ;;  %v435_v4 = vld [vmem:[#allocation2 + $0x7e8] sm:$0xff]  ;;  %v14042_v8 = vcombine.high %v430_v0, %v434_v1  ;;  %v490_v0 = vld [vmem:[#allocation2 + $0x9a0] sm:$0xff] }
  0xf1   :  { %v487_v1 = vld [vmem:[#allocation2 + $0x988] sm:$0xff] }
  0xf3   :  { %9496 = vmatpush1.bf16.msra.mxu0 %v13977_v10  ;;  %9988 = vmatpush1.bf16.msra.mxu1 %v13979_v11  ;;  %v439_v10 = vld [vmem:[#allocation2 + $0x808] sm:$0xff] }
  0xf4   :  { %9497 = vmatprep.subr.bf16.mxu0 %v13986_v13  ;;  %9989 = vmatprep.subr.bf16.mxu1 %v13988_v17  ;;  %v443_v11 = vld [vmem:[#allocation2 + $0x828] sm:$0xff]  ;;  %v14044_v13 = vcombine.high %v431_v2, %v435_v4  ;;  %v14043_v17 = vcombine.low %v431_v2, %v435_v4 }
  0xf5   :  { %v14052_v22 = vcombine.high %v439_v10, %v443_v11  ;;  %v14051_v27 = vcombine.low %v439_v10, %v443_v11  ;;  %v499_v11 = vld [vmem:[#allocation2 + $0x9e8] sm:$0xff] }
  0xf7   :  { %9498 = vmatpush1.bf16.msra.mxu0 %v13985_v19  ;;  %9990 = vmatpush1.bf16.msra.mxu1 %v13987_v20  ;;  %v450_v19 = vld [vmem:[#allocation2 + $0x860] sm:$0xff]  ;;  %v447_v20 = vld [vmem:[#allocation2 + $0x848] sm:$0xff] }
  0xf8   :  { %9499 = vmatprep.subr.bf16.mxu0 %v13994_v21  ;;  %9991 = vmatprep.subr.bf16.mxu1 %v13996_v26  ;;  %v451_v21 = vld [vmem:[#allocation2 + $0x868] sm:$0xff]  ;;  %v14049_v26 = vcombine.low %v438_v6, %v442_v9  ;;  %v14057_v35 = vcombine.low %v446_v16, %v450_v19 }
  0xf9   :  { %v495_v9 = vld [vmem:[#allocation2 + $0x9c8] sm:$0xff] }
  0xfb   :  { %9500 = vmatpush1.bf16.msra.mxu0 %v13993_v28  ;;  %9992 = vmatpush1.bf16.msra.mxu1 %v13995_v29  ;;  %v14058_v28 = vcombine.high %v446_v16, %v450_v19  ;;  %v454_v29 = vld [vmem:[#allocation2 + $0x880] sm:$0xff]  ;;  %v14108_v19 = vcombine.high %v495_v9, %v499_v11 }
  0xfc   :  { %9501 = vmatprep.subr.bf16.mxu0 %v14002_v30  ;;  %9993 = vmatprep.subr.bf16.mxu1 %v14004_v34  ;;  %v14060_v30 = vcombine.high %v447_v20, %v451_v21  ;;  %v16741_v34 = vpack.c.bf16 %v139_v24, %v139_v24  ;;  %v14065_v43 = vcombine.low %v454_v29, %v458_v31  ;;  %v502_v16 = vld [vmem:[#allocation2 + $0xa00] sm:$0xff] }
  0xff   :  { %9502 = vmatpush1.bf16.msra.mxu0 %v14001_v36  ;;  %9994 = vmatpush1.bf16.msra.mxu1 %v14003_v37  ;;  %v14059_v36 = vcombine.low %v447_v20, %v451_v21  ;;  %v14066_v37 = vcombine.high %v454_v29, %v458_v31  ;;  %v507_v20 = vld [vmem:[#allocation2 + $0xa28] sm:$0xff] }
 0x100   :  { %9503 = vmatprep.subr.bf16.mxu0 %v14010_v38  ;;  %9995 = vmatprep.subr.bf16.mxu1 %v14012_v42  ;;  %v462_v38 = vld [vmem:[#allocation2 + $0x8c0] sm:$0xff]  ;;  %v467_v42 = vld [vmem:[#allocation2 + $0x8e8] sm:$0xff] }
 0x101   :  { %v14076_v49 = vcombine.high %v463_v40, %v467_v42  ;;  %v14073_v51 = vcombine.low %v462_v38, %v466_v39 }
 0x103   :  { %9504 = vmatpush1.bf16.msra.mxu0 %v14009_v44  ;;  %9996 = vmatpush1.bf16.msra.mxu1 %v14011_v45  ;;  %v14067_v44 = vcombine.low %v455_v32, %v459_v33  ;;  %v14074_v45 = vcombine.high %v462_v38, %v466_v39  ;;  %v523_v39 = vld [vmem:[#allocation2 + $0xaa8] sm:$0xff] }
 0x104   :  { %9505 = vmatprep.subr.bf16.mxu0 %v14018_v46  ;;  %9997 = vmatprep.subr.bf16.mxu1 %v14020_v50  ;;  %v470_v46 = vld [vmem:[#allocation2 + $0x900] sm:$0xff]  ;;  %v475_v50 = vld [vmem:[#allocation2 + $0x928] sm:$0xff] }
 0x105   :  { %v14084_v58 = vcombine.high %v471_v48, %v475_v50  ;;  %v14081_v60 = vcombine.low %v470_v46, %v474_v47 }
 0x107   :  { %9506 = vmatpush1.bf16.msra.mxu0 %v14017_v52  ;;  %9998 = vmatpush1.bf16.msra.mxu1 %v14019_v53  ;;  %v14075_v52 = vcombine.low %v463_v40, %v467_v42  ;;  %v14082_v53 = vcombine.high %v470_v46, %v474_v47  ;;  %v531_v47 = vld [vmem:[#allocation2 + $0xae8] sm:$0xff] }
 0x108   :  { %9507 = vmatprep.subr.bf16.mxu0 %v14026_v54  ;;  %9999 = vmatprep.subr.bf16.mxu1 %v14028_v59  ;;  %v478_v54 = vld [vmem:[#allocation2 + $0x940] sm:$0xff]  ;;  %v483_v59 = vld [vmem:[#allocation2 + $0x968] sm:$0xff] }
 0x109   :  { %v14092_v2 = vcombine.high %v479_v56, %v483_v59  ;;  %v14089_v4 = vcombine.low %v478_v54, %v482_v55 }
 0x10b   :  { %9508 = vmatpush1.bf16.msra.mxu0 %v14025_v61  ;;  %10000 = vmatpush1.bf16.msra.mxu1 %v14027_v62  ;;  %v14083_v61 = vcombine.low %v471_v48, %v475_v50  ;;  %v14090_v62 = vcombine.high %v478_v54, %v482_v55  ;;  %v539_v55 = vld [vmem:[#allocation2 + $0xb28] sm:$0xff] }
 0x10c   :  { %9509 = vmatprep.subr.bf16.mxu0 %v14034_v63  ;;  %10001 = vmatprep.subr.bf16.mxu1 %v14036_v3  ;;  %v486_v63 = vld [vmem:[#allocation2 + $0x980] sm:$0xff]  ;;  %v491_v3 = vld [vmem:[#allocation2 + $0x9a8] sm:$0xff] }
 0x10d   :  { %v14098_v6 = vcombine.high %v486_v63, %v490_v0  ;;  %v14100_v10 = vcombine.high %v487_v1, %v491_v3  ;;  %v14099_v14 = vcombine.low %v487_v1, %v491_v3 }
 0x10f   :  { %9510 = vmatpush1.bf16.msra.mxu0 %v14033_v5  ;;  %10002 = vmatpush1.bf16.msra.mxu1 %v14035_v7  ;;  %v14091_v5 = vcombine.low %v479_v56, %v483_v59  ;;  %v494_v7 = vld [vmem:[#allocation2 + $0x9c0] sm:$0xff] }
 0x110   :  { %9511 = vmatprep.subr.bf16.mxu0 %v14042_v8  ;;  %10003 = vmatprep.subr.bf16.mxu1 %v14044_v13  ;;  %v498_v8 = vld [vmem:[#allocation2 + $0x9e0] sm:$0xff]  ;;  %v14097_v13 = vcombine.low %v486_v63, %v490_v0  ;;  %v547_v0 = vld [vmem:[#allocation2 + $0xb68] sm:$0xff] }
 0x111   :  { %v14105_v21 = vcombine.low %v494_v7, %v498_v8 }
 0x113   :  { %9512 = vmatpush1.bf16.msra.mxu0 %v14041_v15  ;;  %10004 = vmatpush1.bf16.msra.mxu1 %v14043_v17  ;;  %v14106_v15 = vcombine.high %v494_v7, %v498_v8  ;;  %v506_v17 = vld [vmem:[#allocation2 + $0xa20] sm:$0xff]  ;;  %v555_v8 = vld [vmem:[#allocation2 + $0xba8] sm:$0xff] }
 0x114   :  { %9522 = vmatprep.subr.bf16.mxu0 %v14050_v18  ;;  %10014 = vmatprep.subr.bf16.mxu1 %v14052_v22  ;;  %v503_v18 = vld [vmem:[#allocation2 + $0xa08] sm:$0xff]  ;;  %v14107_v22 = vcombine.low %v495_v9, %v499_v11  ;;  %v14114_v24 = vcombine.high %v502_v16, %v506_v17  ;;  %v14113_v31 = vcombine.low %v502_v16, %v506_v17 }
 0x115   :  { %v14116_v29 = vcombine.high %v503_v18, %v507_v20  ;;  %v14115_v32 = vcombine.low %v503_v18, %v507_v20  ;;  %v563_v17 = vld [vmem:[#allocation2 + $0xbe8] sm:$0xff] }
 0x116   :  { %9514 = vmatmul.mubr.bf16.vlgmr.msra.gmra.mrb[0].mxu0 %v16739_v25  ;;  %10006 = vmatmul.mubr.bf16.vlgmr.msra.gmra.mrb[0].mxu1 %v16739_v25 }
 0x117   :  { %9523 = vmatpush1.bf16.msra.mxu0 %v14049_v26  ;;  %10015 = vmatpush1.bf16.msra.mxu1 %v14051_v27  ;;  %v510_v26 = vld [vmem:[#allocation2 + $0xa40] sm:$0xff] }
 0x118   :  { %9524 = vmatprep.subr.bf16.mxu0 %v14058_v28  ;;  %10016 = vmatprep.subr.bf16.mxu1 %v14060_v30  ;;  %v514_v27 = vld [vmem:[#allocation2 + $0xa60] sm:$0xff]  ;;  %v511_v28 = vld [vmem:[#allocation2 + $0xa48] sm:$0xff] }
 0x119   :  { %9554 = vmatprep.mubr.bf16.mxu0 %v16741_v34  ;;  %10046 = vmatprep.mubr.bf16.mxu1 %v16741_v34  ;;  %v515_v30 = vld [vmem:[#allocation2 + $0xa68] sm:$0xff]  ;;  %v14122_v33 = vcombine.high %v510_v26, %v514_v27  ;;  %v14121_v40 = vcombine.low %v510_v26, %v514_v27 }
 0x11a   :  { %v14124_v38 = vcombine.high %v511_v28, %v515_v30  ;;  %v571_v26 = vld [vmem:[#allocation2 + $0xc28] sm:$0xff] }
 0x11b   :  { %9525 = vmatpush1.bf16.msra.mxu0 %v14057_v35  ;;  %10017 = vmatpush1.bf16.msra.mxu1 %v14059_v36  ;;  %v518_v35 = vld [vmem:[#allocation2 + $0xa80] sm:$0xff] }
 0x11c   :  { %9526 = vmatprep.subr.bf16.mxu0 %v14066_v37  ;;  %10018 = vmatprep.subr.bf16.mxu1 %v14068_v41  ;;  %v522_v36 = vld [vmem:[#allocation2 + $0xaa0] sm:$0xff]  ;;  %v519_v37 = vld [vmem:[#allocation2 + $0xa88] sm:$0xff]  ;;  %v14123_v41 = vcombine.low %v511_v28, %v515_v30 }
 0x11d   :  { %v14130_v42 = vcombine.high %v518_v35, %v522_v36  ;;  %v14132_v46 = vcombine.high %v519_v37, %v523_v39  ;;  %v14129_v48 = vcombine.low %v518_v35, %v522_v36  ;;  %v138_v28 = vld [vmem:[%s16981_s0 + $0x20] sm:$0xff]  ;;  %v575_v35 = vld [vmem:[#allocation2 + $0xc48] sm:$0xff] }
 0x11e   :  { %v574_v30 = vld [vmem:[#allocation2 + $0xc40] sm:$0xff]  ;;  %v579_v36 = vld [vmem:[#allocation2 + $0xc68] sm:$0xff] }
 0x11f   :  { %9527 = vmatpush1.bf16.msra.mxu0 %v14065_v43  ;;  %10019 = vmatpush1.bf16.msra.mxu1 %v14067_v44  ;;  %v526_v43 = vld [vmem:[#allocation2 + $0xac0] sm:$0xff] }
 0x120   :  { %9528 = vmatprep.subr.bf16.mxu0 %v14074_v45  ;;  %10020 = vmatprep.subr.bf16.mxu1 %v14076_v49  ;;  %v530_v44 = vld [vmem:[#allocation2 + $0xae0] sm:$0xff]  ;;  %v527_v45 = vld [vmem:[#allocation2 + $0xac8] sm:$0xff]  ;;  %v14131_v49 = vcombine.low %v519_v37, %v523_v39  ;;  %v16753_v39 = vpack.c.bf16 %v138_v28, %v138_v28 }
 0x121   :  { %v14138_v50 = vcombine.high %v526_v43, %v530_v44  ;;  %v14140_v54 = vcombine.high %v527_v45, %v531_v47  ;;  %v14137_v56 = vcombine.low %v526_v43, %v530_v44  ;;  %v582_v43 = vld [vmem:[#allocation2 + $0xc80] sm:$0xff]  ;;  %v14188_v44 = vcombine.high %v575_v35, %v579_v36  ;;  %v627_v28 = vld [vmem:[#allocation2 + $0xde8] sm:$0xff] }
 0x123   :  { %9529 = vmatpush1.bf16.msra.mxu0 %v14073_v51  ;;  %10021 = vmatpush1.bf16.msra.mxu1 %v14075_v52  ;;  %v534_v51 = vld [vmem:[#allocation2 + $0xb00] sm:$0xff] }
 0x124   :  { %9530 = vmatprep.subr.bf16.mxu0 %v14082_v53  ;;  %10022 = vmatprep.subr.bf16.mxu1 %v14084_v58  ;;  %v538_v52 = vld [vmem:[#allocation2 + $0xb20] sm:$0xff]  ;;  %v535_v53 = vld [vmem:[#allocation2 + $0xb08] sm:$0xff]  ;;  %v14139_v58 = vcombine.low %v527_v45, %v531_v47 }
 0x125   :  { %v14146_v59 = vcombine.high %v534_v51, %v538_v52  ;;  %v14148_v63 = vcombine.high %v535_v53, %v539_v55  ;;  %v14145_v1 = vcombine.low %v534_v51, %v538_v52  ;;  %v586_v45 = vld [vmem:[#allocation2 + $0xca0] sm:$0xff]  ;;  %v587_v47 = vld [vmem:[#allocation2 + $0xca8] sm:$0xff] }
 0x126   :  { %v14194_v51 = vcombine.high %v582_v43, %v586_v45  ;;  %v590_v52 = vld [vmem:[#allocation2 + $0xcc0] sm:$0xff] }
 0x127   :  { %9531 = vmatpush1.bf16.msra.mxu0 %v14081_v60  ;;  %10023 = vmatpush1.bf16.msra.mxu1 %v14083_v61  ;;  %v542_v60 = vld [vmem:[#allocation2 + $0xb40] sm:$0xff] }
 0x128   :  { %9532 = vmatprep.subr.bf16.mxu0 %v14090_v62  ;;  %10024 = vmatprep.subr.bf16.mxu1 %v14092_v2  ;;  %v546_v61 = vld [vmem:[#allocation2 + $0xb60] sm:$0xff]  ;;  %v543_v62 = vld [vmem:[#allocation2 + $0xb48] sm:$0xff]  ;;  %v14147_v2 = vcombine.low %v535_v53, %v539_v55 }
 0x129   :  { %v14154_v3 = vcombine.high %v542_v60, %v546_v61  ;;  %v14156_v7 = vcombine.high %v543_v62, %v547_v0  ;;  %v14153_v9 = vcombine.low %v542_v60, %v546_v61  ;;  %v594_v53 = vld [vmem:[#allocation2 + $0xce0] sm:$0xff] }
 0x12a   :  { %v14202_v60 = vcombine.high %v590_v52, %v594_v53  ;;  %v598_v61 = vld [vmem:[#allocation2 + $0xd00] sm:$0xff] }
 0x12b   :  { %9533 = vmatpush1.bf16.msra.mxu0 %v14089_v4  ;;  %10025 = vmatpush1.bf16.msra.mxu1 %v14091_v5  ;;  %v550_v4 = vld [vmem:[#allocation2 + $0xb80] sm:$0xff] }
 0x12c   :  { %9534 = vmatprep.subr.bf16.mxu0 %v14098_v6  ;;  %10026 = vmatprep.subr.bf16.mxu1 %v14100_v10  ;;  %v554_v5 = vld [vmem:[#allocation2 + $0xba0] sm:$0xff]  ;;  %v551_v6 = vld [vmem:[#allocation2 + $0xb88] sm:$0xff]  ;;  %v14155_v10 = vcombine.low %v543_v62, %v547_v0 }
 0x12d   :  { %v14162_v11 = vcombine.high %v550_v4, %v554_v5  ;;  %v14164_v16 = vcombine.high %v551_v6, %v555_v8  ;;  %v14161_v18 = vcombine.low %v550_v4, %v554_v5  ;;  %v14163_v20 = vcombine.low %v551_v6, %v555_v8  ;;  %v602_v62 = vld [vmem:[#allocation2 + $0xd20] sm:$0xff] }
 0x12e   :  { %v14210_v4 = vcombine.high %v598_v61, %v602_v62  ;;  %v606_v5 = vld [vmem:[#allocation2 + $0xd40] sm:$0xff] }
 0x12f   :  { %9535 = vmatpush1.bf16.msra.mxu0 %v14097_v13  ;;  %10027 = vmatpush1.bf16.msra.mxu1 %v14099_v14  ;;  %v558_v13 = vld [vmem:[#allocation2 + $0xbc0] sm:$0xff] }
 0x130   :  { %9536 = vmatprep.subr.bf16.mxu0 %v14106_v15  ;;  %10028 = vmatprep.subr.bf16.mxu1 %v14108_v19  ;;  %v562_v14 = vld [vmem:[#allocation2 + $0xbe0] sm:$0xff]  ;;  %v559_v15 = vld [vmem:[#allocation2 + $0xbc8] sm:$0xff] }
 0x131   :  { %v566_v19 = vld [vmem:[#allocation2 + $0xc00] sm:$0xff]  ;;  %v14172_v27 = vcombine.high %v559_v15, %v563_v17 }
 0x132   :  { %v610_v6 = vld [vmem:[#allocation2 + $0xd60] sm:$0xff] }
 0x133   :  { %9537 = vmatpush1.bf16.msra.mxu0 %v14105_v21  ;;  %10029 = vmatpush1.bf16.msra.mxu1 %v14107_v22  ;;  %v14170_v21 = vcombine.high %v558_v13, %v562_v14  ;;  %v570_v22 = vld [vmem:[#allocation2 + $0xc20] sm:$0xff] }
 0x134   :  { %9538 = vmatprep.subr.bf16.mxu0 %v14114_v24  ;;  %10030 = vmatprep.subr.bf16.mxu1 %v14116_v29  ;;  %v567_v24 = vld [vmem:[#allocation2 + $0xc08] sm:$0xff]  ;;  %v14169_v29 = vcombine.low %v558_v13, %v562_v14  ;;  %v14218_v13 = vcombine.high %v606_v5, %v610_v6  ;;  %v614_v14 = vld [vmem:[#allocation2 + $0xd80] sm:$0xff] }
 0x135   :  { %v14180_v37 = vcombine.high %v567_v24, %v571_v26 }
 0x137   :  { %9539 = vmatpush1.bf16.msra.mxu0 %v14113_v31  ;;  %10031 = vmatpush1.bf16.msra.mxu1 %v14115_v32  ;;  %v14171_v31 = vcombine.low %v559_v15, %v563_v17  ;;  %v14178_v32 = vcombine.high %v566_v19, %v570_v22  ;;  %v618_v15 = vld [vmem:[#allocation2 + $0xda0] sm:$0xff] }
 0x138   :  { %9540 = vmatprep.subr.bf16.mxu0 %v14122_v33  ;;  %10032 = vmatprep.subr.bf16.mxu1 %v14124_v38  ;;  %v578_v33 = vld [vmem:[#allocation2 + $0xc60] sm:$0xff]  ;;  %v141_v38 = vld [vmem:[%s16981_s0 + $0x38] sm:$0xff] }
 0x13b   :  { %9541 = vmatpush1.bf16.msra.mxu0 %v14121_v40  ;;  %10033 = vmatpush1.bf16.msra.mxu1 %v14123_v41  ;;  %v14177_v40 = vcombine.low %v566_v19, %v570_v22  ;;  %v14179_v41 = vcombine.low %v567_v24, %v571_v26  ;;  %v14217_v19 = vcombine.low %v606_v5, %v610_v6  ;;  %v622_v22 = vld [vmem:[#allocation2 + $0xdc0] sm:$0xff]  ;;  %v623_v26 = vld [vmem:[#allocation2 + $0xdc8] sm:$0xff] }
 0x13c   :  { %9542 = vmatprep.subr.bf16.mxu0 %v14130_v42  ;;  %10034 = vmatprep.subr.bf16.mxu1 %v14132_v46  ;;  %v14186_v42 = vcombine.high %v574_v30, %v578_v33  ;;  %v583_v46 = vld [vmem:[#allocation2 + $0xc88] sm:$0xff]  ;;  %v626_v24 = vld [vmem:[#allocation2 + $0xde0] sm:$0xff] }
 0x13d   :  { %v14196_v55 = vcombine.high %v583_v46, %v587_v47  ;;  %v666_v5 = vld [vmem:[#allocation2 + $0xf20] sm:$0xff]  ;;  %v663_v6 = vld [vmem:[#allocation2 + $0xf08] sm:$0xff] }
 0x13f   :  { %9543 = vmatpush1.bf16.msra.mxu0 %v14129_v48  ;;  %10035 = vmatpush1.bf16.msra.mxu1 %v14131_v49  ;;  %v16755_v48 = vpack.c.bf16 %v141_v38, %v141_v38  ;;  %v14185_v49 = vcombine.low %v574_v30, %v578_v33  ;;  %v634_v33 = vld [vmem:[#allocation2 + $0xe20] sm:$0xff]  ;;  %v14233_v38 = vcombine.low %v622_v22, %v626_v24 }
 0x140   :  { %9544 = vmatprep.subr.bf16.mxu0 %v14138_v50  ;;  %10036 = vmatprep.subr.bf16.mxu1 %v14140_v54  ;;  %v14187_v50 = vcombine.low %v575_v35, %v579_v36  ;;  %v591_v54 = vld [vmem:[#allocation2 + $0xcc8] sm:$0xff]  ;;  %v14236_v36 = vcombine.high %v623_v26, %v627_v28 }
 0x141   :  { %v631_v35 = vld [vmem:[#allocation2 + $0xe08] sm:$0xff] }
 0x143   :  { %9545 = vmatpush1.bf16.msra.mxu0 %v14137_v56  ;;  %10037 = vmatpush1.bf16.msra.mxu1 %v14139_v58  ;;  %v595_v56 = vld [vmem:[#allocation2 + $0xce8] sm:$0xff]  ;;  %v14193_v58 = vcombine.low %v582_v43, %v586_v45  ;;  %v642_v43 = vld [vmem:[#allocation2 + $0xe60] sm:$0xff] }
 0x144   :  { %9546 = vmatprep.subr.bf16.mxu0 %v14146_v59  ;;  %10038 = vmatprep.subr.bf16.mxu1 %v14148_v63  ;;  %v14195_v59 = vcombine.low %v583_v46, %v587_v47  ;;  %v599_v63 = vld [vmem:[#allocation2 + $0xd08] sm:$0xff]  ;;  %v14204_v0 = vcombine.high %v591_v54, %v595_v56 }
 0x145   :  { %v643_v46 = vld [vmem:[#allocation2 + $0xe68] sm:$0xff] }
 0x147   :  { %9547 = vmatpush1.bf16.msra.mxu0 %v14145_v1  ;;  %10039 = vmatpush1.bf16.msra.mxu1 %v14147_v2  ;;  %v603_v1 = vld [vmem:[#allocation2 + $0xd28] sm:$0xff]  ;;  %v14201_v2 = vcombine.low %v590_v52, %v594_v53  ;;  %v650_v52 = vld [vmem:[#allocation2 + $0xea0] sm:$0xff] }
 0x148   :  { %9548 = vmatprep.subr.bf16.mxu0 %v14154_v3  ;;  %10040 = vmatprep.subr.bf16.mxu1 %v14156_v7  ;;  %v14203_v3 = vcombine.low %v591_v54, %v595_v56  ;;  %v607_v7 = vld [vmem:[#allocation2 + $0xd48] sm:$0xff]  ;;  %v14212_v8 = vcombine.high %v599_v63, %v603_v1 }
 0x149   :  { %v647_v53 = vld [vmem:[#allocation2 + $0xe88] sm:$0xff] }
 0x14b   :  { %9549 = vmatpush1.bf16.msra.mxu0 %v14153_v9  ;;  %10041 = vmatpush1.bf16.msra.mxu1 %v14155_v10  ;;  %v611_v9 = vld [vmem:[#allocation2 + $0xd68] sm:$0xff]  ;;  %v14209_v10 = vcombine.low %v598_v61, %v602_v62  ;;  %v658_v61 = vld [vmem:[#allocation2 + $0xee0] sm:$0xff] }
 0x14c   :  { %9550 = vmatprep.subr.bf16.mxu0 %v14162_v11  ;;  %10042 = vmatprep.subr.bf16.mxu1 %v14164_v16  ;;  %v14211_v11 = vcombine.low %v599_v63, %v603_v1  ;;  %v615_v16 = vld [vmem:[#allocation2 + $0xd88] sm:$0xff]  ;;  %v14220_v17 = vcombine.high %v607_v7, %v611_v9 }
 0x14d   :  { %v655_v62 = vld [vmem:[#allocation2 + $0xec8] sm:$0xff] }
 0x14f   :  { %9551 = vmatpush1.bf16.msra.mxu0 %v14161_v18  ;;  %10043 = vmatpush1.bf16.msra.mxu1 %v14163_v20  ;;  %v619_v18 = vld [vmem:[#allocation2 + $0xda8] sm:$0xff]  ;;  %v14219_v20 = vcombine.low %v607_v7, %v611_v9 }
 0x150   :  { %9552 = vmatprep.subr.bf16.mxu0 %v14170_v21  ;;  %10044 = vmatprep.subr.bf16.mxu1 %v14172_v27  ;;  %v14226_v21 = vcombine.high %v614_v14, %v618_v15  ;;  %v14228_v27 = vcombine.high %v615_v16, %v619_v18  ;;  %v14227_v30 = vcombine.low %v615_v16, %v619_v18  ;;  %v671_v16 = vld [vmem:[#allocation2 + $0xf48] sm:$0xff] }
 0x153   :  { %9553 = vmatpush1.bf16.msra.mxu0 %v14169_v29  ;;  %10045 = vmatpush1.bf16.msra.mxu1 %v14171_v31  ;;  %v14225_v29 = vcombine.low %v614_v14, %v618_v15  ;;  %v14234_v31 = vcombine.high %v622_v22, %v626_v24  ;;  %v670_v14 = vld [vmem:[#allocation2 + $0xf40] sm:$0xff] }
 0x154   :  { %9563 = vmatprep.subr.bf16.mxu0 %v14178_v32  ;;  %10055 = vmatprep.subr.bf16.mxu1 %v14180_v37  ;;  %v630_v32 = vld [vmem:[#allocation2 + $0xe00] sm:$0xff]  ;;  %v635_v37 = vld [vmem:[#allocation2 + $0xe28] sm:$0xff] }
 0x155   :  { %v14244_v45 = vcombine.high %v631_v35, %v635_v37  ;;  %v14241_v47 = vcombine.low %v630_v32, %v634_v33  ;;  %v674_v15 = vld [vmem:[#allocation2 + $0xf60] sm:$0xff] }
 0x156   :  { %9555 = vmatmul.mubr.bf16.vlgmr.msra.gmra.mrb[0].mxu0 %v16753_v39  ;;  %10047 = vmatmul.mubr.bf16.vlgmr.msra.gmra.mrb[0].mxu1 %v16753_v39  ;;  %v678_v22 = vld [vmem:[#allocation2 + $0xf80] sm:$0xff] }
 0x157   :  { %9564 = vmatpush1.bf16.msra.mxu0 %v14177_v40  ;;  %10056 = vmatpush1.bf16.msra.mxu1 %v14179_v41  ;;  %v14235_v40 = vcombine.low %v623_v26, %v627_v28  ;;  %v14242_v41 = vcombine.high %v630_v32, %v634_v33  ;;  %v682_v24 = vld [vmem:[#allocation2 + $0xfa0] sm:$0xff]  ;;  %v679_v26 = vld [vmem:[#allocation2 + $0xf88] sm:$0xff]  ;;  %v14281_v28 = vcombine.low %v670_v14, %v674_v15 }
 0x158   :  { %9565 = vmatprep.subr.bf16.mxu0 %v14186_v42  ;;  %10057 = vmatprep.subr.bf16.mxu1 %v14188_v44  ;;  %v638_v42 = vld [vmem:[#allocation2 + $0xe40] sm:$0xff]  ;;  %v639_v44 = vld [vmem:[#allocation2 + $0xe48] sm:$0xff] }
 0x159   :  { %9595 = vmatprep.mubr.bf16.mxu0 %v16755_v48  ;;  %10087 = vmatprep.mubr.bf16.mxu1 %v16755_v48  ;;  %v14252_v54 = vcombine.high %v639_v44, %v643_v46  ;;  %v14249_v56 = vcombine.low %v638_v42, %v642_v43  ;;  %v686_v32 = vld [vmem:[#allocation2 + $0xfc0] sm:$0xff] }
 0x15a   :  { %v690_v33 = vld [vmem:[#allocation2 + $0xfe0] sm:$0xff] }
 0x15b   :  { %9566 = vmatpush1.bf16.msra.mxu0 %v14185_v49  ;;  %10058 = vmatpush1.bf16.msra.mxu1 %v14187_v50  ;;  %v14243_v49 = vcombine.low %v631_v35, %v635_v37  ;;  %v14250_v50 = vcombine.high %v638_v42, %v642_v43  ;;  %v687_v35 = vld [vmem:[#allocation2 + $0xfc8] sm:$0xff]  ;;  %v14289_v37 = vcombine.low %v678_v22, %v682_v24  ;;  %v694_v42 = vld [vmem:[#allocation2 + $0x1000] sm:$0xff] }
 0x15c   :  { %9567 = vmatprep.subr.bf16.mxu0 %v14194_v51  ;;  %10059 = vmatprep.subr.bf16.mxu1 %v14196_v55  ;;  %v646_v51 = vld [vmem:[#allocation2 + $0xe80] sm:$0xff]  ;;  %v651_v55 = vld [vmem:[#allocation2 + $0xea8] sm:$0xff] }
 0x15d   :  { %v14260_v63 = vcombine.high %v647_v53, %v651_v55  ;;  %v14257_v1 = vcombine.low %v646_v51, %v650_v52  ;;  %v698_v43 = vld [vmem:[#allocation2 + $0x1020] sm:$0xff] }
 0x15f   :  { %9568 = vmatpush1.bf16.msra.mxu0 %v14193_v58  ;;  %10060 = vmatpush1.bf16.msra.mxu1 %v14195_v59  ;;  %v14251_v58 = vcombine.low %v639_v44, %v643_v46  ;;  %v14258_v59 = vcombine.high %v646_v51, %v650_v52  ;;  %v695_v44 = vld [vmem:[#allocation2 + $0x1008] sm:$0xff]  ;;  %v14297_v46 = vcombine.low %v686_v32, %v690_v33  ;;  %v702_v52 = vld [vmem:[#allocation2 + $0x1040] sm:$0xff] }
 0x160   :  { %9569 = vmatprep.subr.bf16.mxu0 %v14202_v60  ;;  %10061 = vmatprep.subr.bf16.mxu1 %v14204_v0  ;;  %v654_v60 = vld [vmem:[#allocation2 + $0xec0] sm:$0xff]  ;;  %v659_v0 = vld [vmem:[#allocation2 + $0xee8] sm:$0xff] }
 0x161   :  { %v14268_v7 = vcombine.high %v655_v62, %v659_v0  ;;  %v14265_v9 = vcombine.low %v654_v60, %v658_v61 }
 0x163   :  { %9570 = vmatpush1.bf16.msra.mxu0 %v14201_v2  ;;  %10062 = vmatpush1.bf16.msra.mxu1 %v14203_v3  ;;  %v14259_v2 = vcombine.low %v647_v53, %v651_v55  ;;  %v14266_v3 = vcombine.high %v654_v60, %v658_v61  ;;  %v706_v53 = vld [vmem:[#allocation2 + $0x1060] sm:$0xff]  ;;  %v703_v55 = vld [vmem:[#allocation2 + $0x1048] sm:$0xff] }
 0x164   :  { %9571 = vmatprep.subr.bf16.mxu0 %v14210_v4  ;;  %10063 = vmatprep.subr.bf16.mxu1 %v14212_v8  ;;  %v662_v4 = vld [vmem:[#allocation2 + $0xf00] sm:$0xff]  ;;  %v667_v8 = vld [vmem:[#allocation2 + $0xf28] sm:$0xff]  ;;  %v14314_v61 = vcombine.high %v702_v52, %v706_v53 }
 0x165   :  { %v14273_v18 = vcombine.low %v662_v4, %v666_v5 }
 0x167   :  { %9572 = vmatpush1.bf16.msra.mxu0 %v14209_v10  ;;  %10064 = vmatpush1.bf16.msra.mxu1 %v14211_v11  ;;  %v14267_v10 = vcombine.low %v655_v62, %v659_v0  ;;  %v14274_v11 = vcombine.high %v662_v4, %v666_v5  ;;  %v714_v0 = vld [vmem:[#allocation2 + $0x10a0] sm:$0xff]  ;;  %v14313_v4 = vcombine.low %v702_v52, %v706_v53 }
 0x168   :  { %9573 = vmatprep.subr.bf16.mxu0 %v14218_v13  ;;  %10065 = vmatprep.subr.bf16.mxu1 %v14220_v17  ;;  %v14276_v13 = vcombine.high %v663_v6, %v667_v8  ;;  %v675_v17 = vld [vmem:[#allocation2 + $0xf68] sm:$0xff] }
 0x16b   :  { %9574 = vmatpush1.bf16.msra.mxu0 %v14217_v19  ;;  %10066 = vmatpush1.bf16.msra.mxu1 %v14219_v20  ;;  %v14275_v19 = vcombine.low %v663_v6, %v667_v8  ;;  %v14282_v20 = vcombine.high %v670_v14, %v674_v15  ;;  %v718_v8 = vld [vmem:[#allocation2 + $0x10c0] sm:$0xff] }
 0x16c   :  { %9575 = vmatprep.subr.bf16.mxu0 %v14226_v21  ;;  %10067 = vmatprep.subr.bf16.mxu1 %v14228_v27  ;;  %v14284_v21 = vcombine.high %v671_v16, %v675_v17  ;;  %v683_v27 = vld [vmem:[#allocation2 + $0xfa8] sm:$0xff] }
 0x16f   :  { %9576 = vmatpush1.bf16.msra.mxu0 %v14225_v29  ;;  %10068 = vmatpush1.bf16.msra.mxu1 %v14227_v30  ;;  %v14283_v29 = vcombine.low %v671_v16, %v675_v17  ;;  %v14290_v30 = vcombine.high %v678_v22, %v682_v24  ;;  %v726_v17 = vld [vmem:[#allocation2 + $0x1100] sm:$0xff] }
 0x170   :  { %9577 = vmatprep.subr.bf16.mxu0 %v14234_v31  ;;  %10069 = vmatprep.subr.bf16.mxu1 %v14236_v36  ;;  %v14292_v31 = vcombine.high %v679_v26, %v683_v27  ;;  %v691_v36 = vld [vmem:[#allocation2 + $0xfe8] sm:$0xff] }
 0x173   :  { %9578 = vmatpush1.bf16.msra.mxu0 %v14233_v38  ;;  %10070 = vmatpush1.bf16.msra.mxu1 %v14235_v40  ;;  %v14291_v38 = vcombine.low %v679_v26, %v683_v27  ;;  %v14298_v40 = vcombine.high %v686_v32, %v690_v33  ;;  %v734_v27 = vld [vmem:[#allocation2 + $0x1140] sm:$0xff] }
 0x174   :  { %9579 = vmatprep.subr.bf16.mxu0 %v14242_v41  ;;  %10071 = vmatprep.subr.bf16.mxu1 %v14244_v45  ;;  %v14300_v41 = vcombine.high %v687_v35, %v691_v36  ;;  %v699_v45 = vld [vmem:[#allocation2 + $0x1028] sm:$0xff] }
 0x175   :  { %v14308_v51 = vcombine.high %v695_v44, %v699_v45  ;;  %v14307_v60 = vcombine.low %v695_v44, %v699_v45  ;;  %v750_v45 = vld [vmem:[#allocation2 + $0x11c0] sm:$0xff] }
 0x177   :  { %9580 = vmatpush1.bf16.msra.mxu0 %v14241_v47  ;;  %10072 = vmatpush1.bf16.msra.mxu1 %v14243_v49  ;;  %v140_v47 = vld [vmem:[%s16981_s0 + $0x30] sm:$0xff]  ;;  %v14299_v49 = vcombine.low %v687_v35, %v691_v36  ;;  %v742_v36 = vld [vmem:[#allocation2 + $0x1180] sm:$0xff] }
 0x178   :  { %9581 = vmatprep.subr.bf16.mxu0 %v14250_v50  ;;  %10073 = vmatprep.subr.bf16.mxu1 %v14252_v54  ;;  %v14306_v50 = vcombine.high %v694_v42, %v698_v43  ;;  %v16764_v54 = vpack.c.bf16 %v140_v47, %v140_v47  ;;  %v751_v47 = vld [vmem:[#allocation2 + $0x11c8] sm:$0xff] }
 0x17b   :  { %9582 = vmatpush1.bf16.msra.mxu0 %v14249_v56  ;;  %10074 = vmatpush1.bf16.msra.mxu1 %v14251_v58  ;;  %v707_v56 = vld [vmem:[#allocation2 + $0x1068] sm:$0xff] }
 0x17c   :  { %9583 = vmatprep.subr.bf16.mxu0 %v14258_v59  ;;  %10075 = vmatprep.subr.bf16.mxu1 %v14260_v63  ;;  %v143_v58 = vld [vmem:[%s16981_s0 + $0x48] sm:$0xff]  ;;  %v14305_v59 = vcombine.low %v694_v42, %v698_v43  ;;  %v14316_v62 = vcombine.high %v703_v55, %v707_v56  ;;  %v710_v63 = vld [vmem:[#allocation2 + $0x1080] sm:$0xff]  ;;  %v14315_v5 = vcombine.low %v703_v55, %v707_v56 }
 0x17d   :  { %v14322_v6 = vcombine.high %v710_v63, %v714_v0  ;;  %v758_v55 = vld [vmem:[#allocation2 + $0x1200] sm:$0xff] }
 0x17e   :  { %v762_v56 = vld [vmem:[#allocation2 + $0x1220] sm:$0xff] }
 0x17f   :  { %9584 = vmatpush1.bf16.msra.mxu0 %v14257_v1  ;;  %10076 = vmatpush1.bf16.msra.mxu1 %v14259_v2  ;;  %v16769_v1 = vpack.c.bf16 %v143_v58, %v143_v58  ;;  %v711_v2 = vld [vmem:[#allocation2 + $0x1088] sm:$0xff] }
 0x180   :  { %9585 = vmatprep.subr.bf16.mxu0 %v14266_v3  ;;  %10077 = vmatprep.subr.bf16.mxu1 %v14268_v7  ;;  %v715_v3 = vld [vmem:[#allocation2 + $0x10a8] sm:$0xff] }
 0x181   :  { %v14324_v7 = vcombine.high %v711_v2, %v715_v3  ;;  %v14323_v14 = vcombine.low %v711_v2, %v715_v3  ;;  %v759_v58 = vld [vmem:[#allocation2 + $0x1208] sm:$0xff]  ;;  %v770_v2 = vld [vmem:[#allocation2 + $0x1260] sm:$0xff] }
 0x182   :  { %v767_v3 = vld [vmem:[#allocation2 + $0x1248] sm:$0xff] }
 0x183   :  { %9586 = vmatpush1.bf16.msra.mxu0 %v14265_v9  ;;  %10078 = vmatpush1.bf16.msra.mxu1 %v14267_v10  ;;  %v722_v9 = vld [vmem:[#allocation2 + $0x10e0] sm:$0xff]  ;;  %v719_v10 = vld [vmem:[#allocation2 + $0x10c8] sm:$0xff] }
 0x184   :  { %9587 = vmatprep.subr.bf16.mxu0 %v14274_v11  ;;  %10079 = vmatprep.subr.bf16.mxu1 %v14276_v13  ;;  %v723_v11 = vld [vmem:[#allocation2 + $0x10e8] sm:$0xff]  ;;  %v14321_v13 = vcombine.low %v710_v63, %v714_v0  ;;  %v14330_v15 = vcombine.high %v718_v8, %v722_v9  ;;  %v766_v0 = vld [vmem:[#allocation2 + $0x1240] sm:$0xff] }
 0x185   :  { %v14332_v16 = vcombine.high %v719_v10, %v723_v11  ;;  %v14331_v22 = vcombine.low %v719_v10, %v723_v11  ;;  %v778_v10 = vld [vmem:[#allocation2 + $0x12a0] sm:$0xff]  ;;  %v775_v11 = vld [vmem:[#allocation2 + $0x1288] sm:$0xff] }
 0x187   :  { %9588 = vmatpush1.bf16.msra.mxu0 %v14273_v18  ;;  %10080 = vmatpush1.bf16.msra.mxu1 %v14275_v19  ;;  %v730_v18 = vld [vmem:[#allocation2 + $0x1120] sm:$0xff]  ;;  %v727_v19 = vld [vmem:[#allocation2 + $0x1108] sm:$0xff] }
 0x188   :  { %9589 = vmatprep.subr.bf16.mxu0 %v14282_v20  ;;  %10081 = vmatprep.subr.bf16.mxu1 %v14284_v21  ;;  %v731_v20 = vld [vmem:[#allocation2 + $0x1128] sm:$0xff]  ;;  %v14329_v21 = vcombine.low %v718_v8, %v722_v9  ;;  %v14338_v24 = vcombine.high %v726_v17, %v730_v18  ;;  %v774_v9 = vld [vmem:[#allocation2 + $0x1280] sm:$0xff] }
 0x189   :  { %v14340_v26 = vcombine.high %v727_v19, %v731_v20  ;;  %v14339_v32 = vcombine.low %v727_v19, %v731_v20  ;;  %v786_v19 = vld [vmem:[#allocation2 + $0x12e0] sm:$0xff]  ;;  %v783_v20 = vld [vmem:[#allocation2 + $0x12c8] sm:$0xff] }
 0x18b   :  { %9590 = vmatpush1.bf16.msra.mxu0 %v14281_v28  ;;  %10082 = vmatpush1.bf16.msra.mxu1 %v14283_v29  ;;  %v738_v28 = vld [vmem:[#allocation2 + $0x1160] sm:$0xff]  ;;  %v735_v29 = vld [vmem:[#allocation2 + $0x1148] sm:$0xff] }
 0x18c   :  { %9591 = vmatprep.subr.bf16.mxu0 %v14290_v30  ;;  %10083 = vmatprep.subr.bf16.mxu1 %v14292_v31  ;;  %v739_v30 = vld [vmem:[#allocation2 + $0x1168] sm:$0xff]  ;;  %v14337_v31 = vcombine.low %v726_v17, %v730_v18  ;;  %v14346_v33 = vcombine.high %v734_v27, %v738_v28  ;;  %v782_v18 = vld [vmem:[#allocation2 + $0x12c0] sm:$0xff] }
 0x18d   :  { %v14348_v35 = vcombine.high %v735_v29, %v739_v30  ;;  %v14347_v42 = vcombine.low %v735_v29, %v739_v30  ;;  %v794_v29 = vld [vmem:[#allocation2 + $0x1320] sm:$0xff]  ;;  %v791_v30 = vld [vmem:[#allocation2 + $0x1308] sm:$0xff] }
 0x18f   :  { %9592 = vmatpush1.bf16.msra.mxu0 %v14289_v37  ;;  %10084 = vmatpush1.bf16.msra.mxu1 %v14291_v38  ;;  %v746_v37 = vld [vmem:[#allocation2 + $0x11a0] sm:$0xff]  ;;  %v743_v38 = vld [vmem:[#allocation2 + $0x1188] sm:$0xff] }
 0x190   :  { %9593 = vmatprep.subr.bf16.mxu0 %v14298_v40  ;;  %10085 = vmatprep.subr.bf16.mxu1 %v14300_v41  ;;  %v747_v40 = vld [vmem:[#allocation2 + $0x11a8] sm:$0xff]  ;;  %v14345_v41 = vcombine.low %v734_v27, %v738_v28  ;;  %v14354_v43 = vcombine.high %v742_v36, %v746_v37  ;;  %v790_v28 = vld [vmem:[#allocation2 + $0x1300] sm:$0xff] }
 0x191   :  { %v14356_v44 = vcombine.high %v743_v38, %v747_v40 }
 0x193   :  { %9594 = vmatpush1.bf16.msra.mxu0 %v14297_v46  ;;  %10086 = vmatpush1.bf16.msra.mxu1 %v14299_v49  ;;  %v754_v46 = vld [vmem:[#allocation2 + $0x11e0] sm:$0xff]  ;;  %v755_v49 = vld [vmem:[#allocation2 + $0x11e8] sm:$0xff] }
 0x194   :  { %9604 = vmatprep.subr.bf16.mxu0 %v14306_v50  ;;  %10096 = vmatprep.subr.bf16.mxu1 %v14308_v51  ;;  %v14353_v50 = vcombine.low %v742_v36, %v746_v37  ;;  %v14355_v51 = vcombine.low %v743_v38, %v747_v40  ;;  %v14362_v52 = vcombine.high %v750_v45, %v754_v46  ;;  %v798_v37 = vld [vmem:[#allocation2 + $0x1340] sm:$0xff]  ;;  %v799_v40 = vld [vmem:[#allocation2 + $0x1348] sm:$0xff] }
 0x195   :  { %v14364_v53 = vcombine.high %v751_v47, %v755_v49  ;;  %v802_v38 = vld [vmem:[#allocation2 + $0x1360] sm:$0xff] }
 0x196   :  { %9596 = vmatmul.mubr.bf16.vlgmr.msra.gmra.mrb[0].mxu0 %v16764_v54  ;;  %10088 = vmatmul.mubr.bf16.vlgmr.msra.gmra.mrb[0].mxu1 %v16764_v54 }
 0x197   :  { %9605 = vmatpush1.bf16.msra.mxu0 %v14305_v59  ;;  %10097 = vmatpush1.bf16.msra.mxu1 %v14307_v60  ;;  %v763_v59 = vld [vmem:[#allocation2 + $0x1228] sm:$0xff]  ;;  %v14361_v60 = vcombine.low %v750_v45, %v754_v46  ;;  %v806_v46 = vld [vmem:[#allocation2 + $0x1380] sm:$0xff] }
 0x198   :  { %9606 = vmatprep.subr.bf16.mxu0 %v14314_v61  ;;  %10098 = vmatprep.subr.bf16.mxu1 %v14316_v62  ;;  %v14363_v61 = vcombine.low %v751_v47, %v755_v49  ;;  %v14370_v62 = vcombine.high %v758_v55, %v762_v56  ;;  %v14372_v63 = vcombine.high %v759_v58, %v763_v59  ;;  %v810_v47 = vld [vmem:[#allocation2 + $0x13a0] sm:$0xff]  ;;  %v807_v49 = vld [vmem:[#allocation2 + $0x1388] sm:$0xff] }
 0x199   :  { %9636 = vmatprep.mubr.bf16.mxu0 %v16769_v1  ;;  %10128 = vmatprep.mubr.bf16.mxu1 %v16769_v1 }
 0x19b   :  { %9607 = vmatpush1.bf16.msra.mxu0 %v14313_v4  ;;  %10099 = vmatpush1.bf16.msra.mxu1 %v14315_v5  ;;  %v771_v4 = vld [vmem:[#allocation2 + $0x1268] sm:$0xff]  ;;  %v14369_v5 = vcombine.low %v758_v55, %v762_v56  ;;  %v814_v56 = vld [vmem:[#allocation2 + $0x13c0] sm:$0xff] }
 0x19c   :  { %9608 = vmatprep.subr.bf16.mxu0 %v14322_v6  ;;  %10100 = vmatprep.subr.bf16.mxu1 %v14324_v7  ;;  %v14371_v6 = vcombine.low %v759_v58, %v763_v59  ;;  %v14378_v7 = vcombine.high %v766_v0, %v770_v2  ;;  %v14380_v8 = vcombine.high %v767_v3, %v771_v4  ;;  %v818_v58 = vld [vmem:[#allocation2 + $0x13e0] sm:$0xff]  ;;  %v815_v59 = vld [vmem:[#allocation2 + $0x13c8] sm:$0xff] }
 0x19f   :  { %9609 = vmatpush1.bf16.msra.mxu0 %v14321_v13  ;;  %10101 = vmatpush1.bf16.msra.mxu1 %v14323_v14  ;;  %v779_v13 = vld [vmem:[#allocation2 + $0x12a8] sm:$0xff]  ;;  %v14377_v14 = vcombine.low %v766_v0, %v770_v2  ;;  %v822_v2 = vld [vmem:[#allocation2 + $0x1400] sm:$0xff] }
 0x1a0   :  { %9610 = vmatprep.subr.bf16.mxu0 %v14330_v15  ;;  %10102 = vmatprep.subr.bf16.mxu1 %v14332_v16  ;;  %v14379_v15 = vcombine.low %v767_v3, %v771_v4  ;;  %v14386_v16 = vcombine.high %v774_v9, %v778_v10  ;;  %v14388_v17 = vcombine.high %v775_v11, %v779_v13  ;;  %v826_v3 = vld [vmem:[#allocation2 + $0x1420] sm:$0xff]  ;;  %v823_v4 = vld [vmem:[#allocation2 + $0x1408] sm:$0xff] }
 0x1a3   :  { %9611 = vmatpush1.bf16.msra.mxu0 %v14329_v21  ;;  %10103 = vmatpush1.bf16.msra.mxu1 %v14331_v22  ;;  %v787_v21 = vld [vmem:[#allocation2 + $0x12e8] sm:$0xff]  ;;  %v14385_v22 = vcombine.low %v774_v9, %v778_v10  ;;  %v14434_v9 = vcombine.high %v822_v2, %v826_v3 }
 0x1a4   :  { %9612 = vmatprep.subr.bf16.mxu0 %v14338_v24  ;;  %10104 = vmatprep.subr.bf16.mxu1 %v14340_v26  ;;  %v14387_v24 = vcombine.low %v775_v11, %v779_v13  ;;  %v14394_v26 = vcombine.high %v782_v18, %v786_v19  ;;  %v14396_v27 = vcombine.high %v783_v20, %v787_v21  ;;  %v830_v11 = vld [vmem:[#allocation2 + $0x1440] sm:$0xff] }
 0x1a5   :  { %v834_v13 = vld [vmem:[#allocation2 + $0x1460] sm:$0xff] }
 0x1a7   :  { %9613 = vmatpush1.bf16.msra.mxu0 %v14337_v31  ;;  %10105 = vmatpush1.bf16.msra.mxu1 %v14339_v32  ;;  %v795_v31 = vld [vmem:[#allocation2 + $0x1328] sm:$0xff]  ;;  %v14393_v32 = vcombine.low %v782_v18, %v786_v19  ;;  %v14433_v18 = vcombine.low %v822_v2, %v826_v3 }
 0x1a8   :  { %9614 = vmatprep.subr.bf16.mxu0 %v14346_v33  ;;  %10106 = vmatprep.subr.bf16.mxu1 %v14348_v35  ;;  %v14395_v33 = vcombine.low %v783_v20, %v787_v21  ;;  %v14402_v35 = vcombine.high %v790_v28, %v794_v29  ;;  %v14404_v36 = vcombine.high %v791_v30, %v795_v31  ;;  %v875_v2 = vld [vmem:[#allocation2 + $0x15a8] sm:$0xff] }
 0x1a9   :  { %v14442_v20 = vcombine.high %v830_v11, %v834_v13 }
 0x1ab   :  { %9615 = vmatpush1.bf16.msra.mxu0 %v14345_v41  ;;  %10107 = vmatpush1.bf16.msra.mxu1 %v14347_v42  ;;  %v803_v41 = vld [vmem:[#allocation2 + $0x1368] sm:$0xff]  ;;  %v14401_v42 = vcombine.low %v790_v28, %v794_v29  ;;  %v14441_v29 = vcombine.low %v830_v11, %v834_v13 }
 0x1ac   :  { %9616 = vmatprep.subr.bf16.mxu0 %v14354_v43  ;;  %10108 = vmatprep.subr.bf16.mxu1 %v14356_v44  ;;  %v14403_v43 = vcombine.low %v791_v30, %v795_v31  ;;  %v14410_v44 = vcombine.high %v798_v37, %v802_v38  ;;  %v14412_v45 = vcombine.high %v799_v40, %v803_v41  ;;  %v843_v28 = vld [vmem:[#allocation2 + $0x14a8] sm:$0xff] }
 0x1af   :  { %9617 = vmatpush1.bf16.msra.mxu0 %v14353_v50  ;;  %10109 = vmatpush1.bf16.msra.mxu1 %v14355_v51  ;;  %v811_v50 = vld [vmem:[#allocation2 + $0x13a8] sm:$0xff]  ;;  %v14409_v51 = vcombine.low %v798_v37, %v802_v38 }
 0x1b0   :  { %9618 = vmatprep.subr.bf16.mxu0 %v14362_v52  ;;  %10110 = vmatprep.subr.bf16.mxu1 %v14364_v53  ;;  %v14411_v52 = vcombine.low %v799_v40, %v803_v41  ;;  %v14418_v53 = vcombine.high %v806_v46, %v810_v47  ;;  %v14420_v55 = vcombine.high %v807_v49, %v811_v50  ;;  %v851_v37 = vld [vmem:[#allocation2 + $0x14e8] sm:$0xff] }
 0x1b3   :  { %9619 = vmatpush1.bf16.msra.mxu0 %v14361_v60  ;;  %10111 = vmatpush1.bf16.msra.mxu1 %v14363_v61  ;;  %v819_v60 = vld [vmem:[#allocation2 + $0x13e8] sm:$0xff]  ;;  %v14417_v61 = vcombine.low %v806_v46, %v810_v47 }
 0x1b4   :  { %9620 = vmatprep.subr.bf16.mxu0 %v14370_v62  ;;  %10112 = vmatprep.subr.bf16.mxu1 %v14372_v63  ;;  %v14419_v62 = vcombine.low %v807_v49, %v811_v50  ;;  %v14426_v63 = vcombine.high %v814_v56, %v818_v58  ;;  %v14428_v0 = vcombine.high %v815_v59, %v819_v60  ;;  %v859_v46 = vld [vmem:[#allocation2 + $0x1528] sm:$0xff] }
 0x1b7   :  { %9621 = vmatpush1.bf16.msra.mxu0 %v14369_v5  ;;  %10113 = vmatpush1.bf16.msra.mxu1 %v14371_v6  ;;  %v827_v5 = vld [vmem:[#allocation2 + $0x1428] sm:$0xff]  ;;  %v14425_v6 = vcombine.low %v814_v56, %v818_v58 }
 0x1b8   :  { %9622 = vmatprep.subr.bf16.mxu0 %v14378_v7  ;;  %10114 = vmatprep.subr.bf16.mxu1 %v14380_v8  ;;  %v142_v7 = vld [vmem:[%s16981_s0 + $0x40] sm:$0xff]  ;;  %v14427_v8 = vcombine.low %v815_v59, %v819_v60  ;;  %v14436_v10 = vcombine.high %v823_v4, %v827_v5  ;;  %v14435_v19 = vcombine.low %v823_v4, %v827_v5  ;;  %v867_v56 = vld [vmem:[#allocation2 + $0x1568] sm:$0xff] }
 0x1bb   :  { %9623 = vmatpush1.bf16.msra.mxu0 %v14377_v14  ;;  %10115 = vmatpush1.bf16.msra.mxu1 %v14379_v15  ;;  %v16778_v14 = vpack.c.bf16 %v142_v7, %v142_v7  ;;  %v831_v15 = vld [vmem:[#allocation2 + $0x1448] sm:$0xff]  ;;  %v878_v7 = vld [vmem:[#allocation2 + $0x15c0] sm:$0xff] }
 0x1bc   :  { %9624 = vmatprep.subr.bf16.mxu0 %v14386_v16  ;;  %10116 = vmatprep.subr.bf16.mxu1 %v14388_v17  ;;  %v835_v16 = vld [vmem:[#allocation2 + $0x1468] sm:$0xff]  ;;  %v145_v17 = vld [vmem:[%s16981_s0 + $0x58] sm:$0xff] }
 0x1bd   :  { %v14444_v21 = vcombine.high %v831_v15, %v835_v16  ;;  %v14443_v30 = vcombine.low %v831_v15, %v835_v16 }
 0x1bf   :  { %9625 = vmatpush1.bf16.msra.mxu0 %v14385_v22  ;;  %10117 = vmatpush1.bf16.msra.mxu1 %v14387_v24  ;;  %v838_v22 = vld [vmem:[#allocation2 + $0x1480] sm:$0xff] }
 0x1c0   :  { %9626 = vmatprep.subr.bf16.mxu0 %v14394_v26  ;;  %10118 = vmatprep.subr.bf16.mxu1 %v14396_v27  ;;  %v842_v24 = vld [vmem:[#allocation2 + $0x14a0] sm:$0xff]  ;;  %v16783_v26 = vpack.c.bf16 %v145_v17, %v145_v17  ;;  %v839_v27 = vld [vmem:[#allocation2 + $0x1488] sm:$0xff] }
 0x1c1   :  { %v14450_v31 = vcombine.high %v838_v22, %v842_v24  ;;  %v14449_v38 = vcombine.low %v838_v22, %v842_v24  ;;  %v14451_v40 = vcombine.low %v839_v27, %v843_v28  ;;  %v886_v17 = vld [vmem:[#allocation2 + $0x1600] sm:$0xff] }
 0x1c3   :  { %9627 = vmatpush1.bf16.msra.mxu0 %v14393_v32  ;;  %10119 = vmatpush1.bf16.msra.mxu1 %v14395_v33  ;;  %v14452_v32 = vcombine.high %v839_v27, %v843_v28  ;;  %v846_v33 = vld [vmem:[#allocation2 + $0x14c0] sm:$0xff] }
 0x1c4   :  { %9628 = vmatprep.subr.bf16.mxu0 %v14402_v35  ;;  %10120 = vmatprep.subr.bf16.mxu1 %v14404_v36  ;;  %v850_v35 = vld [vmem:[#allocation2 + $0x14e0] sm:$0xff]  ;;  %v847_v36 = vld [vmem:[#allocation2 + $0x14c8] sm:$0xff] }
 0x1c5   :  { %v14458_v41 = vcombine.high %v846_v33, %v850_v35  ;;  %v14457_v47 = vcombine.low %v846_v33, %v850_v35  ;;  %v14459_v49 = vcombine.low %v847_v36, %v851_v37  ;;  %v894_v28 = vld [vmem:[#allocation2 + $0x1640] sm:$0xff] }
 0x1c7   :  { %9629 = vmatpush1.bf16.msra.mxu0 %v14401_v42  ;;  %10121 = vmatpush1.bf16.msra.mxu1 %v14403_v43  ;;  %v14460_v42 = vcombine.high %v847_v36, %v851_v37  ;;  %v854_v43 = vld [vmem:[#allocation2 + $0x1500] sm:$0xff] }
 0x1c8   :  { %9630 = vmatprep.subr.bf16.mxu0 %v14410_v44  ;;  %10122 = vmatprep.subr.bf16.mxu1 %v14412_v45  ;;  %v858_v44 = vld [vmem:[#allocation2 + $0x1520] sm:$0xff]  ;;  %v855_v45 = vld [vmem:[#allocation2 + $0x1508] sm:$0xff] }
 0x1c9   :  { %v14466_v50 = vcombine.high %v854_v43, %v858_v44  ;;  %v14465_v58 = vcombine.low %v854_v43, %v858_v44  ;;  %v14467_v59 = vcombine.low %v855_v45, %v859_v46  ;;  %v902_v37 = vld [vmem:[#allocation2 + $0x1680] sm:$0xff] }
 0x1cb   :  { %9631 = vmatpush1.bf16.msra.mxu0 %v14409_v51  ;;  %10123 = vmatpush1.bf16.msra.mxu1 %v14411_v52  ;;  %v14468_v51 = vcombine.high %v855_v45, %v859_v46  ;;  %v862_v52 = vld [vmem:[#allocation2 + $0x1540] sm:$0xff] }
 0x1cc   :  { %9632 = vmatprep.subr.bf16.mxu0 %v14418_v53  ;;  %10124 = vmatprep.subr.bf16.mxu1 %v14420_v55  ;;  %v866_v53 = vld [vmem:[#allocation2 + $0x1560] sm:$0xff]  ;;  %v863_v55 = vld [vmem:[#allocation2 + $0x1548] sm:$0xff] }
 0x1cd   :  { %v14474_v60 = vcombine.high %v862_v52, %v866_v53  ;;  %v14473_v3 = vcombine.low %v862_v52, %v866_v53  ;;  %v14475_v4 = vcombine.low %v863_v55, %v867_v56  ;;  %v910_v46 = vld [vmem:[#allocation2 + $0x16c0] sm:$0xff] }
 0x1cf   :  { %9633 = vmatpush1.bf16.msra.mxu0 %v14417_v61  ;;  %10125 = vmatpush1.bf16.msra.mxu1 %v14419_v62  ;;  %v14476_v61 = vcombine.high %v863_v55, %v867_v56  ;;  %v870_v62 = vld [vmem:[#allocation2 + $0x1580] sm:$0xff] }
 0x1d0   :  { %9634 = vmatprep.subr.bf16.mxu0 %v14426_v63  ;;  %10126 = vmatprep.subr.bf16.mxu1 %v14428_v0  ;;  %v874_v63 = vld [vmem:[#allocation2 + $0x15a0] sm:$0xff]  ;;  %v871_v0 = vld [vmem:[#allocation2 + $0x1588] sm:$0xff] }
 0x1d1   :  { %v14482_v5 = vcombine.high %v870_v62, %v874_v63  ;;  %v14481_v11 = vcombine.low %v870_v62, %v874_v63  ;;  %v14483_v13 = vcombine.low %v871_v0, %v875_v2  ;;  %v918_v56 = vld [vmem:[#allocation2 + $0x1700] sm:$0xff] }
 0x1d3   :  { %9635 = vmatpush1.bf16.msra.mxu0 %v14425_v6  ;;  %10127 = vmatpush1.bf16.msra.mxu1 %v14427_v8  ;;  %v14484_v6 = vcombine.high %v871_v0, %v875_v2  ;;  %v882_v8 = vld [vmem:[#allocation2 + $0x15e0] sm:$0xff] }
 0x1d4   :  { %9645 = vmatprep.subr.bf16.mxu0 %v14434_v9  ;;  %10137 = vmatprep.subr.bf16.mxu1 %v14436_v10  ;;  %v879_v9 = vld [vmem:[#allocation2 + $0x15c8] sm:$0xff]  ;;  %v14490_v15 = vcombine.high %v878_v7, %v882_v8  ;;  %v926_v2 = vld [vmem:[#allocation2 + $0x1740] sm:$0xff] }
 0x1d5   :  { %v883_v10 = vld [vmem:[#allocation2 + $0x15e8] sm:$0xff] }
 0x1d6   :  { %9637 = vmatmul.mubr.bf16.vlgmr.msra.gmra.mrb[0].mxu0 %v16778_v14  ;;  %10129 = vmatmul.mubr.bf16.vlgmr.msra.gmra.mrb[0].mxu1 %v16778_v14  ;;  %v14492_v16 = vcombine.high %v879_v9, %v883_v10  ;;  %v14491_v22 = vcombine.low %v879_v9, %v883_v10  ;;  %v934_v10 = vld [vmem:[#allocation2 + $0x1780] sm:$0xff] }
 0x1d7   :  { %9646 = vmatpush1.bf16.msra.mxu0 %v14433_v18  ;;  %10138 = vmatpush1.bf16.msra.mxu1 %v14435_v19  ;;  %v890_v18 = vld [vmem:[#allocation2 + $0x1620] sm:$0xff]  ;;  %v887_v19 = vld [vmem:[#allocation2 + $0x1608] sm:$0xff] }
 0x1d8   :  { %9647 = vmatprep.subr.bf16.mxu0 %v14442_v20  ;;  %10139 = vmatprep.subr.bf16.mxu1 %v14444_v21  ;;  %v891_v20 = vld [vmem:[#allocation2 + $0x1628] sm:$0xff]  ;;  %v14489_v21 = vcombine.low %v878_v7, %v882_v8  ;;  %v14498_v24 = vcombine.high %v886_v17, %v890_v18 }
 0x1d9   :  { %9677 = vmatprep.mubr.bf16.mxu0 %v16783_v26  ;;  %10169 = vmatprep.mubr.bf16.mxu1 %v16783_v26  ;;  %v14500_v27 = vcombine.high %v887_v19, %v891_v20  ;;  %v14499_v33 = vcombine.low %v887_v19, %v891_v20  ;;  %v942_v20 = vld [vmem:[#allocation2 + $0x17c0] sm:$0xff] }
 0x1db   :  { %9648 = vmatpush1.bf16.msra.mxu0 %v14441_v29  ;;  %10140 = vmatpush1.bf16.msra.mxu1 %v14443_v30  ;;  %v898_v29 = vld [vmem:[#allocation2 + $0x1660] sm:$0xff]  ;;  %v895_v30 = vld [vmem:[#allocation2 + $0x1648] sm:$0xff] }
 0x1dc   :  { %9649 = vmatprep.subr.bf16.mxu0 %v14450_v31  ;;  %10141 = vmatprep.subr.bf16.mxu1 %v14452_v32  ;;  %v899_v31 = vld [vmem:[#allocation2 + $0x1668] sm:$0xff]  ;;  %v14497_v32 = vcombine.low %v886_v17, %v890_v18  ;;  %v14506_v35 = vcombine.high %v894_v28, %v898_v29 }
 0x1dd   :  { %v14508_v36 = vcombine.high %v895_v30, %v899_v31  ;;  %v14507_v43 = vcombine.low %v895_v30, %v899_v31  ;;  %v950_v31 = vld [vmem:[#allocation2 + $0x1800] sm:$0xff] }
 0x1df   :  { %9650 = vmatpush1.bf16.msra.mxu0 %v14449_v38  ;;  %10142 = vmatpush1.bf16.msra.mxu1 %v14451_v40  ;;  %v906_v38 = vld [vmem:[#allocation2 + $0x16a0] sm:$0xff]  ;;  %v903_v40 = vld [vmem:[#allocation2 + $0x1688] sm:$0xff] }
 0x1e0   :  { %9651 = vmatprep.subr.bf16.mxu0 %v14458_v41  ;;  %10143 = vmatprep.subr.bf16.mxu1 %v14460_v42  ;;  %v907_v41 = vld [vmem:[#allocation2 + $0x16a8] sm:$0xff]  ;;  %v14505_v42 = vcombine.low %v894_v28, %v898_v29  ;;  %v14514_v44 = vcombine.high %v902_v37, %v906_v38 }
 0x1e1   :  { %v14516_v45 = vcombine.high %v903_v40, %v907_v41  ;;  %v14515_v52 = vcombine.low %v903_v40, %v907_v41 }
 0x1e3   :  { %9652 = vmatpush1.bf16.msra.mxu0 %v14457_v47  ;;  %10144 = vmatpush1.bf16.msra.mxu1 %v14459_v49  ;;  %v914_v47 = vld [vmem:[#allocation2 + $0x16e0] sm:$0xff]  ;;  %v911_v49 = vld [vmem:[#allocation2 + $0x16c8] sm:$0xff] }
 0x1e4   :  { %9653 = vmatprep.subr.bf16.mxu0 %v14466_v50  ;;  %10145 = vmatprep.subr.bf16.mxu1 %v14468_v51  ;;  %v915_v50 = vld [vmem:[#allocation2 + $0x16e8] sm:$0xff]  ;;  %v14513_v51 = vcombine.low %v902_v37, %v906_v38  ;;  %v14522_v53 = vcombine.high %v910_v46, %v914_v47  ;;  %v144_v37 = vld [vmem:[%s16981_s0 + $0x50] sm:$0xff] }
 0x1e5   :  { %v14524_v55 = vcombine.high %v911_v49, %v915_v50  ;;  %v14523_v62 = vcombine.low %v911_v49, %v915_v50 }
 0x1e7   :  { %9654 = vmatpush1.bf16.msra.mxu0 %v14465_v58  ;;  %10146 = vmatpush1.bf16.msra.mxu1 %v14467_v59  ;;  %v922_v58 = vld [vmem:[#allocation2 + $0x1720] sm:$0xff]  ;;  %v919_v59 = vld [vmem:[#allocation2 + $0x1708] sm:$0xff] }
 0x1e8   :  { %9655 = vmatprep.subr.bf16.mxu0 %v14474_v60  ;;  %10147 = vmatprep.subr.bf16.mxu1 %v14476_v61  ;;  %v923_v60 = vld [vmem:[#allocation2 + $0x1728] sm:$0xff]  ;;  %v14521_v61 = vcombine.low %v910_v46, %v914_v47  ;;  %v14530_v63 = vcombine.high %v918_v56, %v922_v58 }
 0x1e9   :  { %v14532_v0 = vcombine.high %v919_v59, %v923_v60  ;;  %v14531_v7 = vcombine.low %v919_v59, %v923_v60  ;;  %v963_v46 = vld [vmem:[#allocation2 + $0x1868] sm:$0xff] }
 0x1ea   :  { %v147_v47 = vld [vmem:[%s16981_s0 + $0x68] sm:$0xff] }
 0x1eb   :  { %9656 = vmatpush1.bf16.msra.mxu0 %v14473_v3  ;;  %10148 = vmatpush1.bf16.msra.mxu1 %v14475_v4  ;;  %v930_v3 = vld [vmem:[#allocation2 + $0x1760] sm:$0xff]  ;;  %v927_v4 = vld [vmem:[#allocation2 + $0x1748] sm:$0xff] }
 0x1ec   :  { %9657 = vmatprep.subr.bf16.mxu0 %v14482_v5  ;;  %10149 = vmatprep.subr.bf16.mxu1 %v14484_v6  ;;  %v931_v5 = vld [vmem:[#allocation2 + $0x1768] sm:$0xff]  ;;  %v14529_v6 = vcombine.low %v918_v56, %v922_v58  ;;  %v14538_v8 = vcombine.high %v926_v2, %v930_v3  ;;  %v16797_v56 = vpack.c.bf16 %v147_v47, %v147_v47 }
 0x1ed   :  { %v14540_v9 = vcombine.high %v927_v4, %v931_v5  ;;  %v14539_v17 = vcombine.low %v927_v4, %v931_v5  ;;  %v967_v58 = vld [vmem:[#allocation2 + $0x1888] sm:$0xff] }
 0x1ee   :  { %v971_v59 = vld [vmem:[#allocation2 + $0x18a8] sm:$0xff] }
 0x1ef   :  { %9658 = vmatpush1.bf16.msra.mxu0 %v14481_v11  ;;  %10150 = vmatpush1.bf16.msra.mxu1 %v14483_v13  ;;  %v938_v11 = vld [vmem:[#allocation2 + $0x17a0] sm:$0xff]  ;;  %v935_v13 = vld [vmem:[#allocation2 + $0x1788] sm:$0xff] }
 0x1f0   :  { %9659 = vmatprep.subr.bf16.mxu0 %v14490_v15  ;;  %10151 = vmatprep.subr.bf16.mxu1 %v14492_v16  ;;  %v939_v15 = vld [vmem:[#allocation2 + $0x17a8] sm:$0xff]  ;;  %v14537_v16 = vcombine.low %v926_v2, %v930_v3  ;;  %v14546_v18 = vcombine.high %v934_v10, %v938_v11  ;;  %v978_v2 = vld [vmem:[#allocation2 + $0x18e0] sm:$0xff] }
 0x1f1   :  { %v14548_v19 = vcombine.high %v935_v13, %v939_v15  ;;  %v14547_v28 = vcombine.low %v935_v13, %v939_v15  ;;  %v975_v3 = vld [vmem:[#allocation2 + $0x18c8] sm:$0xff] }
 0x1f2   :  { %v979_v4 = vld [vmem:[#allocation2 + $0x18e8] sm:$0xff] }
 0x1f3   :  { %9660 = vmatpush1.bf16.msra.mxu0 %v14489_v21  ;;  %10152 = vmatpush1.bf16.msra.mxu1 %v14491_v22  ;;  %v946_v21 = vld [vmem:[#allocation2 + $0x17e0] sm:$0xff]  ;;  %v943_v22 = vld [vmem:[#allocation2 + $0x17c8] sm:$0xff] }
 0x1f4   :  { %9661 = vmatprep.subr.bf16.mxu0 %v14498_v24  ;;  %10153 = vmatprep.subr.bf16.mxu1 %v14500_v27  ;;  %v947_v24 = vld [vmem:[#allocation2 + $0x17e8] sm:$0xff]  ;;  %v14545_v27 = vcombine.low %v934_v10, %v938_v11  ;;  %v14554_v29 = vcombine.high %v942_v20, %v946_v21  ;;  %v986_v10 = vld [vmem:[#allocation2 + $0x1920] sm:$0xff] }
 0x1f5   :  { %v14556_v30 = vcombine.high %v943_v22, %v947_v24  ;;  %v14555_v38 = vcombine.low %v943_v22, %v947_v24  ;;  %v983_v11 = vld [vmem:[#allocation2 + $0x1908] sm:$0xff] }
 0x1f6   :  { %v987_v13 = vld [vmem:[#allocation2 + $0x1928] sm:$0xff] }
 0x1f7   :  { %9662 = vmatpush1.bf16.msra.mxu0 %v14497_v32  ;;  %10154 = vmatpush1.bf16.msra.mxu1 %v14499_v33  ;;  %v954_v32 = vld [vmem:[#allocation2 + $0x1820] sm:$0xff]  ;;  %v951_v33 = vld [vmem:[#allocation2 + $0x1808] sm:$0xff] }
 0x1f8   :  { %9663 = vmatprep.subr.bf16.mxu0 %v14506_v35  ;;  %10155 = vmatprep.subr.bf16.mxu1 %v14508_v36  ;;  %v955_v35 = vld [vmem:[#allocation2 + $0x1828] sm:$0xff]  ;;  %v14553_v36 = vcombine.low %v942_v20, %v946_v21  ;;  %v14562_v40 = vcombine.high %v950_v31, %v954_v32  ;;  %v14561_v49 = vcombine.low %v950_v31, %v954_v32  ;;  %v994_v20 = vld [vmem:[#allocation2 + $0x1960] sm:$0xff] }
 0x1f9   :  { %v14564_v41 = vcombine.high %v951_v33, %v955_v35  ;;  %v14563_v50 = vcombine.low %v951_v33, %v955_v35  ;;  %v991_v21 = vld [vmem:[#allocation2 + $0x1948] sm:$0xff]  ;;  %v1002_v31 = vld [vmem:[#allocation2 + $0x19a0] sm:$0xff] }
 0x1fa   :  { %v995_v22 = vld [vmem:[#allocation2 + $0x1968] sm:$0xff] }
 0x1fb   :  { %9664 = vmatpush1.bf16.msra.mxu0 %v14505_v42  ;;  %10156 = vmatpush1.bf16.msra.mxu1 %v14507_v43  ;;  %v958_v42 = vld [vmem:[#allocation2 + $0x1840] sm:$0xff]  ;;  %v999_v32 = vld [vmem:[#allocation2 + $0x1988] sm:$0xff] }
 0x1fc   :  { %9665 = vmatprep.subr.bf16.mxu0 %v14514_v44  ;;  %10157 = vmatprep.subr.bf16.mxu1 %v14516_v45  ;;  %v962_v43 = vld [vmem:[#allocation2 + $0x1860] sm:$0xff]  ;;  %v16792_v44 = vpack.c.bf16 %v144_v37, %v144_v37  ;;  %v959_v45 = vld [vmem:[#allocation2 + $0x1848] sm:$0xff] }
 0x1fd   :  { %v14569_v60 = vcombine.low %v958_v42, %v962_v43  ;;  %v1003_v33 = vld [vmem:[#allocation2 + $0x19a8] sm:$0xff] }
 0x1ff   :  { %9666 = vmatpush1.bf16.msra.mxu0 %v14513_v51  ;;  %10158 = vmatpush1.bf16.msra.mxu1 %v14515_v52  ;;  %v14570_v51 = vcombine.high %v958_v42, %v962_v43  ;;  %v14572_v52 = vcombine.high %v959_v45, %v963_v46  ;;  %v1007_v42 = vld [vmem:[#allocation2 + $0x19c8] sm:$0xff] }
 0x200   :  { %9667 = vmatprep.subr.bf16.mxu0 %v14522_v53  ;;  %10159 = vmatprep.subr.bf16.mxu1 %v14524_v55  ;;  %v966_v53 = vld [vmem:[#allocation2 + $0x1880] sm:$0xff]  ;;  %v1011_v43 = vld [vmem:[#allocation2 + $0x19e8] sm:$0xff] }
 0x201   :  { %v970_v55 = vld [vmem:[#allocation2 + $0x18a0] sm:$0xff] }
 0x202   :  { %v14577_v5 = vcombine.low %v966_v53, %v970_v55 }
 0x203   :  { %9668 = vmatpush1.bf16.msra.mxu0 %v14521_v61  ;;  %10160 = vmatpush1.bf16.msra.mxu1 %v14523_v62  ;;  %v14571_v61 = vcombine.low %v959_v45, %v963_v46  ;;  %v14578_v62 = vcombine.high %v966_v53, %v970_v55  ;;  %v14611_v46 = vcombine.low %v999_v32, %v1003_v33  ;;  %v1019_v53 = vld [vmem:[#allocation2 + $0x1a28] sm:$0xff] }
 0x204   :  { %9669 = vmatprep.subr.bf16.mxu0 %v14530_v63  ;;  %10161 = vmatprep.subr.bf16.mxu1 %v14532_v0  ;;  %v14580_v63 = vcombine.high %v967_v58, %v971_v59  ;;  %v974_v0 = vld [vmem:[#allocation2 + $0x18c0] sm:$0xff] }
 0x205   :  { %v14585_v15 = vcombine.low %v974_v0, %v978_v2 }
 0x207   :  { %9670 = vmatpush1.bf16.msra.mxu0 %v14529_v6  ;;  %10162 = vmatpush1.bf16.msra.mxu1 %v14531_v7  ;;  %v14579_v6 = vcombine.low %v967_v58, %v971_v59  ;;  %v14586_v7 = vcombine.high %v974_v0, %v978_v2  ;;  %v14619_v58 = vcombine.low %v1007_v42, %v1011_v43  ;;  %v1027_v0 = vld [vmem:[#allocation2 + $0x1a68] sm:$0xff] }
 0x208   :  { %9671 = vmatprep.subr.bf16.mxu0 %v14538_v8  ;;  %10163 = vmatprep.subr.bf16.mxu1 %v14540_v9  ;;  %v14588_v8 = vcombine.high %v975_v3, %v979_v4  ;;  %v982_v9 = vld [vmem:[#allocation2 + $0x1900] sm:$0xff] }
 0x209   :  { %v14593_v24 = vcombine.low %v982_v9, %v986_v10 }
 0x20b   :  { %9672 = vmatpush1.bf16.msra.mxu0 %v14537_v16  ;;  %10164 = vmatpush1.bf16.msra.mxu1 %v14539_v17  ;;  %v14587_v16 = vcombine.low %v975_v3, %v979_v4  ;;  %v14594_v17 = vcombine.high %v982_v9, %v986_v10  ;;  %v1035_v9 = vld [vmem:[#allocation2 + $0x1aa8] sm:$0xff] }
 0x20c   :  { %9673 = vmatprep.subr.bf16.mxu0 %v14546_v18  ;;  %10165 = vmatprep.subr.bf16.mxu1 %v14548_v19  ;;  %v14596_v18 = vcombine.high %v983_v11, %v987_v13  ;;  %v990_v19 = vld [vmem:[#allocation2 + $0x1940] sm:$0xff] }
 0x20d   :  { %v14601_v35 = vcombine.low %v990_v19, %v994_v20 }
 0x20f   :  { %9674 = vmatpush1.bf16.msra.mxu0 %v14545_v27  ;;  %10166 = vmatpush1.bf16.msra.mxu1 %v14547_v28  ;;  %v14595_v27 = vcombine.low %v983_v11, %v987_v13  ;;  %v14602_v28 = vcombine.high %v990_v19, %v994_v20  ;;  %v1043_v19 = vld [vmem:[#allocation2 + $0x1ae8] sm:$0xff] }
 0x210   :  { %9675 = vmatprep.subr.bf16.mxu0 %v14554_v29  ;;  %10167 = vmatprep.subr.bf16.mxu1 %v14556_v30  ;;  %v14604_v29 = vcombine.high %v991_v21, %v995_v22  ;;  %v998_v30 = vld [vmem:[#allocation2 + $0x1980] sm:$0xff] }
 0x211   :  { %v14610_v37 = vcombine.high %v998_v30, %v1002_v31  ;;  %v14609_v45 = vcombine.low %v998_v30, %v1002_v31  ;;  %v1051_v30 = vld [vmem:[#allocation2 + $0x1b28] sm:$0xff] }
 0x213   :  { %9676 = vmatpush1.bf16.msra.mxu0 %v14553_v36  ;;  %10168 = vmatpush1.bf16.msra.mxu1 %v14555_v38  ;;  %v14603_v36 = vcombine.low %v991_v21, %v995_v22  ;;  %v14612_v38 = vcombine.high %v999_v32, %v1003_v33 }
 0x214   :  { %9686 = vmatprep.subr.bf16.mxu0 %v14562_v40  ;;  %10178 = vmatprep.subr.bf16.mxu1 %v14564_v41  ;;  %v1006_v40 = vld [vmem:[#allocation2 + $0x19c0] sm:$0xff] }
 0x215   :  { %v1010_v41 = vld [vmem:[#allocation2 + $0x19e0] sm:$0xff] }
 0x216   :  { %9678 = vmatmul.mubr.bf16.vlgmr.msra.gmra.mrb[0].mxu0 %v16792_v44  ;;  %10170 = vmatmul.mubr.bf16.vlgmr.msra.gmra.mrb[0].mxu1 %v16792_v44  ;;  %v14618_v47 = vcombine.high %v1006_v40, %v1010_v41  ;;  %v14617_v55 = vcombine.low %v1006_v40, %v1010_v41  ;;  %v1059_v40 = vld [vmem:[#allocation2 + $0x1b68] sm:$0xff] }
 0x217   :  { %9687 = vmatpush1.bf16.msra.mxu0 %v14561_v49  ;;  %10179 = vmatpush1.bf16.msra.mxu1 %v14563_v50  ;;  %v14620_v49 = vcombine.high %v1007_v42, %v1011_v43  ;;  %v1014_v50 = vld [vmem:[#allocation2 + $0x1a00] sm:$0xff] }
 0x218   :  { %9688 = vmatprep.subr.bf16.mxu0 %v14570_v51  ;;  %10180 = vmatprep.subr.bf16.mxu1 %v14572_v52  ;;  %v1018_v51 = vld [vmem:[#allocation2 + $0x1a20] sm:$0xff]  ;;  %v1015_v52 = vld [vmem:[#allocation2 + $0x1a08] sm:$0xff] }
 0x219   :  { %9718 = vmatprep.mubr.bf16.mxu0 %v16797_v56  ;;  %10210 = vmatprep.mubr.bf16.mxu1 %v16797_v56  ;;  %v14626_v59 = vcombine.high %v1014_v50, %v1018_v51  ;;  %v14625_v2 = vcombine.low %v1014_v50, %v1018_v51  ;;  %v14627_v3 = vcombine.low %v1015_v52, %v1019_v53  ;;  %v1067_v50 = vld [vmem:[#allocation2 + $0x1ba8] sm:$0xff] }
 0x21b   :  { %9689 = vmatpush1.bf16.msra.mxu0 %v14569_v60  ;;  %10181 = vmatpush1.bf16.msra.mxu1 %v14571_v61  ;;  %v14628_v60 = vcombine.high %v1015_v52, %v1019_v53  ;;  %v1022_v61 = vld [vmem:[#allocation2 + $0x1a40] sm:$0xff] }
 0x21c   :  { %9690 = vmatprep.subr.bf16.mxu0 %v14578_v62  ;;  %10182 = vmatprep.subr.bf16.mxu1 %v14580_v63  ;;  %v1026_v62 = vld [vmem:[#allocation2 + $0x1a60] sm:$0xff]  ;;  %v1023_v63 = vld [vmem:[#allocation2 + $0x1a48] sm:$0xff] }
 0x21d   :  { %v14634_v4 = vcombine.high %v1022_v61, %v1026_v62  ;;  %v14633_v10 = vcombine.low %v1022_v61, %v1026_v62  ;;  %v14635_v11 = vcombine.low %v1023_v63, %v1027_v0  ;;  %v1075_v61 = vld [vmem:[#allocation2 + $0x1be8] sm:$0xff] }
 0x21f   :  { %9691 = vmatpush1.bf16.msra.mxu0 %v14577_v5  ;;  %10183 = vmatpush1.bf16.msra.mxu1 %v14579_v6  ;;  %v14636_v5 = vcombine.high %v1023_v63, %v1027_v0  ;;  %v1030_v6 = vld [vmem:[#allocation2 + $0x1a80] sm:$0xff] }
 0x220   :  { %9692 = vmatprep.subr.bf16.mxu0 %v14586_v7  ;;  %10184 = vmatprep.subr.bf16.mxu1 %v14588_v8  ;;  %v1034_v7 = vld [vmem:[#allocation2 + $0x1aa0] sm:$0xff]  ;;  %v1031_v8 = vld [vmem:[#allocation2 + $0x1a88] sm:$0xff] }
 0x221   :  { %v14642_v13 = vcombine.high %v1030_v6, %v1034_v7  ;;  %v14641_v20 = vcombine.low %v1030_v6, %v1034_v7  ;;  %v14643_v21 = vcombine.low %v1031_v8, %v1035_v9  ;;  %v1083_v6 = vld [vmem:[#allocation2 + $0x1c28] sm:$0xff] }
 0x223   :  { %9693 = vmatpush1.bf16.msra.mxu0 %v14585_v15  ;;  %10185 = vmatpush1.bf16.msra.mxu1 %v14587_v16  ;;  %v14644_v15 = vcombine.high %v1031_v8, %v1035_v9  ;;  %v1038_v16 = vld [vmem:[#allocation2 + $0x1ac0] sm:$0xff] }
 0x224   :  { %9694 = vmatprep.subr.bf16.mxu0 %v14594_v17  ;;  %10186 = vmatprep.subr.bf16.mxu1 %v14596_v18  ;;  %v1042_v17 = vld [vmem:[#allocation2 + $0x1ae0] sm:$0xff]  ;;  %v1039_v18 = vld [vmem:[#allocation2 + $0x1ac8] sm:$0xff] }
 0x225   :  { %v14650_v22 = vcombine.high %v1038_v16, %v1042_v17  ;;  %v14649_v31 = vcombine.low %v1038_v16, %v1042_v17  ;;  %v14651_v32 = vcombine.low %v1039_v18, %v1043_v19  ;;  %v146_v8 = vld [vmem:[%s16981_s0 + $0x60] sm:$0xff]  ;;  %v1087_v17 = vld [vmem:[#allocation2 + $0x1c48] sm:$0xff] }
 0x226   :  { %v16806_v16 = vpack.c.bf16 %v146_v8, %v146_v8 }
 0x227   :  { %9695 = vmatpush1.bf16.msra.mxu0 %v14593_v24  ;;  %10187 = vmatpush1.bf16.msra.mxu1 %v14595_v27  ;;  %v14652_v24 = vcombine.high %v1039_v18, %v1043_v19  ;;  %v1046_v27 = vld [vmem:[#allocation2 + $0x1b00] sm:$0xff]  ;;  %v1091_v18 = vld [vmem:[#allocation2 + $0x1c68] sm:$0xff]  ;;  %v149_v19 = vld [vmem:[%s16981_s0 + $0x78] sm:$0xff] }
 0x228   :  { %9696 = vmatprep.subr.bf16.mxu0 %v14602_v28  ;;  %10188 = vmatprep.subr.bf16.mxu1 %v14604_v29  ;;  %v1050_v28 = vld [vmem:[#allocation2 + $0x1b20] sm:$0xff]  ;;  %v1047_v29 = vld [vmem:[#allocation2 + $0x1b08] sm:$0xff] }
 0x229   :  { %v14658_v33 = vcombine.high %v1046_v27, %v1050_v28  ;;  %v14657_v41 = vcombine.low %v1046_v27, %v1050_v28  ;;  %v14659_v42 = vcombine.low %v1047_v29, %v1051_v30  ;;  %v1094_v27 = vld [vmem:[#allocation2 + $0x1c80] sm:$0xff] }
 0x22a   :  { %v1098_v28 = vld [vmem:[#allocation2 + $0x1ca0] sm:$0xff] }
 0x22b   :  { %9697 = vmatpush1.bf16.msra.mxu0 %v14601_v35  ;;  %10189 = vmatpush1.bf16.msra.mxu1 %v14603_v36  ;;  %v14660_v35 = vcombine.high %v1047_v29, %v1051_v30  ;;  %v1054_v36 = vld [vmem:[#allocation2 + $0x1b40] sm:$0xff]  ;;  %v16811_v29 = vpack.c.bf16 %v149_v19, %v149_v19  ;;  %v1095_v30 = vld [vmem:[#allocation2 + $0x1c88] sm:$0xff] }
 0x22c   :  { %9698 = vmatprep.subr.bf16.mxu0 %v14610_v37  ;;  %10190 = vmatprep.subr.bf16.mxu1 %v14612_v38  ;;  %v1058_v37 = vld [vmem:[#allocation2 + $0x1b60] sm:$0xff]  ;;  %v1055_v38 = vld [vmem:[#allocation2 + $0x1b48] sm:$0xff] }
 0x22d   :  { %v14666_v43 = vcombine.high %v1054_v36, %v1058_v37  ;;  %v14665_v51 = vcombine.low %v1054_v36, %v1058_v37  ;;  %v14667_v52 = vcombine.low %v1055_v38, %v1059_v40  ;;  %v1102_v37 = vld [vmem:[#allocation2 + $0x1cc0] sm:$0xff] }
 0x22f   :  { %9699 = vmatpush1.bf16.msra.mxu0 %v14609_v45  ;;  %10191 = vmatpush1.bf16.msra.mxu1 %v14611_v46  ;;  %v14668_v45 = vcombine.high %v1055_v38, %v1059_v40  ;;  %v1062_v46 = vld [vmem:[#allocation2 + $0x1b80] sm:$0xff]  ;;  %v1103_v40 = vld [vmem:[#allocation2 + $0x1cc8] sm:$0xff] }
 0x230   :  { %9700 = vmatprep.subr.bf16.mxu0 %v14618_v47  ;;  %10192 = vmatprep.subr.bf16.mxu1 %v14620_v49  ;;  %v1066_v47 = vld [vmem:[#allocation2 + $0x1ba0] sm:$0xff]  ;;  %v1063_v49 = vld [vmem:[#allocation2 + $0x1b88] sm:$0xff] }
 0x231   :  { %v14674_v53 = vcombine.high %v1062_v46, %v1066_v47  ;;  %v14673_v62 = vcombine.low %v1062_v46, %v1066_v47  ;;  %v14675_v63 = vcombine.low %v1063_v49, %v1067_v50  ;;  %v1106_v38 = vld [vmem:[#allocation2 + $0x1ce0] sm:$0xff] }
 0x232   :  { %v1110_v47 = vld [vmem:[#allocation2 + $0x1d00] sm:$0xff] }
 0x233   :  { %9701 = vmatpush1.bf16.msra.mxu0 %v14617_v55  ;;  %10193 = vmatpush1.bf16.msra.mxu1 %v14619_v58  ;;  %v14676_v55 = vcombine.high %v1063_v49, %v1067_v50  ;;  %v1070_v58 = vld [vmem:[#allocation2 + $0x1bc0] sm:$0xff]  ;;  %v1111_v50 = vld [vmem:[#allocation2 + $0x1d08] sm:$0xff] }
 0x234   :  { %9702 = vmatprep.subr.bf16.mxu0 %v14626_v59  ;;  %10194 = vmatprep.subr.bf16.mxu1 %v14628_v60  ;;  %v1074_v59 = vld [vmem:[#allocation2 + $0x1be0] sm:$0xff]  ;;  %v1071_v60 = vld [vmem:[#allocation2 + $0x1bc8] sm:$0xff] }
 0x235   :  { %v14682_v0 = vcombine.high %v1070_v58, %v1074_v59  ;;  %v14681_v7 = vcombine.low %v1070_v58, %v1074_v59  ;;  %v14683_v9 = vcombine.low %v1071_v60, %v1075_v61  ;;  %v1114_v49 = vld [vmem:[#allocation2 + $0x1d20] sm:$0xff] }
 0x236   :  { %v1118_v59 = vld [vmem:[#allocation2 + $0x1d40] sm:$0xff] }
 0x237   :  { %9703 = vmatpush1.bf16.msra.mxu0 %v14625_v2  ;;  %10195 = vmatpush1.bf16.msra.mxu1 %v14627_v3  ;;  %v14684_v2 = vcombine.high %v1071_v60, %v1075_v61  ;;  %v1078_v3 = vld [vmem:[#allocation2 + $0x1c00] sm:$0xff]  ;;  %v1119_v61 = vld [vmem:[#allocation2 + $0x1d48] sm:$0xff] }
 0x238   :  { %9704 = vmatprep.subr.bf16.mxu0 %v14634_v4  ;;  %10196 = vmatprep.subr.bf16.mxu1 %v14636_v5  ;;  %v1082_v4 = vld [vmem:[#allocation2 + $0x1c20] sm:$0xff]  ;;  %v1079_v5 = vld [vmem:[#allocation2 + $0x1c08] sm:$0xff] }
 0x239   :  { %v1122_v60 = vld [vmem:[#allocation2 + $0x1d60] sm:$0xff] }
 0x23a   :  { %v14729_v8 = vcombine.low %v1118_v59, %v1122_v60 }
 0x23b   :  { %9705 = vmatpush1.bf16.msra.mxu0 %v14633_v10  ;;  %10197 = vmatpush1.bf16.msra.mxu1 %v14635_v11  ;;  %v14690_v10 = vcombine.high %v1078_v3, %v1082_v4  ;;  %v14692_v11 = vcombine.high %v1079_v5, %v1083_v6 }
 0x23c   :  { %9706 = vmatprep.subr.bf16.mxu0 %v14642_v13  ;;  %10198 = vmatprep.subr.bf16.mxu1 %v14644_v15  ;;  %v1086_v13 = vld [vmem:[#allocation2 + $0x1c40] sm:$0xff] }
 0x23d   :  { %v1090_v15 = vld [vmem:[#allocation2 + $0x1c60] sm:$0xff] }
 0x23f   :  { %9707 = vmatpush1.bf16.msra.mxu0 %v14641_v20  ;;  %10199 = vmatpush1.bf16.msra.mxu1 %v14643_v21  ;;  %v14689_v20 = vcombine.low %v1078_v3, %v1082_v4  ;;  %v14691_v21 = vcombine.low %v1079_v5, %v1083_v6  ;;  %v1126_v4 = vld [vmem:[#allocation2 + $0x1d80] sm:$0xff]  ;;  %v1127_v6 = vld [vmem:[#allocation2 + $0x1d88] sm:$0xff] }
 0x240   :  { %9708 = vmatprep.subr.bf16.mxu0 %v14650_v22  ;;  %10200 = vmatprep.subr.bf16.mxu1 %v14652_v24  ;;  %v14698_v22 = vcombine.high %v1086_v13, %v1090_v15  ;;  %v14700_v24 = vcombine.high %v1087_v17, %v1091_v18  ;;  %v1130_v5 = vld [vmem:[#allocation2 + $0x1da0] sm:$0xff] }
 0x241   :  { %v14737_v19 = vcombine.low %v1126_v4, %v1130_v5 }
 0x243   :  { %9709 = vmatpush1.bf16.msra.mxu0 %v14649_v31  ;;  %10201 = vmatpush1.bf16.msra.mxu1 %v14651_v32  ;;  %v1099_v31 = vld [vmem:[#allocation2 + $0x1ca8] sm:$0xff]  ;;  %v14697_v32 = vcombine.low %v1086_v13, %v1090_v15  ;;  %v1134_v13 = vld [vmem:[#allocation2 + $0x1dc0] sm:$0xff] }
 0x244   :  { %9710 = vmatprep.subr.bf16.mxu0 %v14658_v33  ;;  %10202 = vmatprep.subr.bf16.mxu1 %v14660_v35  ;;  %v14699_v33 = vcombine.low %v1087_v17, %v1091_v18  ;;  %v14706_v35 = vcombine.high %v1094_v27, %v1098_v28  ;;  %v14708_v36 = vcombine.high %v1095_v30, %v1099_v31  ;;  %v1138_v15 = vld [vmem:[#allocation2 + $0x1de0] sm:$0xff]  ;;  %v1135_v17 = vld [vmem:[#allocation2 + $0x1dc8] sm:$0xff] }
 0x245   :  { %v1139_v18 = vld [vmem:[#allocation2 + $0x1de8] sm:$0xff] }
 0x247   :  { %9711 = vmatpush1.bf16.msra.mxu0 %v14657_v41  ;;  %10203 = vmatpush1.bf16.msra.mxu1 %v14659_v42  ;;  %v1107_v41 = vld [vmem:[#allocation2 + $0x1ce8] sm:$0xff]  ;;  %v14705_v42 = vcombine.low %v1094_v27, %v1098_v28  ;;  %v1146_v27 = vld [vmem:[#allocation2 + $0x1e20] sm:$0xff] }
 0x248   :  { %9712 = vmatprep.subr.bf16.mxu0 %v14666_v43  ;;  %10204 = vmatprep.subr.bf16.mxu1 %v14668_v45  ;;  %v14707_v43 = vcombine.low %v1095_v30, %v1099_v31  ;;  %v14714_v45 = vcombine.high %v1102_v37, %v1106_v38  ;;  %v14716_v46 = vcombine.high %v1103_v40, %v1107_v41  ;;  %v1143_v28 = vld [vmem:[#allocation2 + $0x1e08] sm:$0xff] }
 0x249   :  { %v1147_v30 = vld [vmem:[#allocation2 + $0x1e28] sm:$0xff]  ;;  %v14745_v31 = vcombine.low %v1134_v13, %v1138_v15 }
 0x24b   :  { %9713 = vmatpush1.bf16.msra.mxu0 %v14665_v51  ;;  %10205 = vmatpush1.bf16.msra.mxu1 %v14667_v52  ;;  %v1115_v51 = vld [vmem:[#allocation2 + $0x1d28] sm:$0xff]  ;;  %v14713_v52 = vcombine.low %v1102_v37, %v1106_v38  ;;  %v1154_v37 = vld [vmem:[#allocation2 + $0x1e60] sm:$0xff] }
 0x24c   :  { %9714 = vmatprep.subr.bf16.mxu0 %v14674_v53  ;;  %10206 = vmatprep.subr.bf16.mxu1 %v14676_v55  ;;  %v14715_v53 = vcombine.low %v1103_v40, %v1107_v41  ;;  %v14722_v55 = vcombine.high %v1110_v47, %v1114_v49  ;;  %v14724_v58 = vcombine.high %v1111_v50, %v1115_v51  ;;  %v1151_v38 = vld [vmem:[#allocation2 + $0x1e48] sm:$0xff] }
 0x24d   :  { %v1155_v40 = vld [vmem:[#allocation2 + $0x1e68] sm:$0xff] }
 0x24f   :  { %9715 = vmatpush1.bf16.msra.mxu0 %v14673_v62  ;;  %10207 = vmatpush1.bf16.msra.mxu1 %v14675_v63  ;;  %v1123_v62 = vld [vmem:[#allocation2 + $0x1d68] sm:$0xff]  ;;  %v14721_v63 = vcombine.low %v1110_v47, %v1114_v49  ;;  %v1162_v47 = vld [vmem:[#allocation2 + $0x1ea0] sm:$0xff] }
 0x250   :  { %9716 = vmatprep.subr.bf16.mxu0 %v14682_v0  ;;  %10208 = vmatprep.subr.bf16.mxu1 %v14684_v2  ;;  %v14723_v0 = vcombine.low %v1111_v50, %v1115_v51  ;;  %v14730_v2 = vcombine.high %v1118_v59, %v1122_v60  ;;  %v14732_v3 = vcombine.high %v1119_v61, %v1123_v62  ;;  %v1159_v49 = vld [vmem:[#allocation2 + $0x1e88] sm:$0xff]  ;;  %v1170_v59 = vld [vmem:[#allocation2 + $0x1ee0] sm:$0xff] }
 0x251   :  { %v1163_v50 = vld [vmem:[#allocation2 + $0x1ea8] sm:$0xff] }
 0x252   :  { %v1167_v60 = vld [vmem:[#allocation2 + $0x1ec8] sm:$0xff] }
 0x253   :  { %9717 = vmatpush1.bf16.msra.mxu0 %v14681_v7  ;;  %10209 = vmatpush1.bf16.msra.mxu1 %v14683_v9  ;;  %v1131_v7 = vld [vmem:[#allocation2 + $0x1da8] sm:$0xff]  ;;  %v14731_v9 = vcombine.low %v1119_v61, %v1123_v62 }
 0x254   :  { %9727 = vmatprep.subr.bf16.mxu0 %v14690_v10  ;;  %10219 = vmatprep.subr.bf16.mxu1 %v14692_v11  ;;  %v14738_v10 = vcombine.high %v1126_v4, %v1130_v5  ;;  %v14740_v11 = vcombine.high %v1127_v6, %v1131_v7  ;;  %v1171_v61 = vld [vmem:[#allocation2 + $0x1ee8] sm:$0xff]  ;;  %v1178_v4 = vld [vmem:[#allocation2 + $0x1f20] sm:$0xff] }
 0x255   :  { %v1175_v5 = vld [vmem:[#allocation2 + $0x1f08] sm:$0xff] }
 0x256   :  { %9719 = vmatmul.mubr.bf16.vlgmr.msra.gmra.mrb[0].mxu0 %v16806_v16  ;;  %10211 = vmatmul.mubr.bf16.vlgmr.msra.gmra.mrb[0].mxu1 %v16806_v16 }
 0x257   :  { %9728 = vmatpush1.bf16.msra.mxu0 %v14689_v20  ;;  %10220 = vmatpush1.bf16.msra.mxu1 %v14691_v21  ;;  %v14739_v20 = vcombine.low %v1127_v6, %v1131_v7  ;;  %v14746_v21 = vcombine.high %v1134_v13, %v1138_v15  ;;  %v1179_v6 = vld [vmem:[#allocation2 + $0x1f28] sm:$0xff]  ;;  %v1186_v13 = vld [vmem:[#allocation2 + $0x1f60] sm:$0xff] }
 0x258   :  { %9729 = vmatprep.subr.bf16.mxu0 %v14698_v22  ;;  %10221 = vmatprep.subr.bf16.mxu1 %v14700_v24  ;;  %v14748_v22 = vcombine.high %v1135_v17, %v1139_v18  ;;  %v1142_v24 = vld [vmem:[#allocation2 + $0x1e00] sm:$0xff]  ;;  %v1183_v15 = vld [vmem:[#allocation2 + $0x1f48] sm:$0xff] }
 0x259   :  { %9759 = vmatprep.mubr.bf16.mxu0 %v16811_v29  ;;  %10251 = vmatprep.mubr.bf16.mxu1 %v16811_v29  ;;  %v14753_v41 = vcombine.low %v1142_v24, %v1146_v27 }
 0x25b   :  { %9730 = vmatpush1.bf16.msra.mxu0 %v14697_v32  ;;  %10222 = vmatpush1.bf16.msra.mxu1 %v14699_v33  ;;  %v14747_v32 = vcombine.low %v1135_v17, %v1139_v18  ;;  %v14754_v33 = vcombine.high %v1142_v24, %v1146_v27  ;;  %v1187_v17 = vld [vmem:[#allocation2 + $0x1f68] sm:$0xff]  ;;  %v1194_v24 = vld [vmem:[#allocation2 + $0x1fa0] sm:$0xff] }
 0x25c   :  { %9731 = vmatprep.subr.bf16.mxu0 %v14706_v35  ;;  %10223 = vmatprep.subr.bf16.mxu1 %v14708_v36  ;;  %v14756_v35 = vcombine.high %v1143_v28, %v1147_v30  ;;  %v1150_v36 = vld [vmem:[#allocation2 + $0x1e40] sm:$0xff]  ;;  %v1191_v27 = vld [vmem:[#allocation2 + $0x1f88] sm:$0xff] }
 0x25d   :  { %v14761_v51 = vcombine.low %v1150_v36, %v1154_v37 }
 0x25f   :  { %9732 = vmatpush1.bf16.msra.mxu0 %v14705_v42  ;;  %10224 = vmatpush1.bf16.msra.mxu1 %v14707_v43  ;;  %v14755_v42 = vcombine.low %v1143_v28, %v1147_v30  ;;  %v14762_v43 = vcombine.high %v1150_v36, %v1154_v37  ;;  %v1195_v28 = vld [vmem:[#allocation2 + $0x1fa8] sm:$0xff]  ;;  %v1202_v36 = vld [vmem:[#allocation2 + $0x1fe0] sm:$0xff] }
 0x260   :  { %9733 = vmatprep.subr.bf16.mxu0 %v14714_v45  ;;  %10225 = vmatprep.subr.bf16.mxu1 %v14716_v46  ;;  %v14764_v45 = vcombine.high %v1151_v38, %v1155_v40  ;;  %v1158_v46 = vld [vmem:[#allocation2 + $0x1e80] sm:$0xff]  ;;  %v1199_v37 = vld [vmem:[#allocation2 + $0x1fc8] sm:$0xff] }
 0x261   :  { %v14769_v62 = vcombine.low %v1158_v46, %v1162_v47 }
 0x263   :  { %9734 = vmatpush1.bf16.msra.mxu0 %v14713_v52  ;;  %10226 = vmatpush1.bf16.msra.mxu1 %v14715_v53  ;;  %v14763_v52 = vcombine.low %v1151_v38, %v1155_v40  ;;  %v14770_v53 = vcombine.high %v1158_v46, %v1162_v47  ;;  %v1203_v38 = vld [vmem:[#allocation2 + $0x1fe8] sm:$0xff]  ;;  %v1210_v46 = vld [vmem:[#allocation2 + $0x2020] sm:$0xff] }
 0x264   :  { %9735 = vmatprep.subr.bf16.mxu0 %v14722_v55  ;;  %10227 = vmatprep.subr.bf16.mxu1 %v14724_v58  ;;  %v14772_v55 = vcombine.high %v1159_v49, %v1163_v50  ;;  %v1166_v58 = vld [vmem:[#allocation2 + $0x1ec0] sm:$0xff]  ;;  %v1207_v47 = vld [vmem:[#allocation2 + $0x2008] sm:$0xff] }
 0x265   :  { %v14777_v7 = vcombine.low %v1166_v58, %v1170_v59 }
 0x267   :  { %9736 = vmatpush1.bf16.msra.mxu0 %v14721_v63  ;;  %10228 = vmatpush1.bf16.msra.mxu1 %v14723_v0  ;;  %v14771_v63 = vcombine.low %v1159_v49, %v1163_v50  ;;  %v14778_v0 = vcombine.high %v1166_v58, %v1170_v59  ;;  %v1211_v49 = vld [vmem:[#allocation2 + $0x2028] sm:$0xff]  ;;  %v1214_v58 = vld [vmem:[#allocation2 + $0x2040] sm:$0xff] }
 0x268   :  { %9737 = vmatprep.subr.bf16.mxu0 %v14730_v2  ;;  %10229 = vmatprep.subr.bf16.mxu1 %v14732_v3  ;;  %v14780_v2 = vcombine.high %v1167_v60, %v1171_v61  ;;  %v1174_v3 = vld [vmem:[#allocation2 + $0x1f00] sm:$0xff] }
 0x269   :  { %v14785_v18 = vcombine.low %v1174_v3, %v1178_v4  ;;  %v1218_v59 = vld [vmem:[#allocation2 + $0x2060] sm:$0xff] }
 0x26b   :  { %9738 = vmatpush1.bf16.msra.mxu0 %v14729_v8  ;;  %10230 = vmatpush1.bf16.msra.mxu1 %v14731_v9  ;;  %v14779_v8 = vcombine.low %v1167_v60, %v1171_v61  ;;  %v14786_v9 = vcombine.high %v1174_v3, %v1178_v4  ;;  %v1215_v61 = vld [vmem:[#allocation2 + $0x2048] sm:$0xff]  ;;  %v14826_v3 = vcombine.high %v1214_v58, %v1218_v59 }
 0x26c   :  { %9739 = vmatprep.subr.bf16.mxu0 %v14738_v10  ;;  %10231 = vmatprep.subr.bf16.mxu1 %v14740_v11  ;;  %v14788_v10 = vcombine.high %v1175_v5, %v1179_v6  ;;  %v1182_v11 = vld [vmem:[#allocation2 + $0x1f40] sm:$0xff] }
 0x26d   :  { %v14793_v30 = vcombine.low %v1182_v11, %v1186_v13 }
 0x26f   :  { %9740 = vmatpush1.bf16.msra.mxu0 %v14737_v19  ;;  %10232 = vmatpush1.bf16.msra.mxu1 %v14739_v20  ;;  %v14787_v19 = vcombine.low %v1175_v5, %v1179_v6  ;;  %v14794_v20 = vcombine.high %v1182_v11, %v1186_v13  ;;  %v1222_v5 = vld [vmem:[#allocation2 + $0x2080] sm:$0xff] }
 0x270   :  { %9741 = vmatprep.subr.bf16.mxu0 %v14746_v21  ;;  %10233 = vmatprep.subr.bf16.mxu1 %v14748_v22  ;;  %v14796_v21 = vcombine.high %v1183_v15, %v1187_v17  ;;  %v1190_v22 = vld [vmem:[#allocation2 + $0x1f80] sm:$0xff] }
 0x271   :  { %v14801_v40 = vcombine.low %v1190_v22, %v1194_v24  ;;  %v1226_v6 = vld [vmem:[#allocation2 + $0x20a0] sm:$0xff] }
 0x272   :  { %v14834_v13 = vcombine.high %v1222_v5, %v1226_v6 }
 0x273   :  { %9742 = vmatpush1.bf16.msra.mxu0 %v14745_v31  ;;  %10234 = vmatpush1.bf16.msra.mxu1 %v14747_v32  ;;  %v14795_v31 = vcombine.low %v1183_v15, %v1187_v17  ;;  %v14802_v32 = vcombine.high %v1190_v22, %v1194_v24  ;;  %v1230_v17 = vld [vmem:[#allocation2 + $0x20c0] sm:$0xff] }
 0x274   :  { %9743 = vmatprep.subr.bf16.mxu0 %v14754_v33  ;;  %10235 = vmatprep.subr.bf16.mxu1 %v14756_v35  ;;  %v14804_v33 = vcombine.high %v1191_v27, %v1195_v28  ;;  %v1198_v35 = vld [vmem:[#allocation2 + $0x1fc0] sm:$0xff] }
 0x275   :  { %v14809_v50 = vcombine.low %v1198_v35, %v1202_v36 }
 0x277   :  { %9744 = vmatpush1.bf16.msra.mxu0 %v14753_v41  ;;  %10236 = vmatpush1.bf16.msra.mxu1 %v14755_v42  ;;  %v14803_v41 = vcombine.low %v1191_v27, %v1195_v28  ;;  %v14810_v42 = vcombine.high %v1198_v35, %v1202_v36  ;;  %v1238_v28 = vld [vmem:[#allocation2 + $0x2100] sm:$0xff] }
 0x278   :  { %9745 = vmatprep.subr.bf16.mxu0 %v14762_v43  ;;  %10237 = vmatprep.subr.bf16.mxu1 %v14764_v45  ;;  %v14812_v43 = vcombine.high %v1199_v37, %v1203_v38  ;;  %v1206_v45 = vld [vmem:[#allocation2 + $0x2000] sm:$0xff] }
 0x27b   :  { %9746 = vmatpush1.bf16.msra.mxu0 %v14761_v51  ;;  %10238 = vmatpush1.bf16.msra.mxu1 %v14763_v52  ;;  %v148_v51 = vld [vmem:[%s16981_s0 + $0x70] sm:$0xff]  ;;  %v14811_v52 = vcombine.low %v1199_v37, %v1203_v38  ;;  %v1246_v38 = vld [vmem:[#allocation2 + $0x2140] sm:$0xff] }
 0x27c   :  { %9747 = vmatprep.subr.bf16.mxu0 %v14770_v53  ;;  %10239 = vmatprep.subr.bf16.mxu1 %v14772_v55  ;;  %v14818_v53 = vcombine.high %v1206_v45, %v1210_v46  ;;  %v14820_v55 = vcombine.high %v1207_v47, %v1211_v49  ;;  %v16820_v60 = vpack.c.bf16 %v148_v51, %v148_v51  ;;  %v1255_v51 = vld [vmem:[#allocation2 + $0x2188] sm:$0xff] }
 0x27f   :  { %9748 = vmatpush1.bf16.msra.mxu0 %v14769_v62  ;;  %10240 = vmatpush1.bf16.msra.mxu1 %v14771_v63  ;;  %v1219_v62 = vld [vmem:[#allocation2 + $0x2068] sm:$0xff] }
 0x280   :  { %9749 = vmatprep.subr.bf16.mxu0 %v14778_v0  ;;  %10241 = vmatprep.subr.bf16.mxu1 %v14780_v2  ;;  %v151_v63 = vld [vmem:[%s16981_s0 + $0x88] sm:$0xff]  ;;  %v14817_v0 = vcombine.low %v1206_v45, %v1210_v46  ;;  %v14819_v2 = vcombine.low %v1207_v47, %v1211_v49  ;;  %v14828_v4 = vcombine.high %v1215_v61, %v1219_v62  ;;  %v1254_v49 = vld [vmem:[#allocation2 + $0x2180] sm:$0xff] }
 0x281   :  { %v14827_v11 = vcombine.low %v1215_v61, %v1219_v62  ;;  %v1262_v61 = vld [vmem:[#allocation2 + $0x21c0] sm:$0xff] }
 0x282   :  { %v1266_v62 = vld [vmem:[#allocation2 + $0x21e0] sm:$0xff] }
 0x283   :  { %9750 = vmatpush1.bf16.msra.mxu0 %v14777_v7  ;;  %10242 = vmatpush1.bf16.msra.mxu1 %v14779_v8  ;;  %v16825_v7 = vpack.c.bf16 %v151_v63, %v151_v63  ;;  %v1223_v8 = vld [vmem:[#allocation2 + $0x2088] sm:$0xff] }
 0x284   :  { %9751 = vmatprep.subr.bf16.mxu0 %v14786_v9  ;;  %10243 = vmatprep.subr.bf16.mxu1 %v14788_v10  ;;  %v1227_v9 = vld [vmem:[#allocation2 + $0x20a8] sm:$0xff]  ;;  %v14825_v10 = vcombine.low %v1214_v58, %v1218_v59 }
 0x285   :  { %v14836_v15 = vcombine.high %v1223_v8, %v1227_v9  ;;  %v14835_v22 = vcombine.low %v1223_v8, %v1227_v9  ;;  %v1263_v63 = vld [vmem:[#allocation2 + $0x21c8] sm:$0xff]  ;;  %v1274_v8 = vld [vmem:[#allocation2 + $0x2220] sm:$0xff] }
 0x286   :  { %v1271_v9 = vld [vmem:[#allocation2 + $0x2208] sm:$0xff] }
 0x287   :  { %9752 = vmatpush1.bf16.msra.mxu0 %v14785_v18  ;;  %10244 = vmatpush1.bf16.msra.mxu1 %v14787_v19  ;;  %v1234_v18 = vld [vmem:[#allocation2 + $0x20e0] sm:$0xff]  ;;  %v1231_v19 = vld [vmem:[#allocation2 + $0x20c8] sm:$0xff] }
 0x288   :  { %9753 = vmatprep.subr.bf16.mxu0 %v14794_v20  ;;  %10245 = vmatprep.subr.bf16.mxu1 %v14796_v21  ;;  %v1235_v20 = vld [vmem:[#allocation2 + $0x20e8] sm:$0xff]  ;;  %v14833_v21 = vcombine.low %v1222_v5, %v1226_v6  ;;  %v14842_v24 = vcombine.high %v1230_v17, %v1234_v18  ;;  %v1270_v6 = vld [vmem:[#allocation2 + $0x2200] sm:$0xff] }
 0x289   :  { %v14844_v27 = vcombine.high %v1231_v19, %v1235_v20  ;;  %v14843_v35 = vcombine.low %v1231_v19, %v1235_v20  ;;  %v1282_v19 = vld [vmem:[#allocation2 + $0x2260] sm:$0xff]  ;;  %v1279_v20 = vld [vmem:[#allocation2 + $0x2248] sm:$0xff] }
 0x28b   :  { %9754 = vmatpush1.bf16.msra.mxu0 %v14793_v30  ;;  %10246 = vmatpush1.bf16.msra.mxu1 %v14795_v31  ;;  %v1242_v30 = vld [vmem:[#allocation2 + $0x2120] sm:$0xff]  ;;  %v1239_v31 = vld [vmem:[#allocation2 + $0x2108] sm:$0xff] }
 0x28c   :  { %9755 = vmatprep.subr.bf16.mxu0 %v14802_v32  ;;  %10247 = vmatprep.subr.bf16.mxu1 %v14804_v33  ;;  %v1243_v32 = vld [vmem:[#allocation2 + $0x2128] sm:$0xff]  ;;  %v14841_v33 = vcombine.low %v1230_v17, %v1234_v18  ;;  %v14850_v36 = vcombine.high %v1238_v28, %v1242_v30  ;;  %v1278_v18 = vld [vmem:[#allocation2 + $0x2240] sm:$0xff] }
 0x28d   :  { %v14852_v37 = vcombine.high %v1239_v31, %v1243_v32  ;;  %v14851_v45 = vcombine.low %v1239_v31, %v1243_v32  ;;  %v1290_v31 = vld [vmem:[#allocation2 + $0x22a0] sm:$0xff]  ;;  %v1287_v32 = vld [vmem:[#allocation2 + $0x2288] sm:$0xff] }
 0x28f   :  { %9756 = vmatpush1.bf16.msra.mxu0 %v14801_v40  ;;  %10248 = vmatpush1.bf16.msra.mxu1 %v14803_v41  ;;  %v1250_v40 = vld [vmem:[#allocation2 + $0x2160] sm:$0xff]  ;;  %v1247_v41 = vld [vmem:[#allocation2 + $0x2148] sm:$0xff] }
 0x290   :  { %9757 = vmatprep.subr.bf16.mxu0 %v14810_v42  ;;  %10249 = vmatprep.subr.bf16.mxu1 %v14812_v43  ;;  %v1251_v42 = vld [vmem:[#allocation2 + $0x2168] sm:$0xff]  ;;  %v14849_v43 = vcombine.low %v1238_v28, %v1242_v30  ;;  %v14858_v46 = vcombine.high %v1246_v38, %v1250_v40  ;;  %v1286_v30 = vld [vmem:[#allocation2 + $0x2280] sm:$0xff] }
 0x291   :  { %v14860_v47 = vcombine.high %v1247_v41, %v1251_v42 }
 0x293   :  { %9758 = vmatpush1.bf16.msra.mxu0 %v14809_v50  ;;  %10250 = vmatpush1.bf16.msra.mxu1 %v14811_v52  ;;  %v1258_v50 = vld [vmem:[#allocation2 + $0x21a0] sm:$0xff]  ;;  %v1259_v52 = vld [vmem:[#allocation2 + $0x21a8] sm:$0xff] }
 0x294   :  { %9768 = vmatprep.subr.bf16.mxu0 %v14818_v53  ;;  %10260 = vmatprep.subr.bf16.mxu1 %v14820_v55  ;;  %v14857_v53 = vcombine.low %v1246_v38, %v1250_v40  ;;  %v14859_v55 = vcombine.low %v1247_v41, %v1251_v42  ;;  %v14866_v58 = vcombine.high %v1254_v49, %v1258_v50  ;;  %v1294_v40 = vld [vmem:[#allocation2 + $0x22c0] sm:$0xff]  ;;  %v1295_v42 = vld [vmem:[#allocation2 + $0x22c8] sm:$0xff] }
 0x295   :  { %v14868_v59 = vcombine.high %v1255_v51, %v1259_v52  ;;  %v1298_v41 = vld [vmem:[#allocation2 + $0x22e0] sm:$0xff] }
 0x296   :  { %9760 = vmatmul.mubr.bf16.vlgmr.msra.gmra.mrb[0].mxu0 %v16820_v60  ;;  %10252 = vmatmul.mubr.bf16.vlgmr.msra.gmra.mrb[0].mxu1 %v16820_v60 }
 0x297   :  { %9769 = vmatpush1.bf16.msra.mxu0 %v14817_v0  ;;  %10261 = vmatpush1.bf16.msra.mxu1 %v14819_v2  ;;  %v1267_v0 = vld [vmem:[#allocation2 + $0x21e8] sm:$0xff]  ;;  %v14865_v2 = vcombine.low %v1254_v49, %v1258_v50  ;;  %v1302_v50 = vld [vmem:[#allocation2 + $0x2300] sm:$0xff] }
 0x298   :  { %9770 = vmatprep.subr.bf16.mxu0 %v14826_v3  ;;  %10262 = vmatprep.subr.bf16.mxu1 %v14828_v4  ;;  %v14867_v3 = vcombine.low %v1255_v51, %v1259_v52  ;;  %v14874_v4 = vcombine.high %v1262_v61, %v1266_v62  ;;  %v14876_v5 = vcombine.high %v1263_v63, %v1267_v0  ;;  %v1306_v51 = vld [vmem:[#allocation2 + $0x2320] sm:$0xff]  ;;  %v1303_v52 = vld [vmem:[#allocation2 + $0x2308] sm:$0xff] }
 0x299   :  { %9800 = vmatprep.mubr.bf16.mxu0 %v16825_v7  ;;  %10292 = vmatprep.mubr.bf16.mxu1 %v16825_v7 }
 0x29b   :  { %9771 = vmatpush1.bf16.msra.mxu0 %v14825_v10  ;;  %10263 = vmatpush1.bf16.msra.mxu1 %v14827_v11  ;;  %v1275_v10 = vld [vmem:[#allocation2 + $0x2228] sm:$0xff]  ;;  %v14873_v11 = vcombine.low %v1262_v61, %v1266_v62  ;;  %v1310_v62 = vld [vmem:[#allocation2 + $0x2340] sm:$0xff] }
 0x29c   :  { %9772 = vmatprep.subr.bf16.mxu0 %v14834_v13  ;;  %10264 = vmatprep.subr.bf16.mxu1 %v14836_v15  ;;  %v14875_v13 = vcombine.low %v1263_v63, %v1267_v0  ;;  %v14882_v15 = vcombine.high %v1270_v6, %v1274_v8  ;;  %v14884_v17 = vcombine.high %v1271_v9, %v1275_v10  ;;  %v1314_v63 = vld [vmem:[#allocation2 + $0x2360] sm:$0xff]  ;;  %v1311_v0 = vld [vmem:[#allocation2 + $0x2348] sm:$0xff] }
 0x29f   :  { %9773 = vmatpush1.bf16.msra.mxu0 %v14833_v21  ;;  %10265 = vmatpush1.bf16.msra.mxu1 %v14835_v22  ;;  %v1283_v21 = vld [vmem:[#allocation2 + $0x2268] sm:$0xff]  ;;  %v14881_v22 = vcombine.low %v1270_v6, %v1274_v8  ;;  %v1318_v8 = vld [vmem:[#allocation2 + $0x2380] sm:$0xff] }
 0x2a0   :  { %9774 = vmatprep.subr.bf16.mxu0 %v14842_v24  ;;  %10266 = vmatprep.subr.bf16.mxu1 %v14844_v27  ;;  %v14883_v24 = vcombine.low %v1271_v9, %v1275_v10  ;;  %v14890_v27 = vcombine.high %v1278_v18, %v1282_v19  ;;  %v14892_v28 = vcombine.high %v1279_v20, %v1283_v21  ;;  %v1322_v9 = vld [vmem:[#allocation2 + $0x23a0] sm:$0xff]  ;;  %v1319_v10 = vld [vmem:[#allocation2 + $0x2388] sm:$0xff] }
 0x2a3   :  { %9775 = vmatpush1.bf16.msra.mxu0 %v14841_v33  ;;  %10267 = vmatpush1.bf16.msra.mxu1 %v14843_v35  ;;  %v1291_v33 = vld [vmem:[#allocation2 + $0x22a8] sm:$0xff]  ;;  %v14889_v35 = vcombine.low %v1278_v18, %v1282_v19  ;;  %v1326_v19 = vld [vmem:[#allocation2 + $0x23c0] sm:$0xff] }
 0x2a4   :  { %9776 = vmatprep.subr.bf16.mxu0 %v14850_v36  ;;  %10268 = vmatprep.subr.bf16.mxu1 %v14852_v37  ;;  %v14891_v36 = vcombine.low %v1279_v20, %v1283_v21  ;;  %v14898_v37 = vcombine.high %v1286_v30, %v1290_v31  ;;  %v14900_v38 = vcombine.high %v1287_v32, %v1291_v33  ;;  %v1330_v20 = vld [vmem:[#allocation2 + $0x23e0] sm:$0xff]  ;;  %v1327_v21 = vld [vmem:[#allocation2 + $0x23c8] sm:$0xff] }
 0x2a7   :  { %9777 = vmatpush1.bf16.msra.mxu0 %v14849_v43  ;;  %10269 = vmatpush1.bf16.msra.mxu1 %v14851_v45  ;;  %v1299_v43 = vld [vmem:[#allocation2 + $0x22e8] sm:$0xff]  ;;  %v14897_v45 = vcombine.low %v1286_v30, %v1290_v31  ;;  %v1334_v31 = vld [vmem:[#allocation2 + $0x2400] sm:$0xff] }
 0x2a8   :  { %9778 = vmatprep.subr.bf16.mxu0 %v14858_v46  ;;  %10270 = vmatprep.subr.bf16.mxu1 %v14860_v47  ;;  %v14899_v46 = vcombine.low %v1287_v32, %v1291_v33  ;;  %v14906_v47 = vcombine.high %v1294_v40, %v1298_v41  ;;  %v14908_v49 = vcombine.high %v1295_v42, %v1299_v43  ;;  %v1338_v32 = vld [vmem:[#allocation2 + $0x2420] sm:$0xff]  ;;  %v1335_v33 = vld [vmem:[#allocation2 + $0x2408] sm:$0xff] }
 0x2ab   :  { %9779 = vmatpush1.bf16.msra.mxu0 %v14857_v53  ;;  %10271 = vmatpush1.bf16.msra.mxu1 %v14859_v55  ;;  %v1307_v53 = vld [vmem:[#allocation2 + $0x2328] sm:$0xff]  ;;  %v14905_v55 = vcombine.low %v1294_v40, %v1298_v41  ;;  %v14946_v40 = vcombine.high %v1334_v31, %v1338_v32 }
 0x2ac   :  { %9780 = vmatprep.subr.bf16.mxu0 %v14866_v58  ;;  %10272 = vmatprep.subr.bf16.mxu1 %v14868_v59  ;;  %v14907_v58 = vcombine.low %v1295_v42, %v1299_v43  ;;  %v14914_v59 = vcombine.high %v1302_v50, %v1306_v51  ;;  %v14916_v61 = vcombine.high %v1303_v52, %v1307_v53  ;;  %v1342_v42 = vld [vmem:[#allocation2 + $0x2440] sm:$0xff] }
 0x2ad   :  { %v1346_v43 = vld [vmem:[#allocation2 + $0x2460] sm:$0xff] }
 0x2af   :  { %9781 = vmatpush1.bf16.msra.mxu0 %v14865_v2  ;;  %10273 = vmatpush1.bf16.msra.mxu1 %v14867_v3  ;;  %v1315_v2 = vld [vmem:[#allocation2 + $0x2368] sm:$0xff]  ;;  %v14913_v3 = vcombine.low %v1302_v50, %v1306_v51  ;;  %v14945_v50 = vcombine.low %v1334_v31, %v1338_v32 }
 0x2b0   :  { %9782 = vmatprep.subr.bf16.mxu0 %v14874_v4  ;;  %10274 = vmatprep.subr.bf16.mxu1 %v14876_v5  ;;  %v14915_v4 = vcombine.low %v1303_v52, %v1307_v53  ;;  %v14922_v5 = vcombine.high %v1310_v62, %v1314_v63  ;;  %v14924_v6 = vcombine.high %v1311_v0, %v1315_v2  ;;  %v1379_v31 = vld [vmem:[#allocation2 + $0x2568] sm:$0xff] }
 0x2b1   :  { %v14954_v52 = vcombine.high %v1342_v42, %v1346_v43 }
 0x2b3   :  { %9783 = vmatpush1.bf16.msra.mxu0 %v14873_v11  ;;  %10275 = vmatpush1.bf16.msra.mxu1 %v14875_v13  ;;  %v1323_v11 = vld [vmem:[#allocation2 + $0x23a8] sm:$0xff]  ;;  %v14921_v13 = vcombine.low %v1310_v62, %v1314_v63  ;;  %v14953_v63 = vcombine.low %v1342_v42, %v1346_v43 }
 0x2b4   :  { %9784 = vmatprep.subr.bf16.mxu0 %v14882_v15  ;;  %10276 = vmatprep.subr.bf16.mxu1 %v14884_v17  ;;  %v14923_v15 = vcombine.low %v1311_v0, %v1315_v2  ;;  %v14930_v17 = vcombine.high %v1318_v8, %v1322_v9  ;;  %v14932_v18 = vcombine.high %v1319_v10, %v1323_v11  ;;  %v1355_v62 = vld [vmem:[#allocation2 + $0x24a8] sm:$0xff] }
 0x2b7   :  { %9785 = vmatpush1.bf16.msra.mxu0 %v14881_v22  ;;  %10277 = vmatpush1.bf16.msra.mxu1 %v14883_v24  ;;  %v1331_v22 = vld [vmem:[#allocation2 + $0x23e8] sm:$0xff]  ;;  %v14929_v24 = vcombine.low %v1318_v8, %v1322_v9 }
 0x2b8   :  { %9786 = vmatprep.subr.bf16.mxu0 %v14890_v27  ;;  %10278 = vmatprep.subr.bf16.mxu1 %v14892_v28  ;;  %v14931_v27 = vcombine.low %v1319_v10, %v1323_v11  ;;  %v14938_v28 = vcombine.high %v1326_v19, %v1330_v20  ;;  %v14940_v30 = vcombine.high %v1327_v21, %v1331_v22  ;;  %v1363_v8 = vld [vmem:[#allocation2 + $0x24e8] sm:$0xff] }
 0x2bb   :  { %9787 = vmatpush1.bf16.msra.mxu0 %v14889_v35  ;;  %10279 = vmatpush1.bf16.msra.mxu1 %v14891_v36  ;;  %v1339_v35 = vld [vmem:[#allocation2 + $0x2428] sm:$0xff]  ;;  %v14937_v36 = vcombine.low %v1326_v19, %v1330_v20 }
 0x2bc   :  { %9788 = vmatprep.subr.bf16.mxu0 %v14898_v37  ;;  %10280 = vmatprep.subr.bf16.mxu1 %v14900_v38  ;;  %v150_v37 = vld [vmem:[%s16981_s0 + $0x80] sm:$0xff]  ;;  %v14939_v38 = vcombine.low %v1327_v21, %v1331_v22  ;;  %v14948_v41 = vcombine.high %v1335_v33, %v1339_v35  ;;  %v14947_v51 = vcombine.low %v1335_v33, %v1339_v35  ;;  %v1371_v19 = vld [vmem:[#allocation2 + $0x2528] sm:$0xff] }
 0x2bf   :  { %9789 = vmatpush1.bf16.msra.mxu0 %v14897_v45  ;;  %10281 = vmatpush1.bf16.msra.mxu1 %v14899_v46  ;;  %v16834_v45 = vpack.c.bf16 %v150_v37, %v150_v37  ;;  %v1343_v46 = vld [vmem:[#allocation2 + $0x2448] sm:$0xff]  ;;  %v1382_v37 = vld [vmem:[#allocation2 + $0x2580] sm:$0xff] }
 0x2c0   :  { %9790 = vmatprep.subr.bf16.mxu0 %v14906_v47  ;;  %10282 = vmatprep.subr.bf16.mxu1 %v14908_v49  ;;  %v1347_v47 = vld [vmem:[#allocation2 + $0x2468] sm:$0xff]  ;;  %v153_v49 = vld [vmem:[%s16981_s0 + $0x98] sm:$0xff] }
 0x2c1   :  { %v14956_v53 = vcombine.high %v1343_v46, %v1347_v47  ;;  %v14955_v0 = vcombine.low %v1343_v46, %v1347_v47 }
 0x2c3   :  { %9791 = vmatpush1.bf16.msra.mxu0 %v14905_v55  ;;  %10283 = vmatpush1.bf16.msra.mxu1 %v14907_v58  ;;  %v1350_v55 = vld [vmem:[#allocation2 + $0x2480] sm:$0xff] }
 0x2c4   :  { %9792 = vmatprep.subr.bf16.mxu0 %v14914_v59  ;;  %10284 = vmatprep.subr.bf16.mxu1 %v14916_v61  ;;  %v1354_v58 = vld [vmem:[#allocation2 + $0x24a0] sm:$0xff]  ;;  %v16839_v59 = vpack.c.bf16 %v153_v49, %v153_v49  ;;  %v1351_v61 = vld [vmem:[#allocation2 + $0x2488] sm:$0xff] }
 0x2c5   :  { %v14962_v2 = vcombine.high %v1350_v55, %v1354_v58  ;;  %v14961_v9 = vcombine.low %v1350_v55, %v1354_v58  ;;  %v14963_v10 = vcombine.low %v1351_v61, %v1355_v62  ;;  %v1390_v49 = vld [vmem:[#allocation2 + $0x25c0] sm:$0xff] }
 0x2c7   :  { %9793 = vmatpush1.bf16.msra.mxu0 %v14913_v3  ;;  %10285 = vmatpush1.bf16.msra.mxu1 %v14915_v4  ;;  %v14964_v3 = vcombine.high %v1351_v61, %v1355_v62  ;;  %v1358_v4 = vld [vmem:[#allocation2 + $0x24c0] sm:$0xff] }
 0x2c8   :  { %9794 = vmatprep.subr.bf16.mxu0 %v14922_v5  ;;  %10286 = vmatprep.subr.bf16.mxu1 %v14924_v6  ;;  %v1362_v5 = vld [vmem:[#allocation2 + $0x24e0] sm:$0xff]  ;;  %v1359_v6 = vld [vmem:[#allocation2 + $0x24c8] sm:$0xff] }
 0x2c9   :  { %v14970_v11 = vcombine.high %v1358_v4, %v1362_v5  ;;  %v14969_v20 = vcombine.low %v1358_v4, %v1362_v5  ;;  %v14971_v21 = vcombine.low %v1359_v6, %v1363_v8  ;;  %v1398_v62 = vld [vmem:[#allocation2 + $0x2600] sm:$0xff] }
 0x2cb   :  { %9795 = vmatpush1.bf16.msra.mxu0 %v14921_v13  ;;  %10287 = vmatpush1.bf16.msra.mxu1 %v14923_v15  ;;  %v14972_v13 = vcombine.high %v1359_v6, %v1363_v8  ;;  %v1366_v15 = vld [vmem:[#allocation2 + $0x2500] sm:$0xff] }
 0x2cc   :  { %9796 = vmatprep.subr.bf16.mxu0 %v14930_v17  ;;  %10288 = vmatprep.subr.bf16.mxu1 %v14932_v18  ;;  %v1370_v17 = vld [vmem:[#allocation2 + $0x2520] sm:$0xff]  ;;  %v1367_v18 = vld [vmem:[#allocation2 + $0x2508] sm:$0xff] }
 0x2cd   :  { %v14978_v22 = vcombine.high %v1366_v15, %v1370_v17  ;;  %v14977_v32 = vcombine.low %v1366_v15, %v1370_v17  ;;  %v14979_v33 = vcombine.low %v1367_v18, %v1371_v19  ;;  %v1406_v8 = vld [vmem:[#allocation2 + $0x2640] sm:$0xff] }
 0x2cf   :  { %9797 = vmatpush1.bf16.msra.mxu0 %v14929_v24  ;;  %10289 = vmatpush1.bf16.msra.mxu1 %v14931_v27  ;;  %v14980_v24 = vcombine.high %v1367_v18, %v1371_v19  ;;  %v1374_v27 = vld [vmem:[#allocation2 + $0x2540] sm:$0xff] }
 0x2d0   :  { %9798 = vmatprep.subr.bf16.mxu0 %v14938_v28  ;;  %10290 = vmatprep.subr.bf16.mxu1 %v14940_v30  ;;  %v1378_v28 = vld [vmem:[#allocation2 + $0x2560] sm:$0xff]  ;;  %v1375_v30 = vld [vmem:[#allocation2 + $0x2548] sm:$0xff] }
 0x2d1   :  { %v14986_v35 = vcombine.high %v1374_v27, %v1378_v28  ;;  %v14985_v42 = vcombine.low %v1374_v27, %v1378_v28  ;;  %v14987_v43 = vcombine.low %v1375_v30, %v1379_v31  ;;  %v1414_v19 = vld [vmem:[#allocation2 + $0x2680] sm:$0xff] }
 0x2d3   :  { %9799 = vmatpush1.bf16.msra.mxu0 %v14937_v36  ;;  %10291 = vmatpush1.bf16.msra.mxu1 %v14939_v38  ;;  %v14988_v36 = vcombine.high %v1375_v30, %v1379_v31  ;;  %v1386_v38 = vld [vmem:[#allocation2 + $0x25a0] sm:$0xff] }
 0x2d4   :  { %9809 = vmatprep.subr.bf16.mxu0 %v14946_v40  ;;  %10301 = vmatprep.subr.bf16.mxu1 %v14948_v41  ;;  %v1383_v40 = vld [vmem:[#allocation2 + $0x2588] sm:$0xff]  ;;  %v14994_v46 = vcombine.high %v1382_v37, %v1386_v38  ;;  %v1422_v31 = vld [vmem:[#allocation2 + $0x26c0] sm:$0xff] }
 0x2d5   :  { %v1387_v41 = vld [vmem:[#allocation2 + $0x25a8] sm:$0xff] }
 0x2d6   :  { %9801 = vmatmul.mubr.bf16.vlgmr.msra.gmra.mrb[0].mxu0 %v16834_v45  ;;  %10293 = vmatmul.mubr.bf16.vlgmr.msra.gmra.mrb[0].mxu1 %v16834_v45  ;;  %v14996_v47 = vcombine.high %v1383_v40, %v1387_v41  ;;  %v14995_v55 = vcombine.low %v1383_v40, %v1387_v41  ;;  %v1430_v41 = vld [vmem:[#allocation2 + $0x2700] sm:$0xff] }
 0x2d7   :  { %9810 = vmatpush1.bf16.msra.mxu0 %v14945_v50  ;;  %10302 = vmatpush1.bf16.msra.mxu1 %v14947_v51  ;;  %v1394_v50 = vld [vmem:[#allocation2 + $0x25e0] sm:$0xff]  ;;  %v1391_v51 = vld [vmem:[#allocation2 + $0x25c8] sm:$0xff] }
 0x2d8   :  { %9811 = vmatprep.subr.bf16.mxu0 %v14954_v52  ;;  %10303 = vmatprep.subr.bf16.mxu1 %v14956_v53  ;;  %v1395_v52 = vld [vmem:[#allocation2 + $0x25e8] sm:$0xff]  ;;  %v14993_v53 = vcombine.low %v1382_v37, %v1386_v38  ;;  %v15002_v58 = vcombine.high %v1390_v49, %v1394_v50 }
 0x2d9   :  { %9841 = vmatprep.mubr.bf16.mxu0 %v16839_v59  ;;  %10333 = vmatprep.mubr.bf16.mxu1 %v16839_v59  ;;  %v15004_v61 = vcombine.high %v1391_v51, %v1395_v52  ;;  %v15003_v4 = vcombine.low %v1391_v51, %v1395_v52  ;;  %v1438_v52 = vld [vmem:[#allocation2 + $0x2740] sm:$0xff] }
 0x2db   :  { %9812 = vmatpush1.bf16.msra.mxu0 %v14953_v63  ;;  %10304 = vmatpush1.bf16.msra.mxu1 %v14955_v0  ;;  %v1402_v63 = vld [vmem:[#allocation2 + $0x2620] sm:$0xff]  ;;  %v1399_v0 = vld [vmem:[#allocation2 + $0x2608] sm:$0xff] }
 0x2dc   :  { %9813 = vmatprep.subr.bf16.mxu0 %v14962_v2  ;;  %10305 = vmatprep.subr.bf16.mxu1 %v14964_v3  ;;  %v1403_v2 = vld [vmem:[#allocation2 + $0x2628] sm:$0xff]  ;;  %v15001_v3 = vcombine.low %v1390_v49, %v1394_v50  ;;  %v15010_v5 = vcombine.high %v1398_v62, %v1402_v63 }
 0x2dd   :  { %v15012_v6 = vcombine.high %v1399_v0, %v1403_v2  ;;  %v15011_v15 = vcombine.low %v1399_v0, %v1403_v2  ;;  %v1446_v2 = vld [vmem:[#allocation2 + $0x2780] sm:$0xff] }
 0x2df   :  { %9814 = vmatpush1.bf16.msra.mxu0 %v14961_v9  ;;  %10306 = vmatpush1.bf16.msra.mxu1 %v14963_v10  ;;  %v1410_v9 = vld [vmem:[#allocation2 + $0x2660] sm:$0xff]  ;;  %v1407_v10 = vld [vmem:[#allocation2 + $0x2648] sm:$0xff] }
 0x2e0   :  { %9815 = vmatprep.subr.bf16.mxu0 %v14970_v11  ;;  %10307 = vmatprep.subr.bf16.mxu1 %v14972_v13  ;;  %v1411_v11 = vld [vmem:[#allocation2 + $0x2668] sm:$0xff]  ;;  %v15009_v13 = vcombine.low %v1398_v62, %v1402_v63  ;;  %v15018_v17 = vcombine.high %v1406_v8, %v1410_v9 }
 0x2e1   :  { %v15020_v18 = vcombine.high %v1407_v10, %v1411_v11  ;;  %v15019_v27 = vcombine.low %v1407_v10, %v1411_v11  ;;  %v1454_v11 = vld [vmem:[#allocation2 + $0x27c0] sm:$0xff] }
 0x2e3   :  { %9816 = vmatpush1.bf16.msra.mxu0 %v14969_v20  ;;  %10308 = vmatpush1.bf16.msra.mxu1 %v14971_v21  ;;  %v1418_v20 = vld [vmem:[#allocation2 + $0x26a0] sm:$0xff]  ;;  %v1415_v21 = vld [vmem:[#allocation2 + $0x2688] sm:$0xff] }
 0x2e4   :  { %9817 = vmatprep.subr.bf16.mxu0 %v14978_v22  ;;  %10309 = vmatprep.subr.bf16.mxu1 %v14980_v24  ;;  %v1419_v22 = vld [vmem:[#allocation2 + $0x26a8] sm:$0xff]  ;;  %v15017_v24 = vcombine.low %v1406_v8, %v1410_v9  ;;  %v15026_v28 = vcombine.high %v1414_v19, %v1418_v20 }
 0x2e5   :  { %v15028_v30 = vcombine.high %v1415_v21, %v1419_v22  ;;  %v15027_v37 = vcombine.low %v1415_v21, %v1419_v22  ;;  %v1462_v22 = vld [vmem:[#allocation2 + $0x2800] sm:$0xff] }
 0x2e7   :  { %9818 = vmatpush1.bf16.msra.mxu0 %v14977_v32  ;;  %10310 = vmatpush1.bf16.msra.mxu1 %v14979_v33  ;;  %v1426_v32 = vld [vmem:[#allocation2 + $0x26e0] sm:$0xff]  ;;  %v1423_v33 = vld [vmem:[#allocation2 + $0x26c8] sm:$0xff] }
 0x2e8   :  { %9819 = vmatprep.subr.bf16.mxu0 %v14986_v35  ;;  %10311 = vmatprep.subr.bf16.mxu1 %v14988_v36  ;;  %v1427_v35 = vld [vmem:[#allocation2 + $0x26e8] sm:$0xff]  ;;  %v15025_v36 = vcombine.low %v1414_v19, %v1418_v20  ;;  %v15034_v38 = vcombine.high %v1422_v31, %v1426_v32 }
 0x2e9   :  { %v15036_v40 = vcombine.high %v1423_v33, %v1427_v35  ;;  %v15035_v49 = vcombine.low %v1423_v33, %v1427_v35 }
 0x2eb   :  { %9820 = vmatpush1.bf16.msra.mxu0 %v14985_v42  ;;  %10312 = vmatpush1.bf16.msra.mxu1 %v14987_v43  ;;  %v1434_v42 = vld [vmem:[#allocation2 + $0x2720] sm:$0xff]  ;;  %v1431_v43 = vld [vmem:[#allocation2 + $0x2708] sm:$0xff] }
 0x2ec   :  { %9821 = vmatprep.subr.bf16.mxu0 %v14994_v46  ;;  %10313 = vmatprep.subr.bf16.mxu1 %v14996_v47  ;;  %v1435_v46 = vld [vmem:[#allocation2 + $0x2728] sm:$0xff]  ;;  %v15033_v47 = vcombine.low %v1422_v31, %v1426_v32  ;;  %v15042_v50 = vcombine.high %v1430_v41, %v1434_v42  ;;  %v152_v31 = vld [vmem:[%s16981_s0 + $0x90] sm:$0xff] }
 0x2ed   :  { %v15044_v51 = vcombine.high %v1431_v43, %v1435_v46  ;;  %v15043_v62 = vcombine.low %v1431_v43, %v1435_v46 }
 0x2ef   :  { %9822 = vmatpush1.bf16.msra.mxu0 %v14993_v53  ;;  %10314 = vmatpush1.bf16.msra.mxu1 %v14995_v55  ;;  %v1442_v53 = vld [vmem:[#allocation2 + $0x2760] sm:$0xff]  ;;  %v1439_v55 = vld [vmem:[#allocation2 + $0x2748] sm:$0xff] }
 0x2f0   :  { %9823 = vmatprep.subr.bf16.mxu0 %v15002_v58  ;;  %10315 = vmatprep.subr.bf16.mxu1 %v15004_v61  ;;  %v1443_v58 = vld [vmem:[#allocation2 + $0x2768] sm:$0xff]  ;;  %v15041_v61 = vcombine.low %v1430_v41, %v1434_v42  ;;  %v15050_v63 = vcombine.high %v1438_v52, %v1442_v53 }
 0x2f1   :  { %v15052_v0 = vcombine.high %v1439_v55, %v1443_v58  ;;  %v15051_v8 = vcombine.low %v1439_v55, %v1443_v58  ;;  %v1475_v41 = vld [vmem:[#allocation2 + $0x2868] sm:$0xff] }
 0x2f2   :  { %v155_v42 = vld [vmem:[%s16981_s0 + $0xa8] sm:$0xff] }
 0x2f3   :  { %9824 = vmatpush1.bf16.msra.mxu0 %v15001_v3  ;;  %10316 = vmatpush1.bf16.msra.mxu1 %v15003_v4  ;;  %v1450_v3 = vld [vmem:[#allocation2 + $0x27a0] sm:$0xff]  ;;  %v1447_v4 = vld [vmem:[#allocation2 + $0x2788] sm:$0xff] }
 0x2f4   :  { %9825 = vmatprep.subr.bf16.mxu0 %v15010_v5  ;;  %10317 = vmatprep.subr.bf16.mxu1 %v15012_v6  ;;  %v1451_v5 = vld [vmem:[#allocation2 + $0x27a8] sm:$0xff]  ;;  %v15049_v6 = vcombine.low %v1438_v52, %v1442_v53  ;;  %v15058_v9 = vcombine.high %v1446_v2, %v1450_v3  ;;  %v16853_v52 = vpack.c.bf16 %v155_v42, %v155_v42 }
 0x2f5   :  { %v15060_v10 = vcombine.high %v1447_v4, %v1451_v5  ;;  %v15059_v19 = vcombine.low %v1447_v4, %v1451_v5  ;;  %v1479_v53 = vld [vmem:[#allocation2 + $0x2888] sm:$0xff] }
 0x2f6   :  { %v1483_v55 = vld [vmem:[#allocation2 + $0x28a8] sm:$0xff] }
 0x2f7   :  { %9826 = vmatpush1.bf16.msra.mxu0 %v15009_v13  ;;  %10318 = vmatpush1.bf16.msra.mxu1 %v15011_v15  ;;  %v1458_v13 = vld [vmem:[#allocation2 + $0x27e0] sm:$0xff]  ;;  %v1455_v15 = vld [vmem:[#allocation2 + $0x27c8] sm:$0xff] }
 0x2f8   :  { %9827 = vmatprep.subr.bf16.mxu0 %v15018_v17  ;;  %10319 = vmatprep.subr.bf16.mxu1 %v15020_v18  ;;  %v1459_v17 = vld [vmem:[#allocation2 + $0x27e8] sm:$0xff]  ;;  %v15057_v18 = vcombine.low %v1446_v2, %v1450_v3  ;;  %v15066_v20 = vcombine.high %v1454_v11, %v1458_v13  ;;  %v1490_v2 = vld [vmem:[#allocation2 + $0x28e0] sm:$0xff] }
 0x2f9   :  { %v15068_v21 = vcombine.high %v1455_v15, %v1459_v17  ;;  %v15067_v32 = vcombine.low %v1455_v15, %v1459_v17  ;;  %v1487_v3 = vld [vmem:[#allocation2 + $0x28c8] sm:$0xff] }
 0x2fa   :  { %v1491_v4 = vld [vmem:[#allocation2 + $0x28e8] sm:$0xff] }
 0x2fb   :  { %9828 = vmatpush1.bf16.msra.mxu0 %v15017_v24  ;;  %10320 = vmatpush1.bf16.msra.mxu1 %v15019_v27  ;;  %v1466_v24 = vld [vmem:[#allocation2 + $0x2820] sm:$0xff]  ;;  %v1463_v27 = vld [vmem:[#allocation2 + $0x2808] sm:$0xff] }
 0x2fc   :  { %9829 = vmatprep.subr.bf16.mxu0 %v15026_v28  ;;  %10321 = vmatprep.subr.bf16.mxu1 %v15028_v30  ;;  %v1467_v28 = vld [vmem:[#allocation2 + $0x2828] sm:$0xff]  ;;  %v15065_v30 = vcombine.low %v1454_v11, %v1458_v13  ;;  %v15074_v33 = vcombine.high %v1462_v22, %v1466_v24  ;;  %v15073_v43 = vcombine.low %v1462_v22, %v1466_v24  ;;  %v1498_v11 = vld [vmem:[#allocation2 + $0x2920] sm:$0xff] }
 0x2fd   :  { %v15076_v35 = vcombine.high %v1463_v27, %v1467_v28  ;;  %v15075_v46 = vcombine.low %v1463_v27, %v1467_v28  ;;  %v1495_v13 = vld [vmem:[#allocation2 + $0x2908] sm:$0xff]  ;;  %v1506_v22 = vld [vmem:[#allocation2 + $0x2960] sm:$0xff] }
 0x2fe   :  { %v1499_v15 = vld [vmem:[#allocation2 + $0x2928] sm:$0xff] }
 0x2ff   :  { %9830 = vmatpush1.bf16.msra.mxu0 %v15025_v36  ;;  %10322 = vmatpush1.bf16.msra.mxu1 %v15027_v37  ;;  %v1470_v36 = vld [vmem:[#allocation2 + $0x2840] sm:$0xff]  ;;  %v1503_v24 = vld [vmem:[#allocation2 + $0x2948] sm:$0xff] }
 0x300   :  { %9831 = vmatprep.subr.bf16.mxu0 %v15034_v38  ;;  %10323 = vmatprep.subr.bf16.mxu1 %v15036_v40  ;;  %v1474_v37 = vld [vmem:[#allocation2 + $0x2860] sm:$0xff]  ;;  %v16848_v38 = vpack.c.bf16 %v152_v31, %v152_v31  ;;  %v1471_v40 = vld [vmem:[#allocation2 + $0x2848] sm:$0xff] }
 0x301   :  { %v15081_v58 = vcombine.low %v1470_v36, %v1474_v37  ;;  %v1507_v27 = vld [vmem:[#allocation2 + $0x2968] sm:$0xff] }
 0x303   :  { %9832 = vmatpush1.bf16.msra.mxu0 %v15033_v47  ;;  %10324 = vmatpush1.bf16.msra.mxu1 %v15035_v49  ;;  %v15082_v47 = vcombine.high %v1470_v36, %v1474_v37  ;;  %v15084_v49 = vcombine.high %v1471_v40, %v1475_v41  ;;  %v1511_v36 = vld [vmem:[#allocation2 + $0x2988] sm:$0xff] }
 0x304   :  { %9833 = vmatprep.subr.bf16.mxu0 %v15042_v50  ;;  %10325 = vmatprep.subr.bf16.mxu1 %v15044_v51  ;;  %v1478_v50 = vld [vmem:[#allocation2 + $0x2880] sm:$0xff]  ;;  %v1515_v37 = vld [vmem:[#allocation2 + $0x29a8] sm:$0xff] }
 0x305   :  { %v1482_v51 = vld [vmem:[#allocation2 + $0x28a0] sm:$0xff] }
 0x306   :  { %v15089_v5 = vcombine.low %v1478_v50, %v1482_v51 }
 0x307   :  { %9834 = vmatpush1.bf16.msra.mxu0 %v15041_v61  ;;  %10326 = vmatpush1.bf16.msra.mxu1 %v15043_v62  ;;  %v15083_v61 = vcombine.low %v1471_v40, %v1475_v41  ;;  %v15090_v62 = vcombine.high %v1478_v50, %v1482_v51  ;;  %v15115_v41 = vcombine.low %v1503_v24, %v1507_v27  ;;  %v1523_v50 = vld [vmem:[#allocation2 + $0x29e8] sm:$0xff] }
 0x308   :  { %9835 = vmatprep.subr.bf16.mxu0 %v15050_v63  ;;  %10327 = vmatprep.subr.bf16.mxu1 %v15052_v0  ;;  %v15092_v63 = vcombine.high %v1479_v53, %v1483_v55  ;;  %v1486_v0 = vld [vmem:[#allocation2 + $0x28c0] sm:$0xff] }
 0x309   :  { %v15097_v17 = vcombine.low %v1486_v0, %v1490_v2 }
 0x30b   :  { %9836 = vmatpush1.bf16.msra.mxu0 %v15049_v6  ;;  %10328 = vmatpush1.bf16.msra.mxu1 %v15051_v8  ;;  %v15091_v6 = vcombine.low %v1479_v53, %v1483_v55  ;;  %v15098_v8 = vcombine.high %v1486_v0, %v1490_v2  ;;  %v15123_v53 = vcombine.low %v1511_v36, %v1515_v37  ;;  %v1531_v0 = vld [vmem:[#allocation2 + $0x2a28] sm:$0xff] }
 0x30c   :  { %9837 = vmatprep.subr.bf16.mxu0 %v15058_v9  ;;  %10329 = vmatprep.subr.bf16.mxu1 %v15060_v10  ;;  %v15100_v9 = vcombine.high %v1487_v3, %v1491_v4  ;;  %v1494_v10 = vld [vmem:[#allocation2 + $0x2900] sm:$0xff] }
 0x30d   :  { %v15105_v28 = vcombine.low %v1494_v10, %v1498_v11 }
 0x30f   :  { %9838 = vmatpush1.bf16.msra.mxu0 %v15057_v18  ;;  %10330 = vmatpush1.bf16.msra.mxu1 %v15059_v19  ;;  %v15099_v18 = vcombine.low %v1487_v3, %v1491_v4  ;;  %v15106_v19 = vcombine.high %v1494_v10, %v1498_v11  ;;  %v1539_v10 = vld [vmem:[#allocation2 + $0x2a68] sm:$0xff] }
 0x310   :  { %9839 = vmatprep.subr.bf16.mxu0 %v15066_v20  ;;  %10331 = vmatprep.subr.bf16.mxu1 %v15068_v21  ;;  %v15108_v20 = vcombine.high %v1495_v13, %v1499_v15  ;;  %v1502_v21 = vld [vmem:[#allocation2 + $0x2940] sm:$0xff] }
 0x311   :  { %v15114_v31 = vcombine.high %v1502_v21, %v1506_v22  ;;  %v15113_v40 = vcombine.low %v1502_v21, %v1506_v22  ;;  %v1547_v21 = vld [vmem:[#allocation2 + $0x2aa8] sm:$0xff] }
 0x313   :  { %9840 = vmatpush1.bf16.msra.mxu0 %v15065_v30  ;;  %10332 = vmatpush1.bf16.msra.mxu1 %v15067_v32  ;;  %v15107_v30 = vcombine.low %v1495_v13, %v1499_v15  ;;  %v15116_v32 = vcombine.high %v1503_v24, %v1507_v27 }
 0x314   :  { %9850 = vmatprep.subr.bf16.mxu0 %v15074_v33  ;;  %10342 = vmatprep.subr.bf16.mxu1 %v15076_v35  ;;  %v1510_v33 = vld [vmem:[#allocation2 + $0x2980] sm:$0xff] }
 0x315   :  { %v1514_v35 = vld [vmem:[#allocation2 + $0x29a0] sm:$0xff] }
 0x316   :  { %9842 = vmatmul.mubr.bf16.vlgmr.msra.gmra.mrb[0].mxu0 %v16848_v38  ;;  %10334 = vmatmul.mubr.bf16.vlgmr.msra.gmra.mrb[0].mxu1 %v16848_v38  ;;  %v15122_v42 = vcombine.high %v1510_v33, %v1514_v35  ;;  %v15121_v51 = vcombine.low %v1510_v33, %v1514_v35  ;;  %v1555_v33 = vld [vmem:[#allocation2 + $0x2ae8] sm:$0xff] }
 0x317   :  { %9851 = vmatpush1.bf16.msra.mxu0 %v15073_v43  ;;  %10343 = vmatpush1.bf16.msra.mxu1 %v15075_v46  ;;  %v15124_v43 = vcombine.high %v1511_v36, %v1515_v37  ;;  %v1518_v46 = vld [vmem:[#allocation2 + $0x29c0] sm:$0xff] }
 0x318   :  { %9852 = vmatprep.subr.bf16.mxu0 %v15082_v47  ;;  %10344 = vmatprep.subr.bf16.mxu1 %v15084_v49  ;;  %v1522_v47 = vld [vmem:[#allocation2 + $0x29e0] sm:$0xff]  ;;  %v1519_v49 = vld [vmem:[#allocation2 + $0x29c8] sm:$0xff] }
 0x319   :  { %9882 = vmatprep.mubr.bf16.mxu0 %v16853_v52  ;;  %10374 = vmatprep.mubr.bf16.mxu1 %v16853_v52  ;;  %v15130_v55 = vcombine.high %v1518_v46, %v1522_v47  ;;  %v15129_v2 = vcombine.low %v1518_v46, %v1522_v47  ;;  %v15131_v3 = vcombine.low %v1519_v49, %v1523_v50  ;;  %v1563_v46 = vld [vmem:[#allocation2 + $0x2b28] sm:$0xff] }
 0x31b   :  { %9853 = vmatpush1.bf16.msra.mxu0 %v15081_v58  ;;  %10345 = vmatpush1.bf16.msra.mxu1 %v15083_v61  ;;  %v15132_v58 = vcombine.high %v1519_v49, %v1523_v50  ;;  %v1526_v61 = vld [vmem:[#allocation2 + $0x2a00] sm:$0xff] }
 0x31c   :  { %9854 = vmatprep.subr.bf16.mxu0 %v15090_v62  ;;  %10346 = vmatprep.subr.bf16.mxu1 %v15092_v63  ;;  %v1530_v62 = vld [vmem:[#allocation2 + $0x2a20] sm:$0xff]  ;;  %v1527_v63 = vld [vmem:[#allocation2 + $0x2a08] sm:$0xff] }
 0x31d   :  { %v15138_v4 = vcombine.high %v1526_v61, %v1530_v62  ;;  %v15137_v11 = vcombine.low %v1526_v61, %v1530_v62  ;;  %v15139_v13 = vcombine.low %v1527_v63, %v1531_v0  ;;  %v1571_v61 = vld [vmem:[#allocation2 + $0x2b68] sm:$0xff] }
 0x31f   :  { %9855 = vmatpush1.bf16.msra.mxu0 %v15089_v5  ;;  %10347 = vmatpush1.bf16.msra.mxu1 %v15091_v6  ;;  %v15140_v5 = vcombine.high %v1527_v63, %v1531_v0  ;;  %v1534_v6 = vld [vmem:[#allocation2 + $0x2a40] sm:$0xff] }
 0x320   :  { %9856 = vmatprep.subr.bf16.mxu0 %v15098_v8  ;;  %10348 = vmatprep.subr.bf16.mxu1 %v15100_v9  ;;  %v1538_v8 = vld [vmem:[#allocation2 + $0x2a60] sm:$0xff]  ;;  %v1535_v9 = vld [vmem:[#allocation2 + $0x2a48] sm:$0xff] }
 0x321   :  { %v15146_v15 = vcombine.high %v1534_v6, %v1538_v8  ;;  %v15145_v22 = vcombine.low %v1534_v6, %v1538_v8  ;;  %v15147_v24 = vcombine.low %v1535_v9, %v1539_v10  ;;  %v1579_v6 = vld [vmem:[#allocation2 + $0x2ba8] sm:$0xff] }
 0x323   :  { %9857 = vmatpush1.bf16.msra.mxu0 %v15097_v17  ;;  %10349 = vmatpush1.bf16.msra.mxu1 %v15099_v18  ;;  %v15148_v17 = vcombine.high %v1535_v9, %v1539_v10  ;;  %v1542_v18 = vld [vmem:[#allocation2 + $0x2a80] sm:$0xff] }
 0x324   :  { %9858 = vmatprep.subr.bf16.mxu0 %v15106_v19  ;;  %10350 = vmatprep.subr.bf16.mxu1 %v15108_v20  ;;  %v1546_v19 = vld [vmem:[#allocation2 + $0x2aa0] sm:$0xff]  ;;  %v1543_v20 = vld [vmem:[#allocation2 + $0x2a88] sm:$0xff] }
 0x325   :  { %v15154_v27 = vcombine.high %v1542_v18, %v1546_v19  ;;  %v15153_v35 = vcombine.low %v1542_v18, %v1546_v19  ;;  %v15155_v36 = vcombine.low %v1543_v20, %v1547_v21  ;;  %v1587_v18 = vld [vmem:[#allocation2 + $0x2be8] sm:$0xff] }
 0x327   :  { %9859 = vmatpush1.bf16.msra.mxu0 %v15105_v28  ;;  %10351 = vmatpush1.bf16.msra.mxu1 %v15107_v30  ;;  %v15156_v28 = vcombine.high %v1543_v20, %v1547_v21  ;;  %v1550_v30 = vld [vmem:[#allocation2 + $0x2ac0] sm:$0xff] }
 0x328   :  { %9860 = vmatprep.subr.bf16.mxu0 %v15114_v31  ;;  %10352 = vmatprep.subr.bf16.mxu1 %v15116_v32  ;;  %v1554_v31 = vld [vmem:[#allocation2 + $0x2ae0] sm:$0xff]  ;;  %v1551_v32 = vld [vmem:[#allocation2 + $0x2ac8] sm:$0xff] }
 0x329   :  { %v15162_v37 = vcombine.high %v1550_v30, %v1554_v31  ;;  %v15161_v47 = vcombine.low %v1550_v30, %v1554_v31  ;;  %v15163_v49 = vcombine.low %v1551_v32, %v1555_v33  ;;  %v1595_v30 = vld [vmem:[#allocation2 + $0x2c28] sm:$0xff] }
 0x32b   :  { %9861 = vmatpush1.bf16.msra.mxu0 %v15113_v40  ;;  %10353 = vmatpush1.bf16.msra.mxu1 %v15115_v41  ;;  %v15164_v40 = vcombine.high %v1551_v32, %v1555_v33  ;;  %v1558_v41 = vld [vmem:[#allocation2 + $0x2b00] sm:$0xff] }
 0x32c   :  { %9862 = vmatprep.subr.bf16.mxu0 %v15122_v42  ;;  %10354 = vmatprep.subr.bf16.mxu1 %v15124_v43  ;;  %v1562_v42 = vld [vmem:[#allocation2 + $0x2b20] sm:$0xff]  ;;  %v1559_v43 = vld [vmem:[#allocation2 + $0x2b08] sm:$0xff] }
 0x32d   :  { %v15170_v50 = vcombine.high %v1558_v41, %v1562_v42  ;;  %v15169_v62 = vcombine.low %v1558_v41, %v1562_v42  ;;  %v15171_v63 = vcombine.low %v1559_v43, %v1563_v46  ;;  %v154_v32 = vld [vmem:[%s16981_s0 + $0xa0] sm:$0xff]  ;;  %v1599_v42 = vld [vmem:[#allocation2 + $0x2c48] sm:$0xff] }
 0x32e   :  { %v16862_v41 = vpack.c.bf16 %v154_v32, %v154_v32 }
 0x32f   :  { %9863 = vmatpush1.bf16.msra.mxu0 %v15121_v51  ;;  %10355 = vmatpush1.bf16.msra.mxu1 %v15123_v53  ;;  %v15172_v51 = vcombine.high %v1559_v43, %v1563_v46  ;;  %v1566_v53 = vld [vmem:[#allocation2 + $0x2b40] sm:$0xff]  ;;  %v1603_v43 = vld [vmem:[#allocation2 + $0x2c68] sm:$0xff]  ;;  %v157_v46 = vld [vmem:[%s16981_s0 + $0xb8] sm:$0xff] }
 0x330   :  { %9864 = vmatprep.subr.bf16.mxu0 %v15130_v55  ;;  %10356 = vmatprep.subr.bf16.mxu1 %v15132_v58  ;;  %v1570_v55 = vld [vmem:[#allocation2 + $0x2b60] sm:$0xff]  ;;  %v1567_v58 = vld [vmem:[#allocation2 + $0x2b48] sm:$0xff] }
 0x331   :  { %v15178_v0 = vcombine.high %v1566_v53, %v1570_v55  ;;  %v15177_v8 = vcombine.low %v1566_v53, %v1570_v55  ;;  %v15179_v9 = vcombine.low %v1567_v58, %v1571_v61  ;;  %v1606_v53 = vld [vmem:[#allocation2 + $0x2c80] sm:$0xff] }
 0x332   :  { %v1610_v55 = vld [vmem:[#allocation2 + $0x2ca0] sm:$0xff] }
 0x333   :  { %9865 = vmatpush1.bf16.msra.mxu0 %v15129_v2  ;;  %10357 = vmatpush1.bf16.msra.mxu1 %v15131_v3  ;;  %v15180_v2 = vcombine.high %v1567_v58, %v1571_v61  ;;  %v1574_v3 = vld [vmem:[#allocation2 + $0x2b80] sm:$0xff]  ;;  %v16867_v58 = vpack.c.bf16 %v157_v46, %v157_v46  ;;  %v1607_v61 = vld [vmem:[#allocation2 + $0x2c88] sm:$0xff] }
 0x334   :  { %9866 = vmatprep.subr.bf16.mxu0 %v15138_v4  ;;  %10358 = vmatprep.subr.bf16.mxu1 %v15140_v5  ;;  %v1578_v4 = vld [vmem:[#allocation2 + $0x2ba0] sm:$0xff]  ;;  %v1575_v5 = vld [vmem:[#allocation2 + $0x2b88] sm:$0xff] }
 0x335   :  { %v15186_v10 = vcombine.high %v1574_v3, %v1578_v4  ;;  %v15185_v19 = vcombine.low %v1574_v3, %v1578_v4  ;;  %v15187_v20 = vcombine.low %v1575_v5, %v1579_v6  ;;  %v1614_v4 = vld [vmem:[#allocation2 + $0x2cc0] sm:$0xff] }
 0x337   :  { %9867 = vmatpush1.bf16.msra.mxu0 %v15137_v11  ;;  %10359 = vmatpush1.bf16.msra.mxu1 %v15139_v13  ;;  %v15188_v11 = vcombine.high %v1575_v5, %v1579_v6  ;;  %v1582_v13 = vld [vmem:[#allocation2 + $0x2bc0] sm:$0xff]  ;;  %v1615_v6 = vld [vmem:[#allocation2 + $0x2cc8] sm:$0xff] }
 0x338   :  { %9868 = vmatprep.subr.bf16.mxu0 %v15146_v15  ;;  %10360 = vmatprep.subr.bf16.mxu1 %v15148_v17  ;;  %v1586_v15 = vld [vmem:[#allocation2 + $0x2be0] sm:$0xff]  ;;  %v1583_v17 = vld [vmem:[#allocation2 + $0x2bc8] sm:$0xff] }
 0x339   :  { %v15194_v21 = vcombine.high %v1582_v13, %v1586_v15  ;;  %v15193_v31 = vcombine.low %v1582_v13, %v1586_v15  ;;  %v15195_v33 = vcombine.low %v1583_v17, %v1587_v18  ;;  %v1618_v5 = vld [vmem:[#allocation2 + $0x2ce0] sm:$0xff] }
 0x33a   :  { %v1622_v15 = vld [vmem:[#allocation2 + $0x2d00] sm:$0xff] }
 0x33b   :  { %9869 = vmatpush1.bf16.msra.mxu0 %v15145_v22  ;;  %10361 = vmatpush1.bf16.msra.mxu1 %v15147_v24  ;;  %v15196_v22 = vcombine.high %v1583_v17, %v1587_v18  ;;  %v1590_v24 = vld [vmem:[#allocation2 + $0x2c00] sm:$0xff]  ;;  %v1623_v18 = vld [vmem:[#allocation2 + $0x2d08] sm:$0xff] }
 0x33c   :  { %9870 = vmatprep.subr.bf16.mxu0 %v15154_v27  ;;  %10362 = vmatprep.subr.bf16.mxu1 %v15156_v28  ;;  %v1594_v27 = vld [vmem:[#allocation2 + $0x2c20] sm:$0xff]  ;;  %v1591_v28 = vld [vmem:[#allocation2 + $0x2c08] sm:$0xff] }
 0x33d   :  { %v1626_v17 = vld [vmem:[#allocation2 + $0x2d20] sm:$0xff] }
 0x33e   :  { %v15233_v32 = vcombine.low %v1622_v15, %v1626_v17 }
 0x33f   :  { %9871 = vmatpush1.bf16.msra.mxu0 %v15153_v35  ;;  %10363 = vmatpush1.bf16.msra.mxu1 %v15155_v36  ;;  %v15202_v35 = vcombine.high %v1590_v24, %v1594_v27  ;;  %v15204_v36 = vcombine.high %v1591_v28, %v1595_v30 }
 0x340   :  { %9872 = vmatprep.subr.bf16.mxu0 %v15162_v37  ;;  %10364 = vmatprep.subr.bf16.mxu1 %v15164_v40  ;;  %v1598_v37 = vld [vmem:[#allocation2 + $0x2c40] sm:$0xff] }
 0x341   :  { %v1602_v40 = vld [vmem:[#allocation2 + $0x2c60] sm:$0xff] }
 0x343   :  { %9873 = vmatpush1.bf16.msra.mxu0 %v15161_v47  ;;  %10365 = vmatpush1.bf16.msra.mxu1 %v15163_v49  ;;  %v15201_v47 = vcombine.low %v1590_v24, %v1594_v27  ;;  %v15203_v49 = vcombine.low %v1591_v28, %v1595_v30  ;;  %v1630_v27 = vld [vmem:[#allocation2 + $0x2d40] sm:$0xff]  ;;  %v1631_v30 = vld [vmem:[#allocation2 + $0x2d48] sm:$0xff] }
 0x344   :  { %9874 = vmatprep.subr.bf16.mxu0 %v15170_v50  ;;  %10366 = vmatprep.subr.bf16.mxu1 %v15172_v51  ;;  %v15210_v50 = vcombine.high %v1598_v37, %v1602_v40  ;;  %v15212_v51 = vcombine.high %v1599_v42, %v1603_v43  ;;  %v1634_v28 = vld [vmem:[#allocation2 + $0x2d60] sm:$0xff] }
 0x345   :  { %v15241_v46 = vcombine.low %v1630_v27, %v1634_v28 }
 0x347   :  { %9875 = vmatpush1.bf16.msra.mxu0 %v15169_v62  ;;  %10367 = vmatpush1.bf16.msra.mxu1 %v15171_v63  ;;  %v1611_v62 = vld [vmem:[#allocation2 + $0x2ca8] sm:$0xff]  ;;  %v15209_v63 = vcombine.low %v1598_v37, %v1602_v40  ;;  %v1638_v37 = vld [vmem:[#allocation2 + $0x2d80] sm:$0xff] }
 0x348   :  { %9876 = vmatprep.subr.bf16.mxu0 %v15178_v0  ;;  %10368 = vmatprep.subr.bf16.mxu1 %v15180_v2  ;;  %v15211_v0 = vcombine.low %v1599_v42, %v1603_v43  ;;  %v15218_v2 = vcombine.high %v1606_v53, %v1610_v55  ;;  %v15220_v3 = vcombine.high %v1607_v61, %v1611_v62  ;;  %v1642_v40 = vld [vmem:[#allocation2 + $0x2da0] sm:$0xff]  ;;  %v1639_v42 = vld [vmem:[#allocation2 + $0x2d88] sm:$0xff] }
 0x349   :  { %v1643_v43 = vld [vmem:[#allocation2 + $0x2da8] sm:$0xff] }
 0x34b   :  { %9877 = vmatpush1.bf16.msra.mxu0 %v15177_v8  ;;  %10369 = vmatpush1.bf16.msra.mxu1 %v15179_v9  ;;  %v1619_v8 = vld [vmem:[#allocation2 + $0x2ce8] sm:$0xff]  ;;  %v15217_v9 = vcombine.low %v1606_v53, %v1610_v55  ;;  %v1650_v53 = vld [vmem:[#allocation2 + $0x2de0] sm:$0xff] }
 0x34c   :  { %9878 = vmatprep.subr.bf16.mxu0 %v15186_v10  ;;  %10370 = vmatprep.subr.bf16.mxu1 %v15188_v11  ;;  %v15219_v10 = vcombine.low %v1607_v61, %v1611_v62  ;;  %v15226_v11 = vcombine.high %v1614_v4, %v1618_v5  ;;  %v15228_v13 = vcombine.high %v1615_v6, %v1619_v8  ;;  %v1647_v55 = vld [vmem:[#allocation2 + $0x2dc8] sm:$0xff] }
 0x34d   :  { %v1651_v61 = vld [vmem:[#allocation2 + $0x2de8] sm:$0xff]  ;;  %v15249_v62 = vcombine.low %v1638_v37, %v1642_v40 }
 0x34f   :  { %9879 = vmatpush1.bf16.msra.mxu0 %v15185_v19  ;;  %10371 = vmatpush1.bf16.msra.mxu1 %v15187_v20  ;;  %v1627_v19 = vld [vmem:[#allocation2 + $0x2d28] sm:$0xff]  ;;  %v15225_v20 = vcombine.low %v1614_v4, %v1618_v5  ;;  %v1658_v4 = vld [vmem:[#allocation2 + $0x2e20] sm:$0xff] }
 0x350   :  { %9880 = vmatprep.subr.bf16.mxu0 %v15194_v21  ;;  %10372 = vmatprep.subr.bf16.mxu1 %v15196_v22  ;;  %v15227_v21 = vcombine.low %v1615_v6, %v1619_v8  ;;  %v15234_v22 = vcombine.high %v1622_v15, %v1626_v17  ;;  %v15236_v24 = vcombine.high %v1623_v18, %v1627_v19  ;;  %v1655_v5 = vld [vmem:[#allocation2 + $0x2e08] sm:$0xff]  ;;  %v1666_v15 = vld [vmem:[#allocation2 + $0x2e60] sm:$0xff] }
 0x351   :  { %v1659_v6 = vld [vmem:[#allocation2 + $0x2e28] sm:$0xff] }
 0x352   :  { %v1663_v17 = vld [vmem:[#allocation2 + $0x2e48] sm:$0xff] }
 0x353   :  { %9881 = vmatpush1.bf16.msra.mxu0 %v15193_v31  ;;  %10373 = vmatpush1.bf16.msra.mxu1 %v15195_v33  ;;  %v1635_v31 = vld [vmem:[#allocation2 + $0x2d68] sm:$0xff]  ;;  %v15235_v33 = vcombine.low %v1623_v18, %v1627_v19 }
 0x354   :  { %9891 = vmatprep.subr.bf16.mxu0 %v15202_v35  ;;  %10383 = vmatprep.subr.bf16.mxu1 %v15204_v36  ;;  %v15242_v35 = vcombine.high %v1630_v27, %v1634_v28  ;;  %v15244_v36 = vcombine.high %v1631_v30, %v1635_v31  ;;  %v1667_v18 = vld [vmem:[#allocation2 + $0x2e68] sm:$0xff]  ;;  %v1674_v27 = vld [vmem:[#allocation2 + $0x2ea0] sm:$0xff] }
 0x355   :  { %v1671_v28 = vld [vmem:[#allocation2 + $0x2e88] sm:$0xff] }
 0x356   :  { %9883 = vmatmul.mubr.bf16.vlgmr.msra.gmra.mrb[0].mxu0 %v16862_v41  ;;  %10375 = vmatmul.mubr.bf16.vlgmr.msra.gmra.mrb[0].mxu1 %v16862_v41 }
 0x357   :  { %9892 = vmatpush1.bf16.msra.mxu0 %v15201_v47  ;;  %10384 = vmatpush1.bf16.msra.mxu1 %v15203_v49  ;;  %v15243_v47 = vcombine.low %v1631_v30, %v1635_v31  ;;  %v15250_v49 = vcombine.high %v1638_v37, %v1642_v40  ;;  %v1675_v30 = vld [vmem:[#allocation2 + $0x2ea8] sm:$0xff]  ;;  %v1682_v37 = vld [vmem:[#allocation2 + $0x2ee0] sm:$0xff] }
 0x358   :  { %9893 = vmatprep.subr.bf16.mxu0 %v15210_v50  ;;  %10385 = vmatprep.subr.bf16.mxu1 %v15212_v51  ;;  %v15252_v50 = vcombine.high %v1639_v42, %v1643_v43  ;;  %v1646_v51 = vld [vmem:[#allocation2 + $0x2dc0] sm:$0xff]  ;;  %v1679_v40 = vld [vmem:[#allocation2 + $0x2ec8] sm:$0xff] }
 0x359   :  { %9923 = vmatprep.mubr.bf16.mxu0 %v16867_v58  ;;  %10415 = vmatprep.mubr.bf16.mxu1 %v16867_v58  ;;  %v15257_v8 = vcombine.low %v1646_v51, %v1650_v53 }
 0x35b   :  { %9894 = vmatpush1.bf16.msra.mxu0 %v15209_v63  ;;  %10386 = vmatpush1.bf16.msra.mxu1 %v15211_v0  ;;  %v15251_v63 = vcombine.low %v1639_v42, %v1643_v43  ;;  %v15258_v0 = vcombine.high %v1646_v51, %v1650_v53  ;;  %v1683_v42 = vld [vmem:[#allocation2 + $0x2ee8] sm:$0xff]  ;;  %v1690_v51 = vld [vmem:[#allocation2 + $0x2f20] sm:$0xff] }
 0x35c   :  { %9895 = vmatprep.subr.bf16.mxu0 %v15218_v2  ;;  %10387 = vmatprep.subr.bf16.mxu1 %v15220_v3  ;;  %v15260_v2 = vcombine.high %v1647_v55, %v1651_v61  ;;  %v1654_v3 = vld [vmem:[#allocation2 + $0x2e00] sm:$0xff]  ;;  %v1687_v53 = vld [vmem:[#allocation2 + $0x2f08] sm:$0xff] }
 0x35d   :  { %v15265_v19 = vcombine.low %v1654_v3, %v1658_v4 }
 0x35f   :  { %9896 = vmatpush1.bf16.msra.mxu0 %v15217_v9  ;;  %10388 = vmatpush1.bf16.msra.mxu1 %v15219_v10  ;;  %v15259_v9 = vcombine.low %v1647_v55, %v1651_v61  ;;  %v15266_v10 = vcombine.high %v1654_v3, %v1658_v4  ;;  %v1691_v55 = vld [vmem:[#allocation2 + $0x2f28] sm:$0xff]  ;;  %v1698_v3 = vld [vmem:[#allocation2 + $0x2f60] sm:$0xff] }
 0x360   :  { %9897 = vmatprep.subr.bf16.mxu0 %v15226_v11  ;;  %10389 = vmatprep.subr.bf16.mxu1 %v15228_v13  ;;  %v15268_v11 = vcombine.high %v1655_v5, %v1659_v6  ;;  %v1662_v13 = vld [vmem:[#allocation2 + $0x2e40] sm:$0xff]  ;;  %v1695_v4 = vld [vmem:[#allocation2 + $0x2f48] sm:$0xff] }
 0x361   :  { %v15273_v31 = vcombine.low %v1662_v13, %v1666_v15 }
 0x363   :  { %9898 = vmatpush1.bf16.msra.mxu0 %v15225_v20  ;;  %10390 = vmatpush1.bf16.msra.mxu1 %v15227_v21  ;;  %v15267_v20 = vcombine.low %v1655_v5, %v1659_v6  ;;  %v15274_v21 = vcombine.high %v1662_v13, %v1666_v15  ;;  %v1699_v5 = vld [vmem:[#allocation2 + $0x2f68] sm:$0xff]  ;;  %v1706_v13 = vld [vmem:[#allocation2 + $0x2fa0] sm:$0xff] }
 0x364   :  { %9899 = vmatprep.subr.bf16.mxu0 %v15234_v22  ;;  %10391 = vmatprep.subr.bf16.mxu1 %v15236_v24  ;;  %v15276_v22 = vcombine.high %v1663_v17, %v1667_v18  ;;  %v1670_v24 = vld [vmem:[#allocation2 + $0x2e80] sm:$0xff]  ;;  %v1703_v15 = vld [vmem:[#allocation2 + $0x2f88] sm:$0xff] }
 0x365   :  { %v15281_v43 = vcombine.low %v1670_v24, %v1674_v27 }
 0x367   :  { %9900 = vmatpush1.bf16.msra.mxu0 %v15233_v32  ;;  %10392 = vmatpush1.bf16.msra.mxu1 %v15235_v33  ;;  %v15275_v32 = vcombine.low %v1663_v17, %v1667_v18  ;;  %v15282_v33 = vcombine.high %v1670_v24, %v1674_v27  ;;  %v1707_v17 = vld [vmem:[#allocation2 + $0x2fa8] sm:$0xff]  ;;  %v1714_v24 = vld [vmem:[#allocation2 + $0x2fe0] sm:$0xff] }
 0x368   :  { %9901 = vmatprep.subr.bf16.mxu0 %v15242_v35  ;;  %10393 = vmatprep.subr.bf16.mxu1 %v15244_v36  ;;  %v15284_v35 = vcombine.high %v1671_v28, %v1675_v30  ;;  %v1678_v36 = vld [vmem:[#allocation2 + $0x2ec0] sm:$0xff]  ;;  %v1711_v27 = vld [vmem:[#allocation2 + $0x2fc8] sm:$0xff] }
 0x369   :  { %v15289_v61 = vcombine.low %v1678_v36, %v1682_v37 }
 0x36b   :  { %9902 = vmatpush1.bf16.msra.mxu0 %v15241_v46  ;;  %10394 = vmatpush1.bf16.msra.mxu1 %v15243_v47  ;;  %v15283_v46 = vcombine.low %v1671_v28, %v1675_v30  ;;  %v15290_v47 = vcombine.high %v1678_v36, %v1682_v37  ;;  %v1715_v28 = vld [vmem:[#allocation2 + $0x2fe8] sm:$0xff]  ;;  %v188_v36 = vld [vmem:[#allocation2 + $0x30] sm:$0xff]  ;;  %v185_v37 = vld [vmem:[#allocation2 + $0x18] sm:$0xff] }
 0x36c   :  { %9903 = vmatprep.subr.bf16.mxu0 %v15250_v49  ;;  %10395 = vmatprep.subr.bf16.mxu1 %v15252_v50  ;;  %v15292_v49 = vcombine.high %v1679_v40, %v1683_v42  ;;  %v1686_v50 = vld [vmem:[#allocation2 + $0x2f00] sm:$0xff] }
 0x36d   :  { %v15297_v6 = vcombine.low %v1686_v50, %v1690_v51 }
 0x36f   :  { %9904 = vmatpush1.bf16.msra.mxu0 %v15249_v62  ;;  %10396 = vmatpush1.bf16.msra.mxu1 %v15251_v63  ;;  %v15291_v62 = vcombine.low %v1679_v40, %v1683_v42  ;;  %v15298_v63 = vcombine.high %v1686_v50, %v1690_v51  ;;  %v189_v40 = vld [vmem:[#allocation2 + $0x38] sm:$0xff]  ;;  %v192_v50 = vld [vmem:[#allocation2 + $0x50] sm:$0xff] }
 0x370   :  { %9905 = vmatprep.subr.bf16.mxu0 %v15258_v0  ;;  %10397 = vmatprep.subr.bf16.mxu1 %v15260_v2  ;;  %v15300_v0 = vcombine.high %v1687_v53, %v1691_v55  ;;  %v1694_v2 = vld [vmem:[#allocation2 + $0x2f40] sm:$0xff]  ;;  %v196_v51 = vld [vmem:[#allocation2 + $0x70] sm:$0xff] }
 0x371   :  { %v15305_v18 = vcombine.low %v1694_v2, %v1698_v3 }
 0x373   :  { %9906 = vmatpush1.bf16.msra.mxu0 %v15257_v8  ;;  %10398 = vmatpush1.bf16.msra.mxu1 %v15259_v9  ;;  %v15299_v8 = vcombine.low %v1687_v53, %v1691_v55  ;;  %v15306_v9 = vcombine.high %v1694_v2, %v1698_v3  ;;  %v193_v55 = vld [vmem:[#allocation2 + $0x58] sm:$0xff]  ;;  %v200_v3 = vld [vmem:[#allocation2 + $0x90] sm:$0xff] }
 0x374   :  { %9907 = vmatprep.subr.bf16.mxu0 %v15266_v10  ;;  %10399 = vmatprep.subr.bf16.mxu1 %v15268_v11  ;;  %v15308_v10 = vcombine.high %v1695_v4, %v1699_v5  ;;  %v1702_v11 = vld [vmem:[#allocation2 + $0x2f80] sm:$0xff] }
 0x375   :  { %v15313_v30 = vcombine.low %v1702_v11, %v1706_v13 }
 0x377   :  { %9908 = vmatpush1.bf16.msra.mxu0 %v15265_v19  ;;  %10400 = vmatpush1.bf16.msra.mxu1 %v15267_v20  ;;  %v15307_v19 = vcombine.low %v1695_v4, %v1699_v5  ;;  %v15314_v20 = vcombine.high %v1702_v11, %v1706_v13  ;;  %v204_v4 = vld [vmem:[#allocation2 + $0xb0] sm:$0xff]  ;;  %v201_v5 = vld [vmem:[#allocation2 + $0x98] sm:$0xff] }
 0x378   :  { %9909 = vmatprep.subr.bf16.mxu0 %v15274_v21  ;;  %10401 = vmatprep.subr.bf16.mxu1 %v15276_v22  ;;  %v15316_v21 = vcombine.high %v1703_v15, %v1707_v17  ;;  %v1710_v22 = vld [vmem:[#allocation2 + $0x2fc0] sm:$0xff]  ;;  %v208_v13 = vld [vmem:[#allocation2 + $0xd0] sm:$0xff] }
 0x379   :  { %v15321_v42 = vcombine.low %v1710_v22, %v1714_v24 }
 0x37b   :  { %9910 = vmatpush1.bf16.msra.mxu0 %v15273_v31  ;;  %10402 = vmatpush1.bf16.msra.mxu1 %v15275_v32  ;;  %v15315_v31 = vcombine.low %v1703_v15, %v1707_v17  ;;  %v15322_v32 = vcombine.high %v1710_v22, %v1714_v24  ;;  %v212_v15 = vld [vmem:[#allocation2 + $0xf0] sm:$0xff]  ;;  %v209_v17 = vld [vmem:[#allocation2 + $0xd8] sm:$0xff] }
 0x37c   :  { %9911 = vmatprep.subr.bf16.mxu0 %v15282_v33  ;;  %10403 = vmatprep.subr.bf16.mxu1 %v15284_v35  ;;  %v15324_v33 = vcombine.high %v1711_v27, %v1715_v28  ;;  %v184_v35 = vld [vmem:[#allocation2 + $0x10] sm:$0xff] }
 0x37d   :  { %v216_v24 = vld [vmem:[#allocation2 + $0x110] sm:$0xff] }
 0x37f   :  { %9912 = vmatpush1.bf16.msra.mxu0 %v15281_v43  ;;  %10404 = vmatpush1.bf16.msra.mxu1 %v15283_v46  ;;  %v156_v43 = vld [vmem:[%s16981_s0 + $0xb0] sm:$0xff]  ;;  %v15323_v46 = vcombine.low %v1711_v27, %v1715_v28  ;;  %v217_v28 = vld [vmem:[#allocation2 + $0x118] sm:$0xff] }
 0x380   :  { %9913 = vmatprep.subr.bf16.mxu0 %v15290_v47  ;;  %10405 = vmatprep.subr.bf16.mxu1 %v15292_v49  ;;  %v13798_v47 = vcombine.high %v184_v35, %v188_v36  ;;  %v13800_v49 = vcombine.high %v185_v37, %v189_v40  ;;  %v16876_v53 = vpack.c.bf16 %v156_v43, %v156_v43  ;;  %v220_v27 = vld [vmem:[#allocation2 + $0x130] sm:$0xff] }
 0x383   :  { %9914 = vmatpush1.bf16.msra.mxu0 %v15289_v61  ;;  %10406 = vmatpush1.bf16.msra.mxu1 %v15291_v62  ;;  %v197_v61 = vld [vmem:[#allocation2 + $0x78] sm:$0xff]  ;;  %v13797_v62 = vcombine.low %v184_v35, %v188_v36  ;;  %v224_v35 = vld [vmem:[#allocation2 + $0x150] sm:$0xff] }
 0x384   :  { %9915 = vmatprep.subr.bf16.mxu0 %v15298_v63  ;;  %10407 = vmatprep.subr.bf16.mxu1 %v15300_v0  ;;  %v13799_v63 = vcombine.low %v185_v37, %v189_v40  ;;  %v13806_v0 = vcombine.high %v192_v50, %v196_v51  ;;  %v13808_v2 = vcombine.high %v193_v55, %v197_v61  ;;  %v228_v36 = vld [vmem:[#allocation2 + $0x170] sm:$0xff]  ;;  %v225_v37 = vld [vmem:[#allocation2 + $0x158] sm:$0xff] }
 0x385   :  { %v229_v40 = vld [vmem:[#allocation2 + $0x178] sm:$0xff] }
 0x387   :  { %9916 = vmatpush1.bf16.msra.mxu0 %v15297_v6  ;;  %10408 = vmatpush1.bf16.msra.mxu1 %v15299_v8  ;;  %v205_v6 = vld [vmem:[#allocation2 + $0xb8] sm:$0xff]  ;;  %v13805_v8 = vcombine.low %v192_v50, %v196_v51  ;;  %v236_v50 = vld [vmem:[#allocation2 + $0x1b0] sm:$0xff] }
 0x388   :  { %9917 = vmatprep.subr.bf16.mxu0 %v15306_v9  ;;  %10409 = vmatprep.subr.bf16.mxu1 %v15308_v10  ;;  %v13807_v9 = vcombine.low %v193_v55, %v197_v61  ;;  %v13814_v10 = vcombine.high %v200_v3, %v204_v4  ;;  %v13816_v11 = vcombine.high %v201_v5, %v205_v6  ;;  %v233_v51 = vld [vmem:[#allocation2 + $0x198] sm:$0xff] }
 0x389   :  { %v237_v55 = vld [vmem:[#allocation2 + $0x1b8] sm:$0xff]  ;;  %v13837_v61 = vcombine.low %v224_v35, %v228_v36 }
 0x38b   :  { %9918 = vmatpush1.bf16.msra.mxu0 %v15305_v18  ;;  %10410 = vmatpush1.bf16.msra.mxu1 %v15307_v19  ;;  %v213_v18 = vld [vmem:[#allocation2 + $0xf8] sm:$0xff]  ;;  %v13813_v19 = vcombine.low %v200_v3, %v204_v4  ;;  %v244_v3 = vld [vmem:[#allocation2 + $0x1f0] sm:$0xff] }
 0x38c   :  { %9919 = vmatprep.subr.bf16.mxu0 %v15314_v20  ;;  %10411 = vmatprep.subr.bf16.mxu1 %v15316_v21  ;;  %v13815_v20 = vcombine.low %v201_v5, %v205_v6  ;;  %v13822_v21 = vcombine.high %v208_v13, %v212_v15  ;;  %v13824_v22 = vcombine.high %v209_v17, %v213_v18  ;;  %v241_v4 = vld [vmem:[#allocation2 + $0x1d8] sm:$0xff] }
 0x38d   :  { %v245_v5 = vld [vmem:[#allocation2 + $0x1f8] sm:$0xff] }
 0x38f   :  { %9920 = vmatpush1.bf16.msra.mxu0 %v15313_v30  ;;  %10412 = vmatpush1.bf16.msra.mxu1 %v15315_v31  ;;  %v221_v30 = vld [vmem:[#allocation2 + $0x138] sm:$0xff]  ;;  %v13821_v31 = vcombine.low %v208_v13, %v212_v15  ;;  %v252_v13 = vld [vmem:[#allocation2 + $0x230] sm:$0xff] }
 0x390   :  { %9921 = vmatprep.subr.bf16.mxu0 %v15322_v32  ;;  %10413 = vmatprep.subr.bf16.mxu1 %v15324_v33  ;;  %v13823_v32 = vcombine.low %v209_v17, %v213_v18  ;;  %v13830_v33 = vcombine.high %v216_v24, %v220_v27  ;;  %v13831_v43 = vcombine.low %v217_v28, %v221_v30  ;;  %v249_v15 = vld [vmem:[#allocation2 + $0x218] sm:$0xff] }
 0x391   :  { %v253_v17 = vld [vmem:[#allocation2 + $0x238] sm:$0xff] }
 0x393   :  { %9922 = vmatpush1.bf16.msra.mxu0 %v15321_v42  ;;  %10414 = vmatpush1.bf16.msra.mxu1 %v15323_v46  ;;  %v13829_v42 = vcombine.low %v216_v24, %v220_v27  ;;  %v13838_v46 = vcombine.high %v224_v35, %v228_v36  ;;  %v260_v24 = vld [vmem:[#allocation2 + $0x270] sm:$0xff]  ;;  %v257_v27 = vld [vmem:[#allocation2 + $0x258] sm:$0xff] }
 0x394   :  { %10424 = vmatprep.subr.bf16.mxu0 %v13798_v47  ;;  %10916 = vmatprep.subr.bf16.mxu1 %v13800_v49  ;;  %v13840_v47 = vcombine.high %v225_v37, %v229_v40  ;;  %v232_v49 = vld [vmem:[#allocation2 + $0x190] sm:$0xff]  ;;  %v265_v36 = vld [vmem:[#allocation2 + $0x298] sm:$0xff] }
 0x395   :  { %v13845_v6 = vcombine.low %v232_v49, %v236_v50  ;;  %v268_v35 = vld [vmem:[#allocation2 + $0x2b0] sm:$0xff] }
 0x396   :  { %9924 = vmatmul.mubr.bf16.vlgmr.msra.gmra.mrb[0].mxu0 %v16876_v53  ;;  %10416 = vmatmul.mubr.bf16.vlgmr.msra.gmra.mrb[0].mxu1 %v16876_v53 }
 0x397   :  { %10425 = vmatpush1.bf16.msra.mxu0 %v13797_v62  ;;  %10917 = vmatpush1.bf16.msra.mxu1 %v13799_v63  ;;  %v13839_v62 = vcombine.low %v225_v37, %v229_v40  ;;  %v13846_v63 = vcombine.high %v232_v49, %v236_v50  ;;  %v269_v37 = vld [vmem:[#allocation2 + $0x2b8] sm:$0xff]  ;;  %v276_v49 = vld [vmem:[#allocation2 + $0x2f0] sm:$0xff] }
 0x398   :  { %10426 = vmatprep.subr.bf16.mxu0 %v13806_v0  ;;  %10918 = vmatprep.subr.bf16.mxu1 %v13808_v2  ;;  %v13848_v0 = vcombine.high %v233_v51, %v237_v55  ;;  %v240_v2 = vld [vmem:[#allocation2 + $0x1d0] sm:$0xff]  ;;  %v273_v50 = vld [vmem:[#allocation2 + $0x2d8] sm:$0xff] }
 0x399   :  { %10456 = vmatprep.mubr.bf16.mxu0 %v16715_v57  ;;  %10948 = vmatprep.mubr.bf16.mxu1 %v16715_v57  ;;  %v13832_v57 = vcombine.high %v217_v28, %v221_v30  ;;  %v13853_v18 = vcombine.low %v240_v2, %v244_v3  ;;  %v261_v28 = vld [vmem:[#allocation2 + $0x278] sm:$0xff] }
 0x39b   :  { %10427 = vmatpush1.bf16.msra.mxu0 %v13805_v8  ;;  %10919 = vmatpush1.bf16.msra.mxu1 %v13807_v9  ;;  %v13847_v8 = vcombine.low %v233_v51, %v237_v55  ;;  %v13854_v9 = vcombine.high %v240_v2, %v244_v3  ;;  %v277_v51 = vld [vmem:[#allocation2 + $0x2f8] sm:$0xff]  ;;  %v284_v2 = vld [vmem:[#allocation2 + $0x330] sm:$0xff] }
 0x39c   :  { %10428 = vmatprep.subr.bf16.mxu0 %v13814_v10  ;;  %10920 = vmatprep.subr.bf16.mxu1 %v13816_v11  ;;  %v13856_v10 = vcombine.high %v241_v4, %v245_v5  ;;  %v248_v11 = vld [vmem:[#allocation2 + $0x210] sm:$0xff]  ;;  %v281_v3 = vld [vmem:[#allocation2 + $0x318] sm:$0xff] }
 0x39d   :  { %v13861_v30 = vcombine.low %v248_v11, %v252_v13 }
 0x39f   :  { %10429 = vmatpush1.bf16.msra.mxu0 %v13813_v19  ;;  %10921 = vmatpush1.bf16.msra.mxu1 %v13815_v20  ;;  %v13855_v19 = vcombine.low %v241_v4, %v245_v5  ;;  %v13862_v20 = vcombine.high %v248_v11, %v252_v13  ;;  %v285_v4 = vld [vmem:[#allocation2 + $0x338] sm:$0xff]  ;;  %v292_v11 = vld [vmem:[#allocation2 + $0x370] sm:$0xff] }
 0x3a0   :  { %10430 = vmatprep.subr.bf16.mxu0 %v13822_v21  ;;  %10922 = vmatprep.subr.bf16.mxu1 %v13824_v22  ;;  %v13864_v21 = vcombine.high %v249_v15, %v253_v17  ;;  %v256_v22 = vld [vmem:[#allocation2 + $0x250] sm:$0xff]  ;;  %v289_v13 = vld [vmem:[#allocation2 + $0x358] sm:$0xff] }
 0x3a1   :  { %v13869_v40 = vcombine.low %v256_v22, %v260_v24 }
 0x3a3   :  { %10431 = vmatpush1.bf16.msra.mxu0 %v13821_v31  ;;  %10923 = vmatpush1.bf16.msra.mxu1 %v13823_v32  ;;  %v13863_v31 = vcombine.low %v249_v15, %v253_v17  ;;  %v13870_v32 = vcombine.high %v256_v22, %v260_v24  ;;  %v293_v15 = vld [vmem:[#allocation2 + $0x378] sm:$0xff]  ;;  %v300_v22 = vld [vmem:[#allocation2 + $0x3b0] sm:$0xff] }
 0x3a4   :  { %10432 = vmatprep.subr.bf16.mxu0 %v13830_v33  ;;  %10924 = vmatprep.subr.bf16.mxu1 %v13832_v57  ;;  %v13872_v33 = vcombine.high %v257_v27, %v261_v28  ;;  %v264_v57 = vld [vmem:[#allocation2 + $0x290] sm:$0xff]  ;;  %v297_v24 = vld [vmem:[#allocation2 + $0x398] sm:$0xff] }
 0x3a5   :  { %v13877_v55 = vcombine.low %v264_v57, %v268_v35 }
 0x3a7   :  { %10433 = vmatpush1.bf16.msra.mxu0 %v13829_v42  ;;  %10925 = vmatpush1.bf16.msra.mxu1 %v13831_v43  ;;  %v13871_v42 = vcombine.low %v257_v27, %v261_v28  ;;  %v13878_v43 = vcombine.high %v264_v57, %v268_v35  ;;  %v301_v27 = vld [vmem:[#allocation2 + $0x3b8] sm:$0xff]  ;;  %v308_v57 = vld [vmem:[#allocation2 + $0x3f0] sm:$0xff] }
 0x3a8   :  { %10434 = vmatprep.subr.bf16.mxu0 %v13838_v46  ;;  %10926 = vmatprep.subr.bf16.mxu1 %v13840_v47  ;;  %v13880_v46 = vcombine.high %v265_v36, %v269_v37  ;;  %v272_v47 = vld [vmem:[#allocation2 + $0x2d0] sm:$0xff]  ;;  %v305_v35 = vld [vmem:[#allocation2 + $0x3d8] sm:$0xff] }
 0x3a9   :  { %v13885_v5 = vcombine.low %v272_v47, %v276_v49 }
 0x3ab   :  { %10435 = vmatpush1.bf16.msra.mxu0 %v13837_v61  ;;  %10927 = vmatpush1.bf16.msra.mxu1 %v13839_v62  ;;  %v13879_v61 = vcombine.low %v265_v36, %v269_v37  ;;  %v13886_v62 = vcombine.high %v272_v47, %v276_v49  ;;  %v309_v36 = vld [vmem:[#allocation2 + $0x3f8] sm:$0xff]  ;;  %v316_v47 = vld [vmem:[#allocation2 + $0x430] sm:$0xff] }
 0x3ac   :  { %10436 = vmatprep.subr.bf16.mxu0 %v13846_v63  ;;  %10928 = vmatprep.subr.bf16.mxu1 %v13848_v0  ;;  %v13888_v63 = vcombine.high %v273_v50, %v277_v51  ;;  %v280_v0 = vld [vmem:[#allocation2 + $0x310] sm:$0xff]  ;;  %v313_v49 = vld [vmem:[#allocation2 + $0x418] sm:$0xff] }
 0x3ad   :  { %v13893_v17 = vcombine.low %v280_v0, %v284_v2 }
 0x3af   :  { %10437 = vmatpush1.bf16.msra.mxu0 %v13845_v6  ;;  %10929 = vmatpush1.bf16.msra.mxu1 %v13847_v8  ;;  %v13887_v6 = vcombine.low %v273_v50, %v277_v51  ;;  %v13894_v8 = vcombine.high %v280_v0, %v284_v2  ;;  %v317_v50 = vld [vmem:[#allocation2 + $0x438] sm:$0xff]  ;;  %v324_v0 = vld [vmem:[#allocation2 + $0x470] sm:$0xff] }
 0x3b0   :  { %10438 = vmatprep.subr.bf16.mxu0 %v13854_v9  ;;  %10930 = vmatprep.subr.bf16.mxu1 %v13856_v10  ;;  %v13896_v9 = vcombine.high %v281_v3, %v285_v4  ;;  %v288_v10 = vld [vmem:[#allocation2 + $0x350] sm:$0xff]  ;;  %v321_v2 = vld [vmem:[#allocation2 + $0x458] sm:$0xff] }
 0x3b1   :  { %v13901_v28 = vcombine.low %v288_v10, %v292_v11 }
 0x3b3   :  { %10439 = vmatpush1.bf16.msra.mxu0 %v13853_v18  ;;  %10931 = vmatpush1.bf16.msra.mxu1 %v13855_v19  ;;  %v13895_v18 = vcombine.low %v281_v3, %v285_v4  ;;  %v13902_v19 = vcombine.high %v288_v10, %v292_v11  ;;  %v325_v3 = vld [vmem:[#allocation2 + $0x478] sm:$0xff]  ;;  %v332_v10 = vld [vmem:[#allocation2 + $0x4b0] sm:$0xff] }
 0x3b4   :  { %10440 = vmatprep.subr.bf16.mxu0 %v13862_v20  ;;  %10932 = vmatprep.subr.bf16.mxu1 %v13864_v21  ;;  %v13904_v20 = vcombine.high %v289_v13, %v293_v15  ;;  %v296_v21 = vld [vmem:[#allocation2 + $0x390] sm:$0xff]  ;;  %v329_v11 = vld [vmem:[#allocation2 + $0x498] sm:$0xff] }
 0x3b5   :  { %v13909_v37 = vcombine.low %v296_v21, %v300_v22 }
 0x3b7   :  { %10441 = vmatpush1.bf16.msra.mxu0 %v13861_v30  ;;  %10933 = vmatpush1.bf16.msra.mxu1 %v13863_v31  ;;  %v13903_v30 = vcombine.low %v289_v13, %v293_v15  ;;  %v13910_v31 = vcombine.high %v296_v21, %v300_v22  ;;  %v333_v13 = vld [vmem:[#allocation2 + $0x4b8] sm:$0xff]  ;;  %v340_v21 = vld [vmem:[#allocation2 + $0x4f0] sm:$0xff] }
 0x3b8   :  { %10442 = vmatprep.subr.bf16.mxu0 %v13870_v32  ;;  %10934 = vmatprep.subr.bf16.mxu1 %v13872_v33  ;;  %v13912_v32 = vcombine.high %v297_v24, %v301_v27  ;;  %v304_v33 = vld [vmem:[#allocation2 + $0x3d0] sm:$0xff]  ;;  %v337_v22 = vld [vmem:[#allocation2 + $0x4d8] sm:$0xff] }
 0x3b9   :  { %v13917_v51 = vcombine.low %v304_v33, %v308_v57 }
 0x3bb   :  { %10443 = vmatpush1.bf16.msra.mxu0 %v13869_v40  ;;  %10935 = vmatpush1.bf16.msra.mxu1 %v13871_v42  ;;  %v13911_v40 = vcombine.low %v297_v24, %v301_v27  ;;  %v13918_v42 = vcombine.high %v304_v33, %v308_v57  ;;  %v341_v24 = vld [vmem:[#allocation2 + $0x4f8] sm:$0xff] }
 0x3bc   :  { %10444 = vmatprep.subr.bf16.mxu0 %v13878_v43  ;;  %10936 = vmatprep.subr.bf16.mxu1 %v13880_v46  ;;  %v13920_v43 = vcombine.high %v305_v35, %v309_v36  ;;  %v312_v46 = vld [vmem:[#allocation2 + $0x410] sm:$0xff]  ;;  %v345_v33 = vld [vmem:[#allocation2 + $0x518] sm:$0xff] }
 0x3bd   :  { %v13925_v4 = vcombine.low %v312_v46, %v316_v47  ;;  %v349_v57 = vld [vmem:[#allocation2 + $0x538] sm:$0xff] }
 0x3bf   :  { %10445 = vmatpush1.bf16.msra.mxu0 %v13877_v55  ;;  %10937 = vmatpush1.bf16.msra.mxu1 %v13879_v61  ;;  %v13919_v55 = vcombine.low %v305_v35, %v309_v36  ;;  %v13926_v61 = vcombine.high %v312_v46, %v316_v47  ;;  %v13951_v36 = vcombine.low %v337_v22, %v341_v24  ;;  %v357_v46 = vld [vmem:[#allocation2 + $0x578] sm:$0xff] }
 0x3c0   :  { %10446 = vmatprep.subr.bf16.mxu0 %v13886_v62  ;;  %10938 = vmatprep.subr.bf16.mxu1 %v13888_v63  ;;  %v13928_v62 = vcombine.high %v313_v49, %v317_v50  ;;  %v320_v63 = vld [vmem:[#allocation2 + $0x450] sm:$0xff] }
 0x3c1   :  { %v13933_v15 = vcombine.low %v320_v63, %v324_v0 }
 0x3c3   :  { %10447 = vmatpush1.bf16.msra.mxu0 %v13885_v5  ;;  %10939 = vmatpush1.bf16.msra.mxu1 %v13887_v6  ;;  %v13927_v5 = vcombine.low %v313_v49, %v317_v50  ;;  %v13934_v6 = vcombine.high %v320_v63, %v324_v0  ;;  %v13959_v49 = vcombine.low %v345_v33, %v349_v57  ;;  %v365_v63 = vld [vmem:[#allocation2 + $0x5b8] sm:$0xff] }
 0x3c4   :  { %10448 = vmatprep.subr.bf16.mxu0 %v13894_v8  ;;  %10940 = vmatprep.subr.bf16.mxu1 %v13896_v9  ;;  %v13936_v8 = vcombine.high %v321_v2, %v325_v3  ;;  %v328_v9 = vld [vmem:[#allocation2 + $0x490] sm:$0xff] }
 0x3c5   :  { %v13941_v27 = vcombine.low %v328_v9, %v332_v10 }
 0x3c7   :  { %10449 = vmatpush1.bf16.msra.mxu0 %v13893_v17  ;;  %10941 = vmatpush1.bf16.msra.mxu1 %v13895_v18  ;;  %v13935_v17 = vcombine.low %v321_v2, %v325_v3  ;;  %v13942_v18 = vcombine.high %v328_v9, %v332_v10  ;;  %v373_v9 = vld [vmem:[#allocation2 + $0x5f8] sm:$0xff] }
 0x3c8   :  { %10450 = vmatprep.subr.bf16.mxu0 %v13902_v19  ;;  %10942 = vmatprep.subr.bf16.mxu1 %v13904_v20  ;;  %v13944_v19 = vcombine.high %v329_v11, %v333_v13  ;;  %v336_v20 = vld [vmem:[#allocation2 + $0x4d0] sm:$0xff] }
 0x3c9   :  { %v13949_v35 = vcombine.low %v336_v20, %v340_v21 }
 0x3cb   :  { %10451 = vmatpush1.bf16.msra.mxu0 %v13901_v28  ;;  %10943 = vmatpush1.bf16.msra.mxu1 %v13903_v30  ;;  %v13950_v28 = vcombine.high %v336_v20, %v340_v21  ;;  %v13952_v30 = vcombine.high %v337_v22, %v341_v24  ;;  %v381_v20 = vld [vmem:[#allocation2 + $0x638] sm:$0xff] }
 0x3cc   :  { %10452 = vmatprep.subr.bf16.mxu0 %v13910_v31  ;;  %10944 = vmatprep.subr.bf16.mxu1 %v13912_v32  ;;  %v344_v31 = vld [vmem:[#allocation2 + $0x510] sm:$0xff] }
 0x3cd   :  { %v348_v32 = vld [vmem:[#allocation2 + $0x530] sm:$0xff] }
 0x3ce   :  { %v13957_v47 = vcombine.low %v344_v31, %v348_v32 }
 0x3cf   :  { %10453 = vmatpush1.bf16.msra.mxu0 %v13909_v37  ;;  %10945 = vmatpush1.bf16.msra.mxu1 %v13911_v40  ;;  %v13958_v37 = vcombine.high %v344_v31, %v348_v32  ;;  %v352_v40 = vld [vmem:[#allocation2 + $0x550] sm:$0xff]  ;;  %v389_v31 = vld [vmem:[#allocation2 + $0x678] sm:$0xff] }
 0x3d0   :  { %10454 = vmatprep.subr.bf16.mxu0 %v13918_v42  ;;  %10946 = vmatprep.subr.bf16.mxu1 %v13920_v43  ;;  %v356_v42 = vld [vmem:[#allocation2 + $0x570] sm:$0xff]  ;;  %v353_v43 = vld [vmem:[#allocation2 + $0x558] sm:$0xff] }
 0x3d1   :  { %v13966_v50 = vcombine.high %v352_v40, %v356_v42  ;;  %v13965_v0 = vcombine.low %v352_v40, %v356_v42  ;;  %v13967_v2 = vcombine.low %v353_v43, %v357_v46  ;;  %v397_v40 = vld [vmem:[#allocation2 + $0x6b8] sm:$0xff] }
 0x3d3   :  { %10455 = vmatpush1.bf16.msra.mxu0 %v13917_v51  ;;  %10947 = vmatpush1.bf16.msra.mxu1 %v13919_v55  ;;  %v13968_v51 = vcombine.high %v353_v43, %v357_v46  ;;  %v360_v55 = vld [vmem:[#allocation2 + $0x590] sm:$0xff] }
 0x3d4   :  { %10465 = vmatprep.subr.bf16.mxu0 %v13926_v61  ;;  %10957 = vmatprep.subr.bf16.mxu1 %v13928_v62  ;;  %v364_v61 = vld [vmem:[#allocation2 + $0x5b0] sm:$0xff]  ;;  %v361_v62 = vld [vmem:[#allocation2 + $0x598] sm:$0xff] }
 0x3d5   :  { %v13974_v3 = vcombine.high %v360_v55, %v364_v61  ;;  %v13973_v10 = vcombine.low %v360_v55, %v364_v61  ;;  %v405_v55 = vld [vmem:[#allocation2 + $0x6f8] sm:$0xff] }
 0x3d6   :  { %10457 = vmatmul.mubr.bf16.vlgmr.msra.gmra.mrb[4].mxu0 %v16722_v12  ;;  %10949 = vmatmul.mubr.bf16.vlgmr.msra.gmra.mrb[4].mxu1 %v16722_v12  ;;  %v13943_v12 = vcombine.low %v329_v11, %v333_v13  ;;  %v13975_v11 = vcombine.low %v361_v62, %v365_v63 }
 0x3d7   :  { %10466 = vmatpush1.bf16.msra.mxu0 %v13925_v4  ;;  %10958 = vmatpush1.bf16.msra.mxu1 %v13927_v5  ;;  %v13976_v4 = vcombine.high %v361_v62, %v365_v63  ;;  %v368_v5 = vld [vmem:[#allocation2 + $0x5d0] sm:$0xff] }
 0x3d8   :  { %10467 = vmatprep.subr.bf16.mxu0 %v13934_v6  ;;  %10959 = vmatprep.subr.bf16.mxu1 %v13936_v8  ;;  %v372_v6 = vld [vmem:[#allocation2 + $0x5f0] sm:$0xff]  ;;  %v369_v8 = vld [vmem:[#allocation2 + $0x5d8] sm:$0xff] }
 0x3d9   :  { %10497 = vmatprep.mubr.bf16.mxu0 %v16727_v23  ;;  %10989 = vmatprep.mubr.bf16.mxu1 %v16727_v23  ;;  %v13960_v23 = vcombine.high %v345_v33, %v349_v57  ;;  %v13982_v13 = vcombine.high %v368_v5, %v372_v6  ;;  %v13981_v21 = vcombine.low %v368_v5, %v372_v6  ;;  %v413_v5 = vld [vmem:[#allocation2 + $0x738] sm:$0xff] }
 0x3da   :  { %v13983_v22 = vcombine.low %v369_v8, %v373_v9 }
 0x3db   :  { %10468 = vmatpush1.bf16.msra.mxu0 %v13933_v15  ;;  %10960 = vmatpush1.bf16.msra.mxu1 %v13935_v17  ;;  %v13984_v15 = vcombine.high %v369_v8, %v373_v9  ;;  %v376_v17 = vld [vmem:[#allocation2 + $0x610] sm:$0xff] }
 0x3dc   :  { %10469 = vmatprep.subr.bf16.mxu0 %v13942_v18  ;;  %10961 = vmatprep.subr.bf16.mxu1 %v13944_v19  ;;  %v380_v18 = vld [vmem:[#allocation2 + $0x630] sm:$0xff]  ;;  %v377_v19 = vld [vmem:[#allocation2 + $0x618] sm:$0xff] }
 0x3dd   :  { %v13990_v24 = vcombine.high %v376_v17, %v380_v18  ;;  %v13989_v32 = vcombine.low %v376_v17, %v380_v18  ;;  %v13991_v33 = vcombine.low %v377_v19, %v381_v20  ;;  %v421_v17 = vld [vmem:[#allocation2 + $0x778] sm:$0xff] }
 0x3df   :  { %10470 = vmatpush1.bf16.msra.mxu0 %v13941_v27  ;;  %10962 = vmatpush1.bf16.msra.mxu1 %v13943_v12  ;;  %v13992_v27 = vcombine.high %v377_v19, %v381_v20  ;;  %v384_v12 = vld [vmem:[#allocation2 + $0x650] sm:$0xff] }
 0x3e0   :  { %10471 = vmatprep.subr.bf16.mxu0 %v13950_v28  ;;  %10963 = vmatprep.subr.bf16.mxu1 %v13952_v30  ;;  %v388_v28 = vld [vmem:[#allocation2 + $0x670] sm:$0xff]  ;;  %v385_v30 = vld [vmem:[#allocation2 + $0x658] sm:$0xff] }
 0x3e1   :  { %v13998_v57 = vcombine.high %v384_v12, %v388_v28  ;;  %v13997_v42 = vcombine.low %v384_v12, %v388_v28  ;;  %v13999_v43 = vcombine.low %v385_v30, %v389_v31  ;;  %v429_v12 = vld [vmem:[#allocation2 + $0x7b8] sm:$0xff] }
 0x3e3   :  { %10472 = vmatpush1.bf16.msra.mxu0 %v13949_v35  ;;  %10964 = vmatpush1.bf16.msra.mxu1 %v13951_v36  ;;  %v14000_v35 = vcombine.high %v385_v30, %v389_v31  ;;  %v392_v36 = vld [vmem:[#allocation2 + $0x690] sm:$0xff] }
 0x3e4   :  { %10473 = vmatprep.subr.bf16.mxu0 %v13958_v37  ;;  %10965 = vmatprep.subr.bf16.mxu1 %v13960_v23  ;;  %v396_v37 = vld [vmem:[#allocation2 + $0x6b0] sm:$0xff]  ;;  %v393_v23 = vld [vmem:[#allocation2 + $0x698] sm:$0xff] }
 0x3e5   :  { %v14006_v46 = vcombine.high %v392_v36, %v396_v37  ;;  %v14005_v61 = vcombine.low %v392_v36, %v396_v37  ;;  %v14007_v62 = vcombine.low %v393_v23, %v397_v40  ;;  %v437_v36 = vld [vmem:[#allocation2 + $0x7f8] sm:$0xff] }
 0x3e7   :  { %10474 = vmatpush1.bf16.msra.mxu0 %v13957_v47  ;;  %10966 = vmatpush1.bf16.msra.mxu1 %v13959_v49  ;;  %v14008_v47 = vcombine.high %v393_v23, %v397_v40  ;;  %v400_v49 = vld [vmem:[#allocation2 + $0x6d0] sm:$0xff] }
 0x3e8   :  { %10475 = vmatprep.subr.bf16.mxu0 %v13966_v50  ;;  %10967 = vmatprep.subr.bf16.mxu1 %v13968_v51  ;;  %v404_v50 = vld [vmem:[#allocation2 + $0x6f0] sm:$0xff]  ;;  %v401_v51 = vld [vmem:[#allocation2 + $0x6d8] sm:$0xff] }
 0x3e9   :  { %v14014_v63 = vcombine.high %v400_v49, %v404_v50  ;;  %v14013_v6 = vcombine.low %v400_v49, %v404_v50  ;;  %v14015_v8 = vcombine.low %v401_v51, %v405_v55  ;;  %v445_v49 = vld [vmem:[#allocation2 + $0x838] sm:$0xff] }
 0x3eb   :  { %10476 = vmatpush1.bf16.msra.mxu0 %v13965_v0  ;;  %10968 = vmatpush1.bf16.msra.mxu1 %v13967_v2  ;;  %v14016_v0 = vcombine.high %v401_v51, %v405_v55  ;;  %v408_v2 = vld [vmem:[#allocation2 + $0x710] sm:$0xff] }
 0x3ec   :  { %10477 = vmatprep.subr.bf16.mxu0 %v13974_v3  ;;  %10969 = vmatprep.subr.bf16.mxu1 %v13976_v4  ;;  %v412_v3 = vld [vmem:[#allocation2 + $0x730] sm:$0xff]  ;;  %v409_v4 = vld [vmem:[#allocation2 + $0x718] sm:$0xff] }
 0x3ed   :  { %v14022_v9 = vcombine.high %v408_v2, %v412_v3  ;;  %v14021_v18 = vcombine.low %v408_v2, %v412_v3  ;;  %v14023_v19 = vcombine.low %v409_v4, %v413_v5  ;;  %v453_v2 = vld [vmem:[#allocation2 + $0x878] sm:$0xff] }
 0x3ef   :  { %10478 = vmatpush1.bf16.msra.mxu0 %v13973_v10  ;;  %10970 = vmatpush1.bf16.msra.mxu1 %v13975_v11  ;;  %v14024_v10 = vcombine.high %v409_v4, %v413_v5  ;;  %v416_v11 = vld [vmem:[#allocation2 + $0x750] sm:$0xff] }
 0x3f0   :  { %10479 = vmatprep.subr.bf16.mxu0 %v13982_v13  ;;  %10971 = vmatprep.subr.bf16.mxu1 %v13984_v15  ;;  %v420_v13 = vld [vmem:[#allocation2 + $0x770] sm:$0xff]  ;;  %v417_v15 = vld [vmem:[#allocation2 + $0x758] sm:$0xff] }
 0x3f1   :  { %v14030_v20 = vcombine.high %v416_v11, %v420_v13  ;;  %v14029_v28 = vcombine.low %v416_v11, %v420_v13  ;;  %v14031_v30 = vcombine.low %v417_v15, %v421_v17  ;;  %v461_v11 = vld [vmem:[#allocation2 + $0x8b8] sm:$0xff] }
 0x3f3   :  { %10480 = vmatpush1.bf16.msra.mxu0 %v13981_v21  ;;  %10972 = vmatpush1.bf16.msra.mxu1 %v13983_v22  ;;  %v14032_v21 = vcombine.high %v417_v15, %v421_v17  ;;  %v424_v22 = vld [vmem:[#allocation2 + $0x790] sm:$0xff] }
 0x3f4   :  { %10481 = vmatprep.subr.bf16.mxu0 %v13990_v24  ;;  %10973 = vmatprep.subr.bf16.mxu1 %v13992_v27  ;;  %v428_v24 = vld [vmem:[#allocation2 + $0x7b0] sm:$0xff]  ;;  %v425_v27 = vld [vmem:[#allocation2 + $0x798] sm:$0xff] }
 0x3f5   :  { %v14038_v31 = vcombine.high %v424_v22, %v428_v24  ;;  %v14037_v37 = vcombine.low %v424_v22, %v428_v24  ;;  %v14039_v23 = vcombine.low %v425_v27, %v429_v12  ;;  %v469_v22 = vld [vmem:[#allocation2 + $0x8f8] sm:$0xff] }
 0x3f7   :  { %10482 = vmatpush1.bf16.msra.mxu0 %v13989_v32  ;;  %10974 = vmatpush1.bf16.msra.mxu1 %v13991_v33  ;;  %v14040_v32 = vcombine.high %v425_v27, %v429_v12  ;;  %v432_v33 = vld [vmem:[#allocation2 + $0x7d0] sm:$0xff] }
 0x3f8   :  { %10483 = vmatprep.subr.bf16.mxu0 %v13998_v57  ;;  %10975 = vmatprep.subr.bf16.mxu1 %v14000_v35  ;;  %v436_v57 = vld [vmem:[#allocation2 + $0x7f0] sm:$0xff]  ;;  %v433_v35 = vld [vmem:[#allocation2 + $0x7d8] sm:$0xff] }
 0x3f9   :  { %v14046_v40 = vcombine.high %v432_v33, %v436_v57  ;;  %v14045_v50 = vcombine.low %v432_v33, %v436_v57  ;;  %v14047_v51 = vcombine.low %v433_v35, %v437_v36 }
 0x3fb   :  { %10484 = vmatpush1.bf16.msra.mxu0 %v13997_v42  ;;  %10976 = vmatpush1.bf16.msra.mxu1 %v13999_v43  ;;  %v14048_v42 = vcombine.high %v433_v35, %v437_v36  ;;  %v440_v43 = vld [vmem:[#allocation2 + $0x810] sm:$0xff] }
 0x3fc   :  { %10485 = vmatprep.subr.bf16.mxu0 %v14006_v46  ;;  %10977 = vmatprep.subr.bf16.mxu1 %v14008_v47  ;;  %v444_v46 = vld [vmem:[#allocation2 + $0x830] sm:$0xff]  ;;  %v441_v47 = vld [vmem:[#allocation2 + $0x818] sm:$0xff] }
 0x3fd   :  { %v14054_v55 = vcombine.high %v440_v43, %v444_v46  ;;  %v14053_v3 = vcombine.low %v440_v43, %v444_v46  ;;  %v14055_v4 = vcombine.low %v441_v47, %v445_v49  ;;  %v480_v36 = vld [vmem:[#allocation2 + $0x950] sm:$0xff] }
 0x3ff   :  { %10486 = vmatpush1.bf16.msra.mxu0 %v14005_v61  ;;  %10978 = vmatpush1.bf16.msra.mxu1 %v14007_v62  ;;  %v14056_v61 = vcombine.high %v441_v47, %v445_v49  ;;  %v448_v62 = vld [vmem:[#allocation2 + $0x850] sm:$0xff] }
 0x400   :  { %10487 = vmatprep.subr.bf16.mxu0 %v14014_v63  ;;  %10979 = vmatprep.subr.bf16.mxu1 %v14016_v0  ;;  %v452_v63 = vld [vmem:[#allocation2 + $0x870] sm:$0xff]  ;;  %v449_v0 = vld [vmem:[#allocation2 + $0x858] sm:$0xff] }
 0x401   :  { %v14062_v5 = vcombine.high %v448_v62, %v452_v63  ;;  %v14061_v13 = vcombine.low %v448_v62, %v452_v63  ;;  %v14063_v15 = vcombine.low %v449_v0, %v453_v2  ;;  %v488_v49 = vld [vmem:[#allocation2 + $0x990] sm:$0xff] }
 0x403   :  { %10488 = vmatpush1.bf16.msra.mxu0 %v14013_v6  ;;  %10980 = vmatpush1.bf16.msra.mxu1 %v14015_v8  ;;  %v14064_v6 = vcombine.high %v449_v0, %v453_v2  ;;  %v456_v8 = vld [vmem:[#allocation2 + $0x890] sm:$0xff] }
 0x404   :  { %10489 = vmatprep.subr.bf16.mxu0 %v14022_v9  ;;  %10981 = vmatprep.subr.bf16.mxu1 %v14024_v10  ;;  %v460_v9 = vld [vmem:[#allocation2 + $0x8b0] sm:$0xff]  ;;  %v457_v10 = vld [vmem:[#allocation2 + $0x898] sm:$0xff] }
 0x405   :  { %v14070_v17 = vcombine.high %v456_v8, %v460_v9  ;;  %v14069_v24 = vcombine.low %v456_v8, %v460_v9  ;;  %v496_v2 = vld [vmem:[#allocation2 + $0x9d0] sm:$0xff] }
 0x407   :  { %10490 = vmatpush1.bf16.msra.mxu0 %v14021_v18  ;;  %10982 = vmatpush1.bf16.msra.mxu1 %v14023_v19  ;;  %v14072_v18 = vcombine.high %v457_v10, %v461_v11  ;;  %v464_v19 = vld [vmem:[#allocation2 + $0x8d0] sm:$0xff] }
 0x408   :  { %10491 = vmatprep.subr.bf16.mxu0 %v14030_v20  ;;  %10983 = vmatprep.subr.bf16.mxu1 %v14032_v21  ;;  %v468_v20 = vld [vmem:[#allocation2 + $0x8f0] sm:$0xff]  ;;  %v465_v21 = vld [vmem:[#allocation2 + $0x8d8] sm:$0xff] }
 0x409   :  { %v14078_v27 = vcombine.high %v464_v19, %v468_v20  ;;  %v14080_v12 = vcombine.high %v465_v21, %v469_v22  ;;  %v14077_v33 = vcombine.low %v464_v19, %v468_v20  ;;  %v14079_v57 = vcombine.low %v465_v21, %v469_v22  ;;  %v512_v22 = vld [vmem:[#allocation2 + $0xa50] sm:$0xff] }
 0x40b   :  { %10492 = vmatpush1.bf16.msra.mxu0 %v14029_v28  ;;  %10984 = vmatpush1.bf16.msra.mxu1 %v14031_v30  ;;  %v472_v28 = vld [vmem:[#allocation2 + $0x910] sm:$0xff] }
 0x40c   :  { %10493 = vmatprep.subr.bf16.mxu0 %v14038_v31  ;;  %10985 = vmatprep.subr.bf16.mxu1 %v14040_v32  ;;  %v476_v30 = vld [vmem:[#allocation2 + $0x930] sm:$0xff]  ;;  %v473_v31 = vld [vmem:[#allocation2 + $0x918] sm:$0xff] }
 0x40d   :  { %v477_v32 = vld [vmem:[#allocation2 + $0x938] sm:$0xff]  ;;  %v14086_v35 = vcombine.high %v472_v28, %v476_v30 }
 0x40e   :  { %v14087_v43 = vcombine.low %v473_v31, %v477_v32 }
 0x40f   :  { %10494 = vmatpush1.bf16.msra.mxu0 %v14037_v37  ;;  %10986 = vmatpush1.bf16.msra.mxu1 %v14039_v23  ;;  %v484_v37 = vld [vmem:[#allocation2 + $0x970] sm:$0xff]  ;;  %v481_v23 = vld [vmem:[#allocation2 + $0x958] sm:$0xff] }
 0x410   :  { %10495 = vmatprep.subr.bf16.mxu0 %v14046_v40  ;;  %10987 = vmatprep.subr.bf16.mxu1 %v14048_v42  ;;  %v485_v40 = vld [vmem:[#allocation2 + $0x978] sm:$0xff]  ;;  %v14085_v42 = vcombine.low %v472_v28, %v476_v30  ;;  %v14094_v46 = vcombine.high %v480_v36, %v484_v37 }
 0x411   :  { %v14096_v47 = vcombine.high %v481_v23, %v485_v40  ;;  %v14095_v62 = vcombine.low %v481_v23, %v485_v40  ;;  %v528_v40 = vld [vmem:[#allocation2 + $0xad0] sm:$0xff] }
 0x413   :  { %10496 = vmatpush1.bf16.msra.mxu0 %v14045_v50  ;;  %10988 = vmatpush1.bf16.msra.mxu1 %v14047_v51  ;;  %v492_v50 = vld [vmem:[#allocation2 + $0x9b0] sm:$0xff]  ;;  %v489_v51 = vld [vmem:[#allocation2 + $0x998] sm:$0xff] }
 0x414   :  { %10506 = vmatprep.subr.bf16.mxu0 %v14054_v55  ;;  %10998 = vmatprep.subr.bf16.mxu1 %v14056_v61  ;;  %v493_v55 = vld [vmem:[#allocation2 + $0x9b8] sm:$0xff]  ;;  %v14093_v61 = vcombine.low %v480_v36, %v484_v37  ;;  %v14102_v63 = vcombine.high %v488_v49, %v492_v50 }
 0x415   :  { %v14104_v0 = vcombine.high %v489_v51, %v493_v55  ;;  %v14103_v8 = vcombine.low %v489_v51, %v493_v55  ;;  %v536_v55 = vld [vmem:[#allocation2 + $0xb10] sm:$0xff] }
 0x416   :  { %10498 = vmatmul.mubr.bf16.vlgmr.msra.gmra.mrb[4].mxu0 %v16739_v25  ;;  %10990 = vmatmul.mubr.bf16.vlgmr.msra.gmra.mrb[4].mxu1 %v16739_v25  ;;  %v14071_v25 = vcombine.low %v457_v10, %v461_v11  ;;  %v504_v11 = vld [vmem:[#allocation2 + $0xa10] sm:$0xff] }
 0x417   :  { %10507 = vmatpush1.bf16.msra.mxu0 %v14053_v3  ;;  %10999 = vmatpush1.bf16.msra.mxu1 %v14055_v4  ;;  %v500_v3 = vld [vmem:[#allocation2 + $0x9f0] sm:$0xff]  ;;  %v497_v4 = vld [vmem:[#allocation2 + $0x9d8] sm:$0xff] }
 0x418   :  { %10508 = vmatprep.subr.bf16.mxu0 %v14062_v5  ;;  %11000 = vmatprep.subr.bf16.mxu1 %v14064_v6  ;;  %v501_v5 = vld [vmem:[#allocation2 + $0x9f8] sm:$0xff]  ;;  %v14101_v6 = vcombine.low %v488_v49, %v492_v50  ;;  %v14110_v9 = vcombine.high %v496_v2, %v500_v3 }
 0x419   :  { %10538 = vmatprep.mubr.bf16.mxu0 %v16741_v34  ;;  %11030 = vmatprep.mubr.bf16.mxu1 %v16741_v34  ;;  %v14088_v34 = vcombine.high %v473_v31, %v477_v32  ;;  %v14112_v10 = vcombine.high %v497_v4, %v501_v5  ;;  %v14111_v19 = vcombine.low %v497_v4, %v501_v5  ;;  %v520_v32 = vld [vmem:[#allocation2 + $0xa90] sm:$0xff] }
 0x41a   :  { %v544_v5 = vld [vmem:[#allocation2 + $0xb50] sm:$0xff] }
 0x41b   :  { %10509 = vmatpush1.bf16.msra.mxu0 %v14061_v13  ;;  %11001 = vmatpush1.bf16.msra.mxu1 %v14063_v15  ;;  %v508_v13 = vld [vmem:[#allocation2 + $0xa30] sm:$0xff]  ;;  %v505_v15 = vld [vmem:[#allocation2 + $0xa18] sm:$0xff] }
 0x41c   :  { %10510 = vmatprep.subr.bf16.mxu0 %v14070_v17  ;;  %11002 = vmatprep.subr.bf16.mxu1 %v14072_v18  ;;  %v509_v17 = vld [vmem:[#allocation2 + $0xa38] sm:$0xff]  ;;  %v14109_v18 = vcombine.low %v496_v2, %v500_v3  ;;  %v14118_v20 = vcombine.high %v504_v11, %v508_v13 }
 0x41d   :  { %v14120_v21 = vcombine.high %v505_v15, %v509_v17  ;;  %v14119_v28 = vcombine.low %v505_v15, %v509_v17  ;;  %v552_v17 = vld [vmem:[#allocation2 + $0xb90] sm:$0xff] }
 0x41f   :  { %10511 = vmatpush1.bf16.msra.mxu0 %v14069_v24  ;;  %11003 = vmatpush1.bf16.msra.mxu1 %v14071_v25  ;;  %v516_v24 = vld [vmem:[#allocation2 + $0xa70] sm:$0xff]  ;;  %v513_v25 = vld [vmem:[#allocation2 + $0xa58] sm:$0xff] }
 0x420   :  { %10512 = vmatprep.subr.bf16.mxu0 %v14078_v27  ;;  %11004 = vmatprep.subr.bf16.mxu1 %v14080_v12  ;;  %v517_v27 = vld [vmem:[#allocation2 + $0xa78] sm:$0xff]  ;;  %v14117_v12 = vcombine.low %v504_v11, %v508_v13  ;;  %v14126_v30 = vcombine.high %v512_v22, %v516_v24 }
 0x421   :  { %v14128_v31 = vcombine.high %v513_v25, %v517_v27  ;;  %v14127_v36 = vcombine.low %v513_v25, %v517_v27  ;;  %v560_v27 = vld [vmem:[#allocation2 + $0xbd0] sm:$0xff] }
 0x423   :  { %10513 = vmatpush1.bf16.msra.mxu0 %v14077_v33  ;;  %11005 = vmatpush1.bf16.msra.mxu1 %v14079_v57  ;;  %v524_v33 = vld [vmem:[#allocation2 + $0xab0] sm:$0xff]  ;;  %v521_v57 = vld [vmem:[#allocation2 + $0xa98] sm:$0xff] }
 0x424   :  { %10514 = vmatprep.subr.bf16.mxu0 %v14086_v35  ;;  %11006 = vmatprep.subr.bf16.mxu1 %v14088_v34  ;;  %v525_v35 = vld [vmem:[#allocation2 + $0xab8] sm:$0xff]  ;;  %v14125_v34 = vcombine.low %v512_v22, %v516_v24  ;;  %v14134_v37 = vcombine.high %v520_v32, %v524_v33 }
 0x425   :  { %v14136_v23 = vcombine.high %v521_v57, %v525_v35  ;;  %v14135_v49 = vcombine.low %v521_v57, %v525_v35  ;;  %v568_v35 = vld [vmem:[#allocation2 + $0xc10] sm:$0xff] }
 0x427   :  { %10515 = vmatpush1.bf16.msra.mxu0 %v14085_v42  ;;  %11007 = vmatpush1.bf16.msra.mxu1 %v14087_v43  ;;  %v532_v42 = vld [vmem:[#allocation2 + $0xaf0] sm:$0xff]  ;;  %v529_v43 = vld [vmem:[#allocation2 + $0xad8] sm:$0xff] }
 0x428   :  { %10516 = vmatprep.subr.bf16.mxu0 %v14094_v46  ;;  %11008 = vmatprep.subr.bf16.mxu1 %v14096_v47  ;;  %v533_v46 = vld [vmem:[#allocation2 + $0xaf8] sm:$0xff]  ;;  %v14133_v47 = vcombine.low %v520_v32, %v524_v33  ;;  %v14142_v50 = vcombine.high %v528_v40, %v532_v42 }
 0x429   :  { %v14144_v51 = vcombine.high %v529_v43, %v533_v46  ;;  %v14143_v2 = vcombine.low %v529_v43, %v533_v46  ;;  %v576_v46 = vld [vmem:[#allocation2 + $0xc50] sm:$0xff] }
 0x42b   :  { %10517 = vmatpush1.bf16.msra.mxu0 %v14093_v61  ;;  %11009 = vmatpush1.bf16.msra.mxu1 %v14095_v62  ;;  %v540_v61 = vld [vmem:[#allocation2 + $0xb30] sm:$0xff]  ;;  %v537_v62 = vld [vmem:[#allocation2 + $0xb18] sm:$0xff] }
 0x42c   :  { %10518 = vmatprep.subr.bf16.mxu0 %v14102_v63  ;;  %11010 = vmatprep.subr.bf16.mxu1 %v14104_v0  ;;  %v541_v63 = vld [vmem:[#allocation2 + $0xb38] sm:$0xff]  ;;  %v14141_v0 = vcombine.low %v528_v40, %v532_v42  ;;  %v14150_v3 = vcombine.high %v536_v55, %v540_v61 }
 0x42d   :  { %v14152_v4 = vcombine.high %v537_v62, %v541_v63  ;;  %v14151_v11 = vcombine.low %v537_v62, %v541_v63  ;;  %v584_v63 = vld [vmem:[#allocation2 + $0xc90] sm:$0xff] }
 0x42f   :  { %10519 = vmatpush1.bf16.msra.mxu0 %v14101_v6  ;;  %11011 = vmatpush1.bf16.msra.mxu1 %v14103_v8  ;;  %v548_v6 = vld [vmem:[#allocation2 + $0xb70] sm:$0xff]  ;;  %v545_v8 = vld [vmem:[#allocation2 + $0xb58] sm:$0xff] }
 0x430   :  { %10520 = vmatprep.subr.bf16.mxu0 %v14110_v9  ;;  %11012 = vmatprep.subr.bf16.mxu1 %v14112_v10  ;;  %v549_v9 = vld [vmem:[#allocation2 + $0xb78] sm:$0xff]  ;;  %v14149_v10 = vcombine.low %v536_v55, %v540_v61  ;;  %v14158_v13 = vcombine.high %v544_v5, %v548_v6 }
 0x431   :  { %v14160_v15 = vcombine.high %v545_v8, %v549_v9  ;;  %v14159_v22 = vcombine.low %v545_v8, %v549_v9  ;;  %v592_v9 = vld [vmem:[#allocation2 + $0xcd0] sm:$0xff] }
 0x433   :  { %10521 = vmatpush1.bf16.msra.mxu0 %v14109_v18  ;;  %11013 = vmatpush1.bf16.msra.mxu1 %v14111_v19  ;;  %v556_v18 = vld [vmem:[#allocation2 + $0xbb0] sm:$0xff]  ;;  %v553_v19 = vld [vmem:[#allocation2 + $0xb98] sm:$0xff] }
 0x434   :  { %10522 = vmatprep.subr.bf16.mxu0 %v14118_v20  ;;  %11014 = vmatprep.subr.bf16.mxu1 %v14120_v21  ;;  %v557_v20 = vld [vmem:[#allocation2 + $0xbb8] sm:$0xff]  ;;  %v14157_v21 = vcombine.low %v544_v5, %v548_v6  ;;  %v14166_v24 = vcombine.high %v552_v17, %v556_v18 }
 0x435   :  { %v14168_v25 = vcombine.high %v553_v19, %v557_v20  ;;  %v14167_v32 = vcombine.low %v553_v19, %v557_v20  ;;  %v600_v19 = vld [vmem:[#allocation2 + $0xd10] sm:$0xff] }
 0x436   :  { %v604_v20 = vld [vmem:[#allocation2 + $0xd30] sm:$0xff] }
 0x437   :  { %10523 = vmatpush1.bf16.msra.mxu0 %v14117_v12  ;;  %11015 = vmatpush1.bf16.msra.mxu1 %v14119_v28  ;;  %v564_v12 = vld [vmem:[#allocation2 + $0xbf0] sm:$0xff]  ;;  %v561_v28 = vld [vmem:[#allocation2 + $0xbd8] sm:$0xff] }
 0x438   :  { %10524 = vmatprep.subr.bf16.mxu0 %v14126_v30  ;;  %11016 = vmatprep.subr.bf16.mxu1 %v14128_v31  ;;  %v565_v30 = vld [vmem:[#allocation2 + $0xbf8] sm:$0xff]  ;;  %v14165_v31 = vcombine.low %v552_v17, %v556_v18  ;;  %v14174_v33 = vcombine.high %v560_v27, %v564_v12 }
 0x439   :  { %v14176_v57 = vcombine.high %v561_v28, %v565_v30  ;;  %v14175_v40 = vcombine.low %v561_v28, %v565_v30  ;;  %v612_v28 = vld [vmem:[#allocation2 + $0xd70] sm:$0xff]  ;;  %v609_v30 = vld [vmem:[#allocation2 + $0xd58] sm:$0xff] }
 0x43b   :  { %10525 = vmatpush1.bf16.msra.mxu0 %v14125_v34  ;;  %11017 = vmatpush1.bf16.msra.mxu1 %v14127_v36  ;;  %v572_v34 = vld [vmem:[#allocation2 + $0xc30] sm:$0xff]  ;;  %v569_v36 = vld [vmem:[#allocation2 + $0xc18] sm:$0xff] }
 0x43c   :  { %10526 = vmatprep.subr.bf16.mxu0 %v14134_v37  ;;  %11018 = vmatprep.subr.bf16.mxu1 %v14136_v23  ;;  %v573_v37 = vld [vmem:[#allocation2 + $0xc38] sm:$0xff]  ;;  %v14173_v23 = vcombine.low %v560_v27, %v564_v12  ;;  %v14182_v42 = vcombine.high %v568_v35, %v572_v34  ;;  %v14214_v27 = vcombine.high %v600_v19, %v604_v20  ;;  %v608_v12 = vld [vmem:[#allocation2 + $0xd50] sm:$0xff] }
 0x43d   :  { %v14184_v43 = vcombine.high %v569_v36, %v573_v37  ;;  %v14183_v55 = vcombine.low %v569_v36, %v573_v37  ;;  %v620_v36 = vld [vmem:[#allocation2 + $0xdb0] sm:$0xff]  ;;  %v617_v37 = vld [vmem:[#allocation2 + $0xd98] sm:$0xff] }
 0x43f   :  { %10527 = vmatpush1.bf16.msra.mxu0 %v14133_v47  ;;  %11019 = vmatpush1.bf16.msra.mxu1 %v14135_v49  ;;  %v580_v47 = vld [vmem:[#allocation2 + $0xc70] sm:$0xff]  ;;  %v577_v49 = vld [vmem:[#allocation2 + $0xc58] sm:$0xff] }
 0x440   :  { %10528 = vmatprep.subr.bf16.mxu0 %v14142_v50  ;;  %11020 = vmatprep.subr.bf16.mxu1 %v14144_v51  ;;  %v581_v50 = vld [vmem:[#allocation2 + $0xc78] sm:$0xff]  ;;  %v14181_v51 = vcombine.low %v568_v35, %v572_v34  ;;  %v14190_v61 = vcombine.high %v576_v46, %v580_v47  ;;  %v616_v34 = vld [vmem:[#allocation2 + $0xd90] sm:$0xff] }
 0x441   :  { %v14192_v62 = vcombine.high %v577_v49, %v581_v50  ;;  %v14191_v5 = vcombine.low %v577_v49, %v581_v50  ;;  %v624_v49 = vld [vmem:[#allocation2 + $0xdd0] sm:$0xff] }
 0x442   :  { %v628_v50 = vld [vmem:[#allocation2 + $0xdf0] sm:$0xff] }
 0x443   :  { %10529 = vmatpush1.bf16.msra.mxu0 %v14141_v0  ;;  %11021 = vmatpush1.bf16.msra.mxu1 %v14143_v2  ;;  %v588_v0 = vld [vmem:[#allocation2 + $0xcb0] sm:$0xff]  ;;  %v585_v2 = vld [vmem:[#allocation2 + $0xc98] sm:$0xff] }
 0x444   :  { %10530 = vmatprep.subr.bf16.mxu0 %v14150_v3  ;;  %11022 = vmatprep.subr.bf16.mxu1 %v14152_v4  ;;  %v589_v3 = vld [vmem:[#allocation2 + $0xcb8] sm:$0xff]  ;;  %v14189_v4 = vcombine.low %v576_v46, %v580_v47  ;;  %v14198_v6 = vcombine.high %v584_v63, %v588_v0 }
 0x445   :  { %v14200_v8 = vcombine.high %v585_v2, %v589_v3 }
 0x447   :  { %10531 = vmatpush1.bf16.msra.mxu0 %v14149_v10  ;;  %11023 = vmatpush1.bf16.msra.mxu1 %v14151_v11  ;;  %v596_v10 = vld [vmem:[#allocation2 + $0xcf0] sm:$0xff]  ;;  %v593_v11 = vld [vmem:[#allocation2 + $0xcd8] sm:$0xff] }
 0x448   :  { %10532 = vmatprep.subr.bf16.mxu0 %v14158_v13  ;;  %11024 = vmatprep.subr.bf16.mxu1 %v14160_v15  ;;  %v597_v13 = vld [vmem:[#allocation2 + $0xcf8] sm:$0xff]  ;;  %v14197_v15 = vcombine.low %v584_v63, %v588_v0  ;;  %v14206_v17 = vcombine.high %v592_v9, %v596_v10 }
 0x449   :  { %v14208_v18 = vcombine.high %v593_v11, %v597_v13 }
 0x44b   :  { %10533 = vmatpush1.bf16.msra.mxu0 %v14157_v21  ;;  %11025 = vmatpush1.bf16.msra.mxu1 %v14159_v22  ;;  %v601_v21 = vld [vmem:[#allocation2 + $0xd18] sm:$0xff] }
 0x44c   :  { %10534 = vmatprep.subr.bf16.mxu0 %v14166_v24  ;;  %11026 = vmatprep.subr.bf16.mxu1 %v14168_v25  ;;  %v605_v22 = vld [vmem:[#allocation2 + $0xd38] sm:$0xff]  ;;  %v14205_v24 = vcombine.low %v592_v9, %v596_v10  ;;  %v14207_v25 = vcombine.low %v593_v11, %v597_v13  ;;  %v632_v10 = vld [vmem:[#allocation2 + $0xe10] sm:$0xff] }
 0x44d   :  { %v636_v11 = vld [vmem:[#allocation2 + $0xe30] sm:$0xff]  ;;  %v633_v13 = vld [vmem:[#allocation2 + $0xe18] sm:$0xff] }
 0x44f   :  { %10535 = vmatpush1.bf16.msra.mxu0 %v14165_v31  ;;  %11027 = vmatpush1.bf16.msra.mxu1 %v14167_v32  ;;  %v613_v31 = vld [vmem:[#allocation2 + $0xd78] sm:$0xff]  ;;  %v14213_v32 = vcombine.low %v600_v19, %v604_v20  ;;  %v640_v20 = vld [vmem:[#allocation2 + $0xe50] sm:$0xff] }
 0x450   :  { %10536 = vmatprep.subr.bf16.mxu0 %v14174_v33  ;;  %11028 = vmatprep.subr.bf16.mxu1 %v14176_v57  ;;  %v14215_v33 = vcombine.low %v601_v21, %v605_v22  ;;  %v14222_v57 = vcombine.high %v608_v12, %v612_v28  ;;  %v14224_v35 = vcombine.high %v609_v30, %v613_v31 }
 0x453   :  { %10537 = vmatpush1.bf16.msra.mxu0 %v14173_v23  ;;  %11029 = vmatpush1.bf16.msra.mxu1 %v14175_v40  ;;  %v621_v23 = vld [vmem:[#allocation2 + $0xdb8] sm:$0xff]  ;;  %v14221_v40 = vcombine.low %v608_v12, %v612_v28  ;;  %v648_v28 = vld [vmem:[#allocation2 + $0xe90] sm:$0xff] }
 0x454   :  { %10547 = vmatprep.subr.bf16.mxu0 %v14182_v42  ;;  %11039 = vmatprep.subr.bf16.mxu1 %v14184_v43  ;;  %v14223_v42 = vcombine.low %v609_v30, %v613_v31  ;;  %v14230_v43 = vcombine.high %v616_v34, %v620_v36  ;;  %v14232_v47 = vcombine.high %v617_v37, %v621_v23  ;;  %v652_v30 = vld [vmem:[#allocation2 + $0xeb0] sm:$0xff]  ;;  %v649_v31 = vld [vmem:[#allocation2 + $0xe98] sm:$0xff] }
 0x456   :  { %10539 = vmatmul.mubr.bf16.vlgmr.msra.gmra.mrb[4].mxu0 %v16753_v39  ;;  %11031 = vmatmul.mubr.bf16.vlgmr.msra.gmra.mrb[4].mxu1 %v16753_v39  ;;  %v14199_v39 = vcombine.low %v585_v2, %v589_v3  ;;  %v14229_v2 = vcombine.low %v616_v34, %v620_v36  ;;  %v656_v36 = vld [vmem:[#allocation2 + $0xed0] sm:$0xff] }
 0x457   :  { %10548 = vmatpush1.bf16.msra.mxu0 %v14181_v51  ;;  %11040 = vmatpush1.bf16.msra.mxu1 %v14183_v55 }
 0x458   :  { %10549 = vmatprep.subr.bf16.mxu0 %v14190_v61  ;;  %11041 = vmatprep.subr.bf16.mxu1 %v14192_v62  ;;  %v625_v61 = vld [vmem:[#allocation2 + $0xdd8] sm:$0xff] }
 0x459   :  { %10579 = vmatprep.mubr.bf16.mxu0 %v16755_v48  ;;  %11071 = vmatprep.mubr.bf16.mxu1 %v16755_v48  ;;  %v14216_v48 = vcombine.high %v601_v21, %v605_v22  ;;  %v629_v62 = vld [vmem:[#allocation2 + $0xdf8] sm:$0xff]  ;;  %v644_v21 = vld [vmem:[#allocation2 + $0xe70] sm:$0xff] }
 0x45a   :  { %v14240_v9 = vcombine.high %v625_v61, %v629_v62  ;;  %v641_v22 = vld [vmem:[#allocation2 + $0xe58] sm:$0xff] }
 0x45b   :  { %10550 = vmatpush1.bf16.msra.mxu0 %v14189_v4  ;;  %11042 = vmatpush1.bf16.msra.mxu1 %v14191_v5  ;;  %v14231_v5 = vcombine.low %v617_v37, %v621_v23  ;;  %v660_v37 = vld [vmem:[#allocation2 + $0xef0] sm:$0xff]  ;;  %v657_v23 = vld [vmem:[#allocation2 + $0xed8] sm:$0xff] }
 0x45c   :  { %10551 = vmatprep.subr.bf16.mxu0 %v14198_v6  ;;  %11043 = vmatprep.subr.bf16.mxu1 %v14200_v8  ;;  %v14238_v6 = vcombine.high %v624_v49, %v628_v50 }
 0x45f   :  { %10552 = vmatpush1.bf16.msra.mxu0 %v14197_v15  ;;  %11044 = vmatpush1.bf16.msra.mxu1 %v14199_v39  ;;  %v637_v15 = vld [vmem:[#allocation2 + $0xe38] sm:$0xff]  ;;  %v14237_v39 = vcombine.low %v624_v49, %v628_v50  ;;  %v664_v50 = vld [vmem:[#allocation2 + $0xf10] sm:$0xff] }
 0x460   :  { %10553 = vmatprep.subr.bf16.mxu0 %v14206_v17  ;;  %11045 = vmatprep.subr.bf16.mxu1 %v14208_v18  ;;  %v14239_v17 = vcombine.low %v625_v61, %v629_v62  ;;  %v14246_v18 = vcombine.high %v632_v10, %v636_v11  ;;  %v14248_v19 = vcombine.high %v633_v13, %v637_v15  ;;  %v668_v61 = vld [vmem:[#allocation2 + $0xf30] sm:$0xff]  ;;  %v665_v62 = vld [vmem:[#allocation2 + $0xf18] sm:$0xff] }
 0x463   :  { %10554 = vmatpush1.bf16.msra.mxu0 %v14205_v24  ;;  %11046 = vmatpush1.bf16.msra.mxu1 %v14207_v25  ;;  %v645_v24 = vld [vmem:[#allocation2 + $0xe78] sm:$0xff]  ;;  %v14245_v25 = vcombine.low %v632_v10, %v636_v11  ;;  %v14277_v11 = vcombine.low %v664_v50, %v668_v61 }
 0x464   :  { %10555 = vmatprep.subr.bf16.mxu0 %v14214_v27  ;;  %11047 = vmatprep.subr.bf16.mxu1 %v14216_v48  ;;  %v14247_v27 = vcombine.low %v633_v13, %v637_v15  ;;  %v14254_v48 = vcombine.high %v640_v20, %v644_v21  ;;  %v14256_v12 = vcombine.high %v641_v22, %v645_v24  ;;  %v677_v10 = vld [vmem:[#allocation2 + $0xf78] sm:$0xff] }
 0x467   :  { %10556 = vmatpush1.bf16.msra.mxu0 %v14213_v32  ;;  %11048 = vmatpush1.bf16.msra.mxu1 %v14215_v33  ;;  %v653_v32 = vld [vmem:[#allocation2 + $0xeb8] sm:$0xff]  ;;  %v14253_v33 = vcombine.low %v640_v20, %v644_v21 }
 0x468   :  { %10557 = vmatprep.subr.bf16.mxu0 %v14222_v57  ;;  %11049 = vmatprep.subr.bf16.mxu1 %v14224_v35  ;;  %v14255_v57 = vcombine.low %v641_v22, %v645_v24  ;;  %v14262_v35 = vcombine.high %v648_v28, %v652_v30  ;;  %v14264_v34 = vcombine.high %v649_v31, %v653_v32  ;;  %v685_v20 = vld [vmem:[#allocation2 + $0xfb8] sm:$0xff] }
 0x469   :  { %v16894_v46 = vpop.f32.mrb[0].mxu0  ;;  %v16896_v51 = vpop.f32.mrb[0].mxu1 }
 0x46a   :  { %v16898_v55 = vpop.f32.mrb[1].mxu0  ;;  %v16900_v63 = vpop.f32.mrb[1].mxu1 }
 0x46b   :  { %v9929_v0 = vpop.f32.mrb[2].mxu0  ;;  %10558 = vmatpush1.bf16.msra.mxu0 %v14221_v40  ;;  %v10421_v3 = vpop.f32.mrb[2].mxu1  ;;  %11050 = vmatpush1.bf16.msra.mxu1 %v14223_v42  ;;  %v661_v40 = vld [vmem:[#allocation2 + $0xef8] sm:$0xff]  ;;  %v14261_v42 = vcombine.low %v648_v28, %v652_v30 }
 0x46c   :  { %v9930_v4 = vpop.f32.mrb[3].mxu0  ;;  %10559 = vmatprep.subr.bf16.mxu0 %v14230_v43  ;;  %v10422_v8 = vpop.f32.mrb[3].mxu1  ;;  %11051 = vmatprep.subr.bf16.mxu1 %v14232_v47  ;;  %v14263_v43 = vcombine.low %v649_v31, %v653_v32  ;;  %v14270_v47 = vcombine.high %v656_v36, %v660_v37  ;;  %v14272_v49 = vcombine.high %v657_v23, %v661_v40  ;;  %v669_v0 = vld [vmem:[#allocation2 + $0xf38] sm:$0xff] }
 0x46d   :  { %v14271_v3 = vcombine.low %v657_v23, %v661_v40  ;;  %v14278_v4 = vcombine.high %v664_v50, %v668_v61  ;;  %v676_v8 = vld [vmem:[#allocation2 + $0xf70] sm:$0xff]  ;;  %v14279_v13 = vcombine.low %v665_v62, %v669_v0  ;;  %v693_v28 = vld [vmem:[#allocation2 + $0xff8] sm:$0xff] }
 0x46e   :  { %v709_v50 = vld [vmem:[#allocation2 + $0x1078] sm:$0xff] }
 0x46f   :  { %10560 = vmatpush1.bf16.msra.mxu0 %v14229_v2  ;;  %11052 = vmatpush1.bf16.msra.mxu1 %v14231_v5  ;;  %v14269_v2 = vcombine.low %v656_v36, %v660_v37  ;;  %v14280_v5 = vcombine.high %v665_v62, %v669_v0  ;;  %v701_v36 = vld [vmem:[#allocation2 + $0x1038] sm:$0xff] }
 0x470   :  { %10561 = vmatprep.subr.bf16.mxu0 %v14238_v6  ;;  %11053 = vmatprep.subr.bf16.mxu1 %v14240_v9  ;;  %v672_v6 = vld [vmem:[#allocation2 + $0xf50] sm:$0xff]  ;;  %v673_v9 = vld [vmem:[#allocation2 + $0xf58] sm:$0xff] }
 0x471   :  { %v14286_v15 = vcombine.high %v672_v6, %v676_v8  ;;  %v14285_v21 = vcombine.low %v672_v6, %v676_v8  ;;  %v14287_v22 = vcombine.low %v673_v9, %v677_v10  ;;  %v717_v6 = vld [vmem:[#allocation2 + $0x10b8] sm:$0xff] }
 0x473   :  { %10562 = vmatpush1.bf16.msra.mxu0 %v14237_v39  ;;  %11054 = vmatpush1.bf16.msra.mxu1 %v14239_v17  ;;  %v14288_v39 = vcombine.high %v673_v9, %v677_v10  ;;  %v680_v17 = vld [vmem:[#allocation2 + $0xf90] sm:$0xff] }
 0x474   :  { %10563 = vmatprep.subr.bf16.mxu0 %v14246_v18  ;;  %11055 = vmatprep.subr.bf16.mxu1 %v14248_v19  ;;  %v684_v18 = vld [vmem:[#allocation2 + $0xfb0] sm:$0xff]  ;;  %v681_v19 = vld [vmem:[#allocation2 + $0xf98] sm:$0xff] }
 0x475   :  { %v14294_v24 = vcombine.high %v680_v17, %v684_v18  ;;  %v14293_v30 = vcombine.low %v680_v17, %v684_v18  ;;  %v14295_v31 = vcombine.low %v681_v19, %v685_v20  ;;  %v725_v17 = vld [vmem:[#allocation2 + $0x10f8] sm:$0xff] }
 0x477   :  { %10564 = vmatpush1.bf16.msra.mxu0 %v14245_v25  ;;  %11056 = vmatpush1.bf16.msra.mxu1 %v14247_v27  ;;  %v14296_v25 = vcombine.high %v681_v19, %v685_v20  ;;  %v688_v27 = vld [vmem:[#allocation2 + $0xfd0] sm:$0xff] }
 0x478   :  { %10565 = vmatprep.subr.bf16.mxu0 %v14254_v48  ;;  %11057 = vmatprep.subr.bf16.mxu1 %v14256_v12  ;;  %v692_v48 = vld [vmem:[#allocation2 + $0xff0] sm:$0xff]  ;;  %v689_v12 = vld [vmem:[#allocation2 + $0xfd8] sm:$0xff] }
 0x479   :  { %v14302_v32 = vcombine.high %v688_v27, %v692_v48  ;;  %v14301_v37 = vcombine.low %v688_v27, %v692_v48  ;;  %v14303_v23 = vcombine.low %v689_v12, %v693_v28 }
 0x47b   :  { %10566 = vmatpush1.bf16.msra.mxu0 %v14253_v33  ;;  %11058 = vmatpush1.bf16.msra.mxu1 %v14255_v57  ;;  %v14304_v33 = vcombine.high %v689_v12, %v693_v28  ;;  %v696_v57 = vld [vmem:[#allocation2 + $0x1010] sm:$0xff] }
 0x47c   :  { %10567 = vmatprep.subr.bf16.mxu0 %v14262_v35  ;;  %11059 = vmatprep.subr.bf16.mxu1 %v14264_v34  ;;  %v700_v35 = vld [vmem:[#allocation2 + $0x1030] sm:$0xff]  ;;  %v697_v34 = vld [vmem:[#allocation2 + $0x1018] sm:$0xff] }
 0x47d   :  { %v14310_v40 = vcombine.high %v696_v57, %v700_v35  ;;  %v14309_v61 = vcombine.low %v696_v57, %v700_v35  ;;  %v14311_v62 = vcombine.low %v697_v34, %v701_v36  ;;  %v736_v28 = vld [vmem:[#allocation2 + $0x1150] sm:$0xff] }
 0x47f   :  { %10568 = vmatpush1.bf16.msra.mxu0 %v14261_v42  ;;  %11060 = vmatpush1.bf16.msra.mxu1 %v14263_v43  ;;  %v14312_v42 = vcombine.high %v697_v34, %v701_v36  ;;  %v704_v43 = vld [vmem:[#allocation2 + $0x1050] sm:$0xff] }
 0x480   :  { %10569 = vmatprep.subr.bf16.mxu0 %v14270_v47  ;;  %11061 = vmatprep.subr.bf16.mxu1 %v14272_v49  ;;  %v708_v47 = vld [vmem:[#allocation2 + $0x1070] sm:$0xff]  ;;  %v705_v49 = vld [vmem:[#allocation2 + $0x1058] sm:$0xff] }
 0x481   :  { %v14318_v0 = vcombine.high %v704_v43, %v708_v47  ;;  %v14317_v8 = vcombine.low %v704_v43, %v708_v47  ;;  %v14319_v9 = vcombine.low %v705_v49, %v709_v50  ;;  %v744_v36 = vld [vmem:[#allocation2 + $0x1190] sm:$0xff] }
 0x483   :  { %10570 = vmatpush1.bf16.msra.mxu0 %v14269_v2  ;;  %11062 = vmatpush1.bf16.msra.mxu1 %v14271_v3  ;;  %v14320_v2 = vcombine.high %v705_v49, %v709_v50  ;;  %v712_v3 = vld [vmem:[#allocation2 + $0x1090] sm:$0xff] }
 0x484   :  { %10571 = vmatprep.subr.bf16.mxu0 %v14278_v4  ;;  %11063 = vmatprep.subr.bf16.mxu1 %v14280_v5  ;;  %v716_v4 = vld [vmem:[#allocation2 + $0x10b0] sm:$0xff]  ;;  %v713_v5 = vld [vmem:[#allocation2 + $0x1098] sm:$0xff] }
 0x485   :  { %v14326_v10 = vcombine.high %v712_v3, %v716_v4  ;;  %v14325_v18 = vcombine.low %v712_v3, %v716_v4  ;;  %v752_v50 = vld [vmem:[#allocation2 + $0x11d0] sm:$0xff] }
 0x487   :  { %10572 = vmatpush1.bf16.msra.mxu0 %v14277_v11  ;;  %11064 = vmatpush1.bf16.msra.mxu1 %v14279_v13  ;;  %v14328_v11 = vcombine.high %v713_v5, %v717_v6  ;;  %v720_v13 = vld [vmem:[#allocation2 + $0x10d0] sm:$0xff] }
 0x488   :  { %10573 = vmatprep.subr.bf16.mxu0 %v14286_v15  ;;  %11065 = vmatprep.subr.bf16.mxu1 %v14288_v39  ;;  %v724_v15 = vld [vmem:[#allocation2 + $0x10f0] sm:$0xff]  ;;  %v721_v39 = vld [vmem:[#allocation2 + $0x10d8] sm:$0xff] }
 0x489   :  { %v14334_v19 = vcombine.high %v720_v13, %v724_v15  ;;  %v14336_v20 = vcombine.high %v721_v39, %v725_v17  ;;  %v14333_v27 = vcombine.low %v720_v13, %v724_v15  ;;  %v14335_v48 = vcombine.low %v721_v39, %v725_v17  ;;  %v768_v17 = vld [vmem:[#allocation2 + $0x1250] sm:$0xff] }
 0x48b   :  { %10574 = vmatpush1.bf16.msra.mxu0 %v14285_v21  ;;  %11066 = vmatpush1.bf16.msra.mxu1 %v14287_v22  ;;  %v728_v21 = vld [vmem:[#allocation2 + $0x1110] sm:$0xff] }
 0x48c   :  { %10575 = vmatprep.subr.bf16.mxu0 %v14294_v24  ;;  %11067 = vmatprep.subr.bf16.mxu1 %v14296_v25  ;;  %v732_v22 = vld [vmem:[#allocation2 + $0x1130] sm:$0xff]  ;;  %v729_v24 = vld [vmem:[#allocation2 + $0x1118] sm:$0xff] }
 0x48d   :  { %v733_v25 = vld [vmem:[#allocation2 + $0x1138] sm:$0xff]  ;;  %v14342_v12 = vcombine.high %v728_v21, %v732_v22 }
 0x48e   :  { %v14343_v57 = vcombine.low %v729_v24, %v733_v25 }
 0x48f   :  { %10576 = vmatpush1.bf16.msra.mxu0 %v14293_v30  ;;  %11068 = vmatpush1.bf16.msra.mxu1 %v14295_v31  ;;  %v740_v30 = vld [vmem:[#allocation2 + $0x1170] sm:$0xff]  ;;  %v737_v31 = vld [vmem:[#allocation2 + $0x1158] sm:$0xff] }
 0x490   :  { %10577 = vmatprep.subr.bf16.mxu0 %v14302_v32  ;;  %11069 = vmatprep.subr.bf16.mxu1 %v14304_v33  ;;  %v741_v32 = vld [vmem:[#allocation2 + $0x1178] sm:$0xff]  ;;  %v14341_v33 = vcombine.low %v728_v21, %v732_v22  ;;  %v14350_v35 = vcombine.high %v736_v28, %v740_v30 }
 0x491   :  { %v14352_v34 = vcombine.high %v737_v31, %v741_v32  ;;  %v14351_v43 = vcombine.low %v737_v31, %v741_v32  ;;  %v784_v32 = vld [vmem:[#allocation2 + $0x12d0] sm:$0xff] }
 0x493   :  { %10578 = vmatpush1.bf16.msra.mxu0 %v14301_v37  ;;  %11070 = vmatpush1.bf16.msra.mxu1 %v14303_v23  ;;  %v748_v37 = vld [vmem:[#allocation2 + $0x11b0] sm:$0xff]  ;;  %v745_v23 = vld [vmem:[#allocation2 + $0x1198] sm:$0xff] }
 0x494   :  { %10588 = vmatprep.subr.bf16.mxu0 %v14310_v40  ;;  %11080 = vmatprep.subr.bf16.mxu1 %v14312_v42  ;;  %v749_v40 = vld [vmem:[#allocation2 + $0x11b8] sm:$0xff]  ;;  %v14349_v42 = vcombine.low %v736_v28, %v740_v30  ;;  %v14358_v47 = vcombine.high %v744_v36, %v748_v37 }
 0x495   :  { %v14360_v49 = vcombine.high %v745_v23, %v749_v40  ;;  %v14359_v3 = vcombine.low %v745_v23, %v749_v40  ;;  %v792_v40 = vld [vmem:[#allocation2 + $0x1310] sm:$0xff] }
 0x496   :  { %10580 = vmatmul.mubr.bf16.vlgmr.msra.gmra.mrb[4].mxu0 %v16764_v54  ;;  %11072 = vmatmul.mubr.bf16.vlgmr.msra.gmra.mrb[4].mxu1 %v16764_v54  ;;  %v14327_v54 = vcombine.low %v713_v5, %v717_v6  ;;  %v760_v6 = vld [vmem:[#allocation2 + $0x1210] sm:$0xff] }
 0x497   :  { %10589 = vmatpush1.bf16.msra.mxu0 %v14309_v61  ;;  %11081 = vmatpush1.bf16.msra.mxu1 %v14311_v62  ;;  %v756_v61 = vld [vmem:[#allocation2 + $0x11f0] sm:$0xff]  ;;  %v753_v62 = vld [vmem:[#allocation2 + $0x11d8] sm:$0xff] }
 0x498   :  { %10590 = vmatprep.subr.bf16.mxu0 %v14318_v0  ;;  %11082 = vmatprep.subr.bf16.mxu1 %v14320_v2  ;;  %v757_v0 = vld [vmem:[#allocation2 + $0x11f8] sm:$0xff]  ;;  %v14357_v2 = vcombine.low %v744_v36, %v748_v37  ;;  %v14366_v4 = vcombine.high %v752_v50, %v756_v61 }
 0x499   :  { %10620 = vmatprep.mubr.bf16.mxu0 %v16769_v1  ;;  %11112 = vmatprep.mubr.bf16.mxu1 %v16769_v1  ;;  %v14344_v1 = vcombine.high %v729_v24, %v733_v25  ;;  %v14368_v5 = vcombine.high %v753_v62, %v757_v0  ;;  %v14367_v13 = vcombine.low %v753_v62, %v757_v0  ;;  %v776_v25 = vld [vmem:[#allocation2 + $0x1290] sm:$0xff] }
 0x49a   :  { %v800_v0 = vld [vmem:[#allocation2 + $0x1350] sm:$0xff] }
 0x49b   :  { %10591 = vmatpush1.bf16.msra.mxu0 %v14317_v8  ;;  %11083 = vmatpush1.bf16.msra.mxu1 %v14319_v9  ;;  %v764_v8 = vld [vmem:[#allocation2 + $0x1230] sm:$0xff]  ;;  %v761_v9 = vld [vmem:[#allocation2 + $0x1218] sm:$0xff] }
 0x49c   :  { %10592 = vmatprep.subr.bf16.mxu0 %v14326_v10  ;;  %11084 = vmatprep.subr.bf16.mxu1 %v14328_v11  ;;  %v765_v10 = vld [vmem:[#allocation2 + $0x1238] sm:$0xff]  ;;  %v14365_v11 = vcombine.low %v752_v50, %v756_v61  ;;  %v14374_v15 = vcombine.high %v760_v6, %v764_v8 }
 0x49d   :  { %v14376_v39 = vcombine.high %v761_v9, %v765_v10  ;;  %v14375_v21 = vcombine.low %v761_v9, %v765_v10  ;;  %v808_v10 = vld [vmem:[#allocation2 + $0x1390] sm:$0xff] }
 0x49f   :  { %10593 = vmatpush1.bf16.msra.mxu0 %v14325_v18  ;;  %11085 = vmatpush1.bf16.msra.mxu1 %v14327_v54  ;;  %v772_v18 = vld [vmem:[#allocation2 + $0x1270] sm:$0xff]  ;;  %v769_v54 = vld [vmem:[#allocation2 + $0x1258] sm:$0xff] }
 0x4a0   :  { %10594 = vmatprep.subr.bf16.mxu0 %v14334_v19  ;;  %11086 = vmatprep.subr.bf16.mxu1 %v14336_v20  ;;  %v773_v19 = vld [vmem:[#allocation2 + $0x1278] sm:$0xff]  ;;  %v14373_v20 = vcombine.low %v760_v6, %v764_v8  ;;  %v14382_v22 = vcombine.high %v768_v17, %v772_v18 }
 0x4a1   :  { %v14384_v24 = vcombine.high %v769_v54, %v773_v19  ;;  %v14383_v28 = vcombine.low %v769_v54, %v773_v19  ;;  %v816_v19 = vld [vmem:[#allocation2 + $0x13d0] sm:$0xff] }
 0x4a3   :  { %10595 = vmatpush1.bf16.msra.mxu0 %v14333_v27  ;;  %11087 = vmatpush1.bf16.msra.mxu1 %v14335_v48  ;;  %v780_v27 = vld [vmem:[#allocation2 + $0x12b0] sm:$0xff]  ;;  %v777_v48 = vld [vmem:[#allocation2 + $0x1298] sm:$0xff] }
 0x4a4   :  { %10596 = vmatprep.subr.bf16.mxu0 %v14342_v12  ;;  %11088 = vmatprep.subr.bf16.mxu1 %v14344_v1  ;;  %v781_v12 = vld [vmem:[#allocation2 + $0x12b8] sm:$0xff]  ;;  %v14381_v1 = vcombine.low %v768_v17, %v772_v18  ;;  %v14390_v30 = vcombine.high %v776_v25, %v780_v27 }
 0x4a5   :  { %v14392_v31 = vcombine.high %v777_v48, %v781_v12  ;;  %v14391_v36 = vcombine.low %v777_v48, %v781_v12  ;;  %v824_v12 = vld [vmem:[#allocation2 + $0x1410] sm:$0xff] }
 0x4a7   :  { %10597 = vmatpush1.bf16.msra.mxu0 %v14341_v33  ;;  %11089 = vmatpush1.bf16.msra.mxu1 %v14343_v57  ;;  %v788_v33 = vld [vmem:[#allocation2 + $0x12f0] sm:$0xff]  ;;  %v785_v57 = vld [vmem:[#allocation2 + $0x12d8] sm:$0xff] }
 0x4a8   :  { %10598 = vmatprep.subr.bf16.mxu0 %v14350_v35  ;;  %11090 = vmatprep.subr.bf16.mxu1 %v14352_v34  ;;  %v789_v35 = vld [vmem:[#allocation2 + $0x12f8] sm:$0xff]  ;;  %v14389_v34 = vcombine.low %v776_v25, %v780_v27  ;;  %v14398_v37 = vcombine.high %v784_v32, %v788_v33 }
 0x4a9   :  { %v14400_v23 = vcombine.high %v785_v57, %v789_v35  ;;  %v14399_v50 = vcombine.low %v785_v57, %v789_v35  ;;  %v832_v35 = vld [vmem:[#allocation2 + $0x1450] sm:$0xff] }
 0x4ab   :  { %10599 = vmatpush1.bf16.msra.mxu0 %v14349_v42  ;;  %11091 = vmatpush1.bf16.msra.mxu1 %v14351_v43  ;;  %v796_v42 = vld [vmem:[#allocation2 + $0x1330] sm:$0xff]  ;;  %v793_v43 = vld [vmem:[#allocation2 + $0x1318] sm:$0xff] }
 0x4ac   :  { %10600 = vmatprep.subr.bf16.mxu0 %v14358_v47  ;;  %11092 = vmatprep.subr.bf16.mxu1 %v14360_v49  ;;  %v797_v47 = vld [vmem:[#allocation2 + $0x1338] sm:$0xff]  ;;  %v14397_v49 = vcombine.low %v784_v32, %v788_v33  ;;  %v14406_v61 = vcombine.high %v792_v40, %v796_v42 }
 0x4ad   :  { %v14408_v62 = vcombine.high %v793_v43, %v797_v47  ;;  %v14407_v6 = vcombine.low %v793_v43, %v797_v47  ;;  %v840_v47 = vld [vmem:[#allocation2 + $0x1490] sm:$0xff] }
 0x4af   :  { %10601 = vmatpush1.bf16.msra.mxu0 %v14357_v2  ;;  %11093 = vmatpush1.bf16.msra.mxu1 %v14359_v3  ;;  %v804_v2 = vld [vmem:[#allocation2 + $0x1370] sm:$0xff]  ;;  %v801_v3 = vld [vmem:[#allocation2 + $0x1358] sm:$0xff] }
 0x4b0   :  { %10602 = vmatprep.subr.bf16.mxu0 %v14366_v4  ;;  %11094 = vmatprep.subr.bf16.mxu1 %v14368_v5  ;;  %v805_v4 = vld [vmem:[#allocation2 + $0x1378] sm:$0xff]  ;;  %v14405_v5 = vcombine.low %v792_v40, %v796_v42  ;;  %v14414_v8 = vcombine.high %v800_v0, %v804_v2 }
 0x4b1   :  { %v14416_v9 = vcombine.high %v801_v3, %v805_v4  ;;  %v14415_v17 = vcombine.low %v801_v3, %v805_v4  ;;  %v848_v4 = vld [vmem:[#allocation2 + $0x14d0] sm:$0xff] }
 0x4b3   :  { %10603 = vmatpush1.bf16.msra.mxu0 %v14365_v11  ;;  %11095 = vmatpush1.bf16.msra.mxu1 %v14367_v13  ;;  %v812_v11 = vld [vmem:[#allocation2 + $0x13b0] sm:$0xff]  ;;  %v809_v13 = vld [vmem:[#allocation2 + $0x1398] sm:$0xff] }
 0x4b4   :  { %10604 = vmatprep.subr.bf16.mxu0 %v14374_v15  ;;  %11096 = vmatprep.subr.bf16.mxu1 %v14376_v39  ;;  %v813_v15 = vld [vmem:[#allocation2 + $0x13b8] sm:$0xff]  ;;  %v14413_v39 = vcombine.low %v800_v0, %v804_v2  ;;  %v14422_v18 = vcombine.high %v808_v10, %v812_v11 }
 0x4b5   :  { %v14424_v54 = vcombine.high %v809_v13, %v813_v15  ;;  %v14423_v25 = vcombine.low %v809_v13, %v813_v15  ;;  %v856_v13 = vld [vmem:[#allocation2 + $0x1510] sm:$0xff] }
 0x4b6   :  { %v860_v15 = vld [vmem:[#allocation2 + $0x1530] sm:$0xff] }
 0x4b7   :  { %10605 = vmatpush1.bf16.msra.mxu0 %v14373_v20  ;;  %11097 = vmatpush1.bf16.msra.mxu1 %v14375_v21  ;;  %v820_v20 = vld [vmem:[#allocation2 + $0x13f0] sm:$0xff]  ;;  %v817_v21 = vld [vmem:[#allocation2 + $0x13d8] sm:$0xff] }
 0x4b8   :  { %10606 = vmatprep.subr.bf16.mxu0 %v14382_v22  ;;  %11098 = vmatprep.subr.bf16.mxu1 %v14384_v24  ;;  %v821_v22 = vld [vmem:[#allocation2 + $0x13f8] sm:$0xff]  ;;  %v14421_v24 = vcombine.low %v808_v10, %v812_v11  ;;  %v14430_v27 = vcombine.high %v816_v19, %v820_v20 }
 0x4b9   :  { %v14432_v48 = vcombine.high %v817_v21, %v821_v22  ;;  %v14431_v32 = vcombine.low %v817_v21, %v821_v22  ;;  %v868_v21 = vld [vmem:[#allocation2 + $0x1570] sm:$0xff]  ;;  %v865_v22 = vld [vmem:[#allocation2 + $0x1558] sm:$0xff] }
 0x4bb   :  { %10607 = vmatpush1.bf16.msra.mxu0 %v14381_v1  ;;  %11099 = vmatpush1.bf16.msra.mxu1 %v14383_v28  ;;  %v828_v1 = vld [vmem:[#allocation2 + $0x1430] sm:$0xff]  ;;  %v825_v28 = vld [vmem:[#allocation2 + $0x1418] sm:$0xff] }
 0x4bc   :  { %10608 = vmatprep.subr.bf16.mxu0 %v14390_v30  ;;  %11100 = vmatprep.subr.bf16.mxu1 %v14392_v31  ;;  %v829_v30 = vld [vmem:[#allocation2 + $0x1438] sm:$0xff]  ;;  %v14429_v31 = vcombine.low %v816_v19, %v820_v20  ;;  %v14438_v33 = vcombine.high %v824_v12, %v828_v1  ;;  %v14470_v19 = vcombine.high %v856_v13, %v860_v15  ;;  %v864_v20 = vld [vmem:[#allocation2 + $0x1550] sm:$0xff] }
 0x4bd   :  { %v14440_v57 = vcombine.high %v825_v28, %v829_v30  ;;  %v14439_v40 = vcombine.low %v825_v28, %v829_v30  ;;  %v876_v28 = vld [vmem:[#allocation2 + $0x15b0] sm:$0xff]  ;;  %v873_v30 = vld [vmem:[#allocation2 + $0x1598] sm:$0xff] }
 0x4bf   :  { %10609 = vmatpush1.bf16.msra.mxu0 %v14389_v34  ;;  %11101 = vmatpush1.bf16.msra.mxu1 %v14391_v36  ;;  %v836_v34 = vld [vmem:[#allocation2 + $0x1470] sm:$0xff]  ;;  %v833_v36 = vld [vmem:[#allocation2 + $0x1458] sm:$0xff] }
 0x4c0   :  { %10610 = vmatprep.subr.bf16.mxu0 %v14398_v37  ;;  %11102 = vmatprep.subr.bf16.mxu1 %v14400_v23  ;;  %v837_v37 = vld [vmem:[#allocation2 + $0x1478] sm:$0xff]  ;;  %v14437_v23 = vcombine.low %v824_v12, %v828_v1  ;;  %v14446_v42 = vcombine.high %v832_v35, %v836_v34  ;;  %v872_v1 = vld [vmem:[#allocation2 + $0x1590] sm:$0xff] }
 0x4c1   :  { %v14448_v43 = vcombine.high %v833_v36, %v837_v37  ;;  %v14447_v0 = vcombine.low %v833_v36, %v837_v37  ;;  %v884_v36 = vld [vmem:[#allocation2 + $0x15f0] sm:$0xff]  ;;  %v881_v37 = vld [vmem:[#allocation2 + $0x15d8] sm:$0xff] }
 0x4c3   :  { %10611 = vmatpush1.bf16.msra.mxu0 %v14397_v49  ;;  %11103 = vmatpush1.bf16.msra.mxu1 %v14399_v50  ;;  %v844_v49 = vld [vmem:[#allocation2 + $0x14b0] sm:$0xff]  ;;  %v841_v50 = vld [vmem:[#allocation2 + $0x1498] sm:$0xff] }
 0x4c4   :  { %10612 = vmatprep.subr.bf16.mxu0 %v14406_v61  ;;  %11104 = vmatprep.subr.bf16.mxu1 %v14408_v62  ;;  %v845_v61 = vld [vmem:[#allocation2 + $0x14b8] sm:$0xff]  ;;  %v14445_v62 = vcombine.low %v832_v35, %v836_v34  ;;  %v14454_v2 = vcombine.high %v840_v47, %v844_v49  ;;  %v880_v34 = vld [vmem:[#allocation2 + $0x15d0] sm:$0xff] }
 0x4c5   :  { %v14456_v3 = vcombine.high %v841_v50, %v845_v61 }
 0x4c7   :  { %10613 = vmatpush1.bf16.msra.mxu0 %v14405_v5  ;;  %11105 = vmatpush1.bf16.msra.mxu1 %v14407_v6  ;;  %v852_v5 = vld [vmem:[#allocation2 + $0x14f0] sm:$0xff]  ;;  %v849_v6 = vld [vmem:[#allocation2 + $0x14d8] sm:$0xff] }
 0x4c8   :  { %10614 = vmatprep.subr.bf16.mxu0 %v14414_v8  ;;  %11106 = vmatprep.subr.bf16.mxu1 %v14416_v9  ;;  %v853_v8 = vld [vmem:[#allocation2 + $0x14f8] sm:$0xff]  ;;  %v14453_v9 = vcombine.low %v840_v47, %v844_v49  ;;  %v14462_v10 = vcombine.high %v848_v4, %v852_v5  ;;  %v888_v49 = vld [vmem:[#allocation2 + $0x1610] sm:$0xff] }
 0x4c9   :  { %v14464_v11 = vcombine.high %v849_v6, %v853_v8 }
 0x4cb   :  { %10615 = vmatpush1.bf16.msra.mxu0 %v14413_v39  ;;  %11107 = vmatpush1.bf16.msra.mxu1 %v14415_v17  ;;  %v857_v39 = vld [vmem:[#allocation2 + $0x1518] sm:$0xff] }
 0x4cc   :  { %10616 = vmatprep.subr.bf16.mxu0 %v14422_v18  ;;  %11108 = vmatprep.subr.bf16.mxu1 %v14424_v54  ;;  %v861_v17 = vld [vmem:[#allocation2 + $0x1538] sm:$0xff]  ;;  %v14461_v18 = vcombine.low %v848_v4, %v852_v5  ;;  %v14463_v54 = vcombine.low %v849_v6, %v853_v8  ;;  %v896_v5 = vld [vmem:[#allocation2 + $0x1650] sm:$0xff] }
 0x4cd   :  { %v900_v6 = vld [vmem:[#allocation2 + $0x1670] sm:$0xff]  ;;  %v897_v8 = vld [vmem:[#allocation2 + $0x1658] sm:$0xff] }
 0x4cf   :  { %10617 = vmatpush1.bf16.msra.mxu0 %v14421_v24  ;;  %11109 = vmatpush1.bf16.msra.mxu1 %v14423_v25  ;;  %v869_v24 = vld [vmem:[#allocation2 + $0x1578] sm:$0xff]  ;;  %v14469_v25 = vcombine.low %v856_v13, %v860_v15  ;;  %v904_v15 = vld [vmem:[#allocation2 + $0x1690] sm:$0xff] }
 0x4d0   :  { %10618 = vmatprep.subr.bf16.mxu0 %v14430_v27  ;;  %11110 = vmatprep.subr.bf16.mxu1 %v14432_v48  ;;  %v14471_v27 = vcombine.low %v857_v39, %v861_v17  ;;  %v14478_v48 = vcombine.high %v864_v20, %v868_v21  ;;  %v14480_v12 = vcombine.high %v865_v22, %v869_v24 }
 0x4d3   :  { %10619 = vmatpush1.bf16.msra.mxu0 %v14429_v31  ;;  %11111 = vmatpush1.bf16.msra.mxu1 %v14431_v32  ;;  %v877_v31 = vld [vmem:[#allocation2 + $0x15b8] sm:$0xff]  ;;  %v14477_v32 = vcombine.low %v864_v20, %v868_v21  ;;  %v912_v21 = vld [vmem:[#allocation2 + $0x16d0] sm:$0xff] }
 0x4d4   :  { %10629 = vmatprep.subr.bf16.mxu0 %v14438_v33  ;;  %11121 = vmatprep.subr.bf16.mxu1 %v14440_v57  ;;  %v14479_v33 = vcombine.low %v865_v22, %v869_v24  ;;  %v14486_v57 = vcombine.high %v872_v1, %v876_v28  ;;  %v14488_v35 = vcombine.high %v873_v30, %v877_v31  ;;  %v916_v22 = vld [vmem:[#allocation2 + $0x16f0] sm:$0xff]  ;;  %v913_v24 = vld [vmem:[#allocation2 + $0x16d8] sm:$0xff] }
 0x4d6   :  { %10621 = vmatmul.mubr.bf16.vlgmr.msra.gmra.mrb[4].mxu0 %v16778_v14  ;;  %11113 = vmatmul.mubr.bf16.vlgmr.msra.gmra.mrb[4].mxu1 %v16778_v14  ;;  %v14455_v14 = vcombine.low %v841_v50, %v845_v61  ;;  %v892_v50 = vld [vmem:[#allocation2 + $0x1630] sm:$0xff]  ;;  %v889_v61 = vld [vmem:[#allocation2 + $0x1618] sm:$0xff] }
 0x4d7   :  { %10630 = vmatpush1.bf16.msra.mxu0 %v14437_v23  ;;  %11122 = vmatpush1.bf16.msra.mxu1 %v14439_v40  ;;  %v885_v23 = vld [vmem:[#allocation2 + $0x15f8] sm:$0xff]  ;;  %v14485_v40 = vcombine.low %v872_v1, %v876_v28  ;;  %v920_v28 = vld [vmem:[#allocation2 + $0x1710] sm:$0xff] }
 0x4d8   :  { %10631 = vmatprep.subr.bf16.mxu0 %v14446_v42  ;;  %11123 = vmatprep.subr.bf16.mxu1 %v14448_v43  ;;  %v14487_v42 = vcombine.low %v873_v30, %v877_v31  ;;  %v14494_v43 = vcombine.high %v880_v34, %v884_v36  ;;  %v14496_v47 = vcombine.high %v881_v37, %v885_v23  ;;  %v924_v30 = vld [vmem:[#allocation2 + $0x1730] sm:$0xff]  ;;  %v921_v31 = vld [vmem:[#allocation2 + $0x1718] sm:$0xff] }
 0x4d9   :  { %10661 = vmatprep.mubr.bf16.mxu0 %v16783_v26  ;;  %11153 = vmatprep.mubr.bf16.mxu1 %v16783_v26  ;;  %v14472_v26 = vcombine.high %v857_v39, %v861_v17  ;;  %v908_v39 = vld [vmem:[#allocation2 + $0x16b0] sm:$0xff]  ;;  %v905_v17 = vld [vmem:[#allocation2 + $0x1698] sm:$0xff] }
 0x4db   :  { %10632 = vmatpush1.bf16.msra.mxu0 %v14445_v62  ;;  %11124 = vmatpush1.bf16.msra.mxu1 %v14447_v0  ;;  %v893_v62 = vld [vmem:[#allocation2 + $0x1638] sm:$0xff]  ;;  %v14493_v0 = vcombine.low %v880_v34, %v884_v36  ;;  %v928_v36 = vld [vmem:[#allocation2 + $0x1750] sm:$0xff] }
 0x4dc   :  { %10633 = vmatprep.subr.bf16.mxu0 %v14454_v2  ;;  %11125 = vmatprep.subr.bf16.mxu1 %v14456_v3  ;;  %v14495_v2 = vcombine.low %v881_v37, %v885_v23  ;;  %v14502_v3 = vcombine.high %v888_v49, %v892_v50  ;;  %v14504_v4 = vcombine.high %v889_v61, %v893_v62  ;;  %v932_v37 = vld [vmem:[#allocation2 + $0x1770] sm:$0xff]  ;;  %v929_v23 = vld [vmem:[#allocation2 + $0x1758] sm:$0xff] }
 0x4df   :  { %10634 = vmatpush1.bf16.msra.mxu0 %v14453_v9  ;;  %11126 = vmatpush1.bf16.msra.mxu1 %v14455_v14  ;;  %v901_v9 = vld [vmem:[#allocation2 + $0x1678] sm:$0xff]  ;;  %v14501_v14 = vcombine.low %v888_v49, %v892_v50  ;;  %v936_v50 = vld [vmem:[#allocation2 + $0x1790] sm:$0xff] }
 0x4e0   :  { %10635 = vmatprep.subr.bf16.mxu0 %v14462_v10  ;;  %11127 = vmatprep.subr.bf16.mxu1 %v14464_v11  ;;  %v14503_v10 = vcombine.low %v889_v61, %v893_v62  ;;  %v14510_v11 = vcombine.high %v896_v5, %v900_v6  ;;  %v14512_v13 = vcombine.high %v897_v8, %v901_v9  ;;  %v940_v61 = vld [vmem:[#allocation2 + $0x17b0] sm:$0xff]  ;;  %v937_v62 = vld [vmem:[#allocation2 + $0x1798] sm:$0xff] }
 0x4e3   :  { %10636 = vmatpush1.bf16.msra.mxu0 %v14461_v18  ;;  %11128 = vmatpush1.bf16.msra.mxu1 %v14463_v54  ;;  %v909_v18 = vld [vmem:[#allocation2 + $0x16b8] sm:$0xff]  ;;  %v14509_v54 = vcombine.low %v896_v5, %v900_v6  ;;  %v944_v6 = vld [vmem:[#allocation2 + $0x17d0] sm:$0xff] }
 0x4e4   :  { %10637 = vmatprep.subr.bf16.mxu0 %v14470_v19  ;;  %11129 = vmatprep.subr.bf16.mxu1 %v14472_v26  ;;  %v14511_v19 = vcombine.low %v897_v8, %v901_v9  ;;  %v14518_v26 = vcombine.high %v904_v15, %v908_v39  ;;  %v14520_v20 = vcombine.high %v905_v17, %v909_v18  ;;  %v948_v8 = vld [vmem:[#allocation2 + $0x17f0] sm:$0xff]  ;;  %v945_v9 = vld [vmem:[#allocation2 + $0x17d8] sm:$0xff] }
 0x4e7   :  { %10638 = vmatpush1.bf16.msra.mxu0 %v14469_v25  ;;  %11130 = vmatpush1.bf16.msra.mxu1 %v14471_v27  ;;  %v917_v25 = vld [vmem:[#allocation2 + $0x16f8] sm:$0xff]  ;;  %v14517_v27 = vcombine.low %v904_v15, %v908_v39  ;;  %v952_v39 = vld [vmem:[#allocation2 + $0x1810] sm:$0xff] }
 0x4e8   :  { %10639 = vmatprep.subr.bf16.mxu0 %v14478_v48  ;;  %11131 = vmatprep.subr.bf16.mxu1 %v14480_v12  ;;  %v14519_v48 = vcombine.low %v905_v17, %v909_v18  ;;  %v14526_v12 = vcombine.high %v912_v21, %v916_v22  ;;  %v14528_v1 = vcombine.high %v913_v24, %v917_v25  ;;  %v956_v17 = vld [vmem:[#allocation2 + $0x1830] sm:$0xff]  ;;  %v953_v18 = vld [vmem:[#allocation2 + $0x1818] sm:$0xff] }
 0x4eb   :  { %10640 = vmatpush1.bf16.msra.mxu0 %v14477_v32  ;;  %11132 = vmatpush1.bf16.msra.mxu1 %v14479_v33  ;;  %v925_v32 = vld [vmem:[#allocation2 + $0x1738] sm:$0xff]  ;;  %v14525_v33 = vcombine.low %v912_v21, %v916_v22  ;;  %v960_v22 = vld [vmem:[#allocation2 + $0x1850] sm:$0xff] }
 0x4ec   :  { %10641 = vmatprep.subr.bf16.mxu0 %v14486_v57  ;;  %11133 = vmatprep.subr.bf16.mxu1 %v14488_v35  ;;  %v14527_v57 = vcombine.low %v913_v24, %v917_v25  ;;  %v14534_v35 = vcombine.high %v920_v28, %v924_v30  ;;  %v14536_v34 = vcombine.high %v921_v31, %v925_v32  ;;  %v964_v24 = vld [vmem:[#allocation2 + $0x1870] sm:$0xff]  ;;  %v961_v25 = vld [vmem:[#allocation2 + $0x1858] sm:$0xff] }
 0x4ef   :  { %10642 = vmatpush1.bf16.msra.mxu0 %v14485_v40  ;;  %11134 = vmatpush1.bf16.msra.mxu1 %v14487_v42  ;;  %v933_v40 = vld [vmem:[#allocation2 + $0x1778] sm:$0xff]  ;;  %v14533_v42 = vcombine.low %v920_v28, %v924_v30  ;;  %v968_v30 = vld [vmem:[#allocation2 + $0x1890] sm:$0xff] }
 0x4f0   :  { %10643 = vmatprep.subr.bf16.mxu0 %v14494_v43  ;;  %11135 = vmatprep.subr.bf16.mxu1 %v14496_v47  ;;  %v14535_v43 = vcombine.low %v921_v31, %v925_v32  ;;  %v14542_v47 = vcombine.high %v928_v36, %v932_v37  ;;  %v14544_v49 = vcombine.high %v929_v23, %v933_v40  ;;  %v972_v31 = vld [vmem:[#allocation2 + $0x18b0] sm:$0xff]  ;;  %v969_v32 = vld [vmem:[#allocation2 + $0x1898] sm:$0xff] }
 0x4f3   :  { %10644 = vmatpush1.bf16.msra.mxu0 %v14493_v0  ;;  %11136 = vmatpush1.bf16.msra.mxu1 %v14495_v2  ;;  %v941_v0 = vld [vmem:[#allocation2 + $0x17b8] sm:$0xff]  ;;  %v14541_v2 = vcombine.low %v928_v36, %v932_v37  ;;  %v976_v37 = vld [vmem:[#allocation2 + $0x18d0] sm:$0xff] }
 0x4f4   :  { %10645 = vmatprep.subr.bf16.mxu0 %v14502_v3  ;;  %11137 = vmatprep.subr.bf16.mxu1 %v14504_v4  ;;  %v14543_v3 = vcombine.low %v929_v23, %v933_v40  ;;  %v14550_v4 = vcombine.high %v936_v50, %v940_v61  ;;  %v14552_v5 = vcombine.high %v937_v62, %v941_v0  ;;  %v980_v23 = vld [vmem:[#allocation2 + $0x18f0] sm:$0xff]  ;;  %v977_v40 = vld [vmem:[#allocation2 + $0x18d8] sm:$0xff] }
 0x4f7   :  { %10646 = vmatpush1.bf16.msra.mxu0 %v14501_v14  ;;  %11138 = vmatpush1.bf16.msra.mxu1 %v14503_v10  ;;  %v949_v14 = vld [vmem:[#allocation2 + $0x17f8] sm:$0xff]  ;;  %v14549_v10 = vcombine.low %v936_v50, %v940_v61  ;;  %v984_v50 = vld [vmem:[#allocation2 + $0x1910] sm:$0xff] }
 0x4f8   :  { %10647 = vmatprep.subr.bf16.mxu0 %v14510_v11  ;;  %11139 = vmatprep.subr.bf16.mxu1 %v14512_v13  ;;  %v14551_v11 = vcombine.low %v937_v62, %v941_v0  ;;  %v14558_v13 = vcombine.high %v944_v6, %v948_v8  ;;  %v14560_v15 = vcombine.high %v945_v9, %v949_v14  ;;  %v988_v61 = vld [vmem:[#allocation2 + $0x1930] sm:$0xff]  ;;  %v985_v62 = vld [vmem:[#allocation2 + $0x1918] sm:$0xff] }
 0x4f9   :  { %v989_v0 = vld [vmem:[#allocation2 + $0x1938] sm:$0xff] }
 0x4fb   :  { %10648 = vmatpush1.bf16.msra.mxu0 %v14509_v54  ;;  %11140 = vmatpush1.bf16.msra.mxu1 %v14511_v19  ;;  %v957_v54 = vld [vmem:[#allocation2 + $0x1838] sm:$0xff]  ;;  %v14557_v19 = vcombine.low %v944_v6, %v948_v8  ;;  %v996_v6 = vld [vmem:[#allocation2 + $0x1970] sm:$0xff] }
 0x4fc   :  { %10649 = vmatprep.subr.bf16.mxu0 %v14518_v26  ;;  %11141 = vmatprep.subr.bf16.mxu1 %v14520_v20  ;;  %v14559_v26 = vcombine.low %v945_v9, %v949_v14  ;;  %v14566_v20 = vcombine.high %v952_v39, %v956_v17  ;;  %v14568_v21 = vcombine.high %v953_v18, %v957_v54  ;;  %v993_v8 = vld [vmem:[#allocation2 + $0x1958] sm:$0xff] }
 0x4fd   :  { %v997_v9 = vld [vmem:[#allocation2 + $0x1978] sm:$0xff]  ;;  %v14597_v14 = vcombine.low %v984_v50, %v988_v61 }
 0x4ff   :  { %10650 = vmatpush1.bf16.msra.mxu0 %v14517_v27  ;;  %11142 = vmatpush1.bf16.msra.mxu1 %v14519_v48  ;;  %v965_v27 = vld [vmem:[#allocation2 + $0x1878] sm:$0xff]  ;;  %v14565_v48 = vcombine.low %v952_v39, %v956_v17  ;;  %v1004_v39 = vld [vmem:[#allocation2 + $0x19b0] sm:$0xff] }
 0x500   :  { %10651 = vmatprep.subr.bf16.mxu0 %v14526_v12  ;;  %11143 = vmatprep.subr.bf16.mxu1 %v14528_v1  ;;  %v14567_v12 = vcombine.low %v953_v18, %v957_v54  ;;  %v14574_v1 = vcombine.high %v960_v22, %v964_v24  ;;  %v14576_v28 = vcombine.high %v961_v25, %v965_v27  ;;  %v1001_v17 = vld [vmem:[#allocation2 + $0x1998] sm:$0xff] }
 0x501   :  { %v1005_v18 = vld [vmem:[#allocation2 + $0x19b8] sm:$0xff] }
 0x503   :  { %10652 = vmatpush1.bf16.msra.mxu0 %v14525_v33  ;;  %11144 = vmatpush1.bf16.msra.mxu1 %v14527_v57  ;;  %v973_v33 = vld [vmem:[#allocation2 + $0x18b8] sm:$0xff]  ;;  %v14573_v57 = vcombine.low %v960_v22, %v964_v24  ;;  %v1012_v22 = vld [vmem:[#allocation2 + $0x19f0] sm:$0xff] }
 0x504   :  { %10653 = vmatprep.subr.bf16.mxu0 %v14534_v35  ;;  %11145 = vmatprep.subr.bf16.mxu1 %v14536_v34  ;;  %v14575_v35 = vcombine.low %v961_v25, %v965_v27  ;;  %v14582_v34 = vcombine.high %v968_v30, %v972_v31  ;;  %v14584_v36 = vcombine.high %v969_v32, %v973_v33  ;;  %v1009_v24 = vld [vmem:[#allocation2 + $0x19d8] sm:$0xff] }
 0x505   :  { %v1013_v25 = vld [vmem:[#allocation2 + $0x19f8] sm:$0xff] }
 0x507   :  { %10654 = vmatpush1.bf16.msra.mxu0 %v14533_v42  ;;  %11146 = vmatpush1.bf16.msra.mxu1 %v14535_v43  ;;  %v981_v42 = vld [vmem:[#allocation2 + $0x18f8] sm:$0xff]  ;;  %v14581_v43 = vcombine.low %v968_v30, %v972_v31  ;;  %v1020_v30 = vld [vmem:[#allocation2 + $0x1a30] sm:$0xff] }
 0x508   :  { %10655 = vmatprep.subr.bf16.mxu0 %v14542_v47  ;;  %11147 = vmatprep.subr.bf16.mxu1 %v14544_v49  ;;  %v14590_v47 = vcombine.high %v976_v37, %v980_v23  ;;  %v14592_v49 = vcombine.high %v977_v40, %v981_v42  ;;  %v1017_v31 = vld [vmem:[#allocation2 + $0x1a18] sm:$0xff] }
 0x50b   :  { %10656 = vmatpush1.bf16.msra.mxu0 %v14541_v2  ;;  %11148 = vmatpush1.bf16.msra.mxu1 %v14543_v3  ;;  %v14589_v2 = vcombine.low %v976_v37, %v980_v23  ;;  %v14591_v3 = vcombine.low %v977_v40, %v981_v42  ;;  %v1028_v37 = vld [vmem:[#allocation2 + $0x1a70] sm:$0xff]  ;;  %v1025_v23 = vld [vmem:[#allocation2 + $0x1a58] sm:$0xff] }
 0x50c   :  { %10657 = vmatprep.subr.bf16.mxu0 %v14550_v4  ;;  %11149 = vmatprep.subr.bf16.mxu1 %v14552_v5  ;;  %v14598_v4 = vcombine.high %v984_v50, %v988_v61  ;;  %v992_v5 = vld [vmem:[#allocation2 + $0x1950] sm:$0xff]  ;;  %v1029_v40 = vld [vmem:[#allocation2 + $0x1a78] sm:$0xff] }
 0x50d   :  { %v14605_v54 = vcombine.low %v992_v5, %v996_v6  ;;  %v1036_v50 = vld [vmem:[#allocation2 + $0x1ab0] sm:$0xff]  ;;  %v1033_v61 = vld [vmem:[#allocation2 + $0x1a98] sm:$0xff] }
 0x50f   :  { %10658 = vmatpush1.bf16.msra.mxu0 %v14549_v10  ;;  %11150 = vmatpush1.bf16.msra.mxu1 %v14551_v11  ;;  %v14599_v10 = vcombine.low %v985_v62, %v989_v0  ;;  %v14606_v11 = vcombine.high %v992_v5, %v996_v6  ;;  %v1044_v5 = vld [vmem:[#allocation2 + $0x1af0] sm:$0xff]  ;;  %v1041_v6 = vld [vmem:[#allocation2 + $0x1ad8] sm:$0xff] }
 0x510   :  { %10659 = vmatprep.subr.bf16.mxu0 %v14558_v13  ;;  %11151 = vmatprep.subr.bf16.mxu1 %v14560_v15  ;;  %v14608_v13 = vcombine.high %v993_v8, %v997_v9  ;;  %v1000_v15 = vld [vmem:[#allocation2 + $0x1990] sm:$0xff] }
 0x511   :  { %v14613_v27 = vcombine.low %v1000_v15, %v1004_v39 }
 0x513   :  { %10660 = vmatpush1.bf16.msra.mxu0 %v14557_v19  ;;  %11152 = vmatpush1.bf16.msra.mxu1 %v14559_v26  ;;  %v14607_v19 = vcombine.low %v993_v8, %v997_v9  ;;  %v14614_v26 = vcombine.high %v1000_v15, %v1004_v39  ;;  %v1045_v8 = vld [vmem:[#allocation2 + $0x1af8] sm:$0xff]  ;;  %v1052_v15 = vld [vmem:[#allocation2 + $0x1b30] sm:$0xff] }
 0x514   :  { %10670 = vmatprep.subr.bf16.mxu0 %v14566_v20  ;;  %11162 = vmatprep.subr.bf16.mxu1 %v14568_v21  ;;  %v14616_v20 = vcombine.high %v1001_v17, %v1005_v18  ;;  %v1008_v21 = vld [vmem:[#allocation2 + $0x19d0] sm:$0xff]  ;;  %v1049_v39 = vld [vmem:[#allocation2 + $0x1b18] sm:$0xff] }
 0x516   :  { %10662 = vmatmul.mubr.bf16.vlgmr.msra.gmra.mrb[4].mxu0 %v16792_v44  ;;  %11154 = vmatmul.mubr.bf16.vlgmr.msra.gmra.mrb[4].mxu1 %v16792_v44  ;;  %v14583_v44 = vcombine.low %v969_v32, %v973_v33  ;;  %v1021_v32 = vld [vmem:[#allocation2 + $0x1a38] sm:$0xff]  ;;  %v14621_v33 = vcombine.low %v1008_v21, %v1012_v22 }
 0x517   :  { %10671 = vmatpush1.bf16.msra.mxu0 %v14565_v48  ;;  %11163 = vmatpush1.bf16.msra.mxu1 %v14567_v12  ;;  %v14615_v48 = vcombine.low %v1001_v17, %v1005_v18  ;;  %v14622_v12 = vcombine.high %v1008_v21, %v1012_v22  ;;  %v1053_v17 = vld [vmem:[#allocation2 + $0x1b38] sm:$0xff]  ;;  %v1060_v21 = vld [vmem:[#allocation2 + $0x1b70] sm:$0xff] }
 0x518   :  { %10672 = vmatprep.subr.bf16.mxu0 %v14574_v1  ;;  %11164 = vmatprep.subr.bf16.mxu1 %v14576_v28  ;;  %v14624_v1 = vcombine.high %v1009_v24, %v1013_v25  ;;  %v1016_v28 = vld [vmem:[#allocation2 + $0x1a10] sm:$0xff]  ;;  %v1057_v22 = vld [vmem:[#allocation2 + $0x1b58] sm:$0xff] }
 0x519   :  { %10702 = vmatprep.mubr.bf16.mxu0 %v16797_v56  ;;  %11194 = vmatprep.mubr.bf16.mxu1 %v16797_v56  ;;  %v14600_v56 = vcombine.high %v985_v62, %v989_v0  ;;  %v14629_v42 = vcombine.low %v1016_v28, %v1020_v30  ;;  %v1037_v62 = vld [vmem:[#allocation2 + $0x1ab8] sm:$0xff] }
 0x51b   :  { %10673 = vmatpush1.bf16.msra.mxu0 %v14573_v57  ;;  %11165 = vmatpush1.bf16.msra.mxu1 %v14575_v35  ;;  %v14623_v57 = vcombine.low %v1009_v24, %v1013_v25  ;;  %v14630_v35 = vcombine.high %v1016_v28, %v1020_v30  ;;  %v1061_v24 = vld [vmem:[#allocation2 + $0x1b78] sm:$0xff]  ;;  %v1068_v28 = vld [vmem:[#allocation2 + $0x1bb0] sm:$0xff] }
 0x51c   :  { %10674 = vmatprep.subr.bf16.mxu0 %v14582_v34  ;;  %11166 = vmatprep.subr.bf16.mxu1 %v14584_v36  ;;  %v14632_v34 = vcombine.high %v1017_v31, %v1021_v32  ;;  %v1024_v36 = vld [vmem:[#allocation2 + $0x1a50] sm:$0xff]  ;;  %v1065_v30 = vld [vmem:[#allocation2 + $0x1b98] sm:$0xff] }
 0x51d   :  { %v14637_v0 = vcombine.low %v1024_v36, %v1028_v37 }
 0x51f   :  { %10675 = vmatpush1.bf16.msra.mxu0 %v14581_v43  ;;  %11167 = vmatpush1.bf16.msra.mxu1 %v14583_v44  ;;  %v14631_v43 = vcombine.low %v1017_v31, %v1021_v32  ;;  %v14638_v44 = vcombine.high %v1024_v36, %v1028_v37  ;;  %v1069_v31 = vld [vmem:[#allocation2 + $0x1bb8] sm:$0xff]  ;;  %v1076_v36 = vld [vmem:[#allocation2 + $0x1bf0] sm:$0xff] }
 0x520   :  { %10676 = vmatprep.subr.bf16.mxu0 %v14590_v47  ;;  %11168 = vmatprep.subr.bf16.mxu1 %v14592_v49  ;;  %v14640_v47 = vcombine.high %v1025_v23, %v1029_v40  ;;  %v1032_v49 = vld [vmem:[#allocation2 + $0x1a90] sm:$0xff]  ;;  %v1073_v37 = vld [vmem:[#allocation2 + $0x1bd8] sm:$0xff] }
 0x521   :  { %v14645_v9 = vcombine.low %v1032_v49, %v1036_v50 }
 0x523   :  { %10677 = vmatpush1.bf16.msra.mxu0 %v14589_v2  ;;  %11169 = vmatpush1.bf16.msra.mxu1 %v14591_v3  ;;  %v14639_v2 = vcombine.low %v1025_v23, %v1029_v40  ;;  %v14646_v3 = vcombine.high %v1032_v49, %v1036_v50  ;;  %v1077_v23 = vld [vmem:[#allocation2 + $0x1bf8] sm:$0xff]  ;;  %v1084_v49 = vld [vmem:[#allocation2 + $0x1c30] sm:$0xff] }
 0x524   :  { %10678 = vmatprep.subr.bf16.mxu0 %v14598_v4  ;;  %11170 = vmatprep.subr.bf16.mxu1 %v14600_v56  ;;  %v14648_v4 = vcombine.high %v1033_v61, %v1037_v62  ;;  %v1040_v56 = vld [vmem:[#allocation2 + $0x1ad0] sm:$0xff]  ;;  %v1081_v50 = vld [vmem:[#allocation2 + $0x1c18] sm:$0xff] }
 0x525   :  { %v14653_v18 = vcombine.low %v1040_v56, %v1044_v5 }
 0x527   :  { %10679 = vmatpush1.bf16.msra.mxu0 %v14597_v14  ;;  %11171 = vmatpush1.bf16.msra.mxu1 %v14599_v10  ;;  %v14647_v14 = vcombine.low %v1033_v61, %v1037_v62  ;;  %v14654_v10 = vcombine.high %v1040_v56, %v1044_v5  ;;  %v1085_v61 = vld [vmem:[#allocation2 + $0x1c38] sm:$0xff]  ;;  %v1092_v56 = vld [vmem:[#allocation2 + $0x1c70] sm:$0xff] }
 0x528   :  { %10680 = vmatprep.subr.bf16.mxu0 %v14606_v11  ;;  %11172 = vmatprep.subr.bf16.mxu1 %v14608_v13  ;;  %v14656_v11 = vcombine.high %v1041_v6, %v1045_v8  ;;  %v1048_v13 = vld [vmem:[#allocation2 + $0x1b10] sm:$0xff]  ;;  %v1089_v5 = vld [vmem:[#allocation2 + $0x1c58] sm:$0xff] }
 0x529   :  { %v14661_v25 = vcombine.low %v1048_v13, %v1052_v15 }
 0x52b   :  { %10681 = vmatpush1.bf16.msra.mxu0 %v14605_v54  ;;  %11173 = vmatpush1.bf16.msra.mxu1 %v14607_v19  ;;  %v14655_v54 = vcombine.low %v1041_v6, %v1045_v8  ;;  %v14662_v19 = vcombine.high %v1048_v13, %v1052_v15  ;;  %v1093_v6 = vld [vmem:[#allocation2 + $0x1c78] sm:$0xff]  ;;  %v1100_v13 = vld [vmem:[#allocation2 + $0x1cb0] sm:$0xff] }
 0x52c   :  { %10682 = vmatprep.subr.bf16.mxu0 %v14614_v26  ;;  %11174 = vmatprep.subr.bf16.mxu1 %v14616_v20  ;;  %v14664_v26 = vcombine.high %v1049_v39, %v1053_v17  ;;  %v1056_v20 = vld [vmem:[#allocation2 + $0x1b50] sm:$0xff]  ;;  %v1097_v15 = vld [vmem:[#allocation2 + $0x1c98] sm:$0xff] }
 0x52d   :  { %v14669_v32 = vcombine.low %v1056_v20, %v1060_v21 }
 0x52f   :  { %10683 = vmatpush1.bf16.msra.mxu0 %v14613_v27  ;;  %11175 = vmatpush1.bf16.msra.mxu1 %v14615_v48  ;;  %v14663_v27 = vcombine.low %v1049_v39, %v1053_v17  ;;  %v14670_v48 = vcombine.high %v1056_v20, %v1060_v21  ;;  %v1101_v39 = vld [vmem:[#allocation2 + $0x1cb8] sm:$0xff]  ;;  %v1108_v20 = vld [vmem:[#allocation2 + $0x1cf0] sm:$0xff] }
 0x530   :  { %10684 = vmatprep.subr.bf16.mxu0 %v14622_v12  ;;  %11176 = vmatprep.subr.bf16.mxu1 %v14624_v1  ;;  %v14672_v12 = vcombine.high %v1057_v22, %v1061_v24  ;;  %v1064_v1 = vld [vmem:[#allocation2 + $0x1b90] sm:$0xff]  ;;  %v1105_v21 = vld [vmem:[#allocation2 + $0x1cd8] sm:$0xff] }
 0x531   :  { %v14677_v40 = vcombine.low %v1064_v1, %v1068_v28 }
 0x533   :  { %10685 = vmatpush1.bf16.msra.mxu0 %v14621_v33  ;;  %11177 = vmatpush1.bf16.msra.mxu1 %v14623_v57  ;;  %v14671_v33 = vcombine.low %v1057_v22, %v1061_v24  ;;  %v14678_v57 = vcombine.high %v1064_v1, %v1068_v28  ;;  %v1109_v22 = vld [vmem:[#allocation2 + $0x1cf8] sm:$0xff] }
 0x534   :  { %10686 = vmatprep.subr.bf16.mxu0 %v14630_v35  ;;  %11178 = vmatprep.subr.bf16.mxu1 %v14632_v34  ;;  %v14680_v35 = vcombine.high %v1065_v30, %v1069_v31  ;;  %v1072_v34 = vld [vmem:[#allocation2 + $0x1bd0] sm:$0xff]  ;;  %v1113_v1 = vld [vmem:[#allocation2 + $0x1d18] sm:$0xff] }
 0x535   :  { %v14685_v62 = vcombine.low %v1072_v34, %v1076_v36  ;;  %v1117_v28 = vld [vmem:[#allocation2 + $0x1d38] sm:$0xff] }
 0x537   :  { %10687 = vmatpush1.bf16.msra.mxu0 %v14629_v42  ;;  %11179 = vmatpush1.bf16.msra.mxu1 %v14631_v43  ;;  %v14679_v42 = vcombine.low %v1065_v30, %v1069_v31  ;;  %v14686_v43 = vcombine.high %v1072_v34, %v1076_v36  ;;  %v14719_v31 = vcombine.low %v1105_v21, %v1109_v22  ;;  %v1125_v34 = vld [vmem:[#allocation2 + $0x1d78] sm:$0xff] }
 0x538   :  { %10688 = vmatprep.subr.bf16.mxu0 %v14638_v44  ;;  %11180 = vmatprep.subr.bf16.mxu1 %v14640_v47  ;;  %v14688_v44 = vcombine.high %v1073_v37, %v1077_v23  ;;  %v1080_v47 = vld [vmem:[#allocation2 + $0x1c10] sm:$0xff] }
 0x539   :  { %v14693_v8 = vcombine.low %v1080_v47, %v1084_v49 }
 0x53b   :  { %10689 = vmatpush1.bf16.msra.mxu0 %v14637_v0  ;;  %11181 = vmatpush1.bf16.msra.mxu1 %v14639_v2  ;;  %v14687_v0 = vcombine.low %v1073_v37, %v1077_v23  ;;  %v14694_v2 = vcombine.high %v1080_v47, %v1084_v49  ;;  %v14727_v37 = vcombine.low %v1113_v1, %v1117_v28  ;;  %v1133_v47 = vld [vmem:[#allocation2 + $0x1db8] sm:$0xff] }
 0x53c   :  { %10690 = vmatprep.subr.bf16.mxu0 %v14646_v3  ;;  %11182 = vmatprep.subr.bf16.mxu1 %v14648_v4  ;;  %v14696_v3 = vcombine.high %v1081_v50, %v1085_v61  ;;  %v1088_v4 = vld [vmem:[#allocation2 + $0x1c50] sm:$0xff] }
 0x53d   :  { %v14701_v17 = vcombine.low %v1088_v4, %v1092_v56 }
 0x53f   :  { %10691 = vmatpush1.bf16.msra.mxu0 %v14645_v9  ;;  %11183 = vmatpush1.bf16.msra.mxu1 %v14647_v14  ;;  %v14695_v9 = vcombine.low %v1081_v50, %v1085_v61  ;;  %v14702_v14 = vcombine.high %v1088_v4, %v1092_v56  ;;  %v1141_v4 = vld [vmem:[#allocation2 + $0x1df8] sm:$0xff] }
 0x540   :  { %10692 = vmatprep.subr.bf16.mxu0 %v14654_v10  ;;  %11184 = vmatprep.subr.bf16.mxu1 %v14656_v11  ;;  %v14704_v10 = vcombine.high %v1089_v5, %v1093_v6  ;;  %v1096_v11 = vld [vmem:[#allocation2 + $0x1c90] sm:$0xff] }
 0x541   :  { %v14709_v24 = vcombine.low %v1096_v11, %v1100_v13 }
 0x543   :  { %10693 = vmatpush1.bf16.msra.mxu0 %v14653_v18  ;;  %11185 = vmatpush1.bf16.msra.mxu1 %v14655_v54  ;;  %v14703_v18 = vcombine.low %v1089_v5, %v1093_v6  ;;  %v14710_v54 = vcombine.high %v1096_v11, %v1100_v13  ;;  %v1149_v11 = vld [vmem:[#allocation2 + $0x1e38] sm:$0xff] }
 0x544   :  { %10694 = vmatprep.subr.bf16.mxu0 %v14662_v19  ;;  %11186 = vmatprep.subr.bf16.mxu1 %v14664_v26  ;;  %v14712_v19 = vcombine.high %v1097_v15, %v1101_v39  ;;  %v1104_v26 = vld [vmem:[#allocation2 + $0x1cd0] sm:$0xff] }
 0x545   :  { %v14717_v30 = vcombine.low %v1104_v26, %v1108_v20 }
 0x547   :  { %10695 = vmatpush1.bf16.msra.mxu0 %v14661_v25  ;;  %11187 = vmatpush1.bf16.msra.mxu1 %v14663_v27  ;;  %v14718_v25 = vcombine.high %v1104_v26, %v1108_v20  ;;  %v14720_v27 = vcombine.high %v1105_v21, %v1109_v22  ;;  %v1157_v26 = vld [vmem:[#allocation2 + $0x1e78] sm:$0xff] }
 0x548   :  { %10696 = vmatprep.subr.bf16.mxu0 %v14670_v48  ;;  %11188 = vmatprep.subr.bf16.mxu1 %v14672_v12  ;;  %v1112_v48 = vld [vmem:[#allocation2 + $0x1d10] sm:$0xff] }
 0x549   :  { %v1116_v12 = vld [vmem:[#allocation2 + $0x1d30] sm:$0xff] }
 0x54a   :  { %v14725_v36 = vcombine.low %v1112_v48, %v1116_v12 }
 0x54b   :  { %10697 = vmatpush1.bf16.msra.mxu0 %v14669_v32  ;;  %11189 = vmatpush1.bf16.msra.mxu1 %v14671_v33  ;;  %v14726_v32 = vcombine.high %v1112_v48, %v1116_v12  ;;  %v1120_v33 = vld [vmem:[#allocation2 + $0x1d50] sm:$0xff]  ;;  %v1165_v48 = vld [vmem:[#allocation2 + $0x1eb8] sm:$0xff] }
 0x54c   :  { %10698 = vmatprep.subr.bf16.mxu0 %v14678_v57  ;;  %11190 = vmatprep.subr.bf16.mxu1 %v14680_v35  ;;  %v1124_v57 = vld [vmem:[#allocation2 + $0x1d70] sm:$0xff]  ;;  %v1121_v35 = vld [vmem:[#allocation2 + $0x1d58] sm:$0xff] }
 0x54d   :  { %v14734_v23 = vcombine.high %v1120_v33, %v1124_v57  ;;  %v14733_v49 = vcombine.low %v1120_v33, %v1124_v57  ;;  %v14735_v50 = vcombine.low %v1121_v35, %v1125_v34  ;;  %v1173_v33 = vld [vmem:[#allocation2 + $0x1ef8] sm:$0xff] }
 0x54f   :  { %10699 = vmatpush1.bf16.msra.mxu0 %v14677_v40  ;;  %11191 = vmatpush1.bf16.msra.mxu1 %v14679_v42  ;;  %v14736_v40 = vcombine.high %v1121_v35, %v1125_v34  ;;  %v1128_v42 = vld [vmem:[#allocation2 + $0x1d90] sm:$0xff] }
 0x550   :  { %10700 = vmatprep.subr.bf16.mxu0 %v14686_v43  ;;  %11192 = vmatprep.subr.bf16.mxu1 %v14688_v44  ;;  %v1132_v43 = vld [vmem:[#allocation2 + $0x1db0] sm:$0xff]  ;;  %v1129_v44 = vld [vmem:[#allocation2 + $0x1d98] sm:$0xff] }
 0x551   :  { %v14742_v61 = vcombine.high %v1128_v42, %v1132_v43  ;;  %v14741_v56 = vcombine.low %v1128_v42, %v1132_v43  ;;  %v14743_v5 = vcombine.low %v1129_v44, %v1133_v47  ;;  %v1181_v42 = vld [vmem:[#allocation2 + $0x1f38] sm:$0xff] }
 0x553   :  { %10701 = vmatpush1.bf16.msra.mxu0 %v14685_v62  ;;  %11193 = vmatpush1.bf16.msra.mxu1 %v14687_v0  ;;  %v14744_v62 = vcombine.high %v1129_v44, %v1133_v47  ;;  %v1136_v0 = vld [vmem:[#allocation2 + $0x1dd0] sm:$0xff] }
 0x554   :  { %10711 = vmatprep.subr.bf16.mxu0 %v14694_v2  ;;  %11203 = vmatprep.subr.bf16.mxu1 %v14696_v3  ;;  %v1140_v2 = vld [vmem:[#allocation2 + $0x1df0] sm:$0xff]  ;;  %v1137_v3 = vld [vmem:[#allocation2 + $0x1dd8] sm:$0xff] }
 0x555   :  { %v14750_v6 = vcombine.high %v1136_v0, %v1140_v2  ;;  %v14749_v13 = vcombine.low %v1136_v0, %v1140_v2  ;;  %v1189_v0 = vld [vmem:[#allocation2 + $0x1f78] sm:$0xff] }
 0x556   :  { %10703 = vmatmul.mubr.bf16.vlgmr.msra.gmra.mrb[4].mxu0 %v16806_v16  ;;  %11195 = vmatmul.mubr.bf16.vlgmr.msra.gmra.mrb[4].mxu1 %v16806_v16  ;;  %v14711_v16 = vcombine.low %v1097_v15, %v1101_v39  ;;  %v14751_v15 = vcombine.low %v1137_v3, %v1141_v4 }
 0x557   :  { %10712 = vmatpush1.bf16.msra.mxu0 %v14693_v8  ;;  %11204 = vmatpush1.bf16.msra.mxu1 %v14695_v9  ;;  %v14752_v8 = vcombine.high %v1137_v3, %v1141_v4  ;;  %v1144_v9 = vld [vmem:[#allocation2 + $0x1e10] sm:$0xff] }
 0x558   :  { %10713 = vmatprep.subr.bf16.mxu0 %v14702_v14  ;;  %11205 = vmatprep.subr.bf16.mxu1 %v14704_v10  ;;  %v1148_v14 = vld [vmem:[#allocation2 + $0x1e30] sm:$0xff]  ;;  %v1145_v10 = vld [vmem:[#allocation2 + $0x1e18] sm:$0xff] }
 0x559   :  { %10743 = vmatprep.mubr.bf16.mxu0 %v16811_v29  ;;  %11235 = vmatprep.mubr.bf16.mxu1 %v16811_v29  ;;  %v14728_v29 = vcombine.high %v1113_v1, %v1117_v28  ;;  %v14758_v39 = vcombine.high %v1144_v9, %v1148_v14  ;;  %v14757_v20 = vcombine.low %v1144_v9, %v1148_v14  ;;  %v1197_v9 = vld [vmem:[#allocation2 + $0x1fb8] sm:$0xff] }
 0x55a   :  { %v14759_v21 = vcombine.low %v1145_v10, %v1149_v11 }
 0x55b   :  { %10714 = vmatpush1.bf16.msra.mxu0 %v14701_v17  ;;  %11206 = vmatpush1.bf16.msra.mxu1 %v14703_v18  ;;  %v14760_v17 = vcombine.high %v1145_v10, %v1149_v11  ;;  %v1152_v18 = vld [vmem:[#allocation2 + $0x1e50] sm:$0xff] }
 0x55c   :  { %10715 = vmatprep.subr.bf16.mxu0 %v14710_v54  ;;  %11207 = vmatprep.subr.bf16.mxu1 %v14712_v19  ;;  %v1156_v54 = vld [vmem:[#allocation2 + $0x1e70] sm:$0xff]  ;;  %v1153_v19 = vld [vmem:[#allocation2 + $0x1e58] sm:$0xff] }
 0x55d   :  { %v14766_v22 = vcombine.high %v1152_v18, %v1156_v54  ;;  %v14765_v12 = vcombine.low %v1152_v18, %v1156_v54  ;;  %v14767_v1 = vcombine.low %v1153_v19, %v1157_v26  ;;  %v1205_v18 = vld [vmem:[#allocation2 + $0x1ff8] sm:$0xff] }
 0x55f   :  { %10716 = vmatpush1.bf16.msra.mxu0 %v14709_v24  ;;  %11208 = vmatpush1.bf16.msra.mxu1 %v14711_v16  ;;  %v14768_v24 = vcombine.high %v1153_v19, %v1157_v26  ;;  %v1160_v16 = vld [vmem:[#allocation2 + $0x1e90] sm:$0xff] }
 0x560   :  { %10717 = vmatprep.subr.bf16.mxu0 %v14718_v25  ;;  %11209 = vmatprep.subr.bf16.mxu1 %v14720_v27  ;;  %v1164_v25 = vld [vmem:[#allocation2 + $0x1eb0] sm:$0xff]  ;;  %v1161_v27 = vld [vmem:[#allocation2 + $0x1e98] sm:$0xff] }
 0x561   :  { %v14774_v28 = vcombine.high %v1160_v16, %v1164_v25  ;;  %v14773_v57 = vcombine.low %v1160_v16, %v1164_v25  ;;  %v14775_v35 = vcombine.low %v1161_v27, %v1165_v48  ;;  %v1213_v16 = vld [vmem:[#allocation2 + $0x2038] sm:$0xff] }
 0x563   :  { %10718 = vmatpush1.bf16.msra.mxu0 %v14717_v30  ;;  %11210 = vmatpush1.bf16.msra.mxu1 %v14719_v31  ;;  %v14776_v30 = vcombine.high %v1161_v27, %v1165_v48  ;;  %v1168_v31 = vld [vmem:[#allocation2 + $0x1ed0] sm:$0xff] }
 0x564   :  { %10719 = vmatprep.subr.bf16.mxu0 %v14726_v32  ;;  %11211 = vmatprep.subr.bf16.mxu1 %v14728_v29  ;;  %v1172_v32 = vld [vmem:[#allocation2 + $0x1ef0] sm:$0xff]  ;;  %v1169_v29 = vld [vmem:[#allocation2 + $0x1ed8] sm:$0xff] }
 0x565   :  { %v14782_v34 = vcombine.high %v1168_v31, %v1172_v32  ;;  %v14781_v43 = vcombine.low %v1168_v31, %v1172_v32  ;;  %v14783_v44 = vcombine.low %v1169_v29, %v1173_v33  ;;  %v1221_v31 = vld [vmem:[#allocation2 + $0x2078] sm:$0xff] }
 0x567   :  { %10720 = vmatpush1.bf16.msra.mxu0 %v14725_v36  ;;  %11212 = vmatpush1.bf16.msra.mxu1 %v14727_v37  ;;  %v14784_v36 = vcombine.high %v1169_v29, %v1173_v33  ;;  %v1176_v37 = vld [vmem:[#allocation2 + $0x1f10] sm:$0xff] }
 0x568   :  { %10721 = vmatprep.subr.bf16.mxu0 %v14734_v23  ;;  %11213 = vmatprep.subr.bf16.mxu1 %v14736_v40  ;;  %v1180_v23 = vld [vmem:[#allocation2 + $0x1f30] sm:$0xff]  ;;  %v1177_v40 = vld [vmem:[#allocation2 + $0x1f18] sm:$0xff] }
 0x569   :  { %v14790_v47 = vcombine.high %v1176_v37, %v1180_v23  ;;  %v14789_v2 = vcombine.low %v1176_v37, %v1180_v23  ;;  %v14791_v3 = vcombine.low %v1177_v40, %v1181_v42  ;;  %v1229_v37 = vld [vmem:[#allocation2 + $0x20b8] sm:$0xff] }
 0x56b   :  { %10722 = vmatpush1.bf16.msra.mxu0 %v14733_v49  ;;  %11214 = vmatpush1.bf16.msra.mxu1 %v14735_v50  ;;  %v14792_v49 = vcombine.high %v1177_v40, %v1181_v42  ;;  %v1184_v50 = vld [vmem:[#allocation2 + $0x1f50] sm:$0xff] }
 0x56c   :  { %10723 = vmatprep.subr.bf16.mxu0 %v14742_v61  ;;  %11215 = vmatprep.subr.bf16.mxu1 %v14744_v62  ;;  %v1188_v61 = vld [vmem:[#allocation2 + $0x1f70] sm:$0xff]  ;;  %v1185_v62 = vld [vmem:[#allocation2 + $0x1f58] sm:$0xff] }
 0x56d   :  { %v14798_v4 = vcombine.high %v1184_v50, %v1188_v61  ;;  %v14797_v14 = vcombine.low %v1184_v50, %v1188_v61  ;;  %v14799_v10 = vcombine.low %v1185_v62, %v1189_v0  ;;  %v1237_v50 = vld [vmem:[#allocation2 + $0x20f8] sm:$0xff] }
 0x56f   :  { %10724 = vmatpush1.bf16.msra.mxu0 %v14741_v56  ;;  %11216 = vmatpush1.bf16.msra.mxu1 %v14743_v5  ;;  %v14800_v56 = vcombine.high %v1185_v62, %v1189_v0  ;;  %v1192_v5 = vld [vmem:[#allocation2 + $0x1f90] sm:$0xff] }
 0x570   :  { %10725 = vmatprep.subr.bf16.mxu0 %v14750_v6  ;;  %11217 = vmatprep.subr.bf16.mxu1 %v14752_v8  ;;  %v1196_v6 = vld [vmem:[#allocation2 + $0x1fb0] sm:$0xff]  ;;  %v1193_v8 = vld [vmem:[#allocation2 + $0x1f98] sm:$0xff] }
 0x571   :  { %v14806_v11 = vcombine.high %v1192_v5, %v1196_v6  ;;  %v14805_v54 = vcombine.low %v1192_v5, %v1196_v6  ;;  %v14807_v19 = vcombine.low %v1193_v8, %v1197_v9 }
 0x573   :  { %10726 = vmatpush1.bf16.msra.mxu0 %v14749_v13  ;;  %11218 = vmatpush1.bf16.msra.mxu1 %v14751_v15  ;;  %v14808_v13 = vcombine.high %v1193_v8, %v1197_v9  ;;  %v1200_v15 = vld [vmem:[#allocation2 + $0x1fd0] sm:$0xff] }
 0x574   :  { %10727 = vmatprep.subr.bf16.mxu0 %v14758_v39  ;;  %11219 = vmatprep.subr.bf16.mxu1 %v14760_v17  ;;  %v1204_v39 = vld [vmem:[#allocation2 + $0x1ff0] sm:$0xff]  ;;  %v1201_v17 = vld [vmem:[#allocation2 + $0x1fd8] sm:$0xff] }
 0x575   :  { %v14814_v26 = vcombine.high %v1200_v15, %v1204_v39  ;;  %v14813_v25 = vcombine.low %v1200_v15, %v1204_v39  ;;  %v14815_v27 = vcombine.low %v1201_v17, %v1205_v18  ;;  %v1248_v9 = vld [vmem:[#allocation2 + $0x2150] sm:$0xff] }
 0x577   :  { %10728 = vmatpush1.bf16.msra.mxu0 %v14757_v20  ;;  %11220 = vmatpush1.bf16.msra.mxu1 %v14759_v21  ;;  %v14816_v20 = vcombine.high %v1201_v17, %v1205_v18  ;;  %v1208_v21 = vld [vmem:[#allocation2 + $0x2010] sm:$0xff] }
 0x578   :  { %10729 = vmatprep.subr.bf16.mxu0 %v14766_v22  ;;  %11221 = vmatprep.subr.bf16.mxu1 %v14768_v24  ;;  %v1212_v22 = vld [vmem:[#allocation2 + $0x2030] sm:$0xff]  ;;  %v1209_v24 = vld [vmem:[#allocation2 + $0x2018] sm:$0xff] }
 0x579   :  { %v14822_v48 = vcombine.high %v1208_v21, %v1212_v22  ;;  %v14821_v32 = vcombine.low %v1208_v21, %v1212_v22  ;;  %v14823_v29 = vcombine.low %v1209_v24, %v1213_v16  ;;  %v1256_v18 = vld [vmem:[#allocation2 + $0x2190] sm:$0xff] }
 0x57b   :  { %10730 = vmatpush1.bf16.msra.mxu0 %v14765_v12  ;;  %11222 = vmatpush1.bf16.msra.mxu1 %v14767_v1  ;;  %v14824_v12 = vcombine.high %v1209_v24, %v1213_v16  ;;  %v1216_v1 = vld [vmem:[#allocation2 + $0x2050] sm:$0xff] }
 0x57c   :  { %10731 = vmatprep.subr.bf16.mxu0 %v14774_v28  ;;  %11223 = vmatprep.subr.bf16.mxu1 %v14776_v30  ;;  %v1220_v28 = vld [vmem:[#allocation2 + $0x2070] sm:$0xff]  ;;  %v1217_v30 = vld [vmem:[#allocation2 + $0x2058] sm:$0xff] }
 0x57d   :  { %v14830_v33 = vcombine.high %v1216_v1, %v1220_v28  ;;  %v14829_v23 = vcombine.low %v1216_v1, %v1220_v28  ;;  %v14831_v40 = vcombine.low %v1217_v30, %v1221_v31  ;;  %v1264_v16 = vld [vmem:[#allocation2 + $0x21d0] sm:$0xff] }
 0x57f   :  { %10732 = vmatpush1.bf16.msra.mxu0 %v14773_v57  ;;  %11224 = vmatpush1.bf16.msra.mxu1 %v14775_v35  ;;  %v14832_v57 = vcombine.high %v1217_v30, %v1221_v31  ;;  %v1224_v35 = vld [vmem:[#allocation2 + $0x2090] sm:$0xff] }
 0x580   :  { %10733 = vmatprep.subr.bf16.mxu0 %v14782_v34  ;;  %11225 = vmatprep.subr.bf16.mxu1 %v14784_v36  ;;  %v1228_v34 = vld [vmem:[#allocation2 + $0x20b0] sm:$0xff]  ;;  %v1225_v36 = vld [vmem:[#allocation2 + $0x2098] sm:$0xff] }
 0x581   :  { %v14838_v42 = vcombine.high %v1224_v35, %v1228_v34  ;;  %v14837_v61 = vcombine.low %v1224_v35, %v1228_v34  ;;  %v1272_v31 = vld [vmem:[#allocation2 + $0x2210] sm:$0xff] }
 0x583   :  { %10734 = vmatpush1.bf16.msra.mxu0 %v14781_v43  ;;  %11226 = vmatpush1.bf16.msra.mxu1 %v14783_v44  ;;  %v14840_v43 = vcombine.high %v1225_v36, %v1229_v37  ;;  %v1232_v44 = vld [vmem:[#allocation2 + $0x20d0] sm:$0xff] }
 0x584   :  { %10735 = vmatprep.subr.bf16.mxu0 %v14790_v47  ;;  %11227 = vmatprep.subr.bf16.mxu1 %v14792_v49  ;;  %v1236_v47 = vld [vmem:[#allocation2 + $0x20f0] sm:$0xff]  ;;  %v1233_v49 = vld [vmem:[#allocation2 + $0x20d8] sm:$0xff] }
 0x585   :  { %v14846_v62 = vcombine.high %v1232_v44, %v1236_v47  ;;  %v14848_v0 = vcombine.high %v1233_v49, %v1237_v50  ;;  %v14845_v5 = vcombine.low %v1232_v44, %v1236_v47  ;;  %v14847_v6 = vcombine.low %v1233_v49, %v1237_v50  ;;  %v1288_v50 = vld [vmem:[#allocation2 + $0x2290] sm:$0xff] }
 0x587   :  { %10736 = vmatpush1.bf16.msra.mxu0 %v14789_v2  ;;  %11228 = vmatpush1.bf16.msra.mxu1 %v14791_v3  ;;  %v1240_v2 = vld [vmem:[#allocation2 + $0x2110] sm:$0xff] }
 0x588   :  { %10737 = vmatprep.subr.bf16.mxu0 %v14798_v4  ;;  %11229 = vmatprep.subr.bf16.mxu1 %v14800_v56  ;;  %v1244_v3 = vld [vmem:[#allocation2 + $0x2130] sm:$0xff]  ;;  %v1241_v4 = vld [vmem:[#allocation2 + $0x2118] sm:$0xff] }
 0x589   :  { %v1245_v56 = vld [vmem:[#allocation2 + $0x2138] sm:$0xff]  ;;  %v14854_v8 = vcombine.high %v1240_v2, %v1244_v3 }
 0x58a   :  { %v14855_v15 = vcombine.low %v1241_v4, %v1245_v56 }
 0x58b   :  { %10738 = vmatpush1.bf16.msra.mxu0 %v14797_v14  ;;  %11230 = vmatpush1.bf16.msra.mxu1 %v14799_v10  ;;  %v1252_v14 = vld [vmem:[#allocation2 + $0x2170] sm:$0xff]  ;;  %v1249_v10 = vld [vmem:[#allocation2 + $0x2158] sm:$0xff] }
 0x58c   :  { %10739 = vmatprep.subr.bf16.mxu0 %v14806_v11  ;;  %11231 = vmatprep.subr.bf16.mxu1 %v14808_v13  ;;  %v1253_v11 = vld [vmem:[#allocation2 + $0x2178] sm:$0xff]  ;;  %v14853_v13 = vcombine.low %v1240_v2, %v1244_v3  ;;  %v14862_v39 = vcombine.high %v1248_v9, %v1252_v14 }
 0x58d   :  { %v14864_v17 = vcombine.high %v1249_v10, %v1253_v11  ;;  %v14863_v21 = vcombine.low %v1249_v10, %v1253_v11  ;;  %v1304_v11 = vld [vmem:[#allocation2 + $0x2310] sm:$0xff] }
 0x58f   :  { %10740 = vmatpush1.bf16.msra.mxu0 %v14805_v54  ;;  %11232 = vmatpush1.bf16.msra.mxu1 %v14807_v19  ;;  %v1260_v54 = vld [vmem:[#allocation2 + $0x21b0] sm:$0xff]  ;;  %v1257_v19 = vld [vmem:[#allocation2 + $0x2198] sm:$0xff] }
 0x590   :  { %10741 = vmatprep.subr.bf16.mxu0 %v14814_v26  ;;  %11233 = vmatprep.subr.bf16.mxu1 %v14816_v20  ;;  %v1261_v26 = vld [vmem:[#allocation2 + $0x21b8] sm:$0xff]  ;;  %v14861_v20 = vcombine.low %v1248_v9, %v1252_v14  ;;  %v14870_v22 = vcombine.high %v1256_v18, %v1260_v54 }
 0x591   :  { %v14872_v24 = vcombine.high %v1257_v19, %v1261_v26  ;;  %v14871_v1 = vcombine.low %v1257_v19, %v1261_v26  ;;  %v1312_v26 = vld [vmem:[#allocation2 + $0x2350] sm:$0xff] }
 0x593   :  { %10742 = vmatpush1.bf16.msra.mxu0 %v14813_v25  ;;  %11234 = vmatpush1.bf16.msra.mxu1 %v14815_v27  ;;  %v1268_v25 = vld [vmem:[#allocation2 + $0x21f0] sm:$0xff]  ;;  %v1265_v27 = vld [vmem:[#allocation2 + $0x21d8] sm:$0xff] }
 0x594   :  { %10752 = vmatprep.subr.bf16.mxu0 %v14822_v48  ;;  %11244 = vmatprep.subr.bf16.mxu1 %v14824_v12  ;;  %v1269_v48 = vld [vmem:[#allocation2 + $0x21f8] sm:$0xff]  ;;  %v14869_v12 = vcombine.low %v1256_v18, %v1260_v54  ;;  %v14878_v28 = vcombine.high %v1264_v16, %v1268_v25 }
 0x595   :  { %v14880_v30 = vcombine.high %v1265_v27, %v1269_v48  ;;  %v14879_v35 = vcombine.low %v1265_v27, %v1269_v48  ;;  %v1320_v48 = vld [vmem:[#allocation2 + $0x2390] sm:$0xff] }
 0x596   :  { %10744 = vmatmul.mubr.bf16.vlgmr.msra.gmra.mrb[4].mxu0 %v16820_v60  ;;  %11236 = vmatmul.mubr.bf16.vlgmr.msra.gmra.mrb[4].mxu1 %v16820_v60  ;;  %v14839_v60 = vcombine.low %v1225_v36, %v1229_v37  ;;  %v1280_v37 = vld [vmem:[#allocation2 + $0x2250] sm:$0xff] }
 0x597   :  { %10753 = vmatpush1.bf16.msra.mxu0 %v14821_v32  ;;  %11245 = vmatpush1.bf16.msra.mxu1 %v14823_v29  ;;  %v1276_v32 = vld [vmem:[#allocation2 + $0x2230] sm:$0xff]  ;;  %v1273_v29 = vld [vmem:[#allocation2 + $0x2218] sm:$0xff] }
 0x598   :  { %10754 = vmatprep.subr.bf16.mxu0 %v14830_v33  ;;  %11246 = vmatprep.subr.bf16.mxu1 %v14832_v57  ;;  %v1277_v33 = vld [vmem:[#allocation2 + $0x2238] sm:$0xff]  ;;  %v14877_v57 = vcombine.low %v1264_v16, %v1268_v25  ;;  %v14886_v34 = vcombine.high %v1272_v31, %v1276_v32 }
 0x599   :  { %10784 = vmatprep.mubr.bf16.mxu0 %v16825_v7  ;;  %11276 = vmatprep.mubr.bf16.mxu1 %v16825_v7  ;;  %v14856_v7 = vcombine.high %v1241_v4, %v1245_v56  ;;  %v14888_v36 = vcombine.high %v1273_v29, %v1277_v33  ;;  %v14887_v44 = vcombine.low %v1273_v29, %v1277_v33  ;;  %v1296_v56 = vld [vmem:[#allocation2 + $0x22d0] sm:$0xff] }
 0x59a   :  { %v1328_v33 = vld [vmem:[#allocation2 + $0x23d0] sm:$0xff] }
 0x59b   :  { %10755 = vmatpush1.bf16.msra.mxu0 %v14829_v23  ;;  %11247 = vmatpush1.bf16.msra.mxu1 %v14831_v40  ;;  %v1284_v23 = vld [vmem:[#allocation2 + $0x2270] sm:$0xff]  ;;  %v1281_v40 = vld [vmem:[#allocation2 + $0x2258] sm:$0xff] }
 0x59c   :  { %10756 = vmatprep.subr.bf16.mxu0 %v14838_v42  ;;  %11248 = vmatprep.subr.bf16.mxu1 %v14840_v43  ;;  %v1285_v42 = vld [vmem:[#allocation2 + $0x2278] sm:$0xff]  ;;  %v14885_v43 = vcombine.low %v1272_v31, %v1276_v32  ;;  %v14894_v47 = vcombine.high %v1280_v37, %v1284_v23 }
 0x59d   :  { %v14896_v49 = vcombine.high %v1281_v40, %v1285_v42  ;;  %v14895_v2 = vcombine.low %v1281_v40, %v1285_v42  ;;  %v1336_v42 = vld [vmem:[#allocation2 + $0x2410] sm:$0xff] }
 0x59f   :  { %10757 = vmatpush1.bf16.msra.mxu0 %v14837_v61  ;;  %11249 = vmatpush1.bf16.msra.mxu1 %v14839_v60  ;;  %v1292_v61 = vld [vmem:[#allocation2 + $0x22b0] sm:$0xff]  ;;  %v1289_v60 = vld [vmem:[#allocation2 + $0x2298] sm:$0xff] }
 0x5a0   :  { %10758 = vmatprep.subr.bf16.mxu0 %v14846_v62  ;;  %11250 = vmatprep.subr.bf16.mxu1 %v14848_v0  ;;  %v1293_v62 = vld [vmem:[#allocation2 + $0x22b8] sm:$0xff]  ;;  %v14893_v0 = vcombine.low %v1280_v37, %v1284_v23  ;;  %v14902_v3 = vcombine.high %v1288_v50, %v1292_v61 }
 0x5a1   :  { %v14904_v4 = vcombine.high %v1289_v60, %v1293_v62  ;;  %v14903_v9 = vcombine.low %v1289_v60, %v1293_v62  ;;  %v1344_v62 = vld [vmem:[#allocation2 + $0x2450] sm:$0xff] }
 0x5a3   :  { %10759 = vmatpush1.bf16.msra.mxu0 %v14845_v5  ;;  %11251 = vmatpush1.bf16.msra.mxu1 %v14847_v6  ;;  %v1300_v5 = vld [vmem:[#allocation2 + $0x22f0] sm:$0xff]  ;;  %v1297_v6 = vld [vmem:[#allocation2 + $0x22d8] sm:$0xff] }
 0x5a4   :  { %10760 = vmatprep.subr.bf16.mxu0 %v14854_v8  ;;  %11252 = vmatprep.subr.bf16.mxu1 %v14856_v7  ;;  %v1301_v8 = vld [vmem:[#allocation2 + $0x22f8] sm:$0xff]  ;;  %v14901_v7 = vcombine.low %v1288_v50, %v1292_v61  ;;  %v14910_v14 = vcombine.high %v1296_v56, %v1300_v5 }
 0x5a5   :  { %v14912_v10 = vcombine.high %v1297_v6, %v1301_v8  ;;  %v14911_v18 = vcombine.low %v1297_v6, %v1301_v8  ;;  %v1352_v8 = vld [vmem:[#allocation2 + $0x2490] sm:$0xff] }
 0x5a7   :  { %10761 = vmatpush1.bf16.msra.mxu0 %v14853_v13  ;;  %11253 = vmatpush1.bf16.msra.mxu1 %v14855_v15  ;;  %v1308_v13 = vld [vmem:[#allocation2 + $0x2330] sm:$0xff]  ;;  %v1305_v15 = vld [vmem:[#allocation2 + $0x2318] sm:$0xff] }
 0x5a8   :  { %10762 = vmatprep.subr.bf16.mxu0 %v14862_v39  ;;  %11254 = vmatprep.subr.bf16.mxu1 %v14864_v17  ;;  %v1309_v39 = vld [vmem:[#allocation2 + $0x2338] sm:$0xff]  ;;  %v14909_v17 = vcombine.low %v1296_v56, %v1300_v5  ;;  %v14918_v54 = vcombine.high %v1304_v11, %v1308_v13 }
 0x5a9   :  { %v14920_v19 = vcombine.high %v1305_v15, %v1309_v39  ;;  %v14919_v16 = vcombine.low %v1305_v15, %v1309_v39  ;;  %v1360_v39 = vld [vmem:[#allocation2 + $0x24d0] sm:$0xff] }
 0x5ab   :  { %10763 = vmatpush1.bf16.msra.mxu0 %v14861_v20  ;;  %11255 = vmatpush1.bf16.msra.mxu1 %v14863_v21  ;;  %v1316_v20 = vld [vmem:[#allocation2 + $0x2370] sm:$0xff]  ;;  %v1313_v21 = vld [vmem:[#allocation2 + $0x2358] sm:$0xff] }
 0x5ac   :  { %10764 = vmatprep.subr.bf16.mxu0 %v14870_v22  ;;  %11256 = vmatprep.subr.bf16.mxu1 %v14872_v24  ;;  %v1317_v22 = vld [vmem:[#allocation2 + $0x2378] sm:$0xff]  ;;  %v14917_v24 = vcombine.low %v1304_v11, %v1308_v13  ;;  %v14926_v25 = vcombine.high %v1312_v26, %v1316_v20 }
 0x5ad   :  { %v14928_v27 = vcombine.high %v1313_v21, %v1317_v22  ;;  %v14927_v31 = vcombine.low %v1313_v21, %v1317_v22  ;;  %v1368_v21 = vld [vmem:[#allocation2 + $0x2510] sm:$0xff] }
 0x5ae   :  { %v1372_v22 = vld [vmem:[#allocation2 + $0x2530] sm:$0xff] }
 0x5af   :  { %10765 = vmatpush1.bf16.msra.mxu0 %v14869_v12  ;;  %11257 = vmatpush1.bf16.msra.mxu1 %v14871_v1  ;;  %v1324_v12 = vld [vmem:[#allocation2 + $0x23b0] sm:$0xff]  ;;  %v1321_v1 = vld [vmem:[#allocation2 + $0x2398] sm:$0xff] }
 0x5b0   :  { %10766 = vmatprep.subr.bf16.mxu0 %v14878_v28  ;;  %11258 = vmatprep.subr.bf16.mxu1 %v14880_v30  ;;  %v1325_v28 = vld [vmem:[#allocation2 + $0x23b8] sm:$0xff]  ;;  %v14925_v30 = vcombine.low %v1312_v26, %v1316_v20  ;;  %v14934_v32 = vcombine.high %v1320_v48, %v1324_v12 }
 0x5b1   :  { %v14936_v29 = vcombine.high %v1321_v1, %v1325_v28  ;;  %v14935_v37 = vcombine.low %v1321_v1, %v1325_v28  ;;  %v1380_v1 = vld [vmem:[#allocation2 + $0x2570] sm:$0xff]  ;;  %v1377_v28 = vld [vmem:[#allocation2 + $0x2558] sm:$0xff] }
 0x5b3   :  { %10767 = vmatpush1.bf16.msra.mxu0 %v14877_v57  ;;  %11259 = vmatpush1.bf16.msra.mxu1 %v14879_v35  ;;  %v1332_v57 = vld [vmem:[#allocation2 + $0x23f0] sm:$0xff]  ;;  %v1329_v35 = vld [vmem:[#allocation2 + $0x23d8] sm:$0xff] }
 0x5b4   :  { %10768 = vmatprep.subr.bf16.mxu0 %v14886_v34  ;;  %11260 = vmatprep.subr.bf16.mxu1 %v14888_v36  ;;  %v1333_v34 = vld [vmem:[#allocation2 + $0x23f8] sm:$0xff]  ;;  %v14933_v36 = vcombine.low %v1320_v48, %v1324_v12  ;;  %v14942_v23 = vcombine.high %v1328_v33, %v1332_v57  ;;  %v14982_v48 = vcombine.high %v1368_v21, %v1372_v22  ;;  %v1376_v12 = vld [vmem:[#allocation2 + $0x2550] sm:$0xff] }
 0x5b5   :  { %v14944_v40 = vcombine.high %v1329_v35, %v1333_v34  ;;  %v14943_v50 = vcombine.low %v1329_v35, %v1333_v34  ;;  %v1388_v35 = vld [vmem:[#allocation2 + $0x25b0] sm:$0xff]  ;;  %v1385_v34 = vld [vmem:[#allocation2 + $0x2598] sm:$0xff] }
 0x5b7   :  { %10769 = vmatpush1.bf16.msra.mxu0 %v14885_v43  ;;  %11261 = vmatpush1.bf16.msra.mxu1 %v14887_v44  ;;  %v1340_v43 = vld [vmem:[#allocation2 + $0x2430] sm:$0xff]  ;;  %v1337_v44 = vld [vmem:[#allocation2 + $0x2418] sm:$0xff] }
 0x5b8   :  { %10770 = vmatprep.subr.bf16.mxu0 %v14894_v47  ;;  %11262 = vmatprep.subr.bf16.mxu1 %v14896_v49  ;;  %v1341_v47 = vld [vmem:[#allocation2 + $0x2438] sm:$0xff]  ;;  %v14941_v49 = vcombine.low %v1328_v33, %v1332_v57  ;;  %v14950_v61 = vcombine.high %v1336_v42, %v1340_v43  ;;  %v1384_v57 = vld [vmem:[#allocation2 + $0x2590] sm:$0xff] }
 0x5b9   :  { %v14952_v60 = vcombine.high %v1337_v44, %v1341_v47  ;;  %v14951_v56 = vcombine.low %v1337_v44, %v1341_v47  ;;  %v1396_v44 = vld [vmem:[#allocation2 + $0x25f0] sm:$0xff]  ;;  %v1393_v47 = vld [vmem:[#allocation2 + $0x25d8] sm:$0xff] }
 0x5bb   :  { %10771 = vmatpush1.bf16.msra.mxu0 %v14893_v0  ;;  %11263 = vmatpush1.bf16.msra.mxu1 %v14895_v2  ;;  %v1348_v0 = vld [vmem:[#allocation2 + $0x2470] sm:$0xff]  ;;  %v1345_v2 = vld [vmem:[#allocation2 + $0x2458] sm:$0xff] }
 0x5bc   :  { %10772 = vmatprep.subr.bf16.mxu0 %v14902_v3  ;;  %11264 = vmatprep.subr.bf16.mxu1 %v14904_v4  ;;  %v1349_v3 = vld [vmem:[#allocation2 + $0x2478] sm:$0xff]  ;;  %v14949_v4 = vcombine.low %v1336_v42, %v1340_v43  ;;  %v14958_v5 = vcombine.high %v1344_v62, %v1348_v0  ;;  %v1392_v43 = vld [vmem:[#allocation2 + $0x25d0] sm:$0xff] }
 0x5bd   :  { %v14960_v6 = vcombine.high %v1345_v2, %v1349_v3  ;;  %v14959_v11 = vcombine.low %v1345_v2, %v1349_v3  ;;  %v1404_v2 = vld [vmem:[#allocation2 + $0x2630] sm:$0xff]  ;;  %v1401_v3 = vld [vmem:[#allocation2 + $0x2618] sm:$0xff] }
 0x5bf   :  { %10773 = vmatpush1.bf16.msra.mxu0 %v14901_v7  ;;  %11265 = vmatpush1.bf16.msra.mxu1 %v14903_v9  ;;  %v1356_v7 = vld [vmem:[#allocation2 + $0x24b0] sm:$0xff]  ;;  %v1353_v9 = vld [vmem:[#allocation2 + $0x2498] sm:$0xff] }
 0x5c0   :  { %10774 = vmatprep.subr.bf16.mxu0 %v14910_v14  ;;  %11266 = vmatprep.subr.bf16.mxu1 %v14912_v10  ;;  %v1357_v14 = vld [vmem:[#allocation2 + $0x24b8] sm:$0xff]  ;;  %v14957_v10 = vcombine.low %v1344_v62, %v1348_v0  ;;  %v14966_v13 = vcombine.high %v1352_v8, %v1356_v7  ;;  %v1400_v0 = vld [vmem:[#allocation2 + $0x2610] sm:$0xff] }
 0x5c1   :  { %v14968_v15 = vcombine.high %v1353_v9, %v1357_v14 }
 0x5c3   :  { %10775 = vmatpush1.bf16.msra.mxu0 %v14909_v17  ;;  %11267 = vmatpush1.bf16.msra.mxu1 %v14911_v18  ;;  %v1364_v17 = vld [vmem:[#allocation2 + $0x24f0] sm:$0xff]  ;;  %v1361_v18 = vld [vmem:[#allocation2 + $0x24d8] sm:$0xff] }
 0x5c4   :  { %10776 = vmatprep.subr.bf16.mxu0 %v14918_v54  ;;  %11268 = vmatprep.subr.bf16.mxu1 %v14920_v19  ;;  %v1365_v54 = vld [vmem:[#allocation2 + $0x24f8] sm:$0xff]  ;;  %v14965_v19 = vcombine.low %v1352_v8, %v1356_v7  ;;  %v14974_v26 = vcombine.high %v1360_v39, %v1364_v17  ;;  %v1408_v7 = vld [vmem:[#allocation2 + $0x2650] sm:$0xff] }
 0x5c5   :  { %v14976_v20 = vcombine.high %v1361_v18, %v1365_v54 }
 0x5c7   :  { %10777 = vmatpush1.bf16.msra.mxu0 %v14917_v24  ;;  %11269 = vmatpush1.bf16.msra.mxu1 %v14919_v16  ;;  %v1369_v24 = vld [vmem:[#allocation2 + $0x2518] sm:$0xff] }
 0x5c8   :  { %10778 = vmatprep.subr.bf16.mxu0 %v14926_v25  ;;  %11270 = vmatprep.subr.bf16.mxu1 %v14928_v27  ;;  %v1373_v16 = vld [vmem:[#allocation2 + $0x2538] sm:$0xff]  ;;  %v14973_v25 = vcombine.low %v1360_v39, %v1364_v17  ;;  %v14975_v27 = vcombine.low %v1361_v18, %v1365_v54  ;;  %v1416_v17 = vld [vmem:[#allocation2 + $0x2690] sm:$0xff] }
 0x5c9   :  { %v1420_v18 = vld [vmem:[#allocation2 + $0x26b0] sm:$0xff]  ;;  %v1417_v54 = vld [vmem:[#allocation2 + $0x2698] sm:$0xff] }
 0x5cb   :  { %10779 = vmatpush1.bf16.msra.mxu0 %v14925_v30  ;;  %11271 = vmatpush1.bf16.msra.mxu1 %v14927_v31  ;;  %v1381_v30 = vld [vmem:[#allocation2 + $0x2578] sm:$0xff]  ;;  %v14981_v31 = vcombine.low %v1368_v21, %v1372_v22  ;;  %v1424_v22 = vld [vmem:[#allocation2 + $0x26d0] sm:$0xff] }
 0x5cc   :  { %10780 = vmatprep.subr.bf16.mxu0 %v14934_v32  ;;  %11272 = vmatprep.subr.bf16.mxu1 %v14936_v29  ;;  %v14983_v32 = vcombine.low %v1369_v24, %v1373_v16  ;;  %v14990_v29 = vcombine.high %v1376_v12, %v1380_v1  ;;  %v14992_v33 = vcombine.high %v1377_v28, %v1381_v30 }
 0x5cf   :  { %10781 = vmatpush1.bf16.msra.mxu0 %v14933_v36  ;;  %11273 = vmatpush1.bf16.msra.mxu1 %v14935_v37  ;;  %v1389_v36 = vld [vmem:[#allocation2 + $0x25b8] sm:$0xff]  ;;  %v14989_v37 = vcombine.low %v1376_v12, %v1380_v1  ;;  %v1432_v1 = vld [vmem:[#allocation2 + $0x2710] sm:$0xff] }
 0x5d0   :  { %10782 = vmatprep.subr.bf16.mxu0 %v14942_v23  ;;  %11274 = vmatprep.subr.bf16.mxu1 %v14944_v40  ;;  %v14991_v23 = vcombine.low %v1377_v28, %v1381_v30  ;;  %v14998_v40 = vcombine.high %v1384_v57, %v1388_v35  ;;  %v15000_v42 = vcombine.high %v1385_v34, %v1389_v36  ;;  %v1436_v28 = vld [vmem:[#allocation2 + $0x2730] sm:$0xff]  ;;  %v1433_v30 = vld [vmem:[#allocation2 + $0x2718] sm:$0xff] }
 0x5d3   :  { %10783 = vmatpush1.bf16.msra.mxu0 %v14941_v49  ;;  %11275 = vmatpush1.bf16.msra.mxu1 %v14943_v50  ;;  %v1397_v49 = vld [vmem:[#allocation2 + $0x25f8] sm:$0xff]  ;;  %v14997_v50 = vcombine.low %v1384_v57, %v1388_v35  ;;  %v1440_v35 = vld [vmem:[#allocation2 + $0x2750] sm:$0xff] }
 0x5d4   :  { %10793 = vmatprep.subr.bf16.mxu0 %v14950_v61  ;;  %11285 = vmatprep.subr.bf16.mxu1 %v14952_v60  ;;  %v14999_v61 = vcombine.low %v1385_v34, %v1389_v36  ;;  %v15006_v60 = vcombine.high %v1392_v43, %v1396_v44  ;;  %v15008_v62 = vcombine.high %v1393_v47, %v1397_v49  ;;  %v1444_v34 = vld [vmem:[#allocation2 + $0x2770] sm:$0xff]  ;;  %v1441_v36 = vld [vmem:[#allocation2 + $0x2758] sm:$0xff] }
 0x5d6   :  { %10785 = vmatmul.mubr.bf16.vlgmr.msra.gmra.mrb[4].mxu0 %v16834_v45  ;;  %11277 = vmatmul.mubr.bf16.vlgmr.msra.gmra.mrb[4].mxu1 %v16834_v45  ;;  %v14967_v45 = vcombine.low %v1353_v9, %v1357_v14  ;;  %v1412_v9 = vld [vmem:[#allocation2 + $0x2670] sm:$0xff]  ;;  %v1409_v14 = vld [vmem:[#allocation2 + $0x2658] sm:$0xff] }
 0x5d7   :  { %10794 = vmatpush1.bf16.msra.mxu0 %v14949_v4  ;;  %11286 = vmatpush1.bf16.msra.mxu1 %v14951_v56  ;;  %v1405_v4 = vld [vmem:[#allocation2 + $0x2638] sm:$0xff]  ;;  %v15005_v56 = vcombine.low %v1392_v43, %v1396_v44  ;;  %v1448_v44 = vld [vmem:[#allocation2 + $0x2790] sm:$0xff] }
 0x5d8   :  { %10795 = vmatprep.subr.bf16.mxu0 %v14958_v5  ;;  %11287 = vmatprep.subr.bf16.mxu1 %v14960_v6  ;;  %v15007_v5 = vcombine.low %v1393_v47, %v1397_v49  ;;  %v15014_v6 = vcombine.high %v1400_v0, %v1404_v2  ;;  %v15016_v8 = vcombine.high %v1401_v3, %v1405_v4  ;;  %v1452_v47 = vld [vmem:[#allocation2 + $0x27b0] sm:$0xff]  ;;  %v1449_v49 = vld [vmem:[#allocation2 + $0x2798] sm:$0xff] }
 0x5d9   :  { %10825 = vmatprep.mubr.bf16.mxu0 %v16839_v59  ;;  %11317 = vmatprep.mubr.bf16.mxu1 %v16839_v59  ;;  %v14984_v59 = vcombine.high %v1369_v24, %v1373_v16  ;;  %v1428_v24 = vld [vmem:[#allocation2 + $0x26f0] sm:$0xff]  ;;  %v1425_v16 = vld [vmem:[#allocation2 + $0x26d8] sm:$0xff] }
 0x5db   :  { %10796 = vmatpush1.bf16.msra.mxu0 %v14957_v10  ;;  %11288 = vmatpush1.bf16.msra.mxu1 %v14959_v11  ;;  %v1413_v10 = vld [vmem:[#allocation2 + $0x2678] sm:$0xff]  ;;  %v15013_v11 = vcombine.low %v1400_v0, %v1404_v2  ;;  %v1456_v2 = vld [vmem:[#allocation2 + $0x27d0] sm:$0xff] }
 0x5dc   :  { %10797 = vmatprep.subr.bf16.mxu0 %v14966_v13  ;;  %11289 = vmatprep.subr.bf16.mxu1 %v14968_v15  ;;  %v15015_v13 = vcombine.low %v1401_v3, %v1405_v4  ;;  %v15022_v15 = vcombine.high %v1408_v7, %v1412_v9  ;;  %v15024_v39 = vcombine.high %v1409_v14, %v1413_v10  ;;  %v1460_v3 = vld [vmem:[#allocation2 + $0x27f0] sm:$0xff]  ;;  %v1457_v4 = vld [vmem:[#allocation2 + $0x27d8] sm:$0xff] }
 0x5df   :  { %10798 = vmatpush1.bf16.msra.mxu0 %v14965_v19  ;;  %11290 = vmatpush1.bf16.msra.mxu1 %v14967_v45  ;;  %v1421_v19 = vld [vmem:[#allocation2 + $0x26b8] sm:$0xff]  ;;  %v15021_v45 = vcombine.low %v1408_v7, %v1412_v9  ;;  %v1464_v9 = vld [vmem:[#allocation2 + $0x2810] sm:$0xff] }
 0x5e0   :  { %10799 = vmatprep.subr.bf16.mxu0 %v14974_v26  ;;  %11291 = vmatprep.subr.bf16.mxu1 %v14976_v20  ;;  %v15023_v26 = vcombine.low %v1409_v14, %v1413_v10  ;;  %v15030_v20 = vcombine.high %v1416_v17, %v1420_v18  ;;  %v15032_v21 = vcombine.high %v1417_v54, %v1421_v19  ;;  %v1468_v14 = vld [vmem:[#allocation2 + $0x2830] sm:$0xff]  ;;  %v1465_v10 = vld [vmem:[#allocation2 + $0x2818] sm:$0xff] }
 0x5e3   :  { %10800 = vmatpush1.bf16.msra.mxu0 %v14973_v25  ;;  %11292 = vmatpush1.bf16.msra.mxu1 %v14975_v27  ;;  %v1429_v25 = vld [vmem:[#allocation2 + $0x26f8] sm:$0xff]  ;;  %v15029_v27 = vcombine.low %v1416_v17, %v1420_v18  ;;  %v1472_v18 = vld [vmem:[#allocation2 + $0x2850] sm:$0xff] }
 0x5e4   :  { %10801 = vmatprep.subr.bf16.mxu0 %v14982_v48  ;;  %11293 = vmatprep.subr.bf16.mxu1 %v14984_v59  ;;  %v15031_v48 = vcombine.low %v1417_v54, %v1421_v19  ;;  %v15038_v59 = vcombine.high %v1424_v22, %v1428_v24  ;;  %v15040_v12 = vcombine.high %v1425_v16, %v1429_v25  ;;  %v1476_v54 = vld [vmem:[#allocation2 + $0x2870] sm:$0xff]  ;;  %v1473_v19 = vld [vmem:[#allocation2 + $0x2858] sm:$0xff] }
 0x5e7   :  { %10802 = vmatpush1.bf16.msra.mxu0 %v14981_v31  ;;  %11294 = vmatpush1.bf16.msra.mxu1 %v14983_v32  ;;  %v1437_v31 = vld [vmem:[#allocation2 + $0x2738] sm:$0xff]  ;;  %v15037_v32 = vcombine.low %v1424_v22, %v1428_v24  ;;  %v1480_v24 = vld [vmem:[#allocation2 + $0x2890] sm:$0xff] }
 0x5e8   :  { %10803 = vmatprep.subr.bf16.mxu0 %v14990_v29  ;;  %11295 = vmatprep.subr.bf16.mxu1 %v14992_v33  ;;  %v15039_v29 = vcombine.low %v1425_v16, %v1429_v25  ;;  %v15046_v33 = vcombine.high %v1432_v1, %v1436_v28  ;;  %v15048_v57 = vcombine.high %v1433_v30, %v1437_v31  ;;  %v1484_v16 = vld [vmem:[#allocation2 + $0x28b0] sm:$0xff]  ;;  %v1481_v25 = vld [vmem:[#allocation2 + $0x2898] sm:$0xff] }
 0x5eb   :  { %10804 = vmatpush1.bf16.msra.mxu0 %v14989_v37  ;;  %11296 = vmatpush1.bf16.msra.mxu1 %v14991_v23  ;;  %v1445_v37 = vld [vmem:[#allocation2 + $0x2778] sm:$0xff]  ;;  %v15045_v23 = vcombine.low %v1432_v1, %v1436_v28  ;;  %v1488_v28 = vld [vmem:[#allocation2 + $0x28d0] sm:$0xff] }
 0x5ec   :  { %10805 = vmatprep.subr.bf16.mxu0 %v14998_v40  ;;  %11297 = vmatprep.subr.bf16.mxu1 %v15000_v42  ;;  %v15047_v40 = vcombine.low %v1433_v30, %v1437_v31  ;;  %v15054_v42 = vcombine.high %v1440_v35, %v1444_v34  ;;  %v15056_v43 = vcombine.high %v1441_v36, %v1445_v37  ;;  %v1492_v30 = vld [vmem:[#allocation2 + $0x28f0] sm:$0xff]  ;;  %v1489_v31 = vld [vmem:[#allocation2 + $0x28d8] sm:$0xff] }
 0x5ef   :  { %10806 = vmatpush1.bf16.msra.mxu0 %v14997_v50  ;;  %11298 = vmatpush1.bf16.msra.mxu1 %v14999_v61  ;;  %v1453_v50 = vld [vmem:[#allocation2 + $0x27b8] sm:$0xff]  ;;  %v15053_v61 = vcombine.low %v1440_v35, %v1444_v34  ;;  %v1496_v35 = vld [vmem:[#allocation2 + $0x2910] sm:$0xff] }
 0x5f0   :  { %10807 = vmatprep.subr.bf16.mxu0 %v15006_v60  ;;  %11299 = vmatprep.subr.bf16.mxu1 %v15008_v62  ;;  %v15055_v60 = vcombine.low %v1441_v36, %v1445_v37  ;;  %v15062_v62 = vcombine.high %v1448_v44, %v1452_v47  ;;  %v15064_v0 = vcombine.high %v1449_v49, %v1453_v50  ;;  %v1500_v34 = vld [vmem:[#allocation2 + $0x2930] sm:$0xff]  ;;  %v1497_v36 = vld [vmem:[#allocation2 + $0x2918] sm:$0xff] }
 0x5f1   :  { %v1501_v37 = vld [vmem:[#allocation2 + $0x2938] sm:$0xff] }
 0x5f3   :  { %10808 = vmatpush1.bf16.msra.mxu0 %v15005_v56  ;;  %11300 = vmatpush1.bf16.msra.mxu1 %v15007_v5  ;;  %v1461_v56 = vld [vmem:[#allocation2 + $0x27f8] sm:$0xff]  ;;  %v15061_v5 = vcombine.low %v1448_v44, %v1452_v47  ;;  %v1508_v44 = vld [vmem:[#allocation2 + $0x2970] sm:$0xff] }
 0x5f4   :  { %10809 = vmatprep.subr.bf16.mxu0 %v15014_v6  ;;  %11301 = vmatprep.subr.bf16.mxu1 %v15016_v8  ;;  %v15063_v6 = vcombine.low %v1449_v49, %v1453_v50  ;;  %v15070_v8 = vcombine.high %v1456_v2, %v1460_v3  ;;  %v15072_v7 = vcombine.high %v1457_v4, %v1461_v56  ;;  %v1505_v47 = vld [vmem:[#allocation2 + $0x2958] sm:$0xff] }
 0x5f5   :  { %v1509_v49 = vld [vmem:[#allocation2 + $0x2978] sm:$0xff]  ;;  %v15109_v50 = vcombine.low %v1496_v35, %v1500_v34 }
 0x5f7   :  { %10810 = vmatpush1.bf16.msra.mxu0 %v15013_v11  ;;  %11302 = vmatpush1.bf16.msra.mxu1 %v15015_v13  ;;  %v1469_v11 = vld [vmem:[#allocation2 + $0x2838] sm:$0xff]  ;;  %v15069_v13 = vcombine.low %v1456_v2, %v1460_v3  ;;  %v1516_v2 = vld [vmem:[#allocation2 + $0x29b0] sm:$0xff] }
 0x5f8   :  { %10811 = vmatprep.subr.bf16.mxu0 %v15022_v15  ;;  %11303 = vmatprep.subr.bf16.mxu1 %v15024_v39  ;;  %v15071_v15 = vcombine.low %v1457_v4, %v1461_v56  ;;  %v15078_v39 = vcombine.high %v1464_v9, %v1468_v14  ;;  %v15080_v17 = vcombine.high %v1465_v10, %v1469_v11  ;;  %v1513_v3 = vld [vmem:[#allocation2 + $0x2998] sm:$0xff] }
 0x5f9   :  { %v1517_v4 = vld [vmem:[#allocation2 + $0x29b8] sm:$0xff] }
 0x5fb   :  { %10812 = vmatpush1.bf16.msra.mxu0 %v15021_v45  ;;  %11304 = vmatpush1.bf16.msra.mxu1 %v15023_v26  ;;  %v1477_v45 = vld [vmem:[#allocation2 + $0x2878] sm:$0xff]  ;;  %v15077_v26 = vcombine.low %v1464_v9, %v1468_v14  ;;  %v1524_v9 = vld [vmem:[#allocation2 + $0x29f0] sm:$0xff] }
 0x5fc   :  { %10813 = vmatprep.subr.bf16.mxu0 %v15030_v20  ;;  %11305 = vmatprep.subr.bf16.mxu1 %v15032_v21  ;;  %v15079_v20 = vcombine.low %v1465_v10, %v1469_v11  ;;  %v15086_v21 = vcombine.high %v1472_v18, %v1476_v54  ;;  %v15088_v22 = vcombine.high %v1473_v19, %v1477_v45  ;;  %v1521_v14 = vld [vmem:[#allocation2 + $0x29d8] sm:$0xff] }
 0x5fd   :  { %v1525_v10 = vld [vmem:[#allocation2 + $0x29f8] sm:$0xff] }
 0x5ff   :  { %10814 = vmatpush1.bf16.msra.mxu0 %v15029_v27  ;;  %11306 = vmatpush1.bf16.msra.mxu1 %v15031_v48  ;;  %v1485_v27 = vld [vmem:[#allocation2 + $0x28b8] sm:$0xff]  ;;  %v15085_v48 = vcombine.low %v1472_v18, %v1476_v54  ;;  %v1532_v18 = vld [vmem:[#allocation2 + $0x2a30] sm:$0xff] }
 0x600   :  { %10815 = vmatprep.subr.bf16.mxu0 %v15038_v59  ;;  %11307 = vmatprep.subr.bf16.mxu1 %v15040_v12  ;;  %v15087_v59 = vcombine.low %v1473_v19, %v1477_v45  ;;  %v15094_v12 = vcombine.high %v1480_v24, %v1484_v16  ;;  %v15096_v1 = vcombine.high %v1481_v25, %v1485_v27  ;;  %v1529_v54 = vld [vmem:[#allocation2 + $0x2a18] sm:$0xff] }
 0x601   :  { %v1533_v19 = vld [vmem:[#allocation2 + $0x2a38] sm:$0xff] }
 0x603   :  { %10816 = vmatpush1.bf16.msra.mxu0 %v15037_v32  ;;  %11308 = vmatpush1.bf16.msra.mxu1 %v15039_v29  ;;  %v1493_v32 = vld [vmem:[#allocation2 + $0x28f8] sm:$0xff]  ;;  %v15093_v29 = vcombine.low %v1480_v24, %v1484_v16  ;;  %v1540_v24 = vld [vmem:[#allocation2 + $0x2a70] sm:$0xff] }
 0x604   :  { %10817 = vmatprep.subr.bf16.mxu0 %v15046_v33  ;;  %11309 = vmatprep.subr.bf16.mxu1 %v15048_v57  ;;  %v15102_v33 = vcombine.high %v1488_v28, %v1492_v30  ;;  %v15104_v57 = vcombine.high %v1489_v31, %v1493_v32  ;;  %v1537_v16 = vld [vmem:[#allocation2 + $0x2a58] sm:$0xff] }
 0x607   :  { %10818 = vmatpush1.bf16.msra.mxu0 %v15045_v23  ;;  %11310 = vmatpush1.bf16.msra.mxu1 %v15047_v40  ;;  %v15101_v23 = vcombine.low %v1488_v28, %v1492_v30  ;;  %v15103_v40 = vcombine.low %v1489_v31, %v1493_v32  ;;  %v1548_v28 = vld [vmem:[#allocation2 + $0x2ab0] sm:$0xff]  ;;  %v1545_v30 = vld [vmem:[#allocation2 + $0x2a98] sm:$0xff] }
 0x608   :  { %10819 = vmatprep.subr.bf16.mxu0 %v15054_v42  ;;  %11311 = vmatprep.subr.bf16.mxu1 %v15056_v43  ;;  %v15110_v42 = vcombine.high %v1496_v35, %v1500_v34  ;;  %v1504_v43 = vld [vmem:[#allocation2 + $0x2950] sm:$0xff]  ;;  %v1549_v31 = vld [vmem:[#allocation2 + $0x2ab8] sm:$0xff] }
 0x609   :  { %v15117_v56 = vcombine.low %v1504_v43, %v1508_v44  ;;  %v1556_v35 = vld [vmem:[#allocation2 + $0x2af0] sm:$0xff]  ;;  %v1553_v34 = vld [vmem:[#allocation2 + $0x2ad8] sm:$0xff] }
 0x60b   :  { %10820 = vmatpush1.bf16.msra.mxu0 %v15053_v61  ;;  %11312 = vmatpush1.bf16.msra.mxu1 %v15055_v60  ;;  %v15111_v61 = vcombine.low %v1497_v36, %v1501_v37  ;;  %v15118_v60 = vcombine.high %v1504_v43, %v1508_v44  ;;  %v1564_v43 = vld [vmem:[#allocation2 + $0x2b30] sm:$0xff]  ;;  %v1561_v44 = vld [vmem:[#allocation2 + $0x2b18] sm:$0xff] }
 0x60c   :  { %10821 = vmatprep.subr.bf16.mxu0 %v15062_v62  ;;  %11313 = vmatprep.subr.bf16.mxu1 %v15064_v0  ;;  %v15120_v62 = vcombine.high %v1505_v47, %v1509_v49  ;;  %v1512_v0 = vld [vmem:[#allocation2 + $0x2990] sm:$0xff] }
 0x60d   :  { %v15125_v11 = vcombine.low %v1512_v0, %v1516_v2 }
 0x60f   :  { %10822 = vmatpush1.bf16.msra.mxu0 %v15061_v5  ;;  %11314 = vmatpush1.bf16.msra.mxu1 %v15063_v6  ;;  %v15119_v5 = vcombine.low %v1505_v47, %v1509_v49  ;;  %v15126_v6 = vcombine.high %v1512_v0, %v1516_v2  ;;  %v1565_v47 = vld [vmem:[#allocation2 + $0x2b38] sm:$0xff]  ;;  %v1572_v0 = vld [vmem:[#allocation2 + $0x2b70] sm:$0xff] }
 0x610   :  { %10823 = vmatprep.subr.bf16.mxu0 %v15070_v8  ;;  %11315 = vmatprep.subr.bf16.mxu1 %v15072_v7  ;;  %v15128_v8 = vcombine.high %v1513_v3, %v1517_v4  ;;  %v1520_v7 = vld [vmem:[#allocation2 + $0x29d0] sm:$0xff]  ;;  %v1569_v2 = vld [vmem:[#allocation2 + $0x2b58] sm:$0xff] }
 0x611   :  { %v15133_v45 = vcombine.low %v1520_v7, %v1524_v9 }
 0x613   :  { %10824 = vmatpush1.bf16.msra.mxu0 %v15069_v13  ;;  %11316 = vmatpush1.bf16.msra.mxu1 %v15071_v15  ;;  %v15127_v13 = vcombine.low %v1513_v3, %v1517_v4  ;;  %v15134_v15 = vcombine.high %v1520_v7, %v1524_v9  ;;  %v1573_v3 = vld [vmem:[#allocation2 + $0x2b78] sm:$0xff]  ;;  %v1580_v7 = vld [vmem:[#allocation2 + $0x2bb0] sm:$0xff] }
 0x614   :  { %10834 = vmatprep.subr.bf16.mxu0 %v15078_v39  ;;  %11326 = vmatprep.subr.bf16.mxu1 %v15080_v17  ;;  %v15136_v39 = vcombine.high %v1521_v14, %v1525_v10  ;;  %v1528_v17 = vld [vmem:[#allocation2 + $0x2a10] sm:$0xff]  ;;  %v1577_v9 = vld [vmem:[#allocation2 + $0x2b98] sm:$0xff] }
 0x616   :  { %10826 = vmatmul.mubr.bf16.vlgmr.msra.gmra.mrb[4].mxu0 %v16848_v38  ;;  %11318 = vmatmul.mubr.bf16.vlgmr.msra.gmra.mrb[4].mxu1 %v16848_v38  ;;  %v15095_v38 = vcombine.low %v1481_v25, %v1485_v27  ;;  %v1541_v25 = vld [vmem:[#allocation2 + $0x2a78] sm:$0xff]  ;;  %v15141_v27 = vcombine.low %v1528_v17, %v1532_v18 }
 0x617   :  { %10835 = vmatpush1.bf16.msra.mxu0 %v15077_v26  ;;  %11327 = vmatpush1.bf16.msra.mxu1 %v15079_v20  ;;  %v15135_v26 = vcombine.low %v1521_v14, %v1525_v10  ;;  %v15142_v20 = vcombine.high %v1528_v17, %v1532_v18  ;;  %v1581_v14 = vld [vmem:[#allocation2 + $0x2bb8] sm:$0xff]  ;;  %v1588_v17 = vld [vmem:[#allocation2 + $0x2bf0] sm:$0xff] }
 0x618   :  { %10836 = vmatprep.subr.bf16.mxu0 %v15086_v21  ;;  %11328 = vmatprep.subr.bf16.mxu1 %v15088_v22  ;;  %v15144_v21 = vcombine.high %v1529_v54, %v1533_v19  ;;  %v1536_v22 = vld [vmem:[#allocation2 + $0x2a50] sm:$0xff]  ;;  %v1585_v18 = vld [vmem:[#allocation2 + $0x2bd8] sm:$0xff] }
 0x619   :  { %10866 = vmatprep.mubr.bf16.mxu0 %v16853_v52  ;;  %11358 = vmatprep.mubr.bf16.mxu1 %v16853_v52  ;;  %v15112_v52 = vcombine.high %v1497_v36, %v1501_v37  ;;  %v15149_v32 = vcombine.low %v1536_v22, %v1540_v24  ;;  %v1557_v36 = vld [vmem:[#allocation2 + $0x2af8] sm:$0xff] }
 0x61b   :  { %10837 = vmatpush1.bf16.msra.mxu0 %v15085_v48  ;;  %11329 = vmatpush1.bf16.msra.mxu1 %v15087_v59  ;;  %v15143_v48 = vcombine.low %v1529_v54, %v1533_v19  ;;  %v15150_v59 = vcombine.high %v1536_v22, %v1540_v24  ;;  %v1589_v54 = vld [vmem:[#allocation2 + $0x2bf8] sm:$0xff]  ;;  %v1596_v22 = vld [vmem:[#allocation2 + $0x2c30] sm:$0xff] }
 0x61c   :  { %10838 = vmatprep.subr.bf16.mxu0 %v15094_v12  ;;  %11330 = vmatprep.subr.bf16.mxu1 %v15096_v1  ;;  %v15152_v12 = vcombine.high %v1537_v16, %v1541_v25  ;;  %v1544_v1 = vld [vmem:[#allocation2 + $0x2a90] sm:$0xff]  ;;  %v1593_v24 = vld [vmem:[#allocation2 + $0x2c18] sm:$0xff] }
 0x61d   :  { %v15157_v37 = vcombine.low %v1544_v1, %v1548_v28 }
 0x61f   :  { %10839 = vmatpush1.bf16.msra.mxu0 %v15093_v29  ;;  %11331 = vmatpush1.bf16.msra.mxu1 %v15095_v38  ;;  %v15151_v29 = vcombine.low %v1537_v16, %v1541_v25  ;;  %v15158_v38 = vcombine.high %v1544_v1, %v1548_v28  ;;  %v1597_v16 = vld [vmem:[#allocation2 + $0x2c38] sm:$0xff]  ;;  %v1604_v1 = vld [vmem:[#allocation2 + $0x2c70] sm:$0xff] }
 0x620   :  { %10840 = vmatprep.subr.bf16.mxu0 %v15102_v33  ;;  %11332 = vmatprep.subr.bf16.mxu1 %v15104_v57  ;;  %v15160_v33 = vcombine.high %v1545_v30, %v1549_v31  ;;  %v1552_v57 = vld [vmem:[#allocation2 + $0x2ad0] sm:$0xff]  ;;  %v1601_v28 = vld [vmem:[#allocation2 + $0x2c58] sm:$0xff] }
 0x621   :  { %v15165_v49 = vcombine.low %v1552_v57, %v1556_v35 }
 0x623   :  { %10841 = vmatpush1.bf16.msra.mxu0 %v15101_v23  ;;  %11333 = vmatpush1.bf16.msra.mxu1 %v15103_v40  ;;  %v15159_v23 = vcombine.low %v1545_v30, %v1549_v31  ;;  %v15166_v40 = vcombine.high %v1552_v57, %v1556_v35  ;;  %v1605_v30 = vld [vmem:[#allocation2 + $0x2c78] sm:$0xff]  ;;  %v1612_v57 = vld [vmem:[#allocation2 + $0x2cb0] sm:$0xff] }
 0x624   :  { %10842 = vmatprep.subr.bf16.mxu0 %v15110_v42  ;;  %11334 = vmatprep.subr.bf16.mxu1 %v15112_v52  ;;  %v15168_v42 = vcombine.high %v1553_v34, %v1557_v36  ;;  %v1560_v52 = vld [vmem:[#allocation2 + $0x2b10] sm:$0xff]  ;;  %v1609_v35 = vld [vmem:[#allocation2 + $0x2c98] sm:$0xff] }
 0x625   :  { %v15173_v4 = vcombine.low %v1560_v52, %v1564_v43 }
 0x627   :  { %10843 = vmatpush1.bf16.msra.mxu0 %v15109_v50  ;;  %11335 = vmatpush1.bf16.msra.mxu1 %v15111_v61  ;;  %v15167_v50 = vcombine.low %v1553_v34, %v1557_v36  ;;  %v15174_v61 = vcombine.high %v1560_v52, %v1564_v43  ;;  %v1613_v34 = vld [vmem:[#allocation2 + $0x2cb8] sm:$0xff]  ;;  %v1620_v52 = vld [vmem:[#allocation2 + $0x2cf0] sm:$0xff] }
 0x628   :  { %10844 = vmatprep.subr.bf16.mxu0 %v15118_v60  ;;  %11336 = vmatprep.subr.bf16.mxu1 %v15120_v62  ;;  %v15176_v60 = vcombine.high %v1561_v44, %v1565_v47  ;;  %v1568_v62 = vld [vmem:[#allocation2 + $0x2b50] sm:$0xff]  ;;  %v1617_v43 = vld [vmem:[#allocation2 + $0x2cd8] sm:$0xff] }
 0x629   :  { %v15181_v10 = vcombine.low %v1568_v62, %v1572_v0 }
 0x62b   :  { %10845 = vmatpush1.bf16.msra.mxu0 %v15117_v56  ;;  %11337 = vmatpush1.bf16.msra.mxu1 %v15119_v5  ;;  %v15175_v56 = vcombine.low %v1561_v44, %v1565_v47  ;;  %v15182_v5 = vcombine.high %v1568_v62, %v1572_v0  ;;  %v1621_v44 = vld [vmem:[#allocation2 + $0x2cf8] sm:$0xff] }
 0x62c   :  { %10846 = vmatprep.subr.bf16.mxu0 %v15126_v6  ;;  %11338 = vmatprep.subr.bf16.mxu1 %v15128_v8  ;;  %v15184_v6 = vcombine.high %v1569_v2, %v1573_v3  ;;  %v1576_v8 = vld [vmem:[#allocation2 + $0x2b90] sm:$0xff]  ;;  %v1625_v62 = vld [vmem:[#allocation2 + $0x2d18] sm:$0xff] }
 0x62d   :  { %v15189_v19 = vcombine.low %v1576_v8, %v1580_v7  ;;  %v1629_v0 = vld [vmem:[#allocation2 + $0x2d38] sm:$0xff] }
 0x62f   :  { %10847 = vmatpush1.bf16.msra.mxu0 %v15125_v11  ;;  %11339 = vmatpush1.bf16.msra.mxu1 %v15127_v13  ;;  %v15183_v11 = vcombine.low %v1569_v2, %v1573_v3  ;;  %v15190_v13 = vcombine.high %v1576_v8, %v1580_v7  ;;  %v15231_v3 = vcombine.low %v1617_v43, %v1621_v44  ;;  %v1637_v8 = vld [vmem:[#allocation2 + $0x2d78] sm:$0xff] }
 0x630   :  { %10848 = vmatprep.subr.bf16.mxu0 %v15134_v15  ;;  %11340 = vmatprep.subr.bf16.mxu1 %v15136_v39  ;;  %v15192_v15 = vcombine.high %v1577_v9, %v1581_v14  ;;  %v1584_v39 = vld [vmem:[#allocation2 + $0x2bd0] sm:$0xff] }
 0x631   :  { %v15197_v25 = vcombine.low %v1584_v39, %v1588_v17 }
 0x633   :  { %10849 = vmatpush1.bf16.msra.mxu0 %v15133_v45  ;;  %11341 = vmatpush1.bf16.msra.mxu1 %v15135_v26  ;;  %v15191_v45 = vcombine.low %v1577_v9, %v1581_v14  ;;  %v15198_v26 = vcombine.high %v1584_v39, %v1588_v17  ;;  %v15239_v9 = vcombine.low %v1625_v62, %v1629_v0  ;;  %v1645_v39 = vld [vmem:[#allocation2 + $0x2db8] sm:$0xff] }
 0x634   :  { %10850 = vmatprep.subr.bf16.mxu0 %v15142_v20  ;;  %11342 = vmatprep.subr.bf16.mxu1 %v15144_v21  ;;  %v15200_v20 = vcombine.high %v1585_v18, %v1589_v54  ;;  %v1592_v21 = vld [vmem:[#allocation2 + $0x2c10] sm:$0xff] }
 0x635   :  { %v15205_v31 = vcombine.low %v1592_v21, %v1596_v22 }
 0x637   :  { %10851 = vmatpush1.bf16.msra.mxu0 %v15141_v27  ;;  %11343 = vmatpush1.bf16.msra.mxu1 %v15143_v48  ;;  %v15199_v27 = vcombine.low %v1585_v18, %v1589_v54  ;;  %v15206_v48 = vcombine.high %v1592_v21, %v1596_v22  ;;  %v1653_v21 = vld [vmem:[#allocation2 + $0x2df8] sm:$0xff] }
 0x638   :  { %10852 = vmatprep.subr.bf16.mxu0 %v15150_v59  ;;  %11344 = vmatprep.subr.bf16.mxu1 %v15152_v12  ;;  %v15208_v59 = vcombine.high %v1593_v24, %v1597_v16  ;;  %v1600_v12 = vld [vmem:[#allocation2 + $0x2c50] sm:$0xff] }
 0x639   :  { %v15213_v36 = vcombine.low %v1600_v12, %v1604_v1 }
 0x63b   :  { %10853 = vmatpush1.bf16.msra.mxu0 %v15149_v32  ;;  %11345 = vmatpush1.bf16.msra.mxu1 %v15151_v29  ;;  %v15207_v32 = vcombine.low %v1593_v24, %v1597_v16  ;;  %v15214_v29 = vcombine.high %v1600_v12, %v1604_v1  ;;  %v1661_v12 = vld [vmem:[#allocation2 + $0x2e38] sm:$0xff] }
 0x63c   :  { %10854 = vmatprep.subr.bf16.mxu0 %v15158_v38  ;;  %11346 = vmatprep.subr.bf16.mxu1 %v15160_v33  ;;  %v15216_v38 = vcombine.high %v1601_v28, %v1605_v30  ;;  %v1608_v33 = vld [vmem:[#allocation2 + $0x2c90] sm:$0xff] }
 0x63d   :  { %v15221_v47 = vcombine.low %v1608_v33, %v1612_v57 }
 0x63f   :  { %10855 = vmatpush1.bf16.msra.mxu0 %v15157_v37  ;;  %11347 = vmatpush1.bf16.msra.mxu1 %v15159_v23  ;;  %v15215_v37 = vcombine.low %v1601_v28, %v1605_v30  ;;  %v15222_v23 = vcombine.high %v1608_v33, %v1612_v57  ;;  %v1669_v33 = vld [vmem:[#allocation2 + $0x2e78] sm:$0xff] }
 0x640   :  { %10856 = vmatprep.subr.bf16.mxu0 %v15166_v40  ;;  %11348 = vmatprep.subr.bf16.mxu1 %v15168_v42  ;;  %v15224_v40 = vcombine.high %v1609_v35, %v1613_v34  ;;  %v1616_v42 = vld [vmem:[#allocation2 + $0x2cd0] sm:$0xff] }
 0x641   :  { %v15229_v2 = vcombine.low %v1616_v42, %v1620_v52 }
 0x643   :  { %10857 = vmatpush1.bf16.msra.mxu0 %v15165_v49  ;;  %11349 = vmatpush1.bf16.msra.mxu1 %v15167_v50  ;;  %v15230_v49 = vcombine.high %v1616_v42, %v1620_v52  ;;  %v15232_v50 = vcombine.high %v1617_v43, %v1621_v44  ;;  %v1677_v42 = vld [vmem:[#allocation2 + $0x2eb8] sm:$0xff] }
 0x644   :  { %10858 = vmatprep.subr.bf16.mxu0 %v15174_v61  ;;  %11350 = vmatprep.subr.bf16.mxu1 %v15176_v60  ;;  %v1624_v61 = vld [vmem:[#allocation2 + $0x2d10] sm:$0xff] }
 0x645   :  { %v1628_v60 = vld [vmem:[#allocation2 + $0x2d30] sm:$0xff] }
 0x646   :  { %v15237_v7 = vcombine.low %v1624_v61, %v1628_v60 }
 0x647   :  { %10859 = vmatpush1.bf16.msra.mxu0 %v15173_v4  ;;  %11351 = vmatpush1.bf16.msra.mxu1 %v15175_v56  ;;  %v15238_v4 = vcombine.high %v1624_v61, %v1628_v60  ;;  %v1632_v56 = vld [vmem:[#allocation2 + $0x2d50] sm:$0xff]  ;;  %v1685_v61 = vld [vmem:[#allocation2 + $0x2ef8] sm:$0xff] }
 0x648   :  { %10860 = vmatprep.subr.bf16.mxu0 %v15182_v5  ;;  %11352 = vmatprep.subr.bf16.mxu1 %v15184_v6  ;;  %v1636_v5 = vld [vmem:[#allocation2 + $0x2d70] sm:$0xff]  ;;  %v1633_v6 = vld [vmem:[#allocation2 + $0x2d58] sm:$0xff] }
 0x649   :  { %v15246_v14 = vcombine.high %v1632_v56, %v1636_v5  ;;  %v15245_v17 = vcombine.low %v1632_v56, %v1636_v5  ;;  %v15247_v18 = vcombine.low %v1633_v6, %v1637_v8  ;;  %v1689_v56 = vld [vmem:[#allocation2 + $0x2f18] sm:$0xff] }
 0x64a   :  { %v1693_v5 = vld [vmem:[#allocation2 + $0x2f38] sm:$0xff] }
 0x64b   :  { %10861 = vmatpush1.bf16.msra.mxu0 %v15181_v10  ;;  %11353 = vmatpush1.bf16.msra.mxu1 %v15183_v11  ;;  %v15248_v10 = vcombine.high %v1633_v6, %v1637_v8  ;;  %v1640_v11 = vld [vmem:[#allocation2 + $0x2d90] sm:$0xff] }
 0x64c   :  { %10862 = vmatprep.subr.bf16.mxu0 %v15190_v13  ;;  %11354 = vmatprep.subr.bf16.mxu1 %v15192_v15  ;;  %v1644_v13 = vld [vmem:[#allocation2 + $0x2db0] sm:$0xff]  ;;  %v1641_v15 = vld [vmem:[#allocation2 + $0x2d98] sm:$0xff] }
 0x64d   :  { %v15254_v54 = vcombine.high %v1640_v11, %v1644_v13  ;;  %v15253_v22 = vcombine.low %v1640_v11, %v1644_v13  ;;  %v15255_v24 = vcombine.low %v1641_v15, %v1645_v39  ;;  %v1697_v13 = vld [vmem:[#allocation2 + $0x2f58] sm:$0xff] }
 0x64f   :  { %10863 = vmatpush1.bf16.msra.mxu0 %v15189_v19  ;;  %11355 = vmatpush1.bf16.msra.mxu1 %v15191_v45  ;;  %v15256_v19 = vcombine.high %v1641_v15, %v1645_v39  ;;  %v1648_v45 = vld [vmem:[#allocation2 + $0x2dd0] sm:$0xff]  ;;  %v1701_v15 = vld [vmem:[#allocation2 + $0x2f78] sm:$0xff] }
 0x650   :  { %10864 = vmatprep.subr.bf16.mxu0 %v15198_v26  ;;  %11356 = vmatprep.subr.bf16.mxu1 %v15200_v20  ;;  %v1652_v26 = vld [vmem:[#allocation2 + $0x2df0] sm:$0xff]  ;;  %v1649_v20 = vld [vmem:[#allocation2 + $0x2dd8] sm:$0xff] }
 0x651   :  { %v15262_v16 = vcombine.high %v1648_v45, %v1652_v26  ;;  %v15261_v1 = vcombine.low %v1648_v45, %v1652_v26  ;;  %v15263_v28 = vcombine.low %v1649_v20, %v1653_v21  ;;  %v1708_v45 = vld [vmem:[#allocation2 + $0x2fb0] sm:$0xff] }
 0x653   :  { %10865 = vmatpush1.bf16.msra.mxu0 %v15197_v25  ;;  %11357 = vmatpush1.bf16.msra.mxu1 %v15199_v27  ;;  %v15264_v25 = vcombine.high %v1649_v20, %v1653_v21  ;;  %v1656_v27 = vld [vmem:[#allocation2 + $0x2e10] sm:$0xff]  ;;  %v1705_v20 = vld [vmem:[#allocation2 + $0x2f98] sm:$0xff] }
 0x654   :  { %10875 = vmatprep.subr.bf16.mxu0 %v15206_v48  ;;  %11367 = vmatprep.subr.bf16.mxu1 %v15208_v59  ;;  %v1660_v48 = vld [vmem:[#allocation2 + $0x2e30] sm:$0xff]  ;;  %v1657_v59 = vld [vmem:[#allocation2 + $0x2e18] sm:$0xff] }
 0x655   :  { %v15270_v30 = vcombine.high %v1656_v27, %v1660_v48  ;;  %v15269_v57 = vcombine.low %v1656_v27, %v1660_v48  ;;  %v1709_v21 = vld [vmem:[#allocation2 + $0x2fb8] sm:$0xff]  ;;  %v1712_v48 = vld [vmem:[#allocation2 + $0x2fd0] sm:$0xff] }
 0x656   :  { %10867 = vmatmul.mubr.bf16.vlgmr.msra.gmra.mrb[4].mxu0 %v16862_v41  ;;  %11359 = vmatmul.mubr.bf16.vlgmr.msra.gmra.mrb[4].mxu1 %v16862_v41  ;;  %v15223_v41 = vcombine.low %v1609_v35, %v1613_v34  ;;  %v15271_v35 = vcombine.low %v1657_v59, %v1661_v12  ;;  %v15320_v27 = vcombine.high %v1705_v20, %v1709_v21 }
 0x657   :  { %10876 = vmatpush1.bf16.msra.mxu0 %v15205_v31  ;;  %11368 = vmatpush1.bf16.msra.mxu1 %v15207_v32  ;;  %v15272_v31 = vcombine.high %v1657_v59, %v1661_v12  ;;  %v1664_v32 = vld [vmem:[#allocation2 + $0x2e50] sm:$0xff] }
 0x658   :  { %10877 = vmatprep.subr.bf16.mxu0 %v15214_v29  ;;  %11369 = vmatprep.subr.bf16.mxu1 %v15216_v38  ;;  %v1668_v29 = vld [vmem:[#allocation2 + $0x2e70] sm:$0xff]  ;;  %v1665_v38 = vld [vmem:[#allocation2 + $0x2e58] sm:$0xff] }
 0x659   :  { %10907 = vmatprep.mubr.bf16.mxu0 %v16867_v58  ;;  %11399 = vmatprep.mubr.bf16.mxu1 %v16867_v58  ;;  %v15240_v58 = vcombine.high %v1625_v62, %v1629_v0  ;;  %v15278_v34 = vcombine.high %v1664_v32, %v1668_v29  ;;  %v15277_v52 = vcombine.low %v1664_v32, %v1668_v29  ;;  %v1716_v59 = vld [vmem:[#allocation2 + $0x2ff0] sm:$0xff] }
 0x65a   :  { %v15279_v43 = vcombine.low %v1665_v38, %v1669_v33  ;;  %v15326_v32 = vcombine.high %v1712_v48, %v1716_v59 }
 0x65b   :  { %10878 = vmatpush1.bf16.msra.mxu0 %v15213_v36  ;;  %11370 = vmatpush1.bf16.msra.mxu1 %v15215_v37  ;;  %v15280_v36 = vcombine.high %v1665_v38, %v1669_v33  ;;  %v1672_v37 = vld [vmem:[#allocation2 + $0x2e90] sm:$0xff]  ;;  %v15325_v33 = vcombine.low %v1712_v48, %v1716_v59  ;;  %v15996_v48 = vld [vmem:[#allocation6 + $0x164] ss:$16 sps:$4 sm:$0xff]  }
 0x65c   :  { %10879 = vmatprep.subr.bf16.mxu0 %v15222_v23  ;;  %11371 = vmatprep.subr.bf16.mxu1 %v15224_v40  ;;  %v1676_v23 = vld [vmem:[#allocation2 + $0x2eb0] sm:$0xff]  ;;  %v1673_v40 = vld [vmem:[#allocation2 + $0x2e98] sm:$0xff] }
 0x65d   :  { %v15286_v44 = vcombine.high %v1672_v37, %v1676_v23  ;;  %v15285_v60 = vcombine.low %v1672_v37, %v1676_v23  ;;  %v15287_v62 = vcombine.low %v1673_v40, %v1677_v42  ;;  %v15928_v37 = vld [vmem:[#allocation6] ss:$16 sps:$4 sm:$0xff]   ;;  %v15931_v23 = vld [vmem:[#allocation6 + $0x8] ss:$16 sps:$4 sm:$0xff]   ;;  %v15999_v59 = vld [vmem:[#allocation6 + $0x16c] ss:$16 sps:$4 sm:$0xff]  }
 0x65f   :  { %10880 = vmatpush1.bf16.msra.mxu0 %v15221_v47  ;;  %11372 = vmatpush1.bf16.msra.mxu1 %v15223_v41  ;;  %v15288_v47 = vcombine.high %v1673_v40, %v1677_v42  ;;  %v1680_v41 = vld [vmem:[#allocation2 + $0x2ed0] sm:$0xff]  ;;  %v15936_v40 = vld [vmem:[#allocation6 + $0x24] ss:$16 sps:$4 sm:$0xff]  }
 0x660   :  { %10881 = vmatprep.subr.bf16.mxu0 %v15230_v49  ;;  %11373 = vmatprep.subr.bf16.mxu1 %v15232_v50  ;;  %v1684_v49 = vld [vmem:[#allocation2 + $0x2ef0] sm:$0xff]  ;;  %v1681_v50 = vld [vmem:[#allocation2 + $0x2ed8] sm:$0xff] }
 0x661   :  { %v15294_v0 = vcombine.high %v1680_v41, %v1684_v49  ;;  %v15293_v6 = vcombine.low %v1680_v41, %v1684_v49  ;;  %v15295_v8 = vcombine.low %v1681_v50, %v1685_v61  ;;  %v15940_v41 = vld [vmem:[#allocation6 + $0x40] ss:$16 sps:$4 sm:$0xff]   ;;  %v15943_v49 = vld [vmem:[#allocation6 + $0x48] ss:$16 sps:$4 sm:$0xff]  }
 0x663   :  { %10882 = vmatpush1.bf16.msra.mxu0 %v15229_v2  ;;  %11374 = vmatpush1.bf16.msra.mxu1 %v15231_v3  ;;  %v15296_v2 = vcombine.high %v1681_v50, %v1685_v61  ;;  %v1688_v3 = vld [vmem:[#allocation2 + $0x2f10] sm:$0xff]  ;;  %v15948_v50 = vld [vmem:[#allocation6 + $0x64] ss:$16 sps:$4 sm:$0xff]  }
 0x664   :  { %10883 = vmatprep.subr.bf16.mxu0 %v15238_v4  ;;  %11375 = vmatprep.subr.bf16.mxu1 %v15240_v58  ;;  %v1692_v4 = vld [vmem:[#allocation2 + $0x2f30] sm:$0xff]  ;;  %v1720_v58 = vlaneseq }
 0x665   :  { %v15301_v39 = vcombine.low %v1688_v3, %v1692_v4  ;;  %v15951_v61 = vld [vmem:[#allocation6 + $0x6c] ss:$16 sps:$4 sm:$0xff]  }
 0x666   :  { %v16934_v11 = vshrl.u32 %v1720_v58, 7  ;;  %v15963_v58 = vld [vmem:[#allocation6 + $0xac] ss:$16 sps:$4 sm:$0xff]  }
 0x667   :  { %10884 = vmatpush1.bf16.msra.mxu0 %v15237_v7  ;;  %11376 = vmatpush1.bf16.msra.mxu1 %v15239_v9  ;;  %v15302_v7 = vcombine.high %v1688_v3, %v1692_v4  ;;  %v15304_v9 = vcombine.high %v1689_v56, %v1693_v5  ;;  %v15955_v3 = vld [vmem:[#allocation6 + $0x88] ss:$16 sps:$4 sm:$0xff]   ;;  %v15960_v4 = vld [vmem:[#allocation6 + $0xa4] ss:$16 sps:$4 sm:$0xff]  }
 0x668   :  { %10885 = vmatprep.subr.bf16.mxu0 %v15246_v14  ;;  %11377 = vmatprep.subr.bf16.mxu1 %v15248_v10  ;;  %v1696_v14 = vld [vmem:[#allocation2 + $0x2f50] sm:$0xff]  ;;  %v1726_v26 = vsub.s32 1, %v16934_v11 }
 0x669   :  { %v1700_v10 = vld [vmem:[#allocation2 + $0x2f70] sm:$0xff] }
 0x66b   :  { %10886 = vmatpush1.bf16.msra.mxu0 %v15245_v17  ;;  %11378 = vmatpush1.bf16.msra.mxu1 %v15247_v18  ;;  %v15303_v17 = vcombine.low %v1689_v56, %v1693_v5  ;;  %v15310_v18 = vcombine.high %v1696_v14, %v1700_v10  ;;  %v15958_v56 = vld [vmem:[#allocation6 + $0xa0] ss:$16 sps:$4 sm:$0xff]   ;;  %v15961_v5 = vld [vmem:[#allocation6 + $0xa8] ss:$16 sps:$4 sm:$0xff]  }
 0x66c   :  { %10887 = vmatprep.subr.bf16.mxu0 %v15254_v54  ;;  %11379 = vmatprep.subr.bf16.mxu1 %v15256_v19  ;;  %v15312_v54 = vcombine.high %v1697_v13, %v1701_v15  ;;  %v1704_v19 = vld [vmem:[#allocation2 + $0x2f90] sm:$0xff] }
 0x66f   :  { %10888 = vmatpush1.bf16.msra.mxu0 %v15253_v22  ;;  %11380 = vmatpush1.bf16.msra.mxu1 %v15255_v24  ;;  %v16937_v22 = vld [vmem:[#allocation4] sm:$0xff]  ;;  %v15309_v24 = vcombine.low %v1696_v14, %v1700_v10  ;;  %v15972_v14 = vld [vmem:[#allocation6 + $0xe4] ss:$16 sps:$4 sm:$0xff]  }
 0x670   :  { %10889 = vmatprep.subr.bf16.mxu0 %v15262_v16  ;;  %11381 = vmatprep.subr.bf16.mxu1 %v15264_v25  ;;  %v15311_v16 = vcombine.low %v1697_v13, %v1701_v15  ;;  %v15318_v25 = vcombine.high %v1704_v19, %v1708_v45  ;;  %v1727_v12 = vrot.slane %v16937_v22, %v1726_v26  ;;  %v15975_v10 = vld [vmem:[#allocation6 + $0xec] ss:$16 sps:$4 sm:$0xff]   ;;  %v15970_v13 = vld [vmem:[#allocation6 + $0xe0] ss:$16 sps:$4 sm:$0xff]   ;;  %v15973_v15 = vld [vmem:[#allocation6 + $0xe8] ss:$16 sps:$4 sm:$0xff]  }
 0x672   :  { %v15701_v38 = vadd.f32 %v16898_v55, %v1727_v12  ;;  %v15939_v55 = vld [vmem:[#allocation6 + $0x2c] ss:$16 sps:$4 sm:$0xff]   ;;  %v15994_v12 = vld [vmem:[#allocation6 + $0x160] ss:$16 sps:$4 sm:$0xff]  }
 0x673   :  { %10890 = vmatpush1.bf16.msra.mxu0 %v15261_v1  ;;  %11382 = vmatpush1.bf16.msra.mxu1 %v15263_v28  ;;  %v1713_v1 = vld [vmem:[#allocation2 + $0x2fd8] sm:$0xff] }
 0x674   :  { %10891 = vmatprep.subr.bf16.mxu0 %v15270_v30  ;;  %11383 = vmatprep.subr.bf16.mxu1 %v15272_v31  ;;  %v1717_v28 = vld [vmem:[#allocation2 + $0x2ff8] sm:$0xff]  ;;  %v15317_v30 = vcombine.low %v1704_v19, %v1708_v45  ;;  %v15319_v31 = vcombine.low %v1705_v20, %v1709_v21  ;;  %v15987_v45 = vld [vmem:[#allocation6 + $0x12c] ss:$16 sps:$4 sm:$0xff]   ;;  %v15985_v21 = vld [vmem:[#allocation6 + $0x128] ss:$16 sps:$4 sm:$0xff]  }
 0x675   :  { %v15328_v29 = vcombine.high %v1713_v1, %v1717_v28  ;;  %v15984_v19 = vld [vmem:[#allocation6 + $0x124] ss:$16 sps:$4 sm:$0xff]   ;;  %v15982_v20 = vld [vmem:[#allocation6 + $0x120] ss:$16 sps:$4 sm:$0xff]  }
 0x677   :  { %10892 = vmatpush1.bf16.msra.mxu0 %v15269_v57  ;;  %11384 = vmatpush1.bf16.msra.mxu1 %v15271_v35  ;;  %v15327_v57 = vcombine.low %v1713_v1, %v1717_v28  ;;  %v15930_v35 = vld [vmem:[#allocation6 + $0x4] ss:$16 sps:$4 sm:$0xff]   ;;  %v15997_v1 = vld [vmem:[#allocation6 + $0x168] ss:$16 sps:$4 sm:$0xff]  }
 0x678   :  { %10893 = vmatprep.subr.bf16.mxu0 %v15278_v34  ;;  %11385 = vmatprep.subr.bf16.mxu1 %v15280_v36  ;;  %v15933_v34 = vld [vmem:[#allocation6 + $0xc] ss:$16 sps:$4 sm:$0xff]   ;;  %v11409_v36 = vmax.f32 %v15701_v38, 0.0  ;;  %v16002_v28 = vld [vmem:[#allocation6 + $0x184] ss:$16 sps:$4 sm:$0xff]  }
 0x679   :  { %v16008_v38 = vld [vmem:[#allocation6 + $0x1a4] ss:$16 sps:$4 sm:$0xff]  }
 0x67a   :  { %v11417_v42 = vpack.c.bf16 %v11409_v36, %v11409_v36  ;;  %v16009_v36 = vld [vmem:[#allocation6 + $0x1a8] ss:$16 sps:$4 sm:$0xff]  }
 0x67b   :  { %10894 = vmatpush1.bf16.msra.mxu0 %v15277_v52  ;;  %11386 = vmatpush1.bf16.msra.mxu1 %v15279_v43  ;;  %v15934_v52 = vld [vmem:[#allocation6 + $0x20] ss:$16 sps:$4 sm:$0xff]   ;;  %v15937_v43 = vld [vmem:[#allocation6 + $0x28] ss:$16 sps:$4 sm:$0xff]  }
 0x67c   :  { %10895 = vmatprep.subr.bf16.mxu0 %v15286_v44  ;;  %11387 = vmatprep.subr.bf16.mxu1 %v15288_v47  ;;  %v15942_v44 = vld [vmem:[#allocation6 + $0x44] ss:$16 sps:$4 sm:$0xff]   ;;  %v15945_v47 = vld [vmem:[#allocation6 + $0x4c] ss:$16 sps:$4 sm:$0xff]  }
 0x67f   :  { %10896 = vmatpush1.bf16.msra.mxu0 %v15285_v60  ;;  %11388 = vmatpush1.bf16.msra.mxu1 %v15287_v62  ;;  %v15949_v60 = vld [vmem:[#allocation6 + $0x68] ss:$16 sps:$4 sm:$0xff]   ;;  %v15954_v62 = vld [vmem:[#allocation6 + $0x84] ss:$16 sps:$4 sm:$0xff]  }
 0x680   :  { %10897 = vmatprep.subr.bf16.mxu0 %v15294_v0  ;;  %11389 = vmatprep.subr.bf16.mxu1 %v15296_v2  ;;  %v15957_v0 = vld [vmem:[#allocation6 + $0x8c] ss:$16 sps:$4 sm:$0xff]   ;;  %v15952_v2 = vld [vmem:[#allocation6 + $0x80] ss:$16 sps:$4 sm:$0xff]  }
 0x683   :  { %10898 = vmatpush1.bf16.msra.mxu0 %v15293_v6  ;;  %11390 = vmatpush1.bf16.msra.mxu1 %v15295_v8  ;;  %v15966_v6 = vld [vmem:[#allocation6 + $0xc4] ss:$16 sps:$4 sm:$0xff]   ;;  %v15969_v8 = vld [vmem:[#allocation6 + $0xcc] ss:$16 sps:$4 sm:$0xff]  }
 0x684   :  { %10899 = vmatprep.subr.bf16.mxu0 %v15302_v7  ;;  %11391 = vmatprep.subr.bf16.mxu1 %v15304_v9  ;;  %v15964_v7 = vld [vmem:[#allocation6 + $0xc0] ss:$16 sps:$4 sm:$0xff]   ;;  %v15967_v9 = vld [vmem:[#allocation6 + $0xc8] ss:$16 sps:$4 sm:$0xff]  }
 0x687   :  { %10900 = vmatpush1.bf16.msra.mxu0 %v15301_v39  ;;  %11392 = vmatpush1.bf16.msra.mxu1 %v15303_v17  ;;  %v15978_v39 = vld [vmem:[#allocation6 + $0x104] ss:$16 sps:$4 sm:$0xff]   ;;  %v15981_v17 = vld [vmem:[#allocation6 + $0x10c] ss:$16 sps:$4 sm:$0xff]  }
 0x688   :  { %10901 = vmatprep.subr.bf16.mxu0 %v15310_v18  ;;  %11393 = vmatprep.subr.bf16.mxu1 %v15312_v54  ;;  %v15976_v18 = vld [vmem:[#allocation6 + $0x100] ss:$16 sps:$4 sm:$0xff]   ;;  %v15979_v54 = vld [vmem:[#allocation6 + $0x108] ss:$16 sps:$4 sm:$0xff]  }
 0x68b   :  { %10902 = vmatpush1.bf16.msra.mxu0 %v15309_v24  ;;  %11394 = vmatpush1.bf16.msra.mxu1 %v15311_v16  ;;  %v15990_v24 = vld [vmem:[#allocation6 + $0x144] ss:$16 sps:$4 sm:$0xff]   ;;  %v15993_v16 = vld [vmem:[#allocation6 + $0x14c] ss:$16 sps:$4 sm:$0xff]  }
 0x68c   :  { %10903 = vmatprep.subr.bf16.mxu0 %v15318_v25  ;;  %11395 = vmatprep.subr.bf16.mxu1 %v15320_v27  ;;  %v15988_v25 = vld [vmem:[#allocation6 + $0x140] ss:$16 sps:$4 sm:$0xff]   ;;  %v15991_v27 = vld [vmem:[#allocation6 + $0x148] ss:$16 sps:$4 sm:$0xff]  }
 0x68f   :  { %10904 = vmatpush1.bf16.msra.mxu0 %v15317_v30  ;;  %11396 = vmatpush1.bf16.msra.mxu1 %v15319_v31  ;;  %v16005_v30 = vld [vmem:[#allocation6 + $0x18c] ss:$16 sps:$4 sm:$0xff]   ;;  %v16000_v31 = vld [vmem:[#allocation6 + $0x180] ss:$16 sps:$4 sm:$0xff]  }
 0x690   :  { %10905 = vmatprep.subr.bf16.mxu0 %v15326_v32  ;;  %11397 = vmatprep.subr.bf16.mxu1 %v15328_v29  ;;  %v1722_v32 = vsub.s32 0, %v16934_v11  ;;  %v16003_v29 = vld [vmem:[#allocation6 + $0x188] ss:$16 sps:$4 sm:$0xff]  }
 0x693   :  { %10906 = vmatpush1.bf16.msra.mxu0 %v15325_v33  ;;  %11398 = vmatpush1.bf16.msra.mxu1 %v15327_v57  ;;  %v16011_v33 = vld [vmem:[#allocation6 + $0x1ac] ss:$16 sps:$4 sm:$0xff]   ;;  %v1734_v57 = vsub.s32 3, %v16934_v11 }
 0x694   :  { %12982 = vmatprep.subr.bf16.mxu0 %v15930_v35  ;;  %13146 = vmatprep.subr.bf16.mxu1 %v15933_v34  ;;  %v16006_v35 = vld [vmem:[#allocation6 + $0x1a0] ss:$16 sps:$4 sm:$0xff]   ;;  %v1723_v34 = vrot.slane %v16937_v22, %v1722_v32 }
 0x696   :  { %10908 = vmatmul.mubr.bf16.vlgmr.msra.gmra.mrb[4].mxu0 %v16876_v53  ;;  %11400 = vmatmul.mubr.bf16.vlgmr.msra.gmra.mrb[4].mxu1 %v16876_v53  ;;  %v15946_v53 = vld [vmem:[#allocation6 + $0x60] ss:$16 sps:$4 sm:$0xff]  }
 0x697   :  { %12983 = vmatpush1.bf16.msra.mxu0 %v15928_v37  ;;  %13014 = vmatprep.mubr.bf16.mxu0 %v11417_v42  ;;  %v16014_v37 = vld [vmem:[#allocation6 + $0x1c4] ss:$16 sps:$4 sm:$0xff]  }
 0x698   :  { %13147 = vmatpush1.bf16.msra.mxu1 %v15931_v23  ;;  %13178 = vmatprep.mubr.bf16.mxu1 %v11417_v42  ;;  %v16017_v23 = vld [vmem:[#allocation6 + $0x1cc] ss:$16 sps:$4 sm:$0xff]   ;;  %v16012_v42 = vld [vmem:[#allocation6 + $0x1c0] ss:$16 sps:$4 sm:$0xff]  }
 0x699   :  { %12984 = vmatprep.subr.bf16.mxu0 %v15936_v40  ;;  %13148 = vmatprep.subr.bf16.mxu1 %v15939_v55  ;;  %v1735_v40 = vrot.slane %v16937_v22, %v1734_v57  ;;  %v15700_v55 = vadd.f32 %v16894_v46, %v1723_v34  ;;  %v16024_v46 = vld [vmem:[#allocation6 + $0x200] ss:$16 sps:$4 sm:$0xff]   ;;  %v16089_v34 = vld [vmem:[#allocation6 + $0x34c] ss:$16 sps:$4 sm:$0xff]  }
 0x69b   :  { %12985 = vmatpush1.bf16.msra.mxu0 %v15934_v52  ;;  %v16015_v52 = vld [vmem:[#allocation6 + $0x1c8] ss:$16 sps:$4 sm:$0xff]  }
 0x69c   :  { %13149 = vmatpush1.bf16.msra.mxu1 %v15937_v43  ;;  %12986 = vmatprep.subr.bf16.mxu0 %v15942_v44  ;;  %v16020_v43 = vld [vmem:[#allocation6 + $0x1e4] ss:$16 sps:$4 sm:$0xff]   ;;  %v16023_v44 = vld [vmem:[#allocation6 + $0x1ec] ss:$16 sps:$4 sm:$0xff]  }
 0x69d   :  { %13150 = vmatprep.subr.bf16.mxu1 %v15945_v47  ;;  %v15703_v47 = vadd.f32 %v16900_v63, %v1735_v40  ;;  %v16035_v63 = vld [vmem:[#allocation6 + $0x22c] ss:$16 sps:$4 sm:$0xff]  }
 0x69e   :  { %v16095_v40 = vld [vmem:[#allocation6 + $0x36c] ss:$16 sps:$4 sm:$0xff]  }
 0x69f   :  { %12987 = vmatpush1.bf16.msra.mxu0 %v15940_v41  ;;  %v16018_v41 = vld [vmem:[#allocation6 + $0x1e0] ss:$16 sps:$4 sm:$0xff]  }
 0x6a0   :  { %13151 = vmatpush1.bf16.msra.mxu1 %v15943_v49  ;;  %12988 = vmatprep.subr.bf16.mxu0 %v15948_v50  ;;  %v11408_v49 = vmax.f32 %v15700_v55, 0.0  ;;  %v16021_v50 = vld [vmem:[#allocation6 + $0x1e8] ss:$16 sps:$4 sm:$0xff]  }
 0x6a1   :  { %13152 = vmatprep.subr.bf16.mxu1 %v15951_v61  ;;  %v16026_v61 = vld [vmem:[#allocation6 + $0x204] ss:$16 sps:$4 sm:$0xff]   ;;  %v16093_v55 = vld [vmem:[#allocation6 + $0x368] ss:$16 sps:$4 sm:$0xff]  }
 0x6a3   :  { %12989 = vmatpush1.bf16.msra.mxu0 %v15946_v53  ;;  %v16029_v53 = vld [vmem:[#allocation6 + $0x20c] ss:$16 sps:$4 sm:$0xff]  }
 0x6a4   :  { %13153 = vmatpush1.bf16.msra.mxu1 %v15949_v60  ;;  %12990 = vmatprep.subr.bf16.mxu0 %v15954_v62  ;;  %v11411_v60 = vmax.f32 %v15703_v47, 0.0  ;;  %v11416_v62 = vpack.c.bf16 %v11408_v49, %v11408_v49  ;;  %v1730_v47 = vsub.s32 2, %v16934_v11  ;;  %v16104_v49 = vld [vmem:[#allocation6 + $0x3a4] ss:$16 sps:$4 sm:$0xff]  }
 0x6a5   :  { %13154 = vmatprep.subr.bf16.mxu1 %v15957_v0  ;;  %v16027_v0 = vld [vmem:[#allocation6 + $0x208] ss:$16 sps:$4 sm:$0xff]  }
 0x6a7   :  { %12991 = vmatpush1.bf16.msra.mxu0 %v15952_v2  ;;  %v16032_v2 = vld [vmem:[#allocation6 + $0x224] ss:$16 sps:$4 sm:$0xff]  }
 0x6a8   :  { %13155 = vmatpush1.bf16.msra.mxu1 %v15955_v3  ;;  %12992 = vmatprep.subr.bf16.mxu0 %v15960_v4  ;;  %v11419_v3 = vpack.c.bf16 %v11411_v60, %v11411_v60  ;;  %v16030_v4 = vld [vmem:[#allocation6 + $0x220] ss:$16 sps:$4 sm:$0xff]   ;;  %v16105_v60 = vld [vmem:[#allocation6 + $0x3a8] ss:$16 sps:$4 sm:$0xff]  }
 0x6a9   :  { %13156 = vmatprep.subr.bf16.mxu1 %v15963_v58  ;;  %v16033_v58 = vld [vmem:[#allocation6 + $0x228] ss:$16 sps:$4 sm:$0xff]  }
 0x6ab   :  { %12993 = vmatpush1.bf16.msra.mxu0 %v15958_v56  ;;  %v16038_v56 = vld [vmem:[#allocation6 + $0x244] ss:$16 sps:$4 sm:$0xff]  }
 0x6ac   :  { %13157 = vmatpush1.bf16.msra.mxu1 %v15961_v5  ;;  %12994 = vmatprep.subr.bf16.mxu0 %v15966_v6  ;;  %v16041_v5 = vld [vmem:[#allocation6 + $0x24c] ss:$16 sps:$4 sm:$0xff]   ;;  %v16036_v6 = vld [vmem:[#allocation6 + $0x240] ss:$16 sps:$4 sm:$0xff]  }
 0x6ad   :  { %13158 = vmatprep.subr.bf16.mxu1 %v15969_v8  ;;  %v16039_v8 = vld [vmem:[#allocation6 + $0x248] ss:$16 sps:$4 sm:$0xff]  }
 0x6af   :  { %12995 = vmatpush1.bf16.msra.mxu0 %v15964_v7  ;;  %v16044_v7 = vld [vmem:[#allocation6 + $0x264] ss:$16 sps:$4 sm:$0xff]  }
 0x6b0   :  { %13159 = vmatpush1.bf16.msra.mxu1 %v15967_v9  ;;  %12996 = vmatprep.subr.bf16.mxu0 %v15972_v14  ;;  %v16047_v9 = vld [vmem:[#allocation6 + $0x26c] ss:$16 sps:$4 sm:$0xff]   ;;  %v16042_v14 = vld [vmem:[#allocation6 + $0x260] ss:$16 sps:$4 sm:$0xff]  }
 0x6b1   :  { %13160 = vmatprep.subr.bf16.mxu1 %v15975_v10  ;;  %v16045_v10 = vld [vmem:[#allocation6 + $0x268] ss:$16 sps:$4 sm:$0xff]  }
 0x6b3   :  { %12997 = vmatpush1.bf16.msra.mxu0 %v15970_v13  ;;  %v16050_v13 = vld [vmem:[#allocation6 + $0x284] ss:$16 sps:$4 sm:$0xff]  }
 0x6b4   :  { %13161 = vmatpush1.bf16.msra.mxu1 %v15973_v15  ;;  %12998 = vmatprep.subr.bf16.mxu0 %v15978_v39  ;;  %v16053_v15 = vld [vmem:[#allocation6 + $0x28c] ss:$16 sps:$4 sm:$0xff]   ;;  %v16048_v39 = vld [vmem:[#allocation6 + $0x280] ss:$16 sps:$4 sm:$0xff]  }
 0x6b5   :  { %13162 = vmatprep.subr.bf16.mxu1 %v15981_v17  ;;  %v16051_v17 = vld [vmem:[#allocation6 + $0x288] ss:$16 sps:$4 sm:$0xff]  }
 0x6b7   :  { %12999 = vmatpush1.bf16.msra.mxu0 %v15976_v18  ;;  %v16056_v18 = vld [vmem:[#allocation6 + $0x2a4] ss:$16 sps:$4 sm:$0xff]  }
 0x6b8   :  { %13163 = vmatpush1.bf16.msra.mxu1 %v15979_v54  ;;  %13000 = vmatprep.subr.bf16.mxu0 %v15984_v19  ;;  %v16059_v54 = vld [vmem:[#allocation6 + $0x2ac] ss:$16 sps:$4 sm:$0xff]   ;;  %v16054_v19 = vld [vmem:[#allocation6 + $0x2a0] ss:$16 sps:$4 sm:$0xff]  }
 0x6b9   :  { %13164 = vmatprep.subr.bf16.mxu1 %v15987_v45  ;;  %v16057_v45 = vld [vmem:[#allocation6 + $0x2a8] ss:$16 sps:$4 sm:$0xff]  }
 0x6bb   :  { %13001 = vmatpush1.bf16.msra.mxu0 %v15982_v20  ;;  %v16062_v20 = vld [vmem:[#allocation6 + $0x2c4] ss:$16 sps:$4 sm:$0xff]  }
 0x6bc   :  { %13165 = vmatpush1.bf16.msra.mxu1 %v15985_v21  ;;  %13002 = vmatprep.subr.bf16.mxu0 %v15990_v24  ;;  %v16065_v21 = vld [vmem:[#allocation6 + $0x2cc] ss:$16 sps:$4 sm:$0xff]   ;;  %v16060_v24 = vld [vmem:[#allocation6 + $0x2c0] ss:$16 sps:$4 sm:$0xff]  }
 0x6bd   :  { %13166 = vmatprep.subr.bf16.mxu1 %v15993_v16  ;;  %v16063_v16 = vld [vmem:[#allocation6 + $0x2c8] ss:$16 sps:$4 sm:$0xff]  }
 0x6bf   :  { %13003 = vmatpush1.bf16.msra.mxu0 %v15988_v25  ;;  %v16068_v25 = vld [vmem:[#allocation6 + $0x2e4] ss:$16 sps:$4 sm:$0xff]  }
 0x6c0   :  { %13167 = vmatpush1.bf16.msra.mxu1 %v15991_v27  ;;  %13004 = vmatprep.subr.bf16.mxu0 %v15996_v48  ;;  %v16071_v27 = vld [vmem:[#allocation6 + $0x2ec] ss:$16 sps:$4 sm:$0xff]   ;;  %v16066_v48 = vld [vmem:[#allocation6 + $0x2e0] ss:$16 sps:$4 sm:$0xff]  }
 0x6c1   :  { %13168 = vmatprep.subr.bf16.mxu1 %v15999_v59  ;;  %v16069_v59 = vld [vmem:[#allocation6 + $0x2e8] ss:$16 sps:$4 sm:$0xff]  }
 0x6c3   :  { %13005 = vmatpush1.bf16.msra.mxu0 %v15994_v12  ;;  %v16074_v12 = vld [vmem:[#allocation6 + $0x304] ss:$16 sps:$4 sm:$0xff]  }
 0x6c4   :  { %13169 = vmatpush1.bf16.msra.mxu1 %v15997_v1  ;;  %13006 = vmatprep.subr.bf16.mxu0 %v16002_v28  ;;  %v16077_v1 = vld [vmem:[#allocation6 + $0x30c] ss:$16 sps:$4 sm:$0xff]   ;;  %v16072_v28 = vld [vmem:[#allocation6 + $0x300] ss:$16 sps:$4 sm:$0xff]  }
 0x6c5   :  { %13170 = vmatprep.subr.bf16.mxu1 %v16005_v30  ;;  %v16075_v30 = vld [vmem:[#allocation6 + $0x308] ss:$16 sps:$4 sm:$0xff]  }
 0x6c7   :  { %13007 = vmatpush1.bf16.msra.mxu0 %v16000_v31  ;;  %v16080_v31 = vld [vmem:[#allocation6 + $0x324] ss:$16 sps:$4 sm:$0xff]  }
 0x6c8   :  { %13171 = vmatpush1.bf16.msra.mxu1 %v16003_v29  ;;  %13008 = vmatprep.subr.bf16.mxu0 %v16008_v38  ;;  %v16083_v29 = vld [vmem:[#allocation6 + $0x32c] ss:$16 sps:$4 sm:$0xff]   ;;  %v16078_v38 = vld [vmem:[#allocation6 + $0x320] ss:$16 sps:$4 sm:$0xff]  }
 0x6c9   :  { %13172 = vmatprep.subr.bf16.mxu1 %v16011_v33  ;;  %v16081_v33 = vld [vmem:[#allocation6 + $0x328] ss:$16 sps:$4 sm:$0xff]  }
 0x6cb   :  { %13009 = vmatpush1.bf16.msra.mxu0 %v16006_v35  ;;  %v16086_v35 = vld [vmem:[#allocation6 + $0x344] ss:$16 sps:$4 sm:$0xff]  }
 0x6cc   :  { %13173 = vmatpush1.bf16.msra.mxu1 %v16009_v36  ;;  %13010 = vmatprep.subr.bf16.mxu0 %v16014_v37  ;;  %v16084_v36 = vld [vmem:[#allocation6 + $0x340] ss:$16 sps:$4 sm:$0xff]   ;;  %v16087_v37 = vld [vmem:[#allocation6 + $0x348] ss:$16 sps:$4 sm:$0xff]  }
 0x6cd   :  { %13174 = vmatprep.subr.bf16.mxu1 %v16017_v23  ;;  %v16092_v23 = vld [vmem:[#allocation6 + $0x364] ss:$16 sps:$4 sm:$0xff]  }
 0x6cf   :  { %13011 = vmatpush1.bf16.msra.mxu0 %v16012_v42  ;;  %v16090_v42 = vld [vmem:[#allocation6 + $0x360] ss:$16 sps:$4 sm:$0xff]  }
 0x6d0   :  { %13175 = vmatpush1.bf16.msra.mxu1 %v16015_v52  ;;  %13012 = vmatprep.subr.bf16.mxu0 %v16020_v43  ;;  %v16098_v52 = vld [vmem:[#allocation6 + $0x384] ss:$16 sps:$4 sm:$0xff]   ;;  %v16101_v43 = vld [vmem:[#allocation6 + $0x38c] ss:$16 sps:$4 sm:$0xff]  }
 0x6d1   :  { %13176 = vmatprep.subr.bf16.mxu1 %v16023_v44  ;;  %v16096_v44 = vld [vmem:[#allocation6 + $0x380] ss:$16 sps:$4 sm:$0xff]  }
 0x6d3   :  { %13013 = vmatpush1.bf16.msra.mxu0 %v16018_v41  ;;  %v16099_v41 = vld [vmem:[#allocation6 + $0x388] ss:$16 sps:$4 sm:$0xff]  }
 0x6d4   :  { %13177 = vmatpush1.bf16.msra.mxu1 %v16021_v50  ;;  %13023 = vmatprep.subr.bf16.mxu0 %v16026_v61  ;;  %v16107_v50 = vld [vmem:[#allocation6 + $0x3ac] ss:$16 sps:$4 sm:$0xff]   ;;  %v16102_v61 = vld [vmem:[#allocation6 + $0x3a0] ss:$16 sps:$4 sm:$0xff]  }
 0x6d5   :  { %13187 = vmatprep.subr.bf16.mxu1 %v16029_v53  ;;  %v1731_v53 = vrot.slane %v16937_v22, %v1730_v47 }
 0x6d6   :  { %13015 = vmatmul.mubr.bf16.vlgmr.msra.gmra.mrb[8].mxu0 %v11416_v62 }
 0x6d7   :  { %13179 = vmatmul.mubr.bf16.vlgmr.msra.gmra.mrb[8].mxu1 %v11416_v62  ;;  %13024 = vmatpush1.bf16.msra.mxu0 %v16024_v46  ;;  %v16110_v46 = vld [vmem:[#allocation6 + $0x3c4] ss:$16 sps:$4 sm:$0xff]   ;;  %v16113_v62 = vld [vmem:[#allocation6 + $0x3cc] ss:$16 sps:$4 sm:$0xff]  }
 0x6d8   :  { %13055 = vmatprep.mubr.bf16.mxu0 %v11419_v3  ;;  %13188 = vmatpush1.bf16.msra.mxu1 %v16027_v0  ;;  %v16108_v0 = vld [vmem:[#allocation6 + $0x3c0] ss:$16 sps:$4 sm:$0xff]  }
 0x6d9   :  { %13219 = vmatprep.mubr.bf16.mxu1 %v11419_v3  ;;  %13025 = vmatprep.subr.bf16.mxu0 %v16032_v2  ;;  %v15702_v2 = vadd.f32 %v16896_v51, %v1731_v53  ;;  %v16111_v3 = vld [vmem:[#allocation6 + $0x3c8] ss:$16 sps:$4 sm:$0xff]   ;;  %v16191_v53 = vld [vmem:[#allocation6 + $0x56c] ss:$16 sps:$4 sm:$0xff]  }
 0x6da   :  { %13189 = vmatprep.subr.bf16.mxu1 %v16035_v63  ;;  %v16116_v63 = vld [vmem:[#allocation6 + $0x3e4] ss:$16 sps:$4 sm:$0xff]   ;;  %v16123_v51 = vld [vmem:[#allocation6 + $0x408] ss:$16 sps:$4 sm:$0xff]  }
 0x6db   :  { %13026 = vmatpush1.bf16.msra.mxu0 %v16030_v4  ;;  %v16119_v4 = vld [vmem:[#allocation6 + $0x3ec] ss:$16 sps:$4 sm:$0xff]  }
 0x6dc   :  { %13190 = vmatpush1.bf16.msra.mxu1 %v16033_v58  ;;  %13027 = vmatprep.subr.bf16.mxu0 %v16038_v56  ;;  %v16114_v58 = vld [vmem:[#allocation6 + $0x3e0] ss:$16 sps:$4 sm:$0xff]   ;;  %v11410_v56 = vmax.f32 %v15702_v2, 0.0 }
 0x6dd   :  { %13191 = vmatprep.subr.bf16.mxu1 %v16041_v5  ;;  %v16117_v5 = vld [vmem:[#allocation6 + $0x3e8] ss:$16 sps:$4 sm:$0xff]   ;;  %v16192_v2 = vld [vmem:[#allocation6 + $0x580] ss:$16 sps:$4 sm:$0xff]  }
 0x6df   :  { %13028 = vmatpush1.bf16.msra.mxu0 %v16036_v6  ;;  %v16122_v6 = vld [vmem:[#allocation6 + $0x404] ss:$16 sps:$4 sm:$0xff]  }
 0x6e0   :  { %13192 = vmatpush1.bf16.msra.mxu1 %v16039_v8  ;;  %13029 = vmatprep.subr.bf16.mxu0 %v16044_v7  ;;  %v16125_v8 = vld [vmem:[#allocation6 + $0x40c] ss:$16 sps:$4 sm:$0xff]   ;;  %v16120_v7 = vld [vmem:[#allocation6 + $0x400] ss:$16 sps:$4 sm:$0xff]  }
 0x6e1   :  { %13193 = vmatprep.subr.bf16.mxu1 %v16047_v9  ;;  %v11418_v9 = vpack.c.bf16 %v11410_v56, %v11410_v56  ;;  %v16201_v56 = vld [vmem:[#allocation6 + $0x5a8] ss:$16 sps:$4 sm:$0xff]  }
 0x6e3   :  { %13030 = vmatpush1.bf16.msra.mxu0 %v16042_v14  ;;  %v16128_v14 = vld [vmem:[#allocation6 + $0x424] ss:$16 sps:$4 sm:$0xff]  }
 0x6e4   :  { %13194 = vmatpush1.bf16.msra.mxu1 %v16045_v10  ;;  %13031 = vmatprep.subr.bf16.mxu0 %v16050_v13  ;;  %v16131_v10 = vld [vmem:[#allocation6 + $0x42c] ss:$16 sps:$4 sm:$0xff]   ;;  %v16126_v13 = vld [vmem:[#allocation6 + $0x420] ss:$16 sps:$4 sm:$0xff]  }
 0x6e5   :  { %13195 = vmatprep.subr.bf16.mxu1 %v16053_v15  ;;  %v16129_v15 = vld [vmem:[#allocation6 + $0x428] ss:$16 sps:$4 sm:$0xff]  }
 0x6e7   :  { %13032 = vmatpush1.bf16.msra.mxu0 %v16048_v39  ;;  %v16134_v39 = vld [vmem:[#allocation6 + $0x444] ss:$16 sps:$4 sm:$0xff]  }
 0x6e8   :  { %13196 = vmatpush1.bf16.msra.mxu1 %v16051_v17  ;;  %13033 = vmatprep.subr.bf16.mxu0 %v16056_v18  ;;  %v16137_v17 = vld [vmem:[#allocation6 + $0x44c] ss:$16 sps:$4 sm:$0xff]   ;;  %v16132_v18 = vld [vmem:[#allocation6 + $0x440] ss:$16 sps:$4 sm:$0xff]  }
 0x6e9   :  { %13197 = vmatprep.subr.bf16.mxu1 %v16059_v54  ;;  %v16135_v54 = vld [vmem:[#allocation6 + $0x448] ss:$16 sps:$4 sm:$0xff]  }
 0x6eb   :  { %13034 = vmatpush1.bf16.msra.mxu0 %v16054_v19  ;;  %v16140_v19 = vld [vmem:[#allocation6 + $0x464] ss:$16 sps:$4 sm:$0xff]  }
 0x6ec   :  { %13198 = vmatpush1.bf16.msra.mxu1 %v16057_v45  ;;  %13035 = vmatprep.subr.bf16.mxu0 %v16062_v20  ;;  %v16143_v45 = vld [vmem:[#allocation6 + $0x46c] ss:$16 sps:$4 sm:$0xff]   ;;  %v16138_v20 = vld [vmem:[#allocation6 + $0x460] ss:$16 sps:$4 sm:$0xff]  }
 0x6ed   :  { %13199 = vmatprep.subr.bf16.mxu1 %v16065_v21  ;;  %v16141_v21 = vld [vmem:[#allocation6 + $0x468] ss:$16 sps:$4 sm:$0xff]  }
 0x6ef   :  { %13036 = vmatpush1.bf16.msra.mxu0 %v16060_v24  ;;  %v16146_v24 = vld [vmem:[#allocation6 + $0x484] ss:$16 sps:$4 sm:$0xff]  }
 0x6f0   :  { %13200 = vmatpush1.bf16.msra.mxu1 %v16063_v16  ;;  %13037 = vmatprep.subr.bf16.mxu0 %v16068_v25  ;;  %v16149_v16 = vld [vmem:[#allocation6 + $0x48c] ss:$16 sps:$4 sm:$0xff]   ;;  %v16144_v25 = vld [vmem:[#allocation6 + $0x480] ss:$16 sps:$4 sm:$0xff]  }
 0x6f1   :  { %13201 = vmatprep.subr.bf16.mxu1 %v16071_v27  ;;  %v16147_v27 = vld [vmem:[#allocation6 + $0x488] ss:$16 sps:$4 sm:$0xff]  }
 0x6f3   :  { %13038 = vmatpush1.bf16.msra.mxu0 %v16066_v48  ;;  %v16152_v48 = vld [vmem:[#allocation6 + $0x4a4] ss:$16 sps:$4 sm:$0xff]  }
 0x6f4   :  { %13202 = vmatpush1.bf16.msra.mxu1 %v16069_v59  ;;  %13039 = vmatprep.subr.bf16.mxu0 %v16074_v12  ;;  %v16155_v59 = vld [vmem:[#allocation6 + $0x4ac] ss:$16 sps:$4 sm:$0xff]   ;;  %v16150_v12 = vld [vmem:[#allocation6 + $0x4a0] ss:$16 sps:$4 sm:$0xff]  }
 0x6f5   :  { %13203 = vmatprep.subr.bf16.mxu1 %v16077_v1  ;;  %v16153_v1 = vld [vmem:[#allocation6 + $0x4a8] ss:$16 sps:$4 sm:$0xff]  }
 0x6f7   :  { %13040 = vmatpush1.bf16.msra.mxu0 %v16072_v28  ;;  %v16158_v28 = vld [vmem:[#allocation6 + $0x4c4] ss:$16 sps:$4 sm:$0xff]  }
 0x6f8   :  { %13204 = vmatpush1.bf16.msra.mxu1 %v16075_v30  ;;  %13041 = vmatprep.subr.bf16.mxu0 %v16080_v31  ;;  %v16161_v30 = vld [vmem:[#allocation6 + $0x4cc] ss:$16 sps:$4 sm:$0xff]   ;;  %v16156_v31 = vld [vmem:[#allocation6 + $0x4c0] ss:$16 sps:$4 sm:$0xff]  }
 0x6f9   :  { %13205 = vmatprep.subr.bf16.mxu1 %v16083_v29  ;;  %v16159_v29 = vld [vmem:[#allocation6 + $0x4c8] ss:$16 sps:$4 sm:$0xff]  }
 0x6fb   :  { %13042 = vmatpush1.bf16.msra.mxu0 %v16078_v38  ;;  %v16164_v38 = vld [vmem:[#allocation6 + $0x4e4] ss:$16 sps:$4 sm:$0xff]  }
 0x6fc   :  { %13206 = vmatpush1.bf16.msra.mxu1 %v16081_v33  ;;  %13043 = vmatprep.subr.bf16.mxu0 %v16086_v35  ;;  %v16167_v33 = vld [vmem:[#allocation6 + $0x4ec] ss:$16 sps:$4 sm:$0xff]   ;;  %v16162_v35 = vld [vmem:[#allocation6 + $0x4e0] ss:$16 sps:$4 sm:$0xff]  }
 0x6fd   :  { %13207 = vmatprep.subr.bf16.mxu1 %v16089_v34  ;;  %v16165_v34 = vld [vmem:[#allocation6 + $0x4e8] ss:$16 sps:$4 sm:$0xff]  }
 0x6ff   :  { %13044 = vmatpush1.bf16.msra.mxu0 %v16084_v36  ;;  %v16170_v36 = vld [vmem:[#allocation6 + $0x504] ss:$16 sps:$4 sm:$0xff]  }
 0x700   :  { %13208 = vmatpush1.bf16.msra.mxu1 %v16087_v37  ;;  %13045 = vmatprep.subr.bf16.mxu0 %v16092_v23  ;;  %v16173_v37 = vld [vmem:[#allocation6 + $0x50c] ss:$16 sps:$4 sm:$0xff]   ;;  %v16168_v23 = vld [vmem:[#allocation6 + $0x500] ss:$16 sps:$4 sm:$0xff]  }
 0x701   :  { %13209 = vmatprep.subr.bf16.mxu1 %v16095_v40  ;;  %v16171_v40 = vld [vmem:[#allocation6 + $0x508] ss:$16 sps:$4 sm:$0xff]  }
 0x703   :  { %13046 = vmatpush1.bf16.msra.mxu0 %v16090_v42  ;;  %v16176_v42 = vld [vmem:[#allocation6 + $0x524] ss:$16 sps:$4 sm:$0xff]  }
 0x704   :  { %13210 = vmatpush1.bf16.msra.mxu1 %v16093_v55  ;;  %13047 = vmatprep.subr.bf16.mxu0 %v16098_v52  ;;  %v16179_v55 = vld [vmem:[#allocation6 + $0x52c] ss:$16 sps:$4 sm:$0xff]   ;;  %v16174_v52 = vld [vmem:[#allocation6 + $0x520] ss:$16 sps:$4 sm:$0xff]  }
 0x705   :  { %13211 = vmatprep.subr.bf16.mxu1 %v16101_v43  ;;  %v16177_v43 = vld [vmem:[#allocation6 + $0x528] ss:$16 sps:$4 sm:$0xff]  }
 0x707   :  { %13048 = vmatpush1.bf16.msra.mxu0 %v16096_v44  ;;  %v16182_v44 = vld [vmem:[#allocation6 + $0x544] ss:$16 sps:$4 sm:$0xff]  }
 0x708   :  { %13212 = vmatpush1.bf16.msra.mxu1 %v16099_v41  ;;  %13049 = vmatprep.subr.bf16.mxu0 %v16104_v49  ;;  %v16185_v41 = vld [vmem:[#allocation6 + $0x54c] ss:$16 sps:$4 sm:$0xff]   ;;  %v16180_v49 = vld [vmem:[#allocation6 + $0x540] ss:$16 sps:$4 sm:$0xff]  }
 0x709   :  { %13213 = vmatprep.subr.bf16.mxu1 %v16107_v50  ;;  %v16183_v50 = vld [vmem:[#allocation6 + $0x548] ss:$16 sps:$4 sm:$0xff]  }
 0x70b   :  { %13050 = vmatpush1.bf16.msra.mxu0 %v16102_v61  ;;  %v16188_v61 = vld [vmem:[#allocation6 + $0x564] ss:$16 sps:$4 sm:$0xff]  }
 0x70c   :  { %13214 = vmatpush1.bf16.msra.mxu1 %v16105_v60  ;;  %13051 = vmatprep.subr.bf16.mxu0 %v16110_v46  ;;  %v16186_v60 = vld [vmem:[#allocation6 + $0x560] ss:$16 sps:$4 sm:$0xff]   ;;  %v16189_v46 = vld [vmem:[#allocation6 + $0x568] ss:$16 sps:$4 sm:$0xff]  }
 0x70d   :  { %13215 = vmatprep.subr.bf16.mxu1 %v16113_v62  ;;  %v16194_v62 = vld [vmem:[#allocation6 + $0x584] ss:$16 sps:$4 sm:$0xff]  }
 0x70f   :  { %13052 = vmatpush1.bf16.msra.mxu0 %v16108_v0  ;;  %v16197_v0 = vld [vmem:[#allocation6 + $0x58c] ss:$16 sps:$4 sm:$0xff]  }
 0x710   :  { %13216 = vmatpush1.bf16.msra.mxu1 %v16111_v3  ;;  %13053 = vmatprep.subr.bf16.mxu0 %v16116_v63  ;;  %v16195_v3 = vld [vmem:[#allocation6 + $0x588] ss:$16 sps:$4 sm:$0xff]   ;;  %v16200_v63 = vld [vmem:[#allocation6 + $0x5a4] ss:$16 sps:$4 sm:$0xff]  }
 0x711   :  { %13217 = vmatprep.subr.bf16.mxu1 %v16119_v4  ;;  %v16203_v4 = vld [vmem:[#allocation6 + $0x5ac] ss:$16 sps:$4 sm:$0xff]  }
 0x713   :  { %13054 = vmatpush1.bf16.msra.mxu0 %v16114_v58  ;;  %v16198_v58 = vld [vmem:[#allocation6 + $0x5a0] ss:$16 sps:$4 sm:$0xff]  }
 0x714   :  { %13218 = vmatpush1.bf16.msra.mxu1 %v16117_v5  ;;  %13064 = vmatprep.subr.bf16.mxu0 %v16122_v6  ;;  %v16206_v5 = vld [vmem:[#allocation6 + $0x5c4] ss:$16 sps:$4 sm:$0xff]   ;;  %v16209_v6 = vld [vmem:[#allocation6 + $0x5cc] ss:$16 sps:$4 sm:$0xff]  }
 0x715   :  { %13228 = vmatprep.subr.bf16.mxu1 %v16125_v8  ;;  %v16204_v8 = vld [vmem:[#allocation6 + $0x5c0] ss:$16 sps:$4 sm:$0xff]  }
 0x716   :  { %13056 = vmatmul.mubr.bf16.vlgmr.msra.gmra.mrb[8].mxu0 %v11418_v9 }
 0x717   :  { %13220 = vmatmul.mubr.bf16.vlgmr.msra.gmra.mrb[8].mxu1 %v11418_v9  ;;  %13065 = vmatpush1.bf16.msra.mxu0 %v16120_v7  ;;  %v16207_v7 = vld [vmem:[#allocation6 + $0x5c8] ss:$16 sps:$4 sm:$0xff]   ;;  %v16212_v9 = vld [vmem:[#allocation6 + $0x5e4] ss:$16 sps:$4 sm:$0xff]  }
 0x718   :  { %13229 = vmatpush1.bf16.msra.mxu1 %v16123_v51  ;;  %13066 = vmatprep.subr.bf16.mxu0 %v16128_v14  ;;  %v16215_v51 = vld [vmem:[#allocation6 + $0x5ec] ss:$16 sps:$4 sm:$0xff]   ;;  %v16210_v14 = vld [vmem:[#allocation6 + $0x5e0] ss:$16 sps:$4 sm:$0xff]  }
 0x719   :  { %13230 = vmatprep.subr.bf16.mxu1 %v16131_v10  ;;  %v16213_v10 = vld [vmem:[#allocation6 + $0x5e8] ss:$16 sps:$4 sm:$0xff]  }
 0x71b   :  { %13067 = vmatpush1.bf16.msra.mxu0 %v16126_v13  ;;  %v16218_v13 = vld [vmem:[#allocation6 + $0x604] ss:$16 sps:$4 sm:$0xff]  }
 0x71c   :  { %13231 = vmatpush1.bf16.msra.mxu1 %v16129_v15  ;;  %13068 = vmatprep.subr.bf16.mxu0 %v16134_v39  ;;  %v16221_v15 = vld [vmem:[#allocation6 + $0x60c] ss:$16 sps:$4 sm:$0xff]   ;;  %v1738_v39 = vsub.s32 4, %v16934_v11 }
 0x71d   :  { %13232 = vmatprep.subr.bf16.mxu1 %v16137_v17  ;;  %v1742_v17 = vsub.s32 5, %v16934_v11 }
 0x71f   :  { %13069 = vmatpush1.bf16.msra.mxu0 %v16132_v18  ;;  %v1750_v18 = vsub.s32 7, %v16934_v11 }
 0x720   :  { %13233 = vmatpush1.bf16.msra.mxu1 %v16135_v54  ;;  %13070 = vmatprep.subr.bf16.mxu0 %v16140_v19  ;;  %v1739_v54 = vrot.slane %v16937_v22, %v1738_v39  ;;  %v1743_v19 = vrot.slane %v16937_v22, %v1742_v17  ;;  %v16270_v39 = vld [vmem:[#allocation6 + $0x720] ss:$16 sps:$4 sm:$0xff]   ;;  %v16273_v17 = vld [vmem:[#allocation6 + $0x728] ss:$16 sps:$4 sm:$0xff]  }
 0x721   :  { %13234 = vmatprep.subr.bf16.mxu1 %v16143_v45  ;;  %v1751_v45 = vrot.slane %v16937_v22, %v1750_v18  ;;  %v16224_v22 = vld [vmem:[#allocation6 + $0x624] ss:$16 sps:$4 sm:$0xff]  }
 0x722   :  { %v16278_v18 = vld [vmem:[#allocation6 + $0x744] ss:$16 sps:$4 sm:$0xff]  }
 0x723   :  { %13071 = vmatpush1.bf16.msra.mxu0 %v16138_v20 }
 0x724   :  { %13235 = vmatpush1.bf16.msra.mxu1 %v16141_v21  ;;  %13072 = vmatprep.subr.bf16.mxu0 %v16146_v24 }
 0x725   :  { %13236 = vmatprep.subr.bf16.mxu1 %v16149_v16 }
 0x727   :  { %13073 = vmatpush1.bf16.msra.mxu0 %v16144_v25 }
 0x728   :  { %13237 = vmatpush1.bf16.msra.mxu1 %v16147_v27  ;;  %13074 = vmatprep.subr.bf16.mxu0 %v16152_v48 }
 0x729   :  { %13238 = vmatprep.subr.bf16.mxu1 %v16155_v59 }
 0x72b   :  { %13075 = vmatpush1.bf16.msra.mxu0 %v16150_v12 }
 0x72c   :  { %13239 = vmatpush1.bf16.msra.mxu1 %v16153_v1  ;;  %13076 = vmatprep.subr.bf16.mxu0 %v16158_v28 }
 0x72d   :  { %13240 = vmatprep.subr.bf16.mxu1 %v16161_v30 }
 0x72f   :  { %13077 = vmatpush1.bf16.msra.mxu0 %v16156_v31 }
 0x730   :  { %13241 = vmatpush1.bf16.msra.mxu1 %v16159_v29  ;;  %13078 = vmatprep.subr.bf16.mxu0 %v16164_v38 }
 0x731   :  { %13242 = vmatprep.subr.bf16.mxu1 %v16167_v33  ;;  %v16216_v33 = vld [vmem:[#allocation6 + $0x600] ss:$16 sps:$4 sm:$0xff]  }
 0x733   :  { %13079 = vmatpush1.bf16.msra.mxu0 %v16162_v35  ;;  %v16219_v35 = vld [vmem:[#allocation6 + $0x608] ss:$16 sps:$4 sm:$0xff]  }
 0x734   :  { %13243 = vmatpush1.bf16.msra.mxu1 %v16165_v34  ;;  %13080 = vmatprep.subr.bf16.mxu0 %v16170_v36  ;;  %v16227_v36 = vld [vmem:[#allocation6 + $0x62c] ss:$16 sps:$4 sm:$0xff]  }
 0x735   :  { %13244 = vmatprep.subr.bf16.mxu1 %v16173_v37 }
 0x737   :  { %13081 = vmatpush1.bf16.msra.mxu0 %v16168_v23  ;;  %v16222_v23 = vld [vmem:[#allocation6 + $0x620] ss:$16 sps:$4 sm:$0xff]  }
 0x738   :  { %13245 = vmatpush1.bf16.msra.mxu1 %v16171_v40  ;;  %13082 = vmatprep.subr.bf16.mxu0 %v16176_v42  ;;  %v16225_v40 = vld [vmem:[#allocation6 + $0x628] ss:$16 sps:$4 sm:$0xff]   ;;  %v16230_v42 = vld [vmem:[#allocation6 + $0x644] ss:$16 sps:$4 sm:$0xff]  }
 0x739   :  { %13246 = vmatprep.subr.bf16.mxu1 %v16179_v55  ;;  %v16233_v55 = vld [vmem:[#allocation6 + $0x64c] ss:$16 sps:$4 sm:$0xff]  }
 0x73b   :  { %13083 = vmatpush1.bf16.msra.mxu0 %v16174_v52  ;;  %v16228_v52 = vld [vmem:[#allocation6 + $0x640] ss:$16 sps:$4 sm:$0xff]  }
 0x73c   :  { %13247 = vmatpush1.bf16.msra.mxu1 %v16177_v43  ;;  %13084 = vmatprep.subr.bf16.mxu0 %v16182_v44  ;;  %v16231_v43 = vld [vmem:[#allocation6 + $0x648] ss:$16 sps:$4 sm:$0xff]   ;;  %v16236_v44 = vld [vmem:[#allocation6 + $0x664] ss:$16 sps:$4 sm:$0xff]  }
 0x73d   :  { %13248 = vmatprep.subr.bf16.mxu1 %v16185_v41  ;;  %v16239_v41 = vld [vmem:[#allocation6 + $0x66c] ss:$16 sps:$4 sm:$0xff]  }
 0x73f   :  { %13085 = vmatpush1.bf16.msra.mxu0 %v16180_v49  ;;  %v16234_v49 = vld [vmem:[#allocation6 + $0x660] ss:$16 sps:$4 sm:$0xff]  }
 0x740   :  { %13249 = vmatpush1.bf16.msra.mxu1 %v16183_v50  ;;  %13086 = vmatprep.subr.bf16.mxu0 %v16188_v61  ;;  %v16237_v50 = vld [vmem:[#allocation6 + $0x668] ss:$16 sps:$4 sm:$0xff]   ;;  %v16242_v61 = vld [vmem:[#allocation6 + $0x684] ss:$16 sps:$4 sm:$0xff]  }
 0x741   :  { %13250 = vmatprep.subr.bf16.mxu1 %v16191_v53  ;;  %v16245_v53 = vld [vmem:[#allocation6 + $0x68c] ss:$16 sps:$4 sm:$0xff]  }
 0x743   :  { %13087 = vmatpush1.bf16.msra.mxu0 %v16186_v60  ;;  %v16240_v60 = vld [vmem:[#allocation6 + $0x680] ss:$16 sps:$4 sm:$0xff]  }
 0x744   :  { %13251 = vmatpush1.bf16.msra.mxu1 %v16189_v46  ;;  %13088 = vmatprep.subr.bf16.mxu0 %v16194_v62  ;;  %v16243_v46 = vld [vmem:[#allocation6 + $0x688] ss:$16 sps:$4 sm:$0xff]   ;;  %v16248_v62 = vld [vmem:[#allocation6 + $0x6a4] ss:$16 sps:$4 sm:$0xff]  }
 0x745   :  { %13252 = vmatprep.subr.bf16.mxu1 %v16197_v0  ;;  %v16251_v0 = vld [vmem:[#allocation6 + $0x6ac] ss:$16 sps:$4 sm:$0xff]  }
 0x747   :  { %13089 = vmatpush1.bf16.msra.mxu0 %v16192_v2  ;;  %v16246_v2 = vld [vmem:[#allocation6 + $0x6a0] ss:$16 sps:$4 sm:$0xff]  }
 0x748   :  { %13253 = vmatpush1.bf16.msra.mxu1 %v16195_v3  ;;  %13090 = vmatprep.subr.bf16.mxu0 %v16200_v63  ;;  %v16249_v3 = vld [vmem:[#allocation6 + $0x6a8] ss:$16 sps:$4 sm:$0xff]   ;;  %v16254_v63 = vld [vmem:[#allocation6 + $0x6c4] ss:$16 sps:$4 sm:$0xff]  }
 0x749   :  { %13254 = vmatprep.subr.bf16.mxu1 %v16203_v4  ;;  %v16257_v4 = vld [vmem:[#allocation6 + $0x6cc] ss:$16 sps:$4 sm:$0xff]  }
 0x74b   :  { %13091 = vmatpush1.bf16.msra.mxu0 %v16198_v58  ;;  %v16252_v58 = vld [vmem:[#allocation6 + $0x6c0] ss:$16 sps:$4 sm:$0xff]  }
 0x74c   :  { %13255 = vmatpush1.bf16.msra.mxu1 %v16201_v56  ;;  %13092 = vmatprep.subr.bf16.mxu0 %v16206_v5  ;;  %v16255_v56 = vld [vmem:[#allocation6 + $0x6c8] ss:$16 sps:$4 sm:$0xff]   ;;  %v16260_v5 = vld [vmem:[#allocation6 + $0x6e4] ss:$16 sps:$4 sm:$0xff]  }
 0x74d   :  { %13256 = vmatprep.subr.bf16.mxu1 %v16209_v6  ;;  %v16263_v6 = vld [vmem:[#allocation6 + $0x6ec] ss:$16 sps:$4 sm:$0xff]  }
 0x74f   :  { %13093 = vmatpush1.bf16.msra.mxu0 %v16204_v8  ;;  %v16258_v8 = vld [vmem:[#allocation6 + $0x6e0] ss:$16 sps:$4 sm:$0xff]  }
 0x750   :  { %13257 = vmatpush1.bf16.msra.mxu1 %v16207_v7  ;;  %13094 = vmatprep.subr.bf16.mxu0 %v16212_v9  ;;  %v16261_v7 = vld [vmem:[#allocation6 + $0x6e8] ss:$16 sps:$4 sm:$0xff]   ;;  %v16266_v9 = vld [vmem:[#allocation6 + $0x704] ss:$16 sps:$4 sm:$0xff]  }
 0x751   :  { %13258 = vmatprep.subr.bf16.mxu1 %v16215_v51  ;;  %v16269_v51 = vld [vmem:[#allocation6 + $0x70c] ss:$16 sps:$4 sm:$0xff]  }
 0x753   :  { %13095 = vmatpush1.bf16.msra.mxu0 %v16210_v14  ;;  %v16264_v14 = vld [vmem:[#allocation6 + $0x700] ss:$16 sps:$4 sm:$0xff]  }
 0x754   :  { %13259 = vmatpush1.bf16.msra.mxu1 %v16213_v10  ;;  %13105 = vmatprep.subr.bf16.mxu0 %v16218_v13  ;;  %v16267_v10 = vld [vmem:[#allocation6 + $0x708] ss:$16 sps:$4 sm:$0xff]   ;;  %v16272_v13 = vld [vmem:[#allocation6 + $0x724] ss:$16 sps:$4 sm:$0xff]  }
 0x755   :  { %13269 = vmatprep.subr.bf16.mxu1 %v16221_v15  ;;  %v16275_v15 = vld [vmem:[#allocation6 + $0x72c] ss:$16 sps:$4 sm:$0xff]  }
 0x769   :  { %v10909_v20 = vpop.f32.mrb[4].mxu0  ;;  %v16966_v24 = vpop.f32.mrb[4].mxu1 }
 0x76a   :  { %v15704_v21 = vadd.f32 %v10909_v20, %v1739_v54  ;;  %v10911_v16 = vpop.f32.mrb[5].mxu0  ;;  %v11403_v27 = vpop.f32.mrb[5].mxu1  ;;  %v16281_v54 = vld [vmem:[#allocation6 + $0x74c] ss:$16 sps:$4 sm:$0xff]   ;;  %v16284_v20 = vld [vmem:[#allocation6 + $0x764] ss:$16 sps:$4 sm:$0xff]  }
 0x76b   :  { %v15705_v25 = vadd.f32 %v10911_v16, %v1743_v19  ;;  %v10913_v48 = vpop.f32.mrb[6].mxu0  ;;  %v15707_v12 = vadd.f32 %v11403_v27, %v1751_v45  ;;  %v11405_v1 = vpop.f32.mrb[6].mxu1  ;;  %v16276_v19 = vld [vmem:[#allocation6 + $0x740] ss:$16 sps:$4 sm:$0xff]   ;;  %v16279_v45 = vld [vmem:[#allocation6 + $0x748] ss:$16 sps:$4 sm:$0xff]  }
 0x76c   :  { %v11412_v59 = vmax.f32 %v15704_v21, 0.0  ;;  %v10914_v28 = vpop.f32.mrb[7].mxu0  ;;  %v11406_v31 = vpop.f32.mrb[7].mxu1  ;;  %v16287_v21 = vld [vmem:[#allocation6 + $0x76c] ss:$16 sps:$4 sm:$0xff]   ;;  %v1746_v1 = vsub.s32 6, %v16934_v11 }
 0x76d   :  { %v11413_v30 = vmax.f32 %v15705_v25, 0.0  ;;  %v11415_v29 = vmax.f32 %v15707_v12, 0.0  ;;  %v16282_v16 = vld [vmem:[#allocation6 + $0x760] ss:$16 sps:$4 sm:$0xff]   ;;  %v16285_v25 = vld [vmem:[#allocation6 + $0x768] ss:$16 sps:$4 sm:$0xff]  }
 0x76e   :  { %v11420_v34 = vpack.c.bf16 %v11412_v59, %v11412_v59  ;;  %v16290_v27 = vld [vmem:[#allocation6 + $0x784] ss:$16 sps:$4 sm:$0xff]   ;;  %v16293_v48 = vld [vmem:[#allocation6 + $0x78c] ss:$16 sps:$4 sm:$0xff]   ;;  %v16288_v59 = vld [vmem:[#allocation6 + $0x780] ss:$16 sps:$4 sm:$0xff]  }
 0x76f   :  { %v11421_v38 = vpack.c.bf16 %v11413_v30, %v11413_v30  ;;  %v11423_v37 = vpack.c.bf16 %v11415_v29, %v11415_v29  ;;  %v16291_v12 = vld [vmem:[#allocation6 + $0x788] ss:$16 sps:$4 sm:$0xff]   ;;  %v16296_v28 = vld [vmem:[#allocation6 + $0x7a4] ss:$16 sps:$4 sm:$0xff]   ;;  %v16299_v30 = vld [vmem:[#allocation6 + $0x7ac] ss:$16 sps:$4 sm:$0xff]  }
 0x770   :  { %v16294_v31 = vld [vmem:[#allocation6 + $0x7a0] ss:$16 sps:$4 sm:$0xff]   ;;  %v16297_v29 = vld [vmem:[#allocation6 + $0x7a8] ss:$16 sps:$4 sm:$0xff]  }
 0x771   :  { %13096 = vmatprep.mubr.bf16.mxu0 %v11421_v38  ;;  %13260 = vmatprep.mubr.bf16.mxu1 %v11421_v38  ;;  %v16356_v38 = vld [vmem:[#allocation4] sm:$0xff]  ;;  %v16344_v11 = vld [vmem:[#allocation12] sm:$0xff]  }
 0x772   :  { %13097 = vmatmul.mubr.bf16.vlgmr.msra.gmra.mrb[8].mxu0 %v11420_v34  ;;  %13261 = vmatmul.mubr.bf16.vlgmr.msra.gmra.mrb[8].mxu1 %v11420_v34  ;;  %v16305_v34 = vld [vmem:[#allocation6 + $0x7cc] ss:$16 sps:$4 sm:$0xff]  }
 0x773   :  { %13106 = vmatpush1.bf16.msra.mxu0 %v16216_v33  ;;  %13270 = vmatpush1.bf16.msra.mxu1 %v16219_v35  ;;  %v1747_v33 = vrot.slane %v16356_v38, %v1746_v1  ;;  %v16302_v35 = vld [vmem:[#allocation6 + $0x7c4] ss:$16 sps:$4 sm:$0xff]  }
 0x774   :  { %13137 = vmatprep.mubr.bf16.mxu0 %v11423_v37  ;;  %13301 = vmatprep.mubr.bf16.mxu1 %v11423_v37 }
 0x775   :  { %13107 = vmatprep.subr.bf16.mxu0 %v16224_v22  ;;  %13271 = vmatprep.subr.bf16.mxu1 %v16227_v36  ;;  %v16300_v22 = vld [vmem:[#allocation6 + $0x7c0] ss:$16 sps:$4 sm:$0xff]   ;;  %v16303_v36 = vld [vmem:[#allocation6 + $0x7c8] ss:$16 sps:$4 sm:$0xff]   ;;  %v15706_v37 = vadd.f32 %v16966_v24, %v1747_v33 }
 0x776   :  { %v16316_v24 = vld [vmem:[#allocation9 + $0x48] sm:$0xff]  }
 0x777   :  { %13108 = vmatpush1.bf16.msra.mxu0 %v16222_v23  ;;  %13272 = vmatpush1.bf16.msra.mxu1 %v16225_v40  ;;  %v16308_v23 = vld [vmem:[#allocation6 + $0x7e4] ss:$16 sps:$4 sm:$0xff]   ;;  %v16311_v40 = vld [vmem:[#allocation6 + $0x7ec] ss:$16 sps:$4 sm:$0xff]  }
 0x778   :  { %13109 = vmatprep.subr.bf16.mxu0 %v16230_v42  ;;  %13273 = vmatprep.subr.bf16.mxu1 %v16233_v55  ;;  %v16306_v42 = vld [vmem:[#allocation6 + $0x7e0] ss:$16 sps:$4 sm:$0xff]   ;;  %v16309_v55 = vld [vmem:[#allocation6 + $0x7e8] ss:$16 sps:$4 sm:$0xff]  }
 0x77b   :  { %13110 = vmatpush1.bf16.msra.mxu0 %v16228_v52  ;;  %13274 = vmatpush1.bf16.msra.mxu1 %v16231_v43  ;;  %v11414_v52 = vmax.f32 %v15706_v37, 0.0  ;;  %v16312_v43 = vld [vmem:[#allocation9 + $0x40] sm:$0xff]  }
 0x77c   :  { %13111 = vmatprep.subr.bf16.mxu0 %v16236_v44  ;;  %13275 = vmatprep.subr.bf16.mxu1 %v16239_v41  ;;  %v16313_v44 = vld [vmem:[#allocation9 + $0xc0] sm:$0xff]  }
 0x77d   :  { %v16314_v41 = vld [vmem:[#allocation9] sm:$0xff]  }
 0x77f   :  { %13112 = vmatpush1.bf16.msra.mxu0 %v16234_v49  ;;  %13276 = vmatpush1.bf16.msra.mxu1 %v16237_v50  ;;  %v16315_v49 = vld [vmem:[#allocation9 + $0x80] sm:$0xff]   ;;  %v11422_v50 = vpack.c.bf16 %v11414_v52, %v11414_v52 }
 0x780   :  { %13113 = vmatprep.subr.bf16.mxu0 %v16242_v61  ;;  %13277 = vmatprep.subr.bf16.mxu1 %v16245_v53  ;;  %v16317_v61 = vld [vmem:[#allocation9 + $0xc8] sm:$0xff]  }
 0x781   :  { %v16318_v53 = vld [vmem:[#allocation9 + $0x8] sm:$0xff]  }
 0x782   :  { %v16348_v52 = vld [vmem:[#allocation12 + $0x20] sm:$0xff]  }
 0x783   :  { %13114 = vmatpush1.bf16.msra.mxu0 %v16240_v60  ;;  %13278 = vmatpush1.bf16.msra.mxu1 %v16243_v46  ;;  %v16319_v60 = vld [vmem:[#allocation9 + $0x88] sm:$0xff]   ;;  %v16320_v46 = vld [vmem:[#allocation9 + $0x50] sm:$0xff]  }
 0x784   :  { %13115 = vmatprep.subr.bf16.mxu0 %v16248_v62  ;;  %13279 = vmatprep.subr.bf16.mxu1 %v16251_v0  ;;  %v16321_v62 = vld [vmem:[#allocation9 + $0xd0] sm:$0xff]  }
 0x785   :  { %v16322_v0 = vld [vmem:[#allocation9 + $0x10] sm:$0xff]  }
 0x787   :  { %13116 = vmatpush1.bf16.msra.mxu0 %v16246_v2  ;;  %13280 = vmatpush1.bf16.msra.mxu1 %v16249_v3  ;;  %v16323_v2 = vld [vmem:[#allocation9 + $0x90] sm:$0xff]   ;;  %v16324_v3 = vld [vmem:[#allocation9 + $0x58] sm:$0xff]  }
 0x788   :  { %13117 = vmatprep.subr.bf16.mxu0 %v16254_v63  ;;  %13281 = vmatprep.subr.bf16.mxu1 %v16257_v4  ;;  %v16325_v63 = vld [vmem:[#allocation9 + $0xd8] sm:$0xff]  }
 0x789   :  { %v16326_v4 = vld [vmem:[#allocation9 + $0x18] sm:$0xff]  }
 0x78b   :  { %13118 = vmatpush1.bf16.msra.mxu0 %v16252_v58  ;;  %13282 = vmatpush1.bf16.msra.mxu1 %v16255_v56  ;;  %v16327_v58 = vld [vmem:[#allocation9 + $0x98] sm:$0xff]   ;;  %v16328_v56 = vld [vmem:[#allocation9 + $0x60] sm:$0xff]  }
 0x78c   :  { %13119 = vmatprep.subr.bf16.mxu0 %v16260_v5  ;;  %13283 = vmatprep.subr.bf16.mxu1 %v16263_v6  ;;  %v16329_v5 = vld [vmem:[#allocation9 + $0xe0] sm:$0xff]  }
 0x78d   :  { %v16330_v6 = vld [vmem:[#allocation9 + $0x20] sm:$0xff]  }
 0x78f   :  { %13120 = vmatpush1.bf16.msra.mxu0 %v16258_v8  ;;  %13284 = vmatpush1.bf16.msra.mxu1 %v16261_v7  ;;  %v16331_v8 = vld [vmem:[#allocation9 + $0xa0] sm:$0xff]   ;;  %v16332_v7 = vld [vmem:[#allocation9 + $0x68] sm:$0xff]  }
 0x790   :  { %13121 = vmatprep.subr.bf16.mxu0 %v16266_v9  ;;  %13285 = vmatprep.subr.bf16.mxu1 %v16269_v51  ;;  %v16333_v9 = vld [vmem:[#allocation9 + $0xe8] sm:$0xff]  }
 0x791   :  { %v16334_v51 = vld [vmem:[#allocation9 + $0x28] sm:$0xff]  }
 0x793   :  { %13122 = vmatpush1.bf16.msra.mxu0 %v16264_v14  ;;  %13286 = vmatpush1.bf16.msra.mxu1 %v16267_v10  ;;  %v16335_v14 = vld [vmem:[#allocation9 + $0xa8] sm:$0xff]   ;;  %v16336_v10 = vld [vmem:[#allocation9 + $0x70] sm:$0xff]  }
 0x794   :  { %13123 = vmatprep.subr.bf16.mxu0 %v16272_v13  ;;  %13287 = vmatprep.subr.bf16.mxu1 %v16275_v15  ;;  %v16337_v13 = vld [vmem:[#allocation9 + $0xf0] sm:$0xff]  }
 0x795   :  { %v16338_v15 = vld [vmem:[#allocation9 + $0x30] sm:$0xff]  }
 0x797   :  { %13124 = vmatpush1.bf16.msra.mxu0 %v16270_v39  ;;  %13288 = vmatpush1.bf16.msra.mxu1 %v16273_v17  ;;  %v16339_v39 = vld [vmem:[#allocation9 + $0xb0] sm:$0xff]   ;;  %v16340_v17 = vld [vmem:[#allocation9 + $0x78] sm:$0xff]  }
 0x798   :  { %13125 = vmatprep.subr.bf16.mxu0 %v16278_v18  ;;  %13289 = vmatprep.subr.bf16.mxu1 %v16281_v54  ;;  %v16341_v18 = vld [vmem:[#allocation9 + $0xf8] sm:$0xff]  }
 0x799   :  { %v16342_v54 = vld [vmem:[#allocation9 + $0x38] sm:$0xff]  }
 0x79b   :  { %13126 = vmatpush1.bf16.msra.mxu0 %v16276_v19  ;;  %13290 = vmatpush1.bf16.msra.mxu1 %v16279_v45  ;;  %v16343_v19 = vld [vmem:[#allocation9 + $0xb8] sm:$0xff]   ;;  %v16557_v45 = vmov 0.0  }
 0x79c   :  { %13127 = vmatprep.subr.bf16.mxu0 %v16284_v20  ;;  %13291 = vmatprep.subr.bf16.mxu1 %v16287_v21  ;;  %v11680_v20 = vld [vmem:[#allocation7] sm:$0xf] }
 0x79d   :  { %v11685_v21 = vrot.slane %v11680_v20, %v1722_v32 }
 0x79f   :  { %13128 = vmatpush1.bf16.msra.mxu0 %v16282_v16  ;;  %13292 = vmatpush1.bf16.msra.mxu1 %v16285_v25  ;;  %v11693_v16 = vrot.slane %v11680_v20, %v1730_v47  ;;  %v11689_v25 = vrot.slane %v11680_v20, %v1726_v26 }
 0x7a0   :  { %13129 = vmatprep.subr.bf16.mxu0 %v16290_v27  ;;  %13293 = vmatprep.subr.bf16.mxu1 %v16293_v48  ;;  %v11697_v27 = vrot.slane %v11680_v20, %v1734_v57 }
 0x7a3   :  { %13130 = vmatpush1.bf16.msra.mxu0 %v16288_v59  ;;  %13294 = vmatpush1.bf16.msra.mxu1 %v16291_v12 }
 0x7a4   :  { %13131 = vmatprep.subr.bf16.mxu0 %v16296_v28  ;;  %13295 = vmatprep.subr.bf16.mxu1 %v16299_v30 }
 0x7a7   :  { %13132 = vmatpush1.bf16.msra.mxu0 %v16294_v31  ;;  %13296 = vmatpush1.bf16.msra.mxu1 %v16297_v29 }
 0x7a8   :  { %13133 = vmatprep.subr.bf16.mxu0 %v16302_v35  ;;  %13297 = vmatprep.subr.bf16.mxu1 %v16305_v34 }
 0x7ab   :  { %13134 = vmatpush1.bf16.msra.mxu0 %v16300_v22  ;;  %13298 = vmatpush1.bf16.msra.mxu1 %v16303_v36 }
 0x7ac   :  { %13135 = vmatprep.subr.bf16.mxu0 %v16308_v23  ;;  %13299 = vmatprep.subr.bf16.mxu1 %v16311_v40  ;;  %v16345_v40 = vld [vmem:[#allocation12 + $0x8] sm:$0xff]  }
 0x7af   :  { %13136 = vmatpush1.bf16.msra.mxu0 %v16306_v42  ;;  %13300 = vmatpush1.bf16.msra.mxu1 %v16309_v55  ;;  %v16346_v42 = vld [vmem:[#allocation12 + $0x10] sm:$0xff]   ;;  %v16347_v55 = vld [vmem:[#allocation12 + $0x18] sm:$0xff]  }
 0x7b0   :  { %15627 = vmatprep.subr.bf16.mxu0 %v16312_v43  ;;  %15649 = vmatprep.subr.bf16.mxu1 %v16313_v44  ;;  %v16349_v43 = vld [vmem:[#allocation12 + $0x28] sm:$0xff]   ;;  %v16350_v44 = vld [vmem:[#allocation12 + $0x30] sm:$0xff]  }
 0x7b2   :  { %13138 = vmatmul.mubr.bf16.vlgmr.msra.gmra.mrb[8].mxu0 %v11422_v50  ;;  %13302 = vmatmul.mubr.bf16.vlgmr.msra.gmra.mrb[8].mxu1 %v11422_v50 }
 0x7b3   :  { %15628 = vmatpush3.bf16.msra.mxu0 %v16314_v41  ;;  %15650 = vmatpush3.bf16.msra.mxu1 %v16315_v49  ;;  %v16351_v41 = vld [vmem:[#allocation12 + $0x38] sm:$0xff]  }
 0x7b4   :  { %15629 = vmatprep.subr.bf16.mxu0 %v16316_v24  ;;  %15651 = vmatprep.subr.bf16.mxu1 %v16317_v61  ;;  %v15585_v24 = vld [vmem:[#allocation10] ss:$0 sm:$0xff] }
 0x7b7   :  { %15630 = vmatpush3.bf16.msra.mxu0 %v16318_v53  ;;  %15652 = vmatpush3.bf16.msra.mxu1 %v16319_v60 }
 0x7b8   :  { %15631 = vmatprep.subr.bf16.mxu0 %v16320_v46  ;;  %15653 = vmatprep.subr.bf16.mxu1 %v16321_v62 }
 0x7bb   :  { %15632 = vmatpush3.bf16.msra.mxu0 %v16322_v0  ;;  %15654 = vmatpush3.bf16.msra.mxu1 %v16323_v2 }
 0x7bc   :  { %15633 = vmatprep.subr.bf16.mxu0 %v16324_v3  ;;  %15655 = vmatprep.subr.bf16.mxu1 %v16325_v63 }
 0x7bf   :  { %15634 = vmatpush3.bf16.msra.mxu0 %v16326_v4  ;;  %15656 = vmatpush3.bf16.msra.mxu1 %v16327_v58 }
 0x7c0   :  { %15635 = vmatprep.subr.bf16.mxu0 %v16328_v56  ;;  %15657 = vmatprep.subr.bf16.mxu1 %v16329_v5  ;;  %v15618_v5 = vld [vmem:[#allocation13] ss:$0 sm:$0xff] }
 0x7c3   :  { %15636 = vmatpush3.bf16.msra.mxu0 %v16330_v6  ;;  %15658 = vmatpush3.bf16.msra.mxu1 %v16331_v8 }
 0x7c4   :  { %15637 = vmatprep.subr.bf16.mxu0 %v16332_v7  ;;  %15659 = vmatprep.subr.bf16.mxu1 %v16333_v9 }
 0x7c7   :  { %15638 = vmatpush3.bf16.msra.mxu0 %v16334_v51  ;;  %15660 = vmatpush3.bf16.msra.mxu1 %v16335_v14 }
 0x7c8   :  { %15639 = vmatprep.subr.bf16.mxu0 %v16336_v10  ;;  %15661 = vmatprep.subr.bf16.mxu1 %v16337_v13 }
 0x7cb   :  { %15640 = vmatpush3.bf16.msra.mxu0 %v16338_v15  ;;  %15662 = vmatpush3.bf16.msra.mxu1 %v16339_v39 }
 0x7cc   :  { %15641 = vmatprep.subr.bf16.mxu0 %v16340_v17  ;;  %15663 = vmatprep.subr.bf16.mxu1 %v16341_v18 }
 0x7cf   :  { %15642 = vmatpush3.bf16.msra.mxu0 %v16342_v54  ;;  %15664 = vmatpush3.bf16.msra.mxu1 %v16343_v19 }
 0x7d0   :  { %15680 = vmatprep.subr.bf16.mxu0 %v16557_v45 }
 0x885   :  { %v13139_v48 = vpop.f32.mrb[8].mxu0  ;;  %v13303_v59 = vpop.f32.mrb[8].mxu1 }
 0x886   :  { %v15708_v12 = vadd.f32 %v13139_v48, %v11685_v21  ;;  %v15710_v1 = vadd.f32 %v13303_v59, %v11693_v16  ;;  %v13141_v28 = vpop.f32.mrb[9].mxu0  ;;  %v13305_v30 = vpop.f32.mrb[9].mxu1 }
 0x887   :  { %v15709_v31 = vadd.f32 %v13141_v28, %v11689_v25  ;;  %v15711_v29 = vadd.f32 %v13305_v30, %v11697_v27  ;;  %v13143_v38 = vpop.f32.mrb[10].mxu0  ;;  %v13307_v33 = vpop.f32.mrb[10].mxu1 }
 0x888   :  { %v13310_v32 = vmax.f32 %v15708_v12, 0.0  ;;  %v13312_v35 = vmax.f32 %v15710_v1, 0.0  ;;  %v13144_v34 = vpop.f32.mrb[11].mxu0  ;;  %v13308_v47 = vpop.f32.mrb[11].mxu1 }
 0x889   :  { %v13311_v22 = vmax.f32 %v15709_v31, 0.0  ;;  %v13313_v36 = vmax.f32 %v15711_v29, 0.0 }
 0x88a   :  { %v13314_v57 = vpack.c.bf16 %v13310_v32, %v13310_v32  ;;  %v13316_v23 = vpack.c.bf16 %v13312_v35, %v13312_v35 }
 0x88b   :  { %v13315_v26 = vpack.c.bf16 %v13311_v22, %v13311_v22  ;;  %v13317_v37 = vpack.c.bf16 %v13313_v36, %v13313_v36 }
 0x88d   :  { %13613 = vmatprep.mubr.bf16.mxu0 %v13315_v26  ;;  %13653 = vmatprep.mubr.bf16.mxu1 %v13317_v37 }
 0x88e   :  { %13614 = vmatmul.mubr.bf16.vlgmr.msra.gmra.mrb[12].mxu0 %v13314_v57  ;;  %13654 = vmatmul.mubr.bf16.vlgmr.msra.gmra.mrb[12].mxu1 %v13316_v23 }
 0x88f   :  { %15681 = vmatpush3.bf16.msra.mxu0 %v16344_v11  ;;  %15696 = vmatprep.mubr.msk.bf16.mxu0 %vm16558_vm0, %v16557_v45 }
 0x890   :  { %15682 = vmatprep.subr.bf16.mxu0 %v16557_v45 }
 0x893   :  { %15683 = vmatpush3.bf16.msra.mxu0 %v16345_v40 }
 0x894   :  { %15684 = vmatprep.subr.bf16.mxu0 %v16557_v45 }
 0x897   :  { %15685 = vmatpush3.bf16.msra.mxu0 %v16346_v42 }
 0x898   :  { %15686 = vmatprep.subr.bf16.mxu0 %v16557_v45 }
 0x89b   :  { %15687 = vmatpush3.bf16.msra.mxu0 %v16347_v55 }
 0x89c   :  { %15688 = vmatprep.subr.bf16.mxu0 %v16557_v45 }
 0x89f   :  { %15689 = vmatpush3.bf16.msra.mxu0 %v16348_v52 }
 0x8a0   :  { %15690 = vmatprep.subr.bf16.mxu0 %v16557_v45 }
 0x8a3   :  { %15691 = vmatpush3.bf16.msra.mxu0 %v16349_v43 }
 0x8a4   :  { %15692 = vmatprep.subr.bf16.mxu0 %v16557_v45 }
 0x8a7   :  { %15693 = vmatpush3.bf16.msra.mxu0 %v16350_v44 }
 0x8a8   :  { %15694 = vmatprep.subr.bf16.mxu0 %v16557_v45 }
 0x8ab   :  { %15695 = vmatpush3.bf16.msra.mxu0 %v16351_v41 }
 0x961   :  { %v15643_v49 = vpop.f32.mrb[12].mxu0  ;;  %v15665_v50 = vpop.f32.mrb[12].mxu1 }
 0x962   :  { %v15644_v61 = vpop.f32.mrb[13].mxu0  ;;  %v15666_v53 = vpop.f32.mrb[13].mxu1 }
 0x963   :  { %v15645_v60 = vadd.f32 %v15644_v61, %v15643_v49  ;;  %v15667_v46 = vadd.f32 %v15666_v53, %v15665_v50  ;;  %v15646_v62 = vpop.f32.mrb[14].mxu0  ;;  %v15668_v0 = vpop.f32.mrb[14].mxu1 }
 0x964   :  { %v15647_v2 = vpop.f32.mrb[15].mxu0  ;;  %v15669_v3 = vpop.f32.mrb[15].mxu1 }
 0x965   :  { %v13616_v63 = vadd.f32 %v15645_v60, %v15585_v24 }
 0x967   :  { %v13656_v4 = vadd.f32 %v15667_v46, %v13616_v63 }
 0x969   :  { %v13661_v58 = vmax.f32 %v13656_v4, 0.0 }
 0x96b   :  { %v13662_v56 = vpack.c.bf16 %v13661_v58, %v13661_v58 }
 0x96d   :  { %15697 = vmatmul.mubr.bf16.vlgmr.msra.gmra.mrb[16].mxu0 %v13662_v56 }
 0xa40   :  { %v13768_v6 = vpop.f32.mrb[16].mxu0 }
 0xa41   :  { %v13769_v8 = vadd.f32 %v15618_v5, %v13768_v6  ;;  %v15698_v7 = vpop.f32.mrb[17].mxu0 }
 0xa42   :  { %v13771_v9 = vpop.f32.mrb[18].mxu0 }
 0xa43   :  { %13774 = vmax.xlane.f32.xlu0 %v13769_v8  ;;  %v15699_v51 = vpop.f32.mrb[19].mxu0 }
 0xad0   :  { %v13775_v14 = vpop.xlane.xlu0 %13774 }
 0xad1   :  { %v13776_v10 = vsub.f32 %v13769_v8, %v13775_v14 }
 0xad3   :  { %v13777_v13 = vmul.f32 1.442695, %v13776_v10 }
 0xad5   :  { %16352 = vpow2.f32 %v13777_v13 }
 0xadf   :  { %v16353_v15 = vpop.eup %16352 }
 0xae0   :  { %13779 = vadd.xlane.f32.xlu0 %v16353_v15 }
 0xb6d   :  { %v13780_v39 = vpop.xlane.xlu0 %13779 }
 0xb6e   :  { %16354 = vrcp.f32 %v13780_v39 }
 0xb78   :  { %v16355_v17 = vpop.eup %16354 }
 0xb79   :  { %v13782_v18 = vmul.f32 %v16355_v17, %v16353_v15 }
 0xb7b   :  { %13783 = vst [vmem:[%s16990_s9] sm:$0xff] %v13782_v18 }
 0xb7c   :  { %13788 = vsyncpa [#allocation3], 1 }
 0xb7d   :  { %13789 = vsyncpa [#allocation5], 1 }
 0xb7e   :  { %13790 = vsyncpa [#allocation8], 1 }
 0xb7f   :  { %13791 = vsyncpa [#allocation11], 1 }
 0xb80   :  { %13792 = vsyncpa [#allocation14], 1 }

</bundles_post_ra>
